<compile_context>
chip_gen: v7x
topology: tpu7x:2x2x1
jax: 0.10.0
libtpu: 0.0.40
codegen_flags: <defaults>
</compile_context>

<pallas_src>
from functools import partial

import jax
import jax.numpy as jnp
from jax import lax
from jax.experimental import pallas as pl
from jax.experimental.pallas import tpu as pltpu


def _device_kind():
    try:
        return jax.devices()[0].device_kind.lower()
    except Exception:
        return ""


def _softmax_exp_dtype():
    # v6e/v7x EUP supports bf16 (≈2x exp throughput); v5e and earlier have no bf16
    # VPU/EUP, so keep the softmax elementwise math in f32 there.
    kind = _device_kind()
    if any(v in kind for v in ("v2", "v3", "v4", "v5")):
        return jnp.float32
    return jnp.bfloat16


def _vmem_limit_bytes():
    # v7x has only 64 MiB VMEM per core -> leave double-buffering headroom.
    kind = _device_kind()
    return (40 if "v7" in kind else 48) * 1024 * 1024


def linear_transformer_kernel(
    x_ref, gamma_ref, beta_ref, gavg_ref,
    wqkv_ref, bqkv_ref, wo_ref, bo_ref, o_ref,
    *, num_heads, ch_per_head, n_spatial, batch_tile, eps, residual, exp_dtype,
):
    N = n_spatial
    Bt = batch_tile
    d = ch_per_head
    hid = num_heads * d

    x = x_ref[...]                                  # (C, Bt*N) f32; batch on lanes
    C = x.shape[0]

    # ---- GroupNorm: per-sample stats (one pass, E[x^2]-E[x]^2 clamped at 0);
    # all per-batch stats stacked on lanes -> a single fused (C,C) averaging matmul.
    sums, sqs = [], []
    for b in range(Bt):
        xb = x[:, b * N:(b + 1) * N]
        sums.append(jnp.sum(xb, axis=1, keepdims=True))
        sqs.append(jnp.sum(xb * xb, axis=1, keepdims=True))
    stats = jnp.concatenate(sums + sqs, axis=1)                              # (C, 2*Bt)
    g = jnp.dot(gavg_ref[...], stats, preferred_element_type=jnp.float32)    # E[x] | E[x^2]
    parts = []
    for b in range(Bt):
        mu = g[:, b:b + 1]
        var = jnp.maximum(g[:, Bt + b:Bt + b + 1] - mu * mu, 0.0)            # one-pass var
        parts.append((x[:, b * N:(b + 1) * N] - mu) * lax.rsqrt(var + eps))
    xn = jnp.concatenate(parts, axis=1) * gamma_ref[...] + beta_ref[...]     # (C, Bt*N)

    # ---- fused QKV projection over the whole slab: (3*hid, C) @ (C, Bt*N) ----
    # (the d^-0.5 q scale is folded into wq/bq in the wrapper)
    qkv = (jnp.dot(wqkv_ref[...], xn.astype(jnp.bfloat16),
                   preferred_element_type=jnp.float32)
           + bqkv_ref[...]).astype(jnp.bfloat16)                             # (3*hid, Bt*N)
    q = qkv[:hid]
    k = qkv[hid:2 * hid]
    v = qkv[2 * hid:]

    # one small transpose of the (already bf16) K slab: (hid, Bt*N) -> (Bt*N, hid)
    kT = jnp.transpose(k)

    # ---- attention per (batch, head); both matmuls canonical (M,K)x(K,N) ----
    batch_outs = []
    for b in range(Bt):
        head_outs = []
        for h in range(num_heads):
            q_bh = q[h * d:(h + 1) * d, b * N:(b + 1) * N]                   # (d, N)
            kT_bh = kT[b * N:(b + 1) * N, h * d:(h + 1) * d]                 # (N, d)
            v_bh = v[h * d:(h + 1) * d, b * N:(b + 1) * N]                   # (d, N)
            # transposed scores: sT[j, i] = sum_d k[d, j] * q[d, i]
            sT = jnp.dot(kT_bh, q_bh, preferred_element_type=jnp.float32)    # (Nk, Nq) f32
            m = jnp.max(sT, axis=0, keepdims=True)                           # (1, Nq)
            p = jnp.exp((sT - m).astype(exp_dtype))                          # unnormalized
            l = jnp.sum(p, axis=0, keepdims=True, dtype=jnp.float32)         # (1, Nq) f32
            o = jnp.dot(v_bh, p.astype(jnp.bfloat16),
                        preferred_element_type=jnp.float32)                  # (d, Nq) f32
            # normalize AFTER PV on the small accumulator (EUP approx reciprocal)
            head_outs.append(o * pl.reciprocal(l, approx=True))
        batch_outs.append(jnp.concatenate(head_outs, axis=0))                # (hid, N)
    attn = jnp.concatenate(batch_outs, axis=1).astype(jnp.bfloat16)          # (hid, Bt*N)

    # ---- output projection + residual; lane-dense store (Bt*N lanes) ----
    out = jnp.dot(wo_ref[...], attn, preferred_element_type=jnp.float32) + bo_ref[...]
    if residual:
        out = out + x
    o_ref[...] = out


def linear_transformer_nd(x_nchw, params, *, num_heads, ch_per_head, num_groups,
                          eps=1e-5, batch_tile=None):
    B, C, H, W = x_nchw.shape
    N = H * W
    hid = num_heads * ch_per_head
    Cout = params["wo"].shape[0]
    residual = (Cout == C)

    # Fold batch elements into the lane dimension per grid step, but keep >=2
    # grid steps when possible so both v7x TensorCores get work.
    if batch_tile is None:
        batch_tile = B // 2 if (B >= 2 and B % 2 == 0) else 1
    assert B % batch_tile == 0, (B, batch_tile)
    nb = B // batch_tile

    # NCHW -> (C, B*N) once in the wrapper (layout plumbing); lanes stay a multiple
    # of 128 and each batch element is a contiguous lane block of width N.
    x_cn = jnp.transpose(x_nchw.reshape(B, C, N), (1, 0, 2)).reshape(C, B * N)

    # fused group-average matrix: (gavg @ per-channel-sums)[c] = mean over c's group.
    gs = C // num_groups
    gidx = jnp.arange(C) // gs
    gavg = (gidx[:, None] == gidx[None, :]).astype(jnp.float32) / float(gs * N)  # (C, C)

    # fused QKV weights; fold both d^-0.25 scales (= d^-0.5) into wq/bq before bf16.
    scale2 = float(ch_per_head) ** (-0.5)
    wqkv = jnp.concatenate(
        [params["wq"] * scale2, params["wk"], params["wv"]], axis=0).astype(jnp.bfloat16)
    bqkv = jnp.concatenate(
        [params["bq"] * scale2, params["bk"], params["bv"]], axis=0)[:, None]    # f32
    wo = params["wo"].astype(jnp.bfloat16)
    bo = params["bo"][:, None]
    gamma = params["gamma"][:, None]
    beta = params["beta"][:, None]

    kernel = partial(
        linear_transformer_kernel,
        num_heads=num_heads, ch_per_head=ch_per_head, n_spatial=N,
        batch_tile=batch_tile, eps=eps, residual=residual,
        exp_dtype=_softmax_exp_dtype(),
    )

    def full_spec(shape):
        n = len(shape)
        return pl.BlockSpec(shape, lambda b, _n=n: (0,) * _n)
    # TODO(synk): for large C/hid on v7x, single-buffer the constant weight specs
    # (pipeline_mode=pl.Buffered(1)) to halve their VMEM footprint.

    out = pl.pallas_call(
        kernel,
        out_shape=jax.ShapeDtypeStruct((Cout, B * N), jnp.float32),
        grid=(nb,),
        in_specs=[
            pl.BlockSpec((C, batch_tile * N), lambda b: (0, b)),   # x slab (batch on lanes)
            full_spec((C, 1)), full_spec((C, 1)),                  # gamma, beta
            full_spec((C, C)),                                     # fused group-average
            full_spec((3 * hid, C)), full_spec((3 * hid, 1)),      # Wqkv, bqkv
            full_spec((Cout, hid)), full_spec((Cout, 1)),          # Wo, bo
        ],
        out_specs=pl.BlockSpec((Cout, batch_tile * N), lambda b: (0, b)),
        compiler_params=pltpu.CompilerParams(
            dimension_semantics=("parallel",),
            vmem_limit_bytes=_vmem_limit_bytes(),
        ),
    )(x_cn, gamma, beta, gavg, wqkv, bqkv, wo, bo)

    return jnp.transpose(out.reshape(Cout, B, N), (1, 0, 2)).reshape(B, Cout, H, W)


def reference_forward(x, params, *, num_heads, ch_per_head, num_groups, eps=1e-5):
    """Pure-JAX replica of the PyTorch forward (embedding=None). Weights are (out, in)."""
    B, C, H, W = x.shape
    gs = C // num_groups
    xr = x.reshape(B, num_groups, gs, H, W)
    mu = xr.mean(axis=(2, 3, 4), keepdims=True)
    var = ((xr - mu) ** 2).mean(axis=(2, 3, 4), keepdims=True)
    x_n = ((xr - mu) / jnp.sqrt(var + eps)).reshape(B, C, H, W)
    x_n = x_n * params["gamma"][None, :, None, None] + params["beta"][None, :, None, None]

    N = H * W
    xf = x_n.reshape(B, C, N)

    def proj(w, b):  # w: (out, in)
        return jnp.einsum("oc,bcn->bon", w, xf) + b[None, :, None]

    q = proj(params["wq"], params["bq"])
    k = proj(params["wk"], params["bk"])
    v = proj(params["wv"], params["bv"])

    hid = num_heads * ch_per_head
    scale = ch_per_head ** (-0.25)
    qh = q.reshape(B, num_heads, ch_per_head, N)
    kh = k.reshape(B, num_heads, ch_per_head, N)
    vh = v.reshape(B, num_heads, ch_per_head, N)
    attn = jnp.einsum("bhdi,bhdj->bhij", qh * scale, kh * scale)
    attn = jax.nn.softmax(attn, axis=-1)
    o = jnp.einsum("bhij,bhdj->bhdi", attn, vh).reshape(B, hid, N)
    out = jnp.einsum("oc,bcn->bon", params["wo"], o) + params["bo"][None, :, None]
    out = out.reshape(B, -1, H, W)
    if out.shape == x.shape:
        out = x + out
    return out


if __name__ == "__main__":
    # Config: in_channels == hid_channels == out_channels so the PyTorch reshape
    # `q.reshape(b, c, -1)` and the residual branch behave as intended.
    # B=4 exercises batch folding (2 samples per grid step) with 2 parallel steps;
    # N = H*W = 256 keeps the lane dim a multiple of 128 (lane-dense stores).
    B, H, W = 4, 16, 16
    num_heads, ch_per_head = 4, 8
    hid = num_heads * ch_per_head          # 32
    C_in = hid
    C_out = C_in                           # residual path active
    num_groups = 8                         # group size 4 (exercises group averaging)

    key = jax.random.PRNGKey(0)
    keys = jax.random.split(key, 12)

    x = jax.random.normal(keys[0], (B, C_in, H, W), dtype=jnp.float32)
    params = {
        "gamma": 1.0 + 0.1 * jax.random.normal(keys[1], (C_in,), dtype=jnp.float32),
        "beta": 0.1 * jax.random.normal(keys[2], (C_in,), dtype=jnp.float32),
        # conv 1x1 weights stored as (out_channels, in_channels), matching PyTorch.
        "wq": 0.1 * jax.random.normal(keys[3], (hid, C_in), dtype=jnp.float32),
        "bq": 0.1 * jax.random.normal(keys[4], (hid,), dtype=jnp.float32),
        "wk": 0.1 * jax.random.normal(keys[5], (hid, C_in), dtype=jnp.float32),
        "bk": 0.1 * jax.random.normal(keys[6], (hid,), dtype=jnp.float32),
        "wv": 0.1 * jax.random.normal(keys[7], (hid, C_in), dtype=jnp.float32),
        "bv": 0.1 * jax.random.normal(keys[8], (hid,), dtype=jnp.float32),
        # zero_module would zero these; random here to exercise the kernel.
        "wo": 0.1 * jax.random.normal(keys[9], (C_out, hid), dtype=jnp.float32),
        "bo": 0.1 * jax.random.normal(keys[10], (C_out,), dtype=jnp.float32),
    }

    out = linear_transformer_nd(
        x, params, num_heads=num_heads, ch_per_head=ch_per_head, num_groups=num_groups
    )
    out = jax.block_until_ready(out)

    ref = reference_forward(
        x, params, num_heads=num_heads, ch_per_head=ch_per_head, num_groups=num_groups
    )
    ref = jax.block_until_ready(ref)

    assert out.shape == (B, C_out, H, W), out.shape
    # bf16 MXU operands / bf16 probabilities / approx reciprocal (f32 accumulation)
    # -> looser tolerance than pure f32.
    if not jnp.allclose(out, ref, atol=4e-2, rtol=4e-2):
        max_err = float(jnp.max(jnp.abs(out - ref)))
        raise AssertionError(f"mismatch vs reference, max abs err = {max_err}")

    print("KERNEL_OK")
</pallas_src>

<mosaic_0001>
module attributes {stable_mosaic.version = 11 : i64} {
  func.func @linear_transformer_kernel(%arg0: i32, %arg1: memref<32x512xf32, #tpu.memory_space<vmem>>, %arg2: memref<32x1xf32, #tpu.memory_space<vmem>>, %arg3: memref<32x1xf32, #tpu.memory_space<vmem>>, %arg4: memref<32x32xf32, #tpu.memory_space<vmem>>, %arg5: memref<96x32xbf16, #tpu.memory_space<vmem>>, %arg6: memref<96x1xf32, #tpu.memory_space<vmem>>, %arg7: memref<32x32xbf16, #tpu.memory_space<vmem>>, %arg8: memref<32x1xf32, #tpu.memory_space<vmem>>, %arg9: memref<32x512xf32, #tpu.memory_space<vmem>>) attributes {dimension_semantics = [#tpu.dimension_semantics<parallel>], iteration_bounds = array<i64: 2>, scalar_prefetch = 0 : i64, scratch_operands = 0 : i64, tpu.core_type = #tpu.core_type<tc>, window_params = [{transform_indices = @transform_0, window_bounds = array<i64: 32, 512>}, {pipeline_mode = #tpu.pipeline_mode<synchronous>, transform_indices = @transform_1, window_bounds = array<i64: 32, 1>}, {pipeline_mode = #tpu.pipeline_mode<synchronous>, transform_indices = @transform_2, window_bounds = array<i64: 32, 1>}, {pipeline_mode = #tpu.pipeline_mode<synchronous>, transform_indices = @transform_3, window_bounds = array<i64: 32, 32>}, {pipeline_mode = #tpu.pipeline_mode<synchronous>, transform_indices = @transform_4, window_bounds = array<i64: 96, 32>}, {pipeline_mode = #tpu.pipeline_mode<synchronous>, transform_indices = @transform_5, window_bounds = array<i64: 96, 1>}, {pipeline_mode = #tpu.pipeline_mode<synchronous>, transform_indices = @transform_6, window_bounds = array<i64: 32, 32>}, {pipeline_mode = #tpu.pipeline_mode<synchronous>, transform_indices = @transform_7, window_bounds = array<i64: 32, 1>}, {transform_indices = @transform_8, window_bounds = array<i64: 32, 512>}]} {
    %c0 = arith.constant 0 : index
    %c0_0 = arith.constant 0 : index
    %0 = vector.load %arg1[%c0, %c0_0] : memref<32x512xf32, #tpu.memory_space<vmem>>, vector<32x512xf32>
    %1 = vector.extract_strided_slice %0 {offsets = [0, 0], sizes = [32, 256], strides = [1, 1]} : vector<32x512xf32> to vector<32x256xf32>
    %cst = arith.constant dense<0.000000e+00> : vector<32xf32>
    %2 = vector.multi_reduction <add>, %1, %cst [1] : vector<32x256xf32> to vector<32xf32>
    %3 = vector.shape_cast %2 : vector<32xf32> to vector<32x1xf32>
    %4 = arith.mulf %1, %1 : vector<32x256xf32>
    %cst_1 = arith.constant dense<0.000000e+00> : vector<32xf32>
    %5 = vector.multi_reduction <add>, %4, %cst_1 [1] : vector<32x256xf32> to vector<32xf32>
    %6 = vector.shape_cast %5 : vector<32xf32> to vector<32x1xf32>
    %7 = vector.extract_strided_slice %0 {offsets = [0, 256], sizes = [32, 256], strides = [1, 1]} : vector<32x512xf32> to vector<32x256xf32>
    %cst_2 = arith.constant dense<0.000000e+00> : vector<32xf32>
    %8 = vector.multi_reduction <add>, %7, %cst_2 [1] : vector<32x256xf32> to vector<32xf32>
    %9 = vector.shape_cast %8 : vector<32xf32> to vector<32x1xf32>
    %10 = arith.mulf %7, %7 : vector<32x256xf32>
    %cst_3 = arith.constant dense<0.000000e+00> : vector<32xf32>
    %11 = vector.multi_reduction <add>, %10, %cst_3 [1] : vector<32x256xf32> to vector<32xf32>
    %12 = vector.shape_cast %11 : vector<32xf32> to vector<32x1xf32>
    %13 = tpu.concatenate %3, %9, %6, %12 in 1 : vector<32x1xf32>, vector<32x1xf32>, vector<32x1xf32>, vector<32x1xf32> -> vector<32x4xf32>
    %c0_4 = arith.constant 0 : index
    %c0_5 = arith.constant 0 : index
    %14 = vector.load %arg4[%c0_4, %c0_5] : memref<32x32xf32, #tpu.memory_space<vmem>>, vector<32x32xf32>
    %cst_6 = arith.constant dense<0.000000e+00> : vector<32x4xf32>
    %15 = tpu.matmul %14, %13, %cst_6 {dimension_numbers = #tpu.dot_dimension_numbers<[1], [0], [0], [1], [0, 0, 1, 1], [], []>} : vector<32x32xf32>, vector<32x4xf32>, vector<32x4xf32> -> vector<32x4xf32>
    %16 = vector.extract_strided_slice %15 {offsets = [0, 0], sizes = [32, 1], strides = [1, 1]} : vector<32x4xf32> to vector<32x1xf32>
    %17 = vector.extract_strided_slice %15 {offsets = [0, 2], sizes = [32, 1], strides = [1, 1]} : vector<32x4xf32> to vector<32x1xf32>
    %18 = arith.mulf %16, %16 : vector<32x1xf32>
    %19 = arith.subf %17, %18 : vector<32x1xf32>
    %cst_7 = arith.constant 0.000000e+00 : f32
    %20 = vector.broadcast %cst_7 : f32 to vector<32x1xf32>
    %21 = arith.maximumf %19, %20 : vector<32x1xf32>
    %22 = vector.extract_strided_slice %0 {offsets = [0, 0], sizes = [32, 256], strides = [1, 1]} : vector<32x512xf32> to vector<32x256xf32>
    %23 = vector.broadcast %16 : vector<32x1xf32> to vector<32x256xf32>
    %24 = arith.subf %22, %23 : vector<32x256xf32>
    %cst_8 = arith.constant 9.99999974E-6 : f32
    %25 = vector.broadcast %cst_8 : f32 to vector<32x1xf32>
    %26 = arith.addf %21, %25 : vector<32x1xf32>
    %27 = math.rsqrt %26 : vector<32x1xf32>
    %28 = vector.broadcast %27 : vector<32x1xf32> to vector<32x256xf32>
    %29 = arith.mulf %24, %28 : vector<32x256xf32>
    %30 = vector.extract_strided_slice %15 {offsets = [0, 1], sizes = [32, 1], strides = [1, 1]} : vector<32x4xf32> to vector<32x1xf32>
    %31 = vector.extract_strided_slice %15 {offsets = [0, 3], sizes = [32, 1], strides = [1, 1]} : vector<32x4xf32> to vector<32x1xf32>
    %32 = arith.mulf %30, %30 : vector<32x1xf32>
    %33 = arith.subf %31, %32 : vector<32x1xf32>
    %cst_9 = arith.constant 0.000000e+00 : f32
    %34 = vector.broadcast %cst_9 : f32 to vector<32x1xf32>
    %35 = arith.maximumf %33, %34 : vector<32x1xf32>
    %36 = vector.extract_strided_slice %0 {offsets = [0, 256], sizes = [32, 256], strides = [1, 1]} : vector<32x512xf32> to vector<32x256xf32>
    %37 = vector.broadcast %30 : vector<32x1xf32> to vector<32x256xf32>
    %38 = arith.subf %36, %37 : vector<32x256xf32>
    %cst_10 = arith.constant 9.99999974E-6 : f32
    %39 = vector.broadcast %cst_10 : f32 to vector<32x1xf32>
    %40 = arith.addf %35, %39 : vector<32x1xf32>
    %41 = math.rsqrt %40 : vector<32x1xf32>
    %42 = vector.broadcast %41 : vector<32x1xf32> to vector<32x256xf32>
    %43 = arith.mulf %38, %42 : vector<32x256xf32>
    %44 = tpu.concatenate %29, %43 in 1 : vector<32x256xf32>, vector<32x256xf32> -> vector<32x512xf32>
    %c0_11 = arith.constant 0 : index
    %c0_12 = arith.constant 0 : index
    %45 = vector.load %arg2[%c0_11, %c0_12] : memref<32x1xf32, #tpu.memory_space<vmem>>, vector<32x1xf32>
    %46 = vector.broadcast %45 : vector<32x1xf32> to vector<32x512xf32>
    %47 = arith.mulf %44, %46 : vector<32x512xf32>
    %c0_13 = arith.constant 0 : index
    %c0_14 = arith.constant 0 : index
    %48 = vector.load %arg3[%c0_13, %c0_14] : memref<32x1xf32, #tpu.memory_space<vmem>>, vector<32x1xf32>
    %49 = vector.broadcast %48 : vector<32x1xf32> to vector<32x512xf32>
    %50 = arith.addf %47, %49 : vector<32x512xf32>
    %c0_15 = arith.constant 0 : index
    %c0_16 = arith.constant 0 : index
    %51 = vector.load %arg5[%c0_15, %c0_16] : memref<96x32xbf16, #tpu.memory_space<vmem>>, vector<96x32xbf16>
    %52 = arith.truncf %50 : vector<32x512xf32> to vector<32x512xbf16>
    %cst_17 = arith.constant dense<0.000000e+00> : vector<96x512xf32>
    %53 = tpu.matmul %51, %52, %cst_17 {dimension_numbers = #tpu.dot_dimension_numbers<[1], [0], [0], [1], [0, 0, 1, 1], [], []>} : vector<96x32xbf16>, vector<32x512xbf16>, vector<96x512xf32> -> vector<96x512xf32>
    %c0_18 = arith.constant 0 : index
    %c0_19 = arith.constant 0 : index
    %54 = vector.load %arg6[%c0_18, %c0_19] : memref<96x1xf32, #tpu.memory_space<vmem>>, vector<96x1xf32>
    %55 = vector.broadcast %54 : vector<96x1xf32> to vector<96x512xf32>
    %56 = arith.addf %53, %55 : vector<96x512xf32>
    %57 = arith.truncf %56 : vector<96x512xf32> to vector<96x512xbf16>
    %58 = vector.extract_strided_slice %57 {offsets = [0, 0], sizes = [32, 512], strides = [1, 1]} : vector<96x512xbf16> to vector<32x512xbf16>
    %59 = vector.extract_strided_slice %57 {offsets = [32, 0], sizes = [32, 512], strides = [1, 1]} : vector<96x512xbf16> to vector<32x512xbf16>
    %60 = vector.extract_strided_slice %57 {offsets = [64, 0], sizes = [32, 512], strides = [1, 1]} : vector<96x512xbf16> to vector<32x512xbf16>
    %61 = tpu.transpose %59, [1, 0] : vector<32x512xbf16> -> vector<512x32xbf16>
    %62 = vector.extract_strided_slice %58 {offsets = [0, 0], sizes = [8, 256], strides = [1, 1]} : vector<32x512xbf16> to vector<8x256xbf16>
    %63 = vector.extract_strided_slice %61 {offsets = [0, 0], sizes = [256, 8], strides = [1, 1]} : vector<512x32xbf16> to vector<256x8xbf16>
    %64 = vector.extract_strided_slice %60 {offsets = [0, 0], sizes = [8, 256], strides = [1, 1]} : vector<32x512xbf16> to vector<8x256xbf16>
    %cst_20 = arith.constant dense<0.000000e+00> : vector<256x256xf32>
    %65 = tpu.matmul %63, %62, %cst_20 {dimension_numbers = #tpu.dot_dimension_numbers<[1], [0], [0], [1], [0, 0, 1, 1], [], []>} : vector<256x8xbf16>, vector<8x256xbf16>, vector<256x256xf32> -> vector<256x256xf32>
    %cst_21 = arith.constant dense<0xFF800000> : vector<256xf32>
    %66 = vector.multi_reduction <maximumf>, %65, %cst_21 [0] : vector<256x256xf32> to vector<256xf32>
    %67 = vector.shape_cast %66 : vector<256xf32> to vector<1x256xf32>
    %68 = vector.broadcast %67 : vector<1x256xf32> to vector<256x256xf32>
    %69 = arith.subf %65, %68 : vector<256x256xf32>
    %70 = arith.truncf %69 : vector<256x256xf32> to vector<256x256xbf16>
    %71 = math.exp %70 : vector<256x256xbf16>
    %72 = arith.extf %71 : vector<256x256xbf16> to vector<256x256xf32>
    %cst_22 = arith.constant dense<0.000000e+00> : vector<256xf32>
    %73 = vector.multi_reduction <add>, %72, %cst_22 [0] : vector<256x256xf32> to vector<256xf32>
    %74 = vector.shape_cast %73 : vector<256xf32> to vector<1x256xf32>
    %cst_23 = arith.constant dense<0.000000e+00> : vector<8x256xf32>
    %75 = tpu.matmul %64, %71, %cst_23 {dimension_numbers = #tpu.dot_dimension_numbers<[1], [0], [0], [1], [0, 0, 1, 1], [], []>} : vector<8x256xbf16>, vector<256x256xbf16>, vector<8x256xf32> -> vector<8x256xf32>
    %76 = tpu.reciprocal %74 {approx = true} : vector<1x256xf32> -> vector<1x256xf32>
    %77 = vector.broadcast %76 : vector<1x256xf32> to vector<8x256xf32>
    %78 = arith.mulf %75, %77 : vector<8x256xf32>
    %79 = vector.extract_strided_slice %58 {offsets = [8, 0], sizes = [8, 256], strides = [1, 1]} : vector<32x512xbf16> to vector<8x256xbf16>
    %80 = vector.extract_strided_slice %61 {offsets = [0, 8], sizes = [256, 8], strides = [1, 1]} : vector<512x32xbf16> to vector<256x8xbf16>
    %81 = vector.extract_strided_slice %60 {offsets = [8, 0], sizes = [8, 256], strides = [1, 1]} : vector<32x512xbf16> to vector<8x256xbf16>
    %cst_24 = arith.constant dense<0.000000e+00> : vector<256x256xf32>
    %82 = tpu.matmul %80, %79, %cst_24 {dimension_numbers = #tpu.dot_dimension_numbers<[1], [0], [0], [1], [0, 0, 1, 1], [], []>} : vector<256x8xbf16>, vector<8x256xbf16>, vector<256x256xf32> -> vector<256x256xf32>
    %cst_25 = arith.constant dense<0xFF800000> : vector<256xf32>
    %83 = vector.multi_reduction <maximumf>, %82, %cst_25 [0] : vector<256x256xf32> to vector<256xf32>
    %84 = vector.shape_cast %83 : vector<256xf32> to vector<1x256xf32>
    %85 = vector.broadcast %84 : vector<1x256xf32> to vector<256x256xf32>
    %86 = arith.subf %82, %85 : vector<256x256xf32>
    %87 = arith.truncf %86 : vector<256x256xf32> to vector<256x256xbf16>
    %88 = math.exp %87 : vector<256x256xbf16>
    %89 = arith.extf %88 : vector<256x256xbf16> to vector<256x256xf32>
    %cst_26 = arith.constant dense<0.000000e+00> : vector<256xf32>
    %90 = vector.multi_reduction <add>, %89, %cst_26 [0] : vector<256x256xf32> to vector<256xf32>
    %91 = vector.shape_cast %90 : vector<256xf32> to vector<1x256xf32>
    %cst_27 = arith.constant dense<0.000000e+00> : vector<8x256xf32>
    %92 = tpu.matmul %81, %88, %cst_27 {dimension_numbers = #tpu.dot_dimension_numbers<[1], [0], [0], [1], [0, 0, 1, 1], [], []>} : vector<8x256xbf16>, vector<256x256xbf16>, vector<8x256xf32> -> vector<8x256xf32>
    %93 = tpu.reciprocal %91 {approx = true} : vector<1x256xf32> -> vector<1x256xf32>
    %94 = vector.broadcast %93 : vector<1x256xf32> to vector<8x256xf32>
    %95 = arith.mulf %92, %94 : vector<8x256xf32>
    %96 = vector.extract_strided_slice %58 {offsets = [16, 0], sizes = [8, 256], strides = [1, 1]} : vector<32x512xbf16> to vector<8x256xbf16>
    %97 = vector.extract_strided_slice %61 {offsets = [0, 16], sizes = [256, 8], strides = [1, 1]} : vector<512x32xbf16> to vector<256x8xbf16>
    %98 = vector.extract_strided_slice %60 {offsets = [16, 0], sizes = [8, 256], strides = [1, 1]} : vector<32x512xbf16> to vector<8x256xbf16>
    %cst_28 = arith.constant dense<0.000000e+00> : vector<256x256xf32>
    %99 = tpu.matmul %97, %96, %cst_28 {dimension_numbers = #tpu.dot_dimension_numbers<[1], [0], [0], [1], [0, 0, 1, 1], [], []>} : vector<256x8xbf16>, vector<8x256xbf16>, vector<256x256xf32> -> vector<256x256xf32>
    %cst_29 = arith.constant dense<0xFF800000> : vector<256xf32>
    %100 = vector.multi_reduction <maximumf>, %99, %cst_29 [0] : vector<256x256xf32> to vector<256xf32>
    %101 = vector.shape_cast %100 : vector<256xf32> to vector<1x256xf32>
    %102 = vector.broadcast %101 : vector<1x256xf32> to vector<256x256xf32>
    %103 = arith.subf %99, %102 : vector<256x256xf32>
    %104 = arith.truncf %103 : vector<256x256xf32> to vector<256x256xbf16>
    %105 = math.exp %104 : vector<256x256xbf16>
    %106 = arith.extf %105 : vector<256x256xbf16> to vector<256x256xf32>
    %cst_30 = arith.constant dense<0.000000e+00> : vector<256xf32>
    %107 = vector.multi_reduction <add>, %106, %cst_30 [0] : vector<256x256xf32> to vector<256xf32>
    %108 = vector.shape_cast %107 : vector<256xf32> to vector<1x256xf32>
    %cst_31 = arith.constant dense<0.000000e+00> : vector<8x256xf32>
    %109 = tpu.matmul %98, %105, %cst_31 {dimension_numbers = #tpu.dot_dimension_numbers<[1], [0], [0], [1], [0, 0, 1, 1], [], []>} : vector<8x256xbf16>, vector<256x256xbf16>, vector<8x256xf32> -> vector<8x256xf32>
    %110 = tpu.reciprocal %108 {approx = true} : vector<1x256xf32> -> vector<1x256xf32>
    %111 = vector.broadcast %110 : vector<1x256xf32> to vector<8x256xf32>
    %112 = arith.mulf %109, %111 : vector<8x256xf32>
    %113 = vector.extract_strided_slice %58 {offsets = [24, 0], sizes = [8, 256], strides = [1, 1]} : vector<32x512xbf16> to vector<8x256xbf16>
    %114 = vector.extract_strided_slice %61 {offsets = [0, 24], sizes = [256, 8], strides = [1, 1]} : vector<512x32xbf16> to vector<256x8xbf16>
    %115 = vector.extract_strided_slice %60 {offsets = [24, 0], sizes = [8, 256], strides = [1, 1]} : vector<32x512xbf16> to vector<8x256xbf16>
    %cst_32 = arith.constant dense<0.000000e+00> : vector<256x256xf32>
    %116 = tpu.matmul %114, %113, %cst_32 {dimension_numbers = #tpu.dot_dimension_numbers<[1], [0], [0], [1], [0, 0, 1, 1], [], []>} : vector<256x8xbf16>, vector<8x256xbf16>, vector<256x256xf32> -> vector<256x256xf32>
    %cst_33 = arith.constant dense<0xFF800000> : vector<256xf32>
    %117 = vector.multi_reduction <maximumf>, %116, %cst_33 [0] : vector<256x256xf32> to vector<256xf32>
    %118 = vector.shape_cast %117 : vector<256xf32> to vector<1x256xf32>
    %119 = vector.broadcast %118 : vector<1x256xf32> to vector<256x256xf32>
    %120 = arith.subf %116, %119 : vector<256x256xf32>
    %121 = arith.truncf %120 : vector<256x256xf32> to vector<256x256xbf16>
    %122 = math.exp %121 : vector<256x256xbf16>
    %123 = arith.extf %122 : vector<256x256xbf16> to vector<256x256xf32>
    %cst_34 = arith.constant dense<0.000000e+00> : vector<256xf32>
    %124 = vector.multi_reduction <add>, %123, %cst_34 [0] : vector<256x256xf32> to vector<256xf32>
    %125 = vector.shape_cast %124 : vector<256xf32> to vector<1x256xf32>
    %cst_35 = arith.constant dense<0.000000e+00> : vector<8x256xf32>
    %126 = tpu.matmul %115, %122, %cst_35 {dimension_numbers = #tpu.dot_dimension_numbers<[1], [0], [0], [1], [0, 0, 1, 1], [], []>} : vector<8x256xbf16>, vector<256x256xbf16>, vector<8x256xf32> -> vector<8x256xf32>
    %127 = tpu.reciprocal %125 {approx = true} : vector<1x256xf32> -> vector<1x256xf32>
    %128 = vector.broadcast %127 : vector<1x256xf32> to vector<8x256xf32>
    %129 = arith.mulf %126, %128 : vector<8x256xf32>
    %130 = tpu.concatenate %78, %95, %112, %129 in 0 : vector<8x256xf32>, vector<8x256xf32>, vector<8x256xf32>, vector<8x256xf32> -> vector<32x256xf32>
    %131 = vector.extract_strided_slice %58 {offsets = [0, 256], sizes = [8, 256], strides = [1, 1]} : vector<32x512xbf16> to vector<8x256xbf16>
    %132 = vector.extract_strided_slice %61 {offsets = [256, 0], sizes = [256, 8], strides = [1, 1]} : vector<512x32xbf16> to vector<256x8xbf16>
    %133 = vector.extract_strided_slice %60 {offsets = [0, 256], sizes = [8, 256], strides = [1, 1]} : vector<32x512xbf16> to vector<8x256xbf16>
    %cst_36 = arith.constant dense<0.000000e+00> : vector<256x256xf32>
    %134 = tpu.matmul %132, %131, %cst_36 {dimension_numbers = #tpu.dot_dimension_numbers<[1], [0], [0], [1], [0, 0, 1, 1], [], []>} : vector<256x8xbf16>, vector<8x256xbf16>, vector<256x256xf32> -> vector<256x256xf32>
    %cst_37 = arith.constant dense<0xFF800000> : vector<256xf32>
    %135 = vector.multi_reduction <maximumf>, %134, %cst_37 [0] : vector<256x256xf32> to vector<256xf32>
    %136 = vector.shape_cast %135 : vector<256xf32> to vector<1x256xf32>
    %137 = vector.broadcast %136 : vector<1x256xf32> to vector<256x256xf32>
    %138 = arith.subf %134, %137 : vector<256x256xf32>
    %139 = arith.truncf %138 : vector<256x256xf32> to vector<256x256xbf16>
    %140 = math.exp %139 : vector<256x256xbf16>
    %141 = arith.extf %140 : vector<256x256xbf16> to vector<256x256xf32>
    %cst_38 = arith.constant dense<0.000000e+00> : vector<256xf32>
    %142 = vector.multi_reduction <add>, %141, %cst_38 [0] : vector<256x256xf32> to vector<256xf32>
    %143 = vector.shape_cast %142 : vector<256xf32> to vector<1x256xf32>
    %cst_39 = arith.constant dense<0.000000e+00> : vector<8x256xf32>
    %144 = tpu.matmul %133, %140, %cst_39 {dimension_numbers = #tpu.dot_dimension_numbers<[1], [0], [0], [1], [0, 0, 1, 1], [], []>} : vector<8x256xbf16>, vector<256x256xbf16>, vector<8x256xf32> -> vector<8x256xf32>
    %145 = tpu.reciprocal %143 {approx = true} : vector<1x256xf32> -> vector<1x256xf32>
    %146 = vector.broadcast %145 : vector<1x256xf32> to vector<8x256xf32>
    %147 = arith.mulf %144, %146 : vector<8x256xf32>
    %148 = vector.extract_strided_slice %58 {offsets = [8, 256], sizes = [8, 256], strides = [1, 1]} : vector<32x512xbf16> to vector<8x256xbf16>
    %149 = vector.extract_strided_slice %61 {offsets = [256, 8], sizes = [256, 8], strides = [1, 1]} : vector<512x32xbf16> to vector<256x8xbf16>
    %150 = vector.extract_strided_slice %60 {offsets = [8, 256], sizes = [8, 256], strides = [1, 1]} : vector<32x512xbf16> to vector<8x256xbf16>
    %cst_40 = arith.constant dense<0.000000e+00> : vector<256x256xf32>
    %151 = tpu.matmul %149, %148, %cst_40 {dimension_numbers = #tpu.dot_dimension_numbers<[1], [0], [0], [1], [0, 0, 1, 1], [], []>} : vector<256x8xbf16>, vector<8x256xbf16>, vector<256x256xf32> -> vector<256x256xf32>
    %cst_41 = arith.constant dense<0xFF800000> : vector<256xf32>
    %152 = vector.multi_reduction <maximumf>, %151, %cst_41 [0] : vector<256x256xf32> to vector<256xf32>
    %153 = vector.shape_cast %152 : vector<256xf32> to vector<1x256xf32>
    %154 = vector.broadcast %153 : vector<1x256xf32> to vector<256x256xf32>
    %155 = arith.subf %151, %154 : vector<256x256xf32>
    %156 = arith.truncf %155 : vector<256x256xf32> to vector<256x256xbf16>
    %157 = math.exp %156 : vector<256x256xbf16>
    %158 = arith.extf %157 : vector<256x256xbf16> to vector<256x256xf32>
    %cst_42 = arith.constant dense<0.000000e+00> : vector<256xf32>
    %159 = vector.multi_reduction <add>, %158, %cst_42 [0] : vector<256x256xf32> to vector<256xf32>
    %160 = vector.shape_cast %159 : vector<256xf32> to vector<1x256xf32>
    %cst_43 = arith.constant dense<0.000000e+00> : vector<8x256xf32>
    %161 = tpu.matmul %150, %157, %cst_43 {dimension_numbers = #tpu.dot_dimension_numbers<[1], [0], [0], [1], [0, 0, 1, 1], [], []>} : vector<8x256xbf16>, vector<256x256xbf16>, vector<8x256xf32> -> vector<8x256xf32>
    %162 = tpu.reciprocal %160 {approx = true} : vector<1x256xf32> -> vector<1x256xf32>
    %163 = vector.broadcast %162 : vector<1x256xf32> to vector<8x256xf32>
    %164 = arith.mulf %161, %163 : vector<8x256xf32>
    %165 = vector.extract_strided_slice %58 {offsets = [16, 256], sizes = [8, 256], strides = [1, 1]} : vector<32x512xbf16> to vector<8x256xbf16>
    %166 = vector.extract_strided_slice %61 {offsets = [256, 16], sizes = [256, 8], strides = [1, 1]} : vector<512x32xbf16> to vector<256x8xbf16>
    %167 = vector.extract_strided_slice %60 {offsets = [16, 256], sizes = [8, 256], strides = [1, 1]} : vector<32x512xbf16> to vector<8x256xbf16>
    %cst_44 = arith.constant dense<0.000000e+00> : vector<256x256xf32>
    %168 = tpu.matmul %166, %165, %cst_44 {dimension_numbers = #tpu.dot_dimension_numbers<[1], [0], [0], [1], [0, 0, 1, 1], [], []>} : vector<256x8xbf16>, vector<8x256xbf16>, vector<256x256xf32> -> vector<256x256xf32>
    %cst_45 = arith.constant dense<0xFF800000> : vector<256xf32>
    %169 = vector.multi_reduction <maximumf>, %168, %cst_45 [0] : vector<256x256xf32> to vector<256xf32>
    %170 = vector.shape_cast %169 : vector<256xf32> to vector<1x256xf32>
    %171 = vector.broadcast %170 : vector<1x256xf32> to vector<256x256xf32>
    %172 = arith.subf %168, %171 : vector<256x256xf32>
    %173 = arith.truncf %172 : vector<256x256xf32> to vector<256x256xbf16>
    %174 = math.exp %173 : vector<256x256xbf16>
    %175 = arith.extf %174 : vector<256x256xbf16> to vector<256x256xf32>
    %cst_46 = arith.constant dense<0.000000e+00> : vector<256xf32>
    %176 = vector.multi_reduction <add>, %175, %cst_46 [0] : vector<256x256xf32> to vector<256xf32>
    %177 = vector.shape_cast %176 : vector<256xf32> to vector<1x256xf32>
    %cst_47 = arith.constant dense<0.000000e+00> : vector<8x256xf32>
    %178 = tpu.matmul %167, %174, %cst_47 {dimension_numbers = #tpu.dot_dimension_numbers<[1], [0], [0], [1], [0, 0, 1, 1], [], []>} : vector<8x256xbf16>, vector<256x256xbf16>, vector<8x256xf32> -> vector<8x256xf32>
    %179 = tpu.reciprocal %177 {approx = true} : vector<1x256xf32> -> vector<1x256xf32>
    %180 = vector.broadcast %179 : vector<1x256xf32> to vector<8x256xf32>
    %181 = arith.mulf %178, %180 : vector<8x256xf32>
    %182 = vector.extract_strided_slice %58 {offsets = [24, 256], sizes = [8, 256], strides = [1, 1]} : vector<32x512xbf16> to vector<8x256xbf16>
    %183 = vector.extract_strided_slice %61 {offsets = [256, 24], sizes = [256, 8], strides = [1, 1]} : vector<512x32xbf16> to vector<256x8xbf16>
    %184 = vector.extract_strided_slice %60 {offsets = [24, 256], sizes = [8, 256], strides = [1, 1]} : vector<32x512xbf16> to vector<8x256xbf16>
    %cst_48 = arith.constant dense<0.000000e+00> : vector<256x256xf32>
    %185 = tpu.matmul %183, %182, %cst_48 {dimension_numbers = #tpu.dot_dimension_numbers<[1], [0], [0], [1], [0, 0, 1, 1], [], []>} : vector<256x8xbf16>, vector<8x256xbf16>, vector<256x256xf32> -> vector<256x256xf32>
    %cst_49 = arith.constant dense<0xFF800000> : vector<256xf32>
    %186 = vector.multi_reduction <maximumf>, %185, %cst_49 [0] : vector<256x256xf32> to vector<256xf32>
    %187 = vector.shape_cast %186 : vector<256xf32> to vector<1x256xf32>
    %188 = vector.broadcast %187 : vector<1x256xf32> to vector<256x256xf32>
    %189 = arith.subf %185, %188 : vector<256x256xf32>
    %190 = arith.truncf %189 : vector<256x256xf32> to vector<256x256xbf16>
    %191 = math.exp %190 : vector<256x256xbf16>
    %192 = arith.extf %191 : vector<256x256xbf16> to vector<256x256xf32>
    %cst_50 = arith.constant dense<0.000000e+00> : vector<256xf32>
    %193 = vector.multi_reduction <add>, %192, %cst_50 [0] : vector<256x256xf32> to vector<256xf32>
    %194 = vector.shape_cast %193 : vector<256xf32> to vector<1x256xf32>
    %cst_51 = arith.constant dense<0.000000e+00> : vector<8x256xf32>
    %195 = tpu.matmul %184, %191, %cst_51 {dimension_numbers = #tpu.dot_dimension_numbers<[1], [0], [0], [1], [0, 0, 1, 1], [], []>} : vector<8x256xbf16>, vector<256x256xbf16>, vector<8x256xf32> -> vector<8x256xf32>
    %196 = tpu.reciprocal %194 {approx = true} : vector<1x256xf32> -> vector<1x256xf32>
    %197 = vector.broadcast %196 : vector<1x256xf32> to vector<8x256xf32>
    %198 = arith.mulf %195, %197 : vector<8x256xf32>
    %199 = tpu.concatenate %147, %164, %181, %198 in 0 : vector<8x256xf32>, vector<8x256xf32>, vector<8x256xf32>, vector<8x256xf32> -> vector<32x256xf32>
    %200 = tpu.concatenate %130, %199 in 1 : vector<32x256xf32>, vector<32x256xf32> -> vector<32x512xf32>
    %201 = arith.truncf %200 : vector<32x512xf32> to vector<32x512xbf16>
    %c0_52 = arith.constant 0 : index
    %c0_53 = arith.constant 0 : index
    %202 = vector.load %arg7[%c0_52, %c0_53] : memref<32x32xbf16, #tpu.memory_space<vmem>>, vector<32x32xbf16>
    %cst_54 = arith.constant dense<0.000000e+00> : vector<32x512xf32>
    %203 = tpu.matmul %202, %201, %cst_54 {dimension_numbers = #tpu.dot_dimension_numbers<[1], [0], [0], [1], [0, 0, 1, 1], [], []>} : vector<32x32xbf16>, vector<32x512xbf16>, vector<32x512xf32> -> vector<32x512xf32>
    %c0_55 = arith.constant 0 : index
    %c0_56 = arith.constant 0 : index
    %204 = vector.load %arg8[%c0_55, %c0_56] : memref<32x1xf32, #tpu.memory_space<vmem>>, vector<32x1xf32>
    %205 = vector.broadcast %204 : vector<32x1xf32> to vector<32x512xf32>
    %206 = arith.addf %203, %205 : vector<32x512xf32>
    %207 = arith.addf %206, %0 : vector<32x512xf32>
    %c0_57 = arith.constant 0 : index
    %c0_58 = arith.constant 0 : index
    %208 = vector.load %arg9[%c0_57, %c0_58] : memref<32x512xf32, #tpu.memory_space<vmem>>, vector<32x512xf32>
    tpu.vector_store %arg9[%c0_57, %c0_58], %207 {strides = array<i32>} : memref<32x512xf32, #tpu.memory_space<vmem>>, vector<32x512xf32>,
    return
  }
  func.func @transform_0(%arg0: i32) -> (i32, i32) {
    %c0_i32 = arith.constant 0 : i32
    %c0_i32_0 = arith.constant 0 : i32
    return %c0_i32, %arg0 : i32, i32
  }
  func.func @transform_1(%arg0: i32) -> (i32, i32) {
    %c0_i32 = arith.constant 0 : i32
    %c0_i32_0 = arith.constant 0 : i32
    %c0_i32_1 = arith.constant 0 : i32
    return %c0_i32, %c0_i32_0 : i32, i32
  }
  func.func @transform_2(%arg0: i32) -> (i32, i32) {
    %c0_i32 = arith.constant 0 : i32
    %c0_i32_0 = arith.constant 0 : i32
    %c0_i32_1 = arith.constant 0 : i32
    return %c0_i32, %c0_i32_0 : i32, i32
  }
  func.func @transform_3(%arg0: i32) -> (i32, i32) {
    %c0_i32 = arith.constant 0 : i32
    %c0_i32_0 = arith.constant 0 : i32
    %c0_i32_1 = arith.constant 0 : i32
    return %c0_i32, %c0_i32_0 : i32, i32
  }
  func.func @transform_4(%arg0: i32) -> (i32, i32) {
    %c0_i32 = arith.constant 0 : i32
    %c0_i32_0 = arith.constant 0 : i32
    %c0_i32_1 = arith.constant 0 : i32
    return %c0_i32, %c0_i32_0 : i32, i32
  }
  func.func @transform_5(%arg0: i32) -> (i32, i32) {
    %c0_i32 = arith.constant 0 : i32
    %c0_i32_0 = arith.constant 0 : i32
    %c0_i32_1 = arith.constant 0 : i32
    return %c0_i32, %c0_i32_0 : i32, i32
  }
  func.func @transform_6(%arg0: i32) -> (i32, i32) {
    %c0_i32 = arith.constant 0 : i32
    %c0_i32_0 = arith.constant 0 : i32
    %c0_i32_1 = arith.constant 0 : i32
    return %c0_i32, %c0_i32_0 : i32, i32
  }
  func.func @transform_7(%arg0: i32) -> (i32, i32) {
    %c0_i32 = arith.constant 0 : i32
    %c0_i32_0 = arith.constant 0 : i32
    %c0_i32_1 = arith.constant 0 : i32
    return %c0_i32, %c0_i32_0 : i32, i32
  }
  func.func @transform_8(%arg0: i32) -> (i32, i32) {
    %c0_i32 = arith.constant 0 : i32
    %c0_i32_0 = arith.constant 0 : i32
    return %c0_i32, %arg0 : i32, i32
  }
}

</mosaic_0001>

<bundles_post_ra>
// kernel: tpu_custom_call.1
= control target key start
LH: loop header
LB: loop body
LE: loop exit
PB: predicated region body
PF: predicated region fallthrough
CT: control target
= control target key end

     0   :  { %13 = vsyncpa [#allocation4], 0  ;;  %s13034_s0 = inlined_call_operand.vmem [shape: f32[32,1024], index: 0, kind: input, shape index: {}]   ;;  %s13035_s1 = inlined_call_operand.vmem [shape: f32[32,1], index: 1, kind: input, shape index: {}]   ;;  %s13036_s2 = inlined_call_operand.vmem [shape: f32[32,1], index: 2, kind: input, shape index: {}]   ;;  %s13037_s3 = inlined_call_operand.hbm [shape: f32[32,32], index: 3, kind: input, shape index: {}]   ;;  %s13038_s4 = inlined_call_operand.vmem [shape: bf16[96,32], index: 4, kind: input, shape index: {}]   ;;  %s13039_s5 = inlined_call_operand.vmem [shape: f32[96,1], index: 5, kind: input, shape index: {}]   ;;  %s13040_s6 = inlined_call_operand.vmem [shape: bf16[32,32], index: 6, kind: input, shape index: {}]   ;;  %s13041_s7 = inlined_call_operand.vmem [shape: f32[32,1], index: 7, kind: input, shape index: {}]   ;;  %s13042_s8 = inlined_call_operand.hbm [shape: f32[32,1024], index: 8, kind: output, shape index: {}]  }
   0x1   :  { %14 = vsyncpa [#allocation5], 0 }
   0x2   :  { %16 = vsyncpa [#allocation5 + $0x1], 0  ;;  %s8342_s27 = smov 0   ;;  %s8344_s28 = smov 0  }
   0x3   :  { %s8346_s29 = smov 0   ;;  %s8348_s30 = smov 0  }
   0x4 LB: > { %s8363_s9 = sadd.s32 4294967295, %s8280_s30   ;;  %s7321_s10 = sadd.s32 4294967294, %s8280_s30   ;;  %s8280_s30 = sphi %s8348_s30, %s14071_s30   ;;  %s8276_s29 = sphi %s8346_s29, %s14070_s29   ;;  %s8272_s28 = sphi %s8344_s28, %s14069_s28   ;;  %s8268_s27 = sphi %s8342_s27, %s14068_s27  }
   0x5   : > { %s8367_s11 = sadd.s32 1, %s8280_s30   ;;  %s29_s12 = sadd.s32 1, %s8276_s29 }
   0x6   : > { %s26_s13 = ssub.s32 %s8280_s30, %s8367_s11  ;;  %p36_p0 = scmp.ne.s32.totalorder %s8276_s29, %s8272_s28 }
   0x7   : > { %p27_p1 = scmp.eq.s32.totalorder %s26_s13, 0  ;;  %p37_p2 = scmp.eq.s32.totalorder %s8280_s30, 0 }
   0x8   : > { %p213_p3 = scmp.eq.s32.totalorder %s8363_s9, 1  ;;  %p218_p4 = scmp.ne.s32.totalorder %s8272_s28, %s8268_s27 }
   0x9   : > { %s8379_s14 = scalar_select %p27_p1, %s8276_s29, %s29_s12  }
   0xa   : > { %p8381_p5 = por %p37_p2, %p36_p0  ;;  %p8385_p6 = por %p213_p3, %p36_p0 }
   0xb   : > { %p219_p7 = scmp.eq.s32.totalorder %s7321_s10, 1  ;;  %p7322_p8 = scmp.ge.s32.totalorder %s8280_s30, 1 }
   0xc   : > { %s13317_s15 = scalar_select %p8381_p5, 1, 0 }
   0xd   : > { %s13318_s16 = scalar_select %p8385_p6, 1, 0 }
   0xe   : > { %p226_p9 = scmp.lt.s32.totalorder %s8280_s30, 3  ;;  %p8391_p10 = por %p219_p7, %p218_p4 }
   0xf   : > { %p13043_p11 = scmp.eq.s32.totalorder %s8363_s9, 0  ;;  %s8282_s19 = smov [#allocation3]  }
  0x10   : > { %s13319_s17 = scalar_select %p8391_p10, 1, 0 }
  0x11   : > { %p8396_p12 = pnand %p7322_p8, %p226_p9  ;;  %s244_s20 = sshll.u32 %s8282_s19, 4  ;;  %s245_s20 = int_to_ptr.vmem [resolvable:$true] %s244_s20 }
  0x12   : > { %s8186_s24 = scalar_lea.hbm %s13037_s3, 512 }
  0x13   : > { %s13320_s18 = scalar_select %p8396_p12, 1, 0 }
  0x14   : > { %p7539_p13 = pneg %p8396_p12  ;;  %p8187_p1 = scmp.ne.s32.totalorder %s13037_s3, %s8186_s24 }
  0x15   : > { %p8193_p7 = scmp.lt.u32.totalorder %s8186_s24, %s13037_s3 }
  0x16   : > { %p8404_p0 = pnand %p13043_p11, %p7539_p13 }
  0x18   : > { %p8188_p2 = pneg %p8404_p0 }
  0x1a   : > { %p8189_p3 = pnand %p8188_p2, %p8187_p1 }
  0x1c   : > { %p8190_p4 = pneg %p8189_p3 }
  0x1e   : > { %p8195_p8 = pnand %p8193_p7, %p8190_p4 }
  0x20   : > { %8198 = shalt.err (!%p8195_p8)
}
  0x21   : > { %s8199_s13 = scalar_lea.vmem %s245_s20, 512  ;;  %p8207_p10 = scmp.lt.s32.totalorder %s245_s20, %s245_s20 }
  0x22   : > { %p8200_p9 = scmp.ne.s32.totalorder %s245_s20, %s8199_s13  ;;  %p8208_p6 = scmp.lt.s32.totalorder %s8199_s13, %s8199_s13 }
  0x24   : > { %p8202_p13 = pnand %p8200_p9, %p8188_p2  ;;  %p8209_p12 = por %p8208_p6, %p8207_p10 }
  0x26   : > { %p8203_p11 = pneg %p8202_p13 }
  0x28   : > { %p8210_p5 = pnand %p8209_p12, %p8203_p11 }
  0x2a   : > { %8213 = shalt.err (!%p8210_p5)
}
  0x2b   : > { %s8283_s19 = smov 128   ;;  %s8284_s22 = smov 8  }
  0x2c   : > { %7542 = dma.hbm_to_vmem [thread:$0]  (!%p8404_p0), %s13037_s3, 512, %s245_s20, [#allocation4], %s8283_s19, %s8283_s19, %s8284_s22  }
  0x2d   : > { %p7324_p1 = scmp.ge.s32.totalorder %s8280_s30, 2 }
  0x2e   : > { %p13322_p2 = scmp.ne.s32.totalorder (!%p7324_p1), %s13317_s15, 0 }
  0x2f   : > { %266 = sbr.rel (%p7324_p1) target bundleno = 66 (0x42), region = 44 }
  0x36   : > { %269 = sbr.rel (!%p13322_p2) target bundleno = 66 (0x42), region = 48  ;;  %s271_s24 = sand.u32 (%p13322_p2), 1, %s8276_s29  }
  0x37   : > { %s7501_s26 = sshll.u32 (%p13322_p2), %s8280_s30, 5  ;;  %s7325_s10 = sshll.u32 (%p13322_p2), %s271_s24, 7 }
  0x38   : > { %s8434_s21 = scalar_lea.vmem (%p13322_p2), %s13034_s0, %s7501_s26  ;;  %s273_s15 = scalar_lea.vmem (%p13322_p2), [#allocation2], %s7325_s10 }
  0x39   : > { %v289_v0 = vld [vmem:[%s8434_s21] sm:$0xff] (%p13322_p2)  ;;  %v291_v1 = vld [vmem:[%s8434_s21 + $0x8] sm:$0xff] (%p13322_p2)  ;;  %v293_v2 = vld [vmem:[%s8434_s21 + $0x10] sm:$0xff] (%p13322_p2) }
  0x3a   : > { %290 = vst [vmem:[%s273_s15] sm:$0xff] (%p13322_p2), %v289_v0  ;;  %292 = vst [vmem:[%s273_s15 + $0x8] sm:$0xff] (%p13322_p2), %v291_v1  ;;  %v295_v3 = vld [vmem:[%s8434_s21 + $0x18] sm:$0xff] (%p13322_p2)  ;;  %v297_v4 = vld [vmem:[%s8434_s21 + $0x40] sm:$0xff] (%p13322_p2) }
  0x3b   : > { %294 = vst [vmem:[%s273_s15 + $0x10] sm:$0xff] (%p13322_p2), %v293_v2  ;;  %v299_v5 = vld [vmem:[%s8434_s21 + $0x48] sm:$0xff] (%p13322_p2)  ;;  %296 = vst [vmem:[%s273_s15 + $0x18] sm:$0xff] (%p13322_p2), %v295_v3  ;;  %v301_v6 = vld [vmem:[%s8434_s21 + $0x50] sm:$0xff] (%p13322_p2) }
  0x3c   : > { %298 = vst [vmem:[%s273_s15 + $0x20] sm:$0xff] (%p13322_p2), %v297_v4  ;;  %300 = vst [vmem:[%s273_s15 + $0x28] sm:$0xff] (%p13322_p2), %v299_v5  ;;  %v303_v7 = vld [vmem:[%s8434_s21 + $0x58] sm:$0xff] (%p13322_p2)  ;;  %v305_v8 = vld [vmem:[%s8434_s21 + $0x80] sm:$0xff] (%p13322_p2) }
  0x3d   : > { %302 = vst [vmem:[%s273_s15 + $0x30] sm:$0xff] %v301_v6  ;;  %304 = vst [vmem:[%s273_s15 + $0x38] sm:$0xff] %v303_v7  ;;  %v307_v9 = vld [vmem:[%s8434_s21 + $0x88] sm:$0xff]  ;;  %v309_v10 = vld [vmem:[%s8434_s21 + $0x90] sm:$0xff] }
  0x3e   : > { %306 = vst [vmem:[%s273_s15 + $0x40] sm:$0xff] %v305_v8  ;;  %v311_v11 = vld [vmem:[%s8434_s21 + $0x98] sm:$0xff]  ;;  %308 = vst [vmem:[%s273_s15 + $0x48] sm:$0xff] %v307_v9  ;;  %v313_v12 = vld [vmem:[%s8434_s21 + $0xc0] sm:$0xff] }
  0x3f   : > { %310 = vst [vmem:[%s273_s15 + $0x50] sm:$0xff] %v309_v10  ;;  %312 = vst [vmem:[%s273_s15 + $0x58] sm:$0xff] %v311_v11  ;;  %v315_v13 = vld [vmem:[%s8434_s21 + $0xc8] sm:$0xff]  ;;  %v317_v14 = vld [vmem:[%s8434_s21 + $0xd0] sm:$0xff] }
  0x40   : > { %314 = vst [vmem:[%s273_s15 + $0x60] sm:$0xff] %v313_v12  ;;  %316 = vst [vmem:[%s273_s15 + $0x68] sm:$0xff] %v315_v13  ;;  %v319_v15 = vld [vmem:[%s8434_s21 + $0xd8] sm:$0xff] }
  0x41   : > { %318 = vst [vmem:[%s273_s15 + $0x70] sm:$0xff] %v317_v14  ;;  %320 = vst [vmem:[%s273_s15 + $0x78] sm:$0xff] %v319_v15 }
  0x42 PF: > { %p13323_p5 = scmp.ne.s32.totalorder %s13320_s18, 0 }
  0x44   : > { %329 = sbr.rel (%p13323_p5) target bundleno = 5244 (0x147c), region = 71 }
  0x4b   : > { %s332_s20 = sand.u32 1, %s8272_s28   ;;  %p13324_p6 = scmp.eq.s32.totalorder %s8363_s9, 0 }
  0x4c   : > { %s8457_s19 = sshll.u32 %s332_s20, 7 }
  0x4d   : > { %s8460_s22 = scalar_lea.vmem [#allocation2], %s8457_s19 }
  0x4e   : > { %8259 = dma.done.wait (%p13324_p6), [#allocation4], 512   ;;  %p13325_p10 = pmov %p13324_p6 }
  0x4f   : > { %v8467_v16 = vld [vmem:[%s8460_s22 + $0x10] sm:$0xff]  ;;  %v8470_v17 = vld [vmem:[%s8460_s22 + $0x18] sm:$0xff]  ;;  %v8473_v18 = vld [vmem:[%s8460_s22] sm:$0xff]  ;;  %vm471_vm0 = vcmask 261120   ;;  %vm452_vm1 = vcmask 7168   ;;  %vm457_vm2 = vcmask 15360  }
  0x50   : > { %8261 = vsyncadd (%p13325_p10), [#allocation4], 4294966784  ;;  %v420_v19 = vadd.f32 %v8470_v17, %v8467_v16  ;;  %v8478_v20 = vld [vmem:[%s8460_s22 + $0x8] sm:$0xff]  ;;  %v8481_v21 = vld [vmem:[%s8460_s22 + $0x30] sm:$0xff]  ;;  %v400_v30 = vmul.f32 %v8473_v18, %v8473_v18  ;;  %v432_v36 = vmul.f32 %v8467_v16, %v8467_v16  ;;  %v433_v37 = vmul.f32 %v8470_v17, %v8470_v17  ;;  %s8286_s18 = smov 2   ;;  %s8290_s10 = smov 120  }
  0x51   : > { %v8484_v22 = vld [vmem:[%s8460_s22 + $0x38] sm:$0xff]  ;;  %v388_v23 = vadd.f32 %v8478_v20, %v8473_v18  ;;  %v8489_v24 = vld [vmem:[%s8460_s22 + $0x20] sm:$0xff]  ;;  %v8492_v25 = vld [vmem:[%s8460_s22 + $0x28] sm:$0xff]  ;;  %v401_v31 = vmul.f32 %v8478_v20, %v8478_v20  ;;  %v434_v33 = vmul.f32 %v8481_v21, %v8481_v21  ;;  %vm462_vm3 = vcmask 23552   ;;  %s8292_s12 = smov 104   ;;  %s12947_s21 = scalar_lea.vmem [#allocation6], %s8457_s19 }
  0x52   : > { %421 = vadd.xlane.f32.xlu1 %v420_v19  ;;  %v423_v26 = vadd.f32 %v8484_v22, %v8481_v21  ;;  %v402_v27 = vmul.f32 %v8489_v24, %v8489_v24  ;;  %v403_v28 = vmul.f32 %v8492_v25, %v8492_v25  ;;  %v391_v29 = vadd.f32 %v8492_v25, %v8489_v24  ;;  %v8515_v40 = vld [vmem:[%s8460_s22 + $0x60] sm:$0xff]  ;;  %v8518_v41 = vld [vmem:[%s8460_s22 + $0x68] sm:$0xff]  ;;  %v8531_v46 = vld [vmem:[%s8460_s22 + $0x70] sm:$0xff]  ;;  %s7502_s19 = sshll.u32 %s8363_s9, 9  ;;  %s7241_s15 = sshll.u32 %s12947_s21, 4  ;;  %s12984_s15 = int_to_ptr.vmem [resolvable:$true] %s7241_s15 }
  0x53   : > { %389 = vadd.xlane.f32.xlu0 %v388_v23  ;;  %v435_v34 = vmul.f32 %v8484_v22, %v8484_v22  ;;  %v408_v35 = vadd.f32 %v401_v31, %v400_v30  ;;  %v440_v39 = vadd.f32 %v433_v37, %v432_v36  ;;  %v8521_v42 = vld [vmem:[%s8460_s22 + $0x40] sm:$0xff]  ;;  %v8524_v43 = vld [vmem:[%s8460_s22 + $0x48] sm:$0xff]  ;;  %v397_v44 = vadd.f32 %v8518_v41, %v8515_v40  ;;  %v8534_v47 = vld [vmem:[%s8460_s22 + $0x78] sm:$0xff]  ;;  %s12980_s9 = scalar_lea.hbm %s13042_s8, %s7502_s19  ;;  %s12992_s25 = scalar_lea.sflag [#allocation5], %s332_s20 }
  0x54   : > { %v411_v32 = vadd.f32 %v403_v28, %v402_v27  ;;  %v394_v45 = vadd.f32 %v8524_v43, %v8521_v42  ;;  %v8537_v48 = vld [vmem:[%s8460_s22 + $0x50] sm:$0xff]  ;;  %v8540_v49 = vld [vmem:[%s8460_s22 + $0x58] sm:$0xff]  ;;  %v429_v50 = vadd.f32 %v8534_v47, %v8531_v46  ;;  %v406_v51 = vmul.f32 %v8515_v40, %v8515_v40  ;;  %v467_v0 = vld [vmem:[#allocation3] sm:$0xff]  ;;  %s8214_s24 = scalar_lea.vmem %s12984_s15, 2048  ;;  %p14066_p12 = scmp.ne.s32.totalorder %s13318_s16, 0 }
  0x55   : > { %v443_v38 = vadd.f32 %v435_v34, %v434_v33  ;;  %v407_v52 = vmul.f32 %v8518_v41, %v8518_v41  ;;  %v426_v53 = vadd.f32 %v8540_v49, %v8537_v48  ;;  %v404_v54 = vmul.f32 %v8521_v42, %v8521_v42  ;;  %7519 = vmatprep.mubr.msk.f32.mxu0 %vm471_vm0, %v467_v0  ;;  %v750_v0 = vld [vmem:[%s13036_s2 + $0x8] sm:$0xff]  ;;  %p8215_p11 = scmp.ne.s32.totalorder %s12984_s15, %s8214_s24  ;;  %s8293_s26 = smov [#allocation6]  }
  0x56   : > { %424 = vadd.xlane.f32.xlu1 %v423_v26  ;;  %v405_v55 = vmul.f32 %v8524_v43, %v8524_v43  ;;  %v438_v57 = vmul.f32 %v8531_v46, %v8531_v46  ;;  %v439_v58 = vmul.f32 %v8534_v47, %v8534_v47  ;;  %v436_v60 = vmul.f32 %v8537_v48, %v8537_v48 }
  0x57   : > { %392 = vadd.xlane.f32.xlu0 %v391_v29  ;;  %v417_v56 = vadd.f32 %v407_v52, %v406_v51  ;;  %v437_v61 = vmul.f32 %v8540_v49, %v8540_v49  ;;  %vm1252_vm4 = vcmask 1043456   ;;  %vm1203_vm5 = vcmask 64512   ;;  %p8216_p0 = pnand %p8215_p11, %p14066_p12 }
  0x58   : > { %v414_v59 = vadd.f32 %v405_v55, %v404_v54  ;;  %v449_v62 = vadd.f32 %v439_v58, %v438_v57  ;;  %v709_v58 = vld [vmem:[%s13035_s1] sm:$0xff] }
  0x59   : > { %v446_v63 = vadd.f32 %v437_v61, %v436_v60  ;;  %v711_v60 = vld [vmem:[%s13035_s1 + $0x10] sm:$0xff]  ;;  %v8287_v61 = vmov 2   ;;  %p8217_p3 = pneg %p8216_p0 }
  0x5a   : > { %412 = vadd.xlane.f32.xlu1 %v411_v32 }
  0x5b   : > { %409 = vadd.xlane.f32.xlu0 %v408_v35 }
  0x5e   : > { %444 = vadd.xlane.f32.xlu1 %v443_v38 }
  0x5f   : > { %441 = vadd.xlane.f32.xlu0 %v440_v39  ;;  %v468_v39 = vld [vmem:[#allocation3 + $0x8] sm:$0xff] }
  0x62   : > { %398 = vadd.xlane.f32.xlu1 %v397_v44  ;;  %v469_v44 = vld [vmem:[#allocation3 + $0x10] sm:$0xff] }
  0x63   : > { %395 = vadd.xlane.f32.xlu0 %v394_v45  ;;  %v470_v45 = vld [vmem:[#allocation3 + $0x18] sm:$0xff] }
  0x66   : > { %430 = vadd.xlane.f32.xlu1 %v429_v50  ;;  %v13048_v50 = vmov 0  }
  0x67   : > { %427 = vadd.xlane.f32.xlu0 %v426_v53  ;;  %7597 = vset.pattern.permute.xlu1 %v13048_v50 }
  0x68   : > { %7596 = vset.pattern.permute.xlu0 %v13048_v50  ;;  %961 = vmatprep.mubr.bf16.mxu1 %v13048_v50 }
  0x6a   : > { %418 = vadd.xlane.f32.xlu1 %v417_v56 }
  0x6b   : > { %415 = vadd.xlane.f32.xlu0 %v414_v59 }
  0x6e   : > { %450 = vadd.xlane.f32.xlu1 %v449_v62  ;;  %v710_v62 = vld [vmem:[%s13035_s1 + $0x8] sm:$0xff] }
  0x6f   : > { %447 = vadd.xlane.f32.xlu0 %v446_v63  ;;  %v749_v63 = vld [vmem:[%s13036_s2] sm:$0xff] }
  0xdf   : > { %v422_v1 = vpop.xlane.xlu1 %421 }
  0xe0   : > { %v390_v2 = vpop.xlane.xlu0 %389 }
  0xe1   : > { %v453_v8 = vsel %vm452_vm1, %v390_v2, %v422_v1  ;;  %v712_v1 = vld [vmem:[%s13035_s1 + $0x18] sm:$0xff] }
  0xe3   : > { %v425_v3 = vpop.xlane.xlu1 %424 }
  0xe4   : > { %v393_v4 = vpop.xlane.xlu0 %392 }
  0xe5   : > { %v454_v7 = vsel %vm452_vm1, %v393_v4, %v425_v3 }
  0xe7   : > { %v413_v5 = vpop.xlane.xlu1 %412 }
  0xe8   : > { %v410_v6 = vpop.xlane.xlu0 %409  ;;  %v459_v9 = vsel %vm457_vm2, %v454_v7, %v413_v5 }
  0xe9   : > { %v458_v11 = vsel %vm457_vm2, %v453_v8, %v410_v6 }
  0xeb   : > { %v445_v10 = vpop.xlane.xlu1 %444 }
  0xec   : > { %v464_v12 = vsel %vm462_vm3, %v459_v9, %v445_v10  ;;  %v442_v13 = vpop.xlane.xlu0 %441 }
  0xed   : > { %v463_v14 = vsel %vm462_vm3, %v458_v11, %v442_v13 }
  0xee   : > { %v7525_v15 = vpack.c.bf16 %v464_v12, %v463_v14 }
  0xef   : > { %v399_v19 = vpop.xlane.xlu1 %398 }
  0xf0   : > { %7526 = vmatprep.subr.bf16.mxu0 %v7525_v15  ;;  %v396_v23 = vpop.xlane.xlu0 %395 }
  0xf1   : > { %7528 = vmatpush3.bf16.msra.mxu0 %v7525_v15 }
  0xf3   : > { %v431_v26 = vpop.xlane.xlu1 %430 }
  0xf4   : > { %v428_v27 = vpop.xlane.xlu0 %427  ;;  %v456_v30 = vsel %vm452_vm1, %v399_v19, %v431_v26 }
  0xf5   : > { %v455_v31 = vsel %vm452_vm1, %v396_v23, %v428_v27 }
  0xf7   : > { %v419_v28 = vpop.xlane.xlu1 %418 }
  0xf8   : > { %v416_v29 = vpop.xlane.xlu0 %415  ;;  %v461_v32 = vsel %vm457_vm2, %v456_v30, %v419_v28 }
  0xf9   : > { %v460_v34 = vsel %vm457_vm2, %v455_v31, %v416_v29  ;;  %v751_v29 = vld [vmem:[%s13036_s2 + $0x10] sm:$0xff]  ;;  %v813_v31 = vld [vmem:[%s13039_s5 + $0x20] sm:$0xff] }
  0xfb   : > { %v451_v33 = vpop.xlane.xlu1 %450 }
  0xfc   : > { %v466_v35 = vsel %vm462_vm3, %v461_v32, %v451_v33  ;;  %v448_v36 = vpop.xlane.xlu0 %447  ;;  %v752_v32 = vld [vmem:[%s13036_s2 + $0x18] sm:$0xff]  ;;  %v815_v33 = vld [vmem:[%s13039_s5 + $0x30] sm:$0xff] }
  0xfd   : > { %v465_v37 = vsel %vm462_vm3, %v460_v34, %v448_v36  ;;  %v814_v34 = vld [vmem:[%s13039_s5 + $0x28] sm:$0xff]  ;;  %v816_v36 = vld [vmem:[%s13039_s5 + $0x38] sm:$0xff] }
  0xfe   : > { %v7529_v38 = vpack.c.bf16 %v466_v35, %v465_v37  ;;  %v809_v35 = vld [vmem:[%s13039_s5] sm:$0xff]  ;;  %v810_v37 = vld [vmem:[%s13039_s5 + $0x8] sm:$0xff] }
 0x100   : > { %7530 = vmatprep.subr.bf16.mxu0 %v7529_v38 }
 0x101   : > { %7532 = vmatpush3.bf16.msra.mxu0 %v7529_v38 }
 0x104   : > { %7520 = vmatmul.mubr.msk.f32.vlgmr.msra.gmra.mrb[0].mxu0 %vm471_vm0, %v468_v39 }
 0x105   : > { %7522 = vmatprep.mubr.msk.f32.mxu0 %vm471_vm0, %v469_v44 }
 0x108   : > { %7523 = vmatmul.mubr.msk.f32.gmra.mrb[2].mxu0 %vm471_vm0, %v470_v45 }
 0x109   : > { %1054 = vmatprep.mubr.bf16.mxu0 %v13048_v50 }
 0x1d7   : > { %v8582_v51 = vpop.f32.mrb[0].mxu0 }
 0x1d8   : > { %v8584_v52 = vpop.f32.mrb[1].mxu0  ;;  %v570_v53 = vmul.f32 %v8582_v51, %v8582_v51 }
 0x1d9   : > { %v569_v54 = vmul.f32 %v8584_v52, %v8584_v52 }
 0x1da   : > { %579 = vrot.lane.b32.xlu1 %v570_v53, %s8286_s18 }
 0x1db   : > { %577 = vrot.lane.b32.xlu0 %v569_v54, %s8286_s18  ;;  %v8590_v55 = vpop.f32.mrb[2].mxu0 }
 0x1dc   : > { %v8592_v56 = vpop.f32.mrb[3].mxu0  ;;  %v572_v59 = vmul.f32 %v8590_v55, %v8590_v55 }
 0x1dd   : > { %v571_v57 = vmul.f32 %v8592_v56, %v8592_v56 }
 0x1df   : > { %599 = vperm.xlu0 %7596, %v8584_v52   ;;  %581 = vrot.lane.b32.xlu1 %v571_v57, %s8286_s18 }
 0x1e3   : > { %583 = vrot.lane.b32.xlu1 %v572_v59, %s8286_s18  ;;  %715 = vperm.xlu0 %7596, %v709_v58   ;;  %s8291_s18 = smov 112  }
 0x1e7   : > { %604 = vperm.xlu1 %7597, %v8582_v51   ;;  %725 = vperm.xlu0 %7596, %v711_v60  }
 0x1eb   : > { %609 = vperm.xlu1 %7597, %v8592_v56   ;;  %7598 = vset.pattern.permute.xlu0 %v8287_v61 }
 0x1ef   : > { %614 = vperm.xlu1 %7597, %v8590_v55  }
 0x1f3   : > { %720 = vperm.xlu1 %7597, %v710_v62  }
 0x1f7   : > { %755 = vperm.xlu1 %7597, %v749_v63  }
 0x1fb   : > { %760 = vperm.xlu1 %7597, %v750_v0  }
 0x1ff   : > { %730 = vperm.xlu1 %7597, %v712_v1  }
 0x203   : > { %7599 = vset.pattern.permute.xlu1 %v8287_v61 }
 0x24c   : > { %v580_v2 = vpop.permute.xlu1 %579 }
 0x24d   : > { %v590_v3 = vsub.f32 %v8582_v51, %v580_v2  ;;  %v578_v4 = vpop.permute.xlu0 %577 }
 0x24e   : > { %v589_v5 = vsub.f32 %v8584_v52, %v578_v4 }
 0x24f   : > { %v594_v6 = vmax.f32 %v590_v3, 0.0 }
 0x250   : > { %v593_v7 = vmax.f32 %v589_v5, 0.0 }
 0x251   : > { %v626_v8 = vadd.f32 1e-05, %v594_v6  ;;  %v582_v9 = vpop.permute.xlu1 %581 }
 0x252   : > { %v625_v10 = vadd.f32 1e-05, %v593_v7  ;;  %v591_v11 = vsub.f32 %v8592_v56, %v582_v9 }
 0x253   : > { %7618 = vrsqrt.f32 %v626_v8 }
 0x254   : > { %7620 = vrsqrt.f32 %v625_v10  ;;  %v595_v12 = vmax.f32 %v591_v11, 0.0 }
 0x255   : > { %v584_v13 = vpop.permute.xlu1 %583 }
 0x256   : > { %v627_v14 = vadd.f32 1e-05, %v595_v12  ;;  %v592_v15 = vsub.f32 %v8590_v55, %v584_v13 }
 0x258   : > { %7622 = vrsqrt.f32 %v627_v14  ;;  %v596_v19 = vmax.f32 %v592_v15, 0.0 }
 0x25a   : > { %v628_v23 = vadd.f32 1e-05, %v596_v19 }
 0x25c   : > { %7624 = vrsqrt.f32 %v628_v23 }
 0x25d   : > { %v8624_v26 = vpop.eup %7618 }
 0x25e   : > { %v8626_v27 = vpop.eup %7620  ;;  %640 = vperm.xlu0 %7598, %v8624_v26   ;;  %v600_v54 = vpop.permute.xlu0 %599 }
 0x25f   : > { %635 = vperm.xlu1 %7599, %v8626_v27   ;;  %v617_v63 = vsub.f32 %v8473_v18, %v600_v54  ;;  %v618_v0 = vsub.f32 %v8478_v20, %v600_v54 }
 0x262   : > { %v8630_v28 = vpop.eup %7622  ;;  %v8666_v57 = vpop.permute.xlu0 %715 }
 0x263   : > { %645 = vperm.xlu1 %7599, %v8630_v28  }
 0x266   : > { %v8636_v30 = vpop.eup %7624  ;;  %v605_v38 = vpop.permute.xlu1 %604 }
 0x267   : > { %7600 = vset.pattern.permute.xlu1 %v13048_v50  ;;  %650 = vperm.xlu0 %7598, %v8636_v30   ;;  %v8670_v59 = vpop.permute.xlu0 %725  ;;  %v619_v61 = vsub.f32 %v8489_v24, %v605_v38  ;;  %v620_v62 = vsub.f32 %v8492_v25, %v605_v38 }
 0x268   : > { %765 = vperm.xlu1 %7600, %v751_v29  }
 0x26a   : > { %v610_v39 = vpop.permute.xlu1 %609 }
 0x26b   : > { %7601 = vset.pattern.permute.xlu0 %v13048_v50  ;;  %v621_v25 = vsub.f32 %v8521_v42, %v610_v39  ;;  %v622_v18 = vsub.f32 %v8524_v43, %v610_v39 }
 0x26c   : > { %843 = vperm.xlu1 %7600, %v813_v31   ;;  %770 = vperm.xlu0 %7601, %v752_v32  }
 0x26e   : > { %v615_v44 = vpop.permute.xlu1 %614 }
 0x26f   : > { %v623_v19 = vsub.f32 %v8515_v40, %v615_v44  ;;  %v624_v23 = vsub.f32 %v8518_v41, %v615_v44 }
 0x270   : > { %853 = vperm.xlu1 %7600, %v815_v33   ;;  %848 = vperm.xlu0 %7601, %v814_v34  }
 0x272   : > { %v8662_v45 = vpop.permute.xlu1 %720 }
 0x274   : > { %823 = vperm.xlu1 %7600, %v809_v35   ;;  %858 = vperm.xlu0 %7601, %v816_v36  }
 0x276   : > { %v8664_v53 = vpop.permute.xlu1 %755 }
 0x278   : > { %828 = vperm.xlu0 %7601, %v810_v37  }
 0x27a   : > { %v8668_v58 = vpop.permute.xlu1 %760 }
 0x27e   : > { %v8672_v60 = vpop.permute.xlu1 %730 }
 0x2dd   : > { %v641_v1 = vpop.permute.xlu0 %640 }
 0x2de   : > { %v655_v2 = vmul.f32 %v641_v1, %v619_v61  ;;  %v656_v3 = vmul.f32 %v641_v1, %v620_v62  ;;  %v636_v4 = vpop.permute.xlu1 %635  ;;  %v8705_v62 = vld [vmem:[%s13038_s4] sm:$0xff]   ;;  %v8729_v1 = vld [vmem:[%s13038_s4 + $0x18] sm:$0xff]  }
 0x2df   : > { %v653_v5 = vmul.f32 %v636_v4, %v617_v63  ;;  %v654_v6 = vmul.f32 %v636_v4, %v618_v0  ;;  %v8713_v63 = vld [vmem:[%s13038_s4 + $0x8] sm:$0xff]   ;;  %v8721_v0 = vld [vmem:[%s13038_s4 + $0x10] sm:$0xff]  }
 0x2e0   : > { %v737_v7 = vmul.f32 %v8662_v45, %v655_v2  ;;  %v738_v8 = vmul.f32 %v8662_v45, %v656_v3  ;;  %v8737_v2 = vld [vmem:[%s13038_s4 + $0x20] sm:$0xff]   ;;  %v8745_v3 = vld [vmem:[%s13038_s4 + $0x28] sm:$0xff]  }
 0x2e1   : > { %v733_v9 = vmul.f32 %v8666_v57, %v653_v5  ;;  %v734_v24 = vmul.f32 %v8666_v57, %v654_v6 }
 0x2e2   : > { %v646_v10 = vpop.permute.xlu1 %645  ;;  %v778_v20 = vadd.f32 %v8668_v58, %v738_v8  ;;  %v777_v11 = vadd.f32 %v8668_v58, %v737_v7 }
 0x2e3   : > { %v774_v12 = vadd.f32 %v8664_v53, %v734_v24  ;;  %v773_v13 = vadd.f32 %v8664_v53, %v733_v9  ;;  %v657_v14 = vmul.f32 %v646_v10, %v621_v25  ;;  %v658_v15 = vmul.f32 %v646_v10, %v622_v18 }
 0x2e5   : > { %v802_v29 = vpack.c.bf16 %v778_v20, %v774_v12  ;;  %v801_v31 = vpack.c.bf16 %v777_v11, %v773_v13  ;;  %v741_v33 = vmul.f32 %v8670_v59, %v657_v14  ;;  %v742_v34 = vmul.f32 %v8670_v59, %v658_v15 }
 0x2e6   : > { %v651_v42 = vpop.permute.xlu0 %650 }
 0x2e7   : > { %v659_v32 = vmul.f32 %v651_v42, %v623_v19  ;;  %v660_v43 = vmul.f32 %v651_v42, %v624_v23  ;;  %929 = vmatprep.subr.bf16.mxu1 %v802_v29  ;;  %v8694_v37 = vpop.permute.xlu1 %765 }
 0x2e8   : > { %930 = vmatpush1.bf16.msra.mxu1 %v801_v31  ;;  %v781_v41 = vadd.f32 %v8694_v37, %v741_v33  ;;  %v782_v38 = vadd.f32 %v8694_v37, %v742_v34 }
 0x2e9   : > { %v745_v35 = vmul.f32 %v8672_v60, %v659_v32  ;;  %v746_v36 = vmul.f32 %v8672_v60, %v660_v43 }
 0x2eb   : > { %v8696_v40 = vpop.permute.xlu0 %770  ;;  %v8750_v4 = vpop.permute.xlu1 %843 }
 0x2ec   : > { %v786_v39 = vadd.f32 %v8696_v40, %v746_v36  ;;  %v785_v44 = vadd.f32 %v8696_v40, %v745_v35 }
 0x2ee   : > { %v806_v54 = vpack.c.bf16 %v786_v39, %v782_v38  ;;  %v805_v61 = vpack.c.bf16 %v785_v44, %v781_v41 }
 0x2ef   : > { %v8752_v5 = vpop.permute.xlu0 %848  ;;  %v8754_v6 = vpop.permute.xlu1 %853 }
 0x2f0   : > { %931 = vmatprep.subr.bf16.mxu1 %v806_v54 }
 0x2f1   : > { %932 = vmatpush1.bf16.msra.mxu1 %v805_v61 }
 0x2f3   : > { %v8756_v7 = vpop.permute.xlu0 %858  ;;  %v8758_v9 = vpop.permute.xlu1 %823 }
 0x2f4   : > { %7342 = vmatmul.mubr.msk.bf16.vlgmr.msra.gmra.mrb[0].mxu1 %vm471_vm0, %v8705_v62 }
 0x2f5   : > { %971 = vmatprep.mubr.bf16.mxu1 %v13048_v50 }
 0x2f7   : > { %v8760_v25 = vpop.permute.xlu0 %828 }
 0x2fc   : > { %7343 = vmatmul.mubr.msk.bf16.gmra.mrb[4].mxu1 %vm471_vm0, %v8713_v63 }
 0x2fd   : > { %981 = vmatprep.mubr.bf16.mxu1 %v13048_v50 }
 0x304   : > { %7344 = vmatmul.mubr.msk.bf16.gmra.mrb[8].mxu1 %vm471_vm0, %v8721_v0 }
 0x305   : > { %991 = vmatprep.mubr.bf16.mxu1 %v13048_v50 }
 0x30c   : > { %7345 = vmatmul.mubr.msk.bf16.gmra.mrb[12].mxu1 %vm471_vm0, %v8729_v1 }
 0x30d   : > { %1001 = vmatprep.mubr.bf16.mxu1 %v13048_v50 }
 0x314   : > { %7346 = vmatmul.mubr.msk.bf16.gmra.mrb[16].mxu1 %vm471_vm0, %v8737_v2 }
 0x315   : > { %1011 = vmatprep.mubr.bf16.mxu1 %v13048_v50 }
 0x31c   : > { %7347 = vmatmul.mubr.msk.bf16.gmra.mrb[20].mxu1 %vm471_vm0, %v8745_v3 }
 0x31d   : > { %1291 = vmatprep.mubr.bf16.mxu1 %v13048_v50 }
 0x3c7   : > { %v963_v8 = vpop.f32.mrb[0].mxu1 }
 0x3c8   : > { %v965_v24 = vpop.f32.mrb[1].mxu1  ;;  %v964_v10 = vadd.f32 %v963_v8, %v8758_v9 }
 0x3c9   : > { %v967_v18 = vpop.f32.mrb[2].mxu1  ;;  %v966_v12 = vadd.f32 %v965_v24, %v8758_v9 }
 0x3ca   : > { %v968_v20 = vadd.f32 %v967_v18, %v8760_v25  ;;  %v969_v11 = vpop.f32.mrb[3].mxu1 }
 0x3cb   : > { %v970_v13 = vadd.f32 %v969_v11, %v8760_v25 }
 0x3cc   : > { %v8766_v14 = vpack.c.bf16 %v968_v20, %v964_v10 }
 0x3cd   : > { %v8768_v15 = vpack.c.bf16 %v970_v13, %v966_v12 }
 0x3ce   : > { %13326 = vst [vmem:[#allocation9_spill] sm:$0xff] %v8766_v14  ;;  %v1254_v19 = vsel %vm1252_vm4, %v8766_v14, 0 }
 0x3cf   : > { %13327 = vst [vmem:[#allocation10_spill] sm:$0xff] %v8768_v15  ;;  %v8772_v23 = vpop.f32.mrb[4].mxu1  ;;  %7354 = vmatprep.subr.msk.bf16.mxu1 %vm1252_vm4, %v8768_v15 }
 0x3d0   : > { %v8776_v29 = vpop.f32.mrb[5].mxu1  ;;  %1260 = vmatpush1.bf16.msra.mxu1 %v1254_v19  ;;  %v8288_v19 = vmov 1  }
 0x3d1   : > { %v8778_v31 = vpop.f32.mrb[6].mxu1 }
 0x3d2   : > { %v8780_v42 = vpop.f32.mrb[7].mxu1 }
 0x3d7   : > { %v983_v32 = vpop.f32.mrb[8].mxu1 }
 0x3d8   : > { %v985_v43 = vpop.f32.mrb[9].mxu1  ;;  %v984_v34 = vadd.f32 %v983_v32, %v8750_v4  ;;  %v8289_v32 = vmov 3  }
 0x3d9   : > { %v987_v33 = vpop.f32.mrb[10].mxu1  ;;  %v986_v41 = vadd.f32 %v985_v43, %v8750_v4 }
 0x3da   : > { %v988_v35 = vadd.f32 %v987_v33, %v8752_v5  ;;  %v989_v36 = vpop.f32.mrb[11].mxu1 }
 0x3db   : > { %v990_v38 = vadd.f32 %v989_v36, %v8752_v5 }
 0x3dc   : > { %v1123_v39 = vpack.c.bf16 %v988_v35, %v984_v34 }
 0x3dd   : > { %v1124_v44 = vpack.c.bf16 %v990_v38, %v986_v41 }
 0x3de   : > { %1139 = vxpose.xlu1.c.b16.start [1/2] (short) %v1123_v39, 128 }
 0x3df   : > { %v993_v54 = vpop.f32.mrb[12].mxu1  ;;  %1155 = vxpose.xlu0.c.b16.start [1/2] (short) %v1124_v44, 128 }
 0x3e0   : > { %v995_v61 = vpop.f32.mrb[13].mxu1  ;;  %v994_v24 = vadd.f32 %v993_v54, %v8754_v6  ;;  %v811_v54 = vld [vmem:[%s13039_s5 + $0x10] sm:$0xff] }
 0x3e1   : > { %v997_v8 = vpop.f32.mrb[14].mxu1  ;;  %v996_v20 = vadd.f32 %v995_v61, %v8754_v6 }
 0x3e2   : > { %v998_v18 = vadd.f32 %v997_v8, %v8756_v7  ;;  %v999_v10 = vpop.f32.mrb[15].mxu1  ;;  %v812_v8 = vld [vmem:[%s13039_s5 + $0x18] sm:$0xff] }
 0x3e3   : > { %v1000_v11 = vadd.f32 %v999_v10, %v8756_v7 }
 0x3e4   : > { %v1127_v12 = vpack.c.bf16 %v998_v18, %v994_v24 }
 0x3e5   : > { %v1128_v13 = vpack.c.bf16 %v1000_v11, %v996_v20 }
 0x3e6   : > { %1140 = vxpose.xlu1.c.b16.end [2/2] (short) %v1127_v12, 128 }
 0x3e7   : > { %1156 = vxpose.xlu0.c.b16.end [2/2] (short) %v1128_v13, 128  ;;  %v1003_v12 = vpop.f32.mrb[16].mxu1 }
 0x3ea   : > { %7603 = vset.pattern.permute.xlu1 %v8288_v19 }
 0x3f0   : > { %7602 = vset.pattern.permute.xlu0 %v8288_v19 }
 0x402   : > { %666 = vperm.xlu1 %7603, %v8582_v51   ;;  %v817_v51 = vld [vmem:[%s13039_s5 + $0x40] sm:$0xff] }
 0x406   : > { %7604 = vset.pattern.permute.xlu1 %v8289_v32 }
 0x407   : > { %686 = vperm.xlu1 %7604, %v8626_v27  }
 0x408   : > { %662 = vperm.xlu0 %7602, %v8584_v52   ;;  %v818_v52 = vld [vmem:[%s13039_s5 + $0x48] sm:$0xff] }
 0x40b   : > { %7606 = vset.pattern.permute.xlu1 %v8288_v19 }
 0x40c   : > { %7605 = vset.pattern.permute.xlu0 %v8289_v32  ;;  %670 = vperm.xlu1 %7606, %v8592_v56  }
 0x40d   : > { %690 = vperm.xlu0 %7605, %v8624_v26  }
 0x410   : > { %674 = vperm.xlu1 %7606, %v8590_v55  }
 0x411   : > { %694 = vperm.xlu0 %7605, %v8630_v28  }
 0x414   : > { %7607 = vset.pattern.permute.xlu1 %v8289_v32  ;;  %v1005_v32 = vpop.f32.mrb[17].mxu1 }
 0x415   : > { %698 = vperm.xlu1 %7607, %v8636_v30   ;;  %7608 = vset.pattern.permute.xlu0 %v13048_v50 }
 0x416   : > { %863 = vperm.xlu0 %7608, %v817_v51  }
 0x419   : > { %7609 = vset.pattern.permute.xlu1 %v13048_v50 }
 0x41a   : > { %868 = vperm.xlu1 %7609, %v818_v52   ;;  %v1007_v52 = vpop.f32.mrb[18].mxu1 }
 0x448   : > { %v8806_v55 = vpop.trf.xlu1 }
 0x449   : > { %7355 = vmatmul.mubr.msk.bf16.vlgmr.msra.gmra.mrb[24].mxu1 %vm1203_vm5, %v8806_v55  ;;  %1917 = vrot.lane.b32.xlu1 %v8806_v55, %s8290_s10  ;;  %v8812_v56 = vpop.trf.xlu0 }
 0x44a   : > { %1301 = vmatprep.mubr.bf16.mxu1 %v13048_v50 }
 0x44c   : > { %v8815_v26 = vpop.trf.xlu1 }
 0x44d   : > { %1919 = vrot.lane.b32.xlu0 %v8815_v26, %s8290_s10  ;;  %v8819_v27 = vpop.trf.xlu0 }
 0x450   : > { %v8821_v28 = vpop.trf.xlu1 }
 0x451   : > { %7356 = vmatmul.mubr.msk.bf16.gmra.mrb[28].mxu1 %vm1203_vm5, %v8815_v26  ;;  %1921 = vrot.lane.b32.xlu1 %v8821_v28, %s8290_s10  ;;  %v8832_v43 = vpop.trf.xlu0 }
 0x452   : > { %1311 = vmatprep.mubr.bf16.mxu1 %v13048_v50 }
 0x454   : > { %v8828_v30 = vpop.trf.xlu1 }
 0x455   : > { %1923 = vrot.lane.b32.xlu0 %v8828_v30, %s8290_s10  ;;  %v8841_v34 = vpop.trf.xlu0 }
 0x458   : > { %v8834_v33 = vpop.trf.xlu1 }
 0x459   : > { %7357 = vmatmul.mubr.msk.bf16.gmra.mrb[32].mxu1 %vm1203_vm5, %v8821_v28  ;;  %1925 = vrot.lane.b32.xlu1 %v8834_v33, %s8290_s10  ;;  %v8853_v41 = vpop.trf.xlu0 }
 0x45a   : > { %1321 = vmatprep.mubr.bf16.mxu1 %v13048_v50 }
 0x45c   : > { %v8843_v35 = vpop.trf.xlu1 }
 0x45d   : > { %1927 = vrot.lane.b32.xlu0 %v8843_v35, %s8290_s10  ;;  %v8862_v39 = vpop.trf.xlu0 }
 0x460   : > { %v8847_v36 = vpop.trf.xlu1 }
 0x461   : > { %7358 = vmatmul.mubr.msk.bf16.gmra.mrb[36].mxu1 %vm1203_vm5, %v8828_v30  ;;  %1929 = vrot.lane.b32.xlu1 %v8847_v36, %s8290_s10  ;;  %v8873_v44 = vpop.trf.xlu0 }
 0x462   : > { %1331 = vmatprep.mubr.bf16.mxu1 %v13048_v50 }
 0x464   : > { %v8856_v38 = vpop.trf.xlu1 }
 0x465   : > { %1933 = vrot.lane.b32.xlu1 %v8812_v56, %s8290_s10  ;;  %1931 = vrot.lane.b32.xlu0 %v8856_v38, %s8290_s10  ;;  %v8887_v61 = vpop.trf.xlu0 }
 0x469   : > { %7359 = vmatmul.mubr.msk.bf16.gmra.mrb[40].mxu1 %vm1203_vm5, %v8834_v33  ;;  %1937 = vrot.lane.b32.xlu1 %v8832_v43, %s8290_s10 }
 0x46a   : > { %1935 = vrot.lane.b32.xlu0 %v8819_v27, %s8290_s10  ;;  %1341 = vmatprep.mubr.bf16.mxu1 %v13048_v50 }
 0x46d   : > { %1941 = vrot.lane.b32.xlu1 %v8853_v41, %s8290_s10 }
 0x46e   : > { %1939 = vrot.lane.b32.xlu0 %v8841_v34, %s8290_s10 }
 0x471   : > { %7360 = vmatmul.mubr.msk.bf16.gmra.mrb[44].mxu1 %vm1203_vm5, %v8843_v35  ;;  %1945 = vrot.lane.b32.xlu1 %v8873_v44, %s8290_s10 }
 0x472   : > { %1943 = vrot.lane.b32.xlu0 %v8862_v39, %s8290_s10  ;;  %1351 = vmatprep.mubr.bf16.mxu1 %v13048_v50 }
 0x475   : > { %833 = vperm.xlu1 %7609, %v811_v54  }
 0x476   : > { %1947 = vrot.lane.b32.xlu0 %v8887_v61, %s8290_s10 }
 0x479   : > { %7361 = vmatmul.mubr.msk.bf16.gmra.mrb[48].mxu1 %vm1203_vm5, %v8847_v36  ;;  %2655 = vrot.lane.b32.xlu1 %v8806_v55, %s8291_s18 }
 0x47a   : > { %838 = vperm.xlu0 %7608, %v812_v8   ;;  %1361 = vmatprep.mubr.bf16.mxu1 %v13048_v50 }
 0x47d   : > { %2659 = vrot.lane.b32.xlu1 %v8821_v28, %s8291_s18 }
 0x47e   : > { %2657 = vrot.lane.b32.xlu0 %v8815_v26, %s8291_s18 }
 0x481   : > { %2663 = vrot.lane.b32.xlu1 %v8834_v33, %s8291_s18  ;;  %7362 = vmatmul.mubr.msk.bf16.gmra.mrb[52].mxu1 %vm1203_vm5, %v8856_v38  ;;  %v667_v24 = vpop.permute.xlu1 %666 }
 0x482   : > { %2661 = vrot.lane.b32.xlu0 %v8828_v30, %s8291_s18  ;;  %1371 = vmatprep.mubr.bf16.mxu1 %v13048_v50  ;;  %v679_v51 = vsub.f32 %v8481_v21, %v667_v24 }
 0x485   : > { %2667 = vrot.lane.b32.xlu1 %v8847_v36, %s8291_s18 }
 0x486   : > { %2665 = vrot.lane.b32.xlu0 %v8843_v35, %s8291_s18  ;;  %v687_v18 = vpop.permute.xlu1 %686 }
 0x487   : > { %v663_v10 = vpop.permute.xlu0 %662 }
 0x488   : > { %v677_v20 = vsub.f32 %v8467_v16, %v663_v10  ;;  %v678_v11 = vsub.f32 %v8470_v17, %v663_v10  ;;  %v680_v16 = vsub.f32 %v8484_v22, %v667_v24  ;;  %v1009_v10 = vpop.f32.mrb[19].mxu1 }
 0x489   : > { %2671 = vrot.lane.b32.xlu1 %v8812_v56, %s8291_s18  ;;  %7363 = vmatmul.mubr.msk.bf16.gmra.mrb[56].mxu1 %vm1203_vm5, %v8812_v56 }
 0x48a   : > { %v701_v13 = vmul.f32 %v687_v18, %v677_v20  ;;  %v702_v19 = vmul.f32 %v687_v18, %v678_v11  ;;  %2669 = vrot.lane.b32.xlu0 %v8856_v38, %s8291_s18  ;;  %1381 = vmatprep.mubr.bf16.mxu1 %v13048_v50 }
 0x48b   : > { %v671_v17 = vpop.permute.xlu1 %670 }
 0x48c   : > { %v735_v54 = vmul.f32 %v8666_v57, %v701_v13  ;;  %v691_v8 = vpop.permute.xlu0 %690  ;;  %v736_v18 = vmul.f32 %v8666_v57, %v702_v19  ;;  %v681_v21 = vsub.f32 %v8537_v48, %v671_v17  ;;  %v682_v22 = vsub.f32 %v8540_v49, %v671_v17  ;;  %v8941_v48 = vpop.f32.mrb[20].mxu1 }
 0x48d   : > { %v703_v14 = vmul.f32 %v691_v8, %v679_v51  ;;  %v704_v15 = vmul.f32 %v691_v8, %v680_v16  ;;  %2675 = vrot.lane.b32.xlu1 %v8832_v43, %s8291_s18  ;;  %v13328_v57 = vmov 0  }
 0x48e   : > { %2673 = vrot.lane.b32.xlu0 %v8819_v27, %s8291_s18  ;;  %v775_v51 = vadd.f32 %v8664_v53, %v735_v54  ;;  %v776_v49 = vadd.f32 %v8664_v53, %v736_v18 }
 0x48f   : > { %v739_v24 = vmul.f32 %v8662_v45, %v703_v14  ;;  %v740_v20 = vmul.f32 %v8662_v45, %v704_v15  ;;  %v675_v11 = vpop.permute.xlu1 %674  ;;  %v8948_v14 = vpop.f32.mrb[21].mxu1 }
 0x490   : > { %v695_v13 = vpop.permute.xlu0 %694  ;;  %v683_v15 = vsub.f32 %v8531_v46, %v675_v11  ;;  %v684_v19 = vsub.f32 %v8534_v47, %v675_v11  ;;  %v8952_v54 = vpop.f32.mrb[22].mxu1  ;;  %v819_v46 = vld [vmem:[%s13039_s5 + $0x50] sm:$0xff] }
 0x491   : > { %v779_v16 = vadd.f32 %v8668_v58, %v739_v24  ;;  %v705_v8 = vmul.f32 %v695_v13, %v681_v21  ;;  %v706_v50 = vmul.f32 %v695_v13, %v682_v22  ;;  %2679 = vrot.lane.b32.xlu1 %v8853_v41, %s8291_s18  ;;  %7364 = vmatmul.mubr.msk.bf16.gmra.mrb[60].mxu1 %vm1203_vm5, %v8819_v27  ;;  %v8955_v13 = vpop.f32.mrb[23].mxu1 }
 0x492   : > { %2677 = vrot.lane.b32.xlu0 %v8841_v34, %s8291_s18  ;;  %v780_v45 = vadd.f32 %v8668_v58, %v740_v20  ;;  %1391 = vmatprep.mubr.bf16.mxu1 %v13328_v57 }
 0x493   : > { %v803_v17 = vpack.c.bf16 %v779_v16, %v775_v51  ;;  %v743_v21 = vmul.f32 %v8670_v59, %v705_v8  ;;  %v744_v53 = vmul.f32 %v8670_v59, %v706_v50 }
 0x494   : > { %v699_v22 = vpop.permute.xlu1 %698  ;;  %v804_v24 = vpack.c.bf16 %v780_v45, %v776_v49  ;;  %v820_v45 = vld [vmem:[%s13039_s5 + $0x58] sm:$0xff] }
 0x495   : > { %v707_v58 = vmul.f32 %v699_v22, %v683_v15  ;;  %v708_v18 = vmul.f32 %v699_v22, %v684_v19  ;;  %2683 = vrot.lane.b32.xlu1 %v8873_v44, %s8291_s18  ;;  %v8967_v11 = vpop.permute.xlu0 %863  ;;  %v783_v50 = vadd.f32 %v8694_v37, %v743_v21  ;;  %v784_v8 = vadd.f32 %v8694_v37, %v744_v53 }
 0x496   : > { %2681 = vrot.lane.b32.xlu0 %v8862_v39, %s8291_s18  ;;  %1022 = vmatprep.subr.bf16.mxu0 %v804_v24  ;;  %13329 = vst [vmem:[#allocation11_spill] sm:$0xff] %v8967_v11  ;;  %v1004_v59 = vadd.f32 %v1003_v12, %v8967_v11  ;;  %v1006_v51 = vadd.f32 %v1005_v32, %v8967_v11 }
 0x497   : > { %v747_v47 = vmul.f32 %v8672_v60, %v707_v58  ;;  %v748_v20 = vmul.f32 %v8672_v60, %v708_v18  ;;  %1023 = vmatpush1.bf16.msra.mxu0 %v803_v17 }
 0x499   : > { %v787_v16 = vadd.f32 %v8696_v40, %v747_v47  ;;  %873 = vperm.xlu1 %7609, %v819_v46   ;;  %7365 = vmatmul.mubr.msk.bf16.gmra.mrb[64].mxu1 %vm1203_vm5, %v8832_v43  ;;  %v788_v49 = vadd.f32 %v8696_v40, %v748_v20  ;;  %v8977_v60 = vpop.permute.xlu1 %868 }
 0x49a   : > { %13330 = vst [vmem:[#allocation12_spill] sm:$0xff] %v8977_v60  ;;  %2685 = vrot.lane.b32.xlu0 %v8887_v61, %s8291_s18  ;;  %1401 = vmatprep.mubr.bf16.mxu1 %v13328_v57  ;;  %v1008_v12 = vadd.f32 %v1007_v52, %v8977_v60  ;;  %v1010_v32 = vadd.f32 %v1009_v10, %v8977_v60 }
 0x49b   : > { %v808_v15 = vpack.c.bf16 %v788_v49, %v784_v8  ;;  %v807_v19 = vpack.c.bf16 %v787_v16, %v783_v50 }
 0x49c   : > { %v8987_v37 = vpack.c.bf16 %v1008_v12, %v1004_v59  ;;  %v1132_v40 = vpack.c.bf16 %v1010_v32, %v1006_v51 }
 0x49d   : > { %3383 = vrot.lane.b32.xlu1 %v8806_v55, %s8292_s12  ;;  %1024 = vmatprep.subr.bf16.mxu0 %v808_v15 }
 0x49e   : > { %13331 = vst [vmem:[#allocation13_spill] sm:$0xff] %v8987_v37  ;;  %878 = vperm.xlu0 %7608, %v820_v45   ;;  %1025 = vmatpush1.bf16.msra.mxu0 %v807_v19 }
 0x4a1   : > { %3387 = vrot.lane.b32.xlu1 %v8821_v28, %s8292_s12  ;;  %7366 = vmatmul.mubr.msk.bf16.gmra.mrb[68].mxu1 %vm1203_vm5, %v8841_v34 }
 0x4a2   : > { %3385 = vrot.lane.b32.xlu0 %v8815_v26, %s8292_s12  ;;  %7348 = vmatmul.mubr.msk.bf16.vlgmr.msra.gmra.mrb[4].mxu0 %vm471_vm0, %v8705_v62  ;;  %v2607_v62 = vrot.slane %v1132_v40, 4 }
 0x4a3   : > { %1064 = vmatprep.mubr.bf16.mxu0 %v13328_v57  ;;  %1411 = vmatprep.mubr.bf16.mxu1 %v13328_v57 }
 0x4a5   : > { %3391 = vrot.lane.b32.xlu1 %v8834_v33, %s8292_s12 }
 0x4a6   : > { %3389 = vrot.lane.b32.xlu0 %v8828_v30, %s8292_s12 }
 0x4a9   : > { %3395 = vrot.lane.b32.xlu1 %v8847_v36, %s8292_s12  ;;  %7367 = vmatmul.mubr.msk.bf16.gmra.mrb[72].mxu1 %vm1203_vm5, %v8853_v41 }
 0x4aa   : > { %3393 = vrot.lane.b32.xlu0 %v8843_v35, %s8292_s12  ;;  %7349 = vmatmul.mubr.msk.bf16.gmra.mrb[8].mxu0 %vm471_vm0, %v8713_v63 }
 0x4ab   : > { %1074 = vmatprep.mubr.bf16.mxu0 %v13328_v57  ;;  %1421 = vmatprep.mubr.bf16.mxu1 %v13328_v57 }
 0x4ad   : > { %3399 = vrot.lane.b32.xlu1 %v8812_v56, %s8292_s12 }
 0x4ae   : > { %3397 = vrot.lane.b32.xlu0 %v8856_v38, %s8292_s12 }
 0x4b1   : > { %3403 = vrot.lane.b32.xlu1 %v8832_v43, %s8292_s12  ;;  %7368 = vmatmul.mubr.msk.bf16.gmra.mrb[76].mxu1 %vm1203_vm5, %v8862_v39 }
 0x4b2   : > { %3401 = vrot.lane.b32.xlu0 %v8819_v27, %s8292_s12  ;;  %7350 = vmatmul.mubr.msk.bf16.gmra.mrb[12].mxu0 %vm471_vm0, %v8721_v0 }
 0x4b3   : > { %1084 = vmatprep.mubr.bf16.mxu0 %v13328_v57  ;;  %1431 = vmatprep.mubr.bf16.mxu1 %v13328_v57 }
 0x4b5   : > { %3407 = vrot.lane.b32.xlu1 %v8853_v41, %s8292_s12 }
 0x4b6   : > { %3405 = vrot.lane.b32.xlu0 %v8841_v34, %s8292_s12 }
 0x4b9   : > { %3411 = vrot.lane.b32.xlu1 %v8873_v44, %s8292_s12  ;;  %7369 = vmatmul.mubr.msk.bf16.gmra.mrb[80].mxu1 %vm1203_vm5, %v8873_v44 }
 0x4ba   : > { %3409 = vrot.lane.b32.xlu0 %v8862_v39, %s8292_s12  ;;  %7351 = vmatmul.mubr.msk.bf16.gmra.mrb[16].mxu0 %vm471_vm0, %v8729_v1 }
 0x4bb   : > { %1441 = vmatprep.mubr.bf16.mxu1 %v13328_v57  ;;  %1094 = vmatprep.mubr.bf16.mxu0 %v13328_v57  ;;  %v9050_v63 = vpop.permute.xlu1 %1917 }
 0x4bc   : > { %13332 = vst [vmem:[#allocation14_spill] sm:$0xff] %v9050_v63 }
 0x4be   : > { %3413 = vrot.lane.b32.xlu0 %v8887_v61, %s8292_s12 }
 0x4bf   : > { %v9056_v1 = vpop.permute.xlu0 %1919 }
 0x4c0   : > { %13334 = vst [vmem:[#allocation16_spill] sm:$0xff] %v9056_v1 }
 0x4c1   : > { %7370 = vmatmul.mubr.msk.bf16.gmra.mrb[84].mxu1 %vm1203_vm5, %v8887_v61 }
 0x4c2   : > { %7352 = vmatmul.mubr.msk.bf16.gmra.mrb[20].mxu0 %vm471_vm0, %v8737_v2  ;;  %2642 = vmatprep.mubr.bf16.mxu1 %v2607_v62 }
 0x4c3   : > { %1104 = vmatprep.mubr.bf16.mxu0 %v13328_v57  ;;  %v9054_v0 = vpop.permute.xlu1 %1921 }
 0x4c4   : > { %13333 = vst [vmem:[#allocation15_spill] sm:$0xff] %v9054_v0 }
 0x4c7   : > { %v9060_v56 = vpop.permute.xlu0 %1923 }
 0x4c8   : > { %13336 = vst [vmem:[#allocation18_spill] sm:$0xff] %v9060_v56 }
 0x4ca   : > { %7353 = vmatmul.mubr.msk.bf16.gmra.mrb[24].mxu0 %vm471_vm0, %v8745_v3 }
 0x4cb   : > { %1888 = vmatprep.mubr.bf16.mxu0 %v1132_v40  ;;  %v9058_v55 = vpop.permute.xlu1 %1925 }
 0x4cc   : > { %13335 = vst [vmem:[#allocation17_spill] sm:$0xff] %v9058_v55 }
 0x4cf   : > { %v9062_v26 = vpop.permute.xlu0 %1927 }
 0x4d0   : > { %13337 = vst [vmem:[#allocation19_spill] sm:$0xff] %v9062_v26 }
 0x4d3   : > { %v9064_v2 = vpop.permute.xlu1 %1929 }
 0x4d4   : > { %13338 = vst [vmem:[#allocation20_spill] sm:$0xff] %v9064_v2 }
 0x4d7   : > { %v9066_v27 = vpop.permute.xlu0 %1931  ;;  %v9068_v28 = vpop.permute.xlu1 %1933 }
 0x4d8   : > { %13339 = vst [vmem:[#allocation21_spill] sm:$0xff] %v9066_v27  ;;  %13340 = vst [vmem:[#allocation22_spill] sm:$0xff] %v9068_v28 }
 0x4db   : > { %v9072_v3 = vpop.permute.xlu1 %1937 }
 0x4dc   : > { %v9070_v30 = vpop.permute.xlu0 %1935  ;;  %13342 = vst [vmem:[#allocation24_spill] sm:$0xff] %v9072_v3 }
 0x4dd   : > { %13341 = vst [vmem:[#allocation23_spill] sm:$0xff] %v9070_v30 }
 0x4df   : > { %v9076_v33 = vpop.permute.xlu1 %1941 }
 0x4e0   : > { %v9074_v43 = vpop.permute.xlu0 %1939  ;;  %13344 = vst [vmem:[#allocation26_spill] sm:$0xff] %v9076_v33 }
 0x4e1   : > { %13343 = vst [vmem:[#allocation25_spill] sm:$0xff] %v9074_v43 }
 0x4e3   : > { %v9080_v35 = vpop.permute.xlu1 %1945 }
 0x4e4   : > { %v9078_v34 = vpop.permute.xlu0 %1943  ;;  %13346 = vst [vmem:[#allocation28_spill] sm:$0xff] %v9080_v35 }
 0x4e5   : > { %13345 = vst [vmem:[#allocation27_spill] sm:$0xff] %v9078_v34 }
 0x4e8   : > { %v9082_v36 = vpop.permute.xlu0 %1947 }
 0x4e9   : > { %13347 = vst [vmem:[#allocation29_spill] sm:$0xff] %v9082_v36 }
 0x4f4   : > { %v9084_v41 = vpop.permute.xlu1 %833 }
 0x4f5   : > { %13348 = vst [vmem:[#allocation30_spill] sm:$0xff] %v9084_v41  ;;  %v976_v44 = vadd.f32 %v8776_v29, %v9084_v41  ;;  %v974_v52 = vadd.f32 %v8772_v23, %v9084_v41 }
 0x4f8   : > { %v9086_v38 = vpop.permute.xlu1 %2655 }
 0x4f9   : > { %13349 = vst [vmem:[#allocation31_spill] sm:$0xff] %v9086_v38  ;;  %v9088_v39 = vpop.permute.xlu0 %838 }
 0x4fa   : > { %13350 = vst [vmem:[#allocation32_spill] sm:$0xff] %v9088_v39  ;;  %v980_v61 = vadd.f32 %v8780_v42, %v9088_v39  ;;  %v978_v10 = vadd.f32 %v8778_v31, %v9088_v39 }
 0x4fc   : > { %v9098_v17 = vpop.permute.xlu1 %2659  ;;  %v9100_v21 = vpack.c.bf16 %v980_v61, %v976_v44  ;;  %v9102_v22 = vpack.c.bf16 %v978_v10, %v974_v52 }
 0x4fd   : > { %13351 = vst [vmem:[#allocation33_spill] sm:$0xff] %v9098_v17  ;;  %v9104_v24 = vpop.permute.xlu0 %2657 }
 0x4fe   : > { %13352 = vst [vmem:[#allocation34_spill] sm:$0xff] %v9100_v21  ;;  %13353 = vst [vmem:[#allocation35_spill] sm:$0xff] %v9102_v22 }
 0x4ff   : > { %13354 = vst [vmem:[#allocation36_spill] sm:$0xff] %v9104_v24 }
 0x500   : > { %v9106_v53 = vpop.permute.xlu1 %2663 }
 0x501   : > { %13355 = vst [vmem:[#allocation37_spill] sm:$0xff] %v9106_v53  ;;  %v9108_v29 = vpop.permute.xlu0 %2661 }
 0x502   : > { %13356 = vst [vmem:[#allocation38_spill] sm:$0xff] %v9108_v29 }
 0x504   : > { %v9110_v58 = vpop.permute.xlu1 %2667 }
 0x505   : > { %13357 = vst [vmem:[#allocation39_spill] sm:$0xff] %v9110_v58  ;;  %v9112_v42 = vpop.permute.xlu0 %2665 }
 0x506   : > { %13358 = vst [vmem:[#allocation40_spill] sm:$0xff] %v9112_v42 }
 0x508   : > { %v9114_v23 = vpop.permute.xlu1 %2671 }
 0x509   : > { %13359 = vst [vmem:[#allocation41_spill] sm:$0xff] %v9114_v23  ;;  %v9116_v18 = vpop.permute.xlu0 %2669 }
 0x50a   : > { %13360 = vst [vmem:[#allocation42_spill] sm:$0xff] %v9116_v18 }
 0x50c   : > { %v9118_v31 = vpop.permute.xlu1 %2675 }
 0x50d   : > { %13361 = vst [vmem:[#allocation43_spill] sm:$0xff] %v9118_v31  ;;  %v9120_v46 = vpop.permute.xlu0 %2673 }
 0x50e   : > { %13362 = vst [vmem:[#allocation44_spill] sm:$0xff] %v9120_v46 }
 0x510   : > { %v9122_v47 = vpop.permute.xlu1 %2679 }
 0x511   : > { %13363 = vst [vmem:[#allocation45_spill] sm:$0xff] %v9122_v47  ;;  %v9124_v20 = vpop.permute.xlu0 %2677 }
 0x512   : > { %13364 = vst [vmem:[#allocation46_spill] sm:$0xff] %v9124_v20 }
 0x514   : > { %v9128_v59 = vpop.permute.xlu1 %2683 }
 0x515   : > { %v9126_v50 = vpop.permute.xlu0 %2681  ;;  %13366 = vst [vmem:[#allocation48_spill] sm:$0xff] %v9128_v59 }
 0x516   : > { %13365 = vst [vmem:[#allocation47_spill] sm:$0xff] %v9126_v50 }
 0x518   : > { %v9132_v16 = vpop.permute.xlu1 %873 }
 0x519   : > { %v9130_v51 = vpop.permute.xlu0 %2685  ;;  %13368 = vst [vmem:[#allocation50_spill] sm:$0xff] %v9132_v16  ;;  %v1014_v32 = vadd.f32 %v8941_v48, %v9132_v16  ;;  %v1016_v45 = vadd.f32 %v8948_v14, %v9132_v16 }
 0x51a   : > { %13367 = vst [vmem:[#allocation49_spill] sm:$0xff] %v9130_v51 }
 0x51c   : > { %v9134_v8 = vpop.f32.mrb[24].mxu1 }
 0x51d   : > { %v9136_v49 = vpop.permute.xlu0 %878  ;;  %v9138_v12 = vpop.f32.mrb[25].mxu1 }
 0x51e   : > { %13369 = vst [vmem:[#allocation51_spill] sm:$0xff] %v9136_v49  ;;  %v1018_v15 = vadd.f32 %v8952_v54, %v9136_v49  ;;  %v1020_v19 = vadd.f32 %v8955_v13, %v9136_v49  ;;  %v9148_v40 = vpop.f32.mrb[26].mxu1 }
 0x51f   : > { %13370 = vst [vmem:[#allocation52_spill] sm:$0xff] %v9148_v40  ;;  %v9150_v62 = vpop.f32.mrb[27].mxu1 }
 0x520   : > { %v9152_v44 = vpack.c.bf16 %v1018_v15, %v1014_v32  ;;  %v9154_v61 = vpack.c.bf16 %v1020_v19, %v1016_v45 }
 0x522   : > { %13371 = vst [vmem:[#allocation53_spill] sm:$0xff] %v9152_v44  ;;  %13372 = vst [vmem:[#allocation54_spill] sm:$0xff] %v9154_v61 }
 0x524   : > { %v9156_v52 = vpop.f32.mrb[28].mxu1 }
 0x525   : > { %13373 = vst [vmem:[#allocation55_spill] sm:$0xff] %v9156_v52  ;;  %v1452_v48 = vmax.f32 %v9134_v8, %v9156_v52  ;;  %v9160_v14 = vpop.f32.mrb[29].mxu1 }
 0x526   : > { %v1489_v54 = vmax.f32 %v9138_v12, %v9160_v14  ;;  %v9164_v10 = vpop.f32.mrb[30].mxu1 }
 0x527   : > { %13374 = vst [vmem:[#allocation56_spill] sm:$0xff] %v9164_v10  ;;  %v1453_v13 = vmax.f32 %v9148_v40, %v9164_v10  ;;  %v9168_v51 = vpop.f32.mrb[31].mxu1 }
 0x528   : > { %v1490_v32 = vmax.f32 %v9150_v62, %v9168_v51 }
 0x52c   : > { %v9172_v45 = vpop.f32.mrb[32].mxu1 }
 0x52d   : > { %13375 = vst [vmem:[#allocation57_spill] sm:$0xff] %v9172_v45  ;;  %v1454_v15 = vmax.f32 %v1452_v48, %v9172_v45  ;;  %v9175_v19 = vpop.f32.mrb[33].mxu1 }
 0x52e   : > { %v1491_v44 = vmax.f32 %v1489_v54, %v9175_v19  ;;  %v9178_v59 = vpop.f32.mrb[34].mxu1 }
 0x52f   : > { %v1455_v50 = vmax.f32 %v1453_v13, %v9178_v59  ;;  %v9181_v47 = vpop.f32.mrb[35].mxu1 }
 0x530   : > { %v1492_v20 = vmax.f32 %v1490_v32, %v9181_v47 }
 0x534   : > { %v9184_v31 = vpop.f32.mrb[36].mxu1 }
 0x535   : > { %v1456_v46 = vmax.f32 %v1454_v15, %v9184_v31  ;;  %v9187_v23 = vpop.f32.mrb[37].mxu1 }
 0x536   : > { %13376 = vst [vmem:[#allocation58_spill] sm:$0xff] %v9187_v23  ;;  %v1493_v48 = vmax.f32 %v1491_v44, %v9187_v23  ;;  %v9190_v18 = vpop.f32.mrb[38].mxu1 }
 0x537   : > { %v1457_v54 = vmax.f32 %v1455_v50, %v9190_v18  ;;  %v9193_v58 = vpop.f32.mrb[39].mxu1 }
 0x538   : > { %13377 = vst [vmem:[#allocation59_spill] sm:$0xff] %v9193_v58  ;;  %v1494_v13 = vmax.f32 %v1492_v20, %v9193_v58 }
 0x53c   : > { %v9196_v42 = vpop.f32.mrb[40].mxu1 }
 0x53d   : > { %v1458_v32 = vmax.f32 %v1456_v46, %v9196_v42  ;;  %v9199_v53 = vpop.f32.mrb[41].mxu1 }
 0x53e   : > { %13378 = vst [vmem:[#allocation60_spill] sm:$0xff] %v9199_v53  ;;  %v1495_v15 = vmax.f32 %v1493_v48, %v9199_v53  ;;  %v9202_v29 = vpop.f32.mrb[42].mxu1 }
 0x53f   : > { %v1459_v44 = vmax.f32 %v1457_v54, %v9202_v29  ;;  %v9205_v17 = vpop.f32.mrb[43].mxu1 }
 0x540   : > { %13379 = vst [vmem:[#allocation61_spill] sm:$0xff] %v9205_v17  ;;  %v1496_v50 = vmax.f32 %v1494_v13, %v9205_v17 }
 0x544   : > { %v9208_v24 = vpop.f32.mrb[44].mxu1 }
 0x545   : > { %v1460_v20 = vmax.f32 %v1458_v32, %v9208_v24  ;;  %v9211_v38 = vpop.f32.mrb[45].mxu1 }
 0x546   : > { %13380 = vst [vmem:[#allocation62_spill] sm:$0xff] %v9211_v38  ;;  %v1497_v46 = vmax.f32 %v1495_v15, %v9211_v38  ;;  %v9214_v22 = vpop.f32.mrb[46].mxu1 }
 0x547   : > { %v1461_v48 = vmax.f32 %v1459_v44, %v9214_v22  ;;  %v9217_v21 = vpop.f32.mrb[47].mxu1 }
 0x548   : > { %13381 = vst [vmem:[#allocation63_spill] sm:$0xff] %v9217_v21  ;;  %v1498_v54 = vmax.f32 %v1496_v50, %v9217_v21 }
 0x54c   : > { %v9220_v61 = vpop.f32.mrb[48].mxu1 }
 0x54d   : > { %v9222_v36 = vpop.f32.mrb[49].mxu1  ;;  %v1462_v13 = vmax.f32 %v1460_v20, %v9220_v61 }
 0x54e   : > { %13382 = vst [vmem:[#allocation64_spill] sm:$0xff] %v9222_v36  ;;  %v9225_v35 = vpop.f32.mrb[50].mxu1  ;;  %v1499_v32 = vmax.f32 %v1497_v46, %v9222_v36 }
 0x54f   : > { %v9228_v34 = vpop.f32.mrb[51].mxu1  ;;  %v1463_v15 = vmax.f32 %v1461_v48, %v9225_v35 }
 0x550   : > { %13383 = vst [vmem:[#allocation65_spill] sm:$0xff] %v9228_v34  ;;  %v1500_v44 = vmax.f32 %v1498_v54, %v9228_v34 }
 0x554   : > { %v9232_v33 = vpop.f32.mrb[52].mxu1 }
 0x555   : > { %v9234_v43 = vpop.f32.mrb[53].mxu1  ;;  %v1464_v50 = vmax.f32 %v1462_v13, %v9232_v33 }
 0x556   : > { %13384 = vst [vmem:[#allocation66_spill] sm:$0xff] %v9234_v43  ;;  %v9237_v3 = vpop.f32.mrb[54].mxu1  ;;  %v1501_v20 = vmax.f32 %v1499_v32, %v9234_v43 }
 0x557   : > { %v9240_v30 = vpop.f32.mrb[55].mxu1  ;;  %v1465_v46 = vmax.f32 %v1463_v15, %v9237_v3 }
 0x558   : > { %13385 = vst [vmem:[#allocation67_spill] sm:$0xff] %v9240_v30  ;;  %v1502_v28 = vmax.f32 %v1500_v44, %v9240_v30 }
 0x55c   : > { %v9244_v27 = vpop.f32.mrb[56].mxu1 }
 0x55d   : > { %v1466_v48 = vmax.f32 %v1464_v50, %v9244_v27  ;;  %v9247_v54 = vpop.f32.mrb[57].mxu1 }
 0x55e   : > { %13386 = vst [vmem:[#allocation68_spill] sm:$0xff] %v9247_v54  ;;  %v1503_v2 = vmax.f32 %v1501_v20, %v9247_v54  ;;  %v9250_v26 = vpop.f32.mrb[58].mxu1 }
 0x55f   : > { %v1467_v13 = vmax.f32 %v1465_v46, %v9250_v26  ;;  %v9253_v55 = vpop.f32.mrb[59].mxu1 }
 0x560   : > { %13387 = vst [vmem:[#allocation69_spill] sm:$0xff] %v9253_v55  ;;  %v1504_v32 = vmax.f32 %v1502_v28, %v9253_v55 }
 0x564   : > { %v9256_v56 = vpop.f32.mrb[60].mxu1 }
 0x565   : > { %v1468_v15 = vmax.f32 %v1466_v48, %v9256_v56  ;;  %v9259_v44 = vpop.f32.mrb[61].mxu1 }
 0x566   : > { %13388 = vst [vmem:[#allocation70_spill] sm:$0xff] %v9259_v44  ;;  %v1505_v50 = vmax.f32 %v1503_v2, %v9259_v44  ;;  %v9262_v0 = vpop.f32.mrb[62].mxu1 }
 0x567   : > { %v1469_v20 = vmax.f32 %v1467_v13, %v9262_v0  ;;  %v9265_v1 = vpop.f32.mrb[63].mxu1 }
 0x568   : > { %13389 = vst [vmem:[#allocation71_spill] sm:$0xff] %v9265_v1  ;;  %v1506_v46 = vmax.f32 %v1504_v32, %v9265_v1 }
 0x56c   : > { %v9268_v63 = vpop.f32.mrb[64].mxu1 }
 0x56d   : > { %v1470_v28 = vmax.f32 %v1468_v15, %v9268_v63  ;;  %v9271_v57 = vpop.f32.mrb[65].mxu1 }
 0x56e   : > { %13390 = vst [vmem:[#allocation72_spill] sm:$0xff] %v9271_v57  ;;  %v1507_v48 = vmax.f32 %v1505_v50, %v9271_v57  ;;  %v9274_v37 = vpop.f32.mrb[66].mxu1 }
 0x56f   : > { %v1471_v2 = vmax.f32 %v1469_v20, %v9274_v37  ;;  %v9277_v44 = vpop.f32.mrb[67].mxu1 }
 0x570   : > { %13391 = vst [vmem:[#allocation73_spill] sm:$0xff] %v9277_v44  ;;  %v1508_v13 = vmax.f32 %v1506_v46, %v9277_v44 }
 0x574   : > { %v9280_v55 = vpop.f32.mrb[68].mxu1 }
 0x575   : > { %v1056_v54 = vpop.f32.mrb[4].mxu0  ;;  %v1472_v32 = vmax.f32 %v1470_v28, %v9280_v55  ;;  %v9283_v1 = vpop.f32.mrb[69].mxu1 }
 0x576   : > { %13392 = vst [vmem:[#allocation74_spill] sm:$0xff] %v9283_v1  ;;  %v1058_v15 = vpop.f32.mrb[5].mxu0  ;;  %v1509_v30 = vmax.f32 %v1507_v48, %v9283_v1  ;;  %v9286_v43 = vpop.f32.mrb[70].mxu1  ;;  %v1057_v34 = vadd.f32 %v1056_v54, %v8758_v9 }
 0x577   : > { %v1060_v50 = vpop.f32.mrb[6].mxu0  ;;  %v1473_v57 = vmax.f32 %v1471_v2, %v9286_v43  ;;  %v9289_v20 = vpop.f32.mrb[71].mxu1  ;;  %v1059_v28 = vadd.f32 %v1058_v15, %v8758_v9 }
 0x578   : > { %13393 = vst [vmem:[#allocation75_spill] sm:$0xff] %v9289_v20  ;;  %v1061_v46 = vadd.f32 %v1060_v50, %v8760_v25  ;;  %v1062_v44 = vpop.f32.mrb[7].mxu0  ;;  %v1510_v36 = vmax.f32 %v1508_v13, %v9289_v20 }
 0x579   : > { %v1063_v21 = vadd.f32 %v1062_v44, %v8760_v25 }
 0x57a   : > { %v9296_v38 = vpack.c.bf16 %v1061_v46, %v1057_v34 }
 0x57b   : > { %v9298_v48 = vpack.c.bf16 %v1063_v21, %v1059_v28 }
 0x57c   : > { %13394 = vst [vmem:[#allocation76_spill] sm:$0xff] %v9296_v38  ;;  %v9300_v1 = vpop.f32.mrb[72].mxu1 }
 0x57d   : > { %13395 = vst [vmem:[#allocation77_spill] sm:$0xff] %v9298_v48  ;;  %v1474_v2 = vmax.f32 %v1472_v32, %v9300_v1  ;;  %v9303_v17 = vpop.f32.mrb[73].mxu1  ;;  %v9305_v54 = vpop.f32.mrb[8].mxu0 }
 0x57e   : > { %13396 = vst [vmem:[#allocation78_spill] sm:$0xff] %v9303_v17  ;;  %13397 = vst [vmem:[#allocation79_spill] sm:$0xff] %v9305_v54  ;;  %v1511_v50 = vmax.f32 %v1509_v30, %v9303_v17  ;;  %v9308_v53 = vpop.f32.mrb[74].mxu1  ;;  %v1068_v13 = vpop.f32.mrb[9].mxu0 }
 0x57f   : > { %v1475_v9 = vmax.f32 %v1473_v57, %v9308_v53  ;;  %v9311_v25 = vpop.f32.mrb[75].mxu1  ;;  %v1069_v34 = vadd.f32 %v1068_v13, %v9084_v41  ;;  %v9314_v21 = vpop.f32.mrb[10].mxu0 }
 0x580   : > { %13398 = vst [vmem:[#allocation80_spill] sm:$0xff] %v9311_v25  ;;  %13399 = vst [vmem:[#allocation81_spill] sm:$0xff] %v9314_v21  ;;  %v1512_v44 = vmax.f32 %v1510_v36, %v9311_v25  ;;  %v1072_v32 = vpop.f32.mrb[11].mxu0 }
 0x581   : > { %v1073_v15 = vadd.f32 %v1072_v32, %v9088_v39 }
 0x583   : > { %v9318_v46 = vpack.c.bf16 %v1073_v15, %v1069_v34 }
 0x584   : > { %v9320_v28 = vpop.f32.mrb[76].mxu1 }
 0x585   : > { %13400 = vst [vmem:[#allocation82_spill] sm:$0xff] %v9318_v46  ;;  %v1076_v30 = vpop.f32.mrb[12].mxu0  ;;  %v1476_v38 = vmax.f32 %v1474_v2, %v9320_v28  ;;  %v9323_v48 = vpop.f32.mrb[77].mxu1 }
 0x586   : > { %13401 = vst [vmem:[#allocation83_spill] sm:$0xff] %v9323_v48  ;;  %v1078_v57 = vpop.f32.mrb[13].mxu0  ;;  %v1513_v54 = vmax.f32 %v1511_v50, %v9323_v48  ;;  %v9326_v13 = vpop.f32.mrb[78].mxu1  ;;  %v1077_v34 = vadd.f32 %v1076_v30, %v8750_v4 }
 0x587   : > { %v1080_v21 = vpop.f32.mrb[14].mxu0  ;;  %v1477_v36 = vmax.f32 %v1475_v9, %v9326_v13  ;;  %v9329_v41 = vpop.f32.mrb[79].mxu1  ;;  %v1079_v2 = vadd.f32 %v1078_v57, %v8750_v4 }
 0x588   : > { %13402 = vst [vmem:[#allocation84_spill] sm:$0xff] %v9329_v41  ;;  %v1081_v32 = vadd.f32 %v1080_v21, %v8752_v5  ;;  %v1082_v15 = vpop.f32.mrb[15].mxu0  ;;  %v1514_v46 = vmax.f32 %v1512_v44, %v9329_v41 }
 0x589   : > { %v1083_v39 = vadd.f32 %v1082_v15, %v8752_v5 }
 0x58a   : > { %v1125_v25 = vpack.c.bf16 %v1081_v32, %v1077_v34 }
 0x58b   : > { %v1126_v50 = vpack.c.bf16 %v1083_v39, %v1079_v2 }
 0x58c   : > { %1171 = vxpose.xlu1.c.b16.start [1/2] (short) %v1125_v25, 128  ;;  %v9336_v48 = vpop.f32.mrb[80].mxu1 }
 0x58d   : > { %v1086_v17 = vpop.f32.mrb[16].mxu0  ;;  %v1478_v9 = vmax.f32 %v1476_v38, %v9336_v48  ;;  %1187 = vxpose.xlu0.c.b16.start [1/2] (short) %v1126_v50, 128  ;;  %v9339_v20 = vpop.f32.mrb[81].mxu1 }
 0x58e   : > { %13403 = vst [vmem:[#allocation85_spill] sm:$0xff] %v9339_v20  ;;  %v1088_v30 = vpop.f32.mrb[17].mxu0  ;;  %v1515_v21 = vmax.f32 %v1513_v54, %v9339_v20  ;;  %v9342_v58 = vpop.f32.mrb[82].mxu1  ;;  %v1087_v39 = vadd.f32 %v1086_v17, %v8754_v6 }
 0x58f   : > { %v1090_v44 = vpop.f32.mrb[18].mxu0  ;;  %v1479_v4 = vmax.f32 %v1477_v36, %v9342_v58  ;;  %v9345_v5 = vpop.f32.mrb[83].mxu1  ;;  %v1089_v34 = vadd.f32 %v1088_v30, %v8754_v6 }
 0x590   : > { %13404 = vst [vmem:[#allocation86_spill] sm:$0xff] %v9345_v5  ;;  %v1091_v25 = vadd.f32 %v1090_v44, %v8756_v7  ;;  %v1092_v57 = vpop.f32.mrb[19].mxu0  ;;  %v1516_v38 = vmax.f32 %v1514_v46, %v9345_v5 }
 0x591   : > { %v1093_v32 = vadd.f32 %v1092_v57, %v8756_v7 }
 0x592   : > { %v1129_v15 = vpack.c.bf16 %v1091_v25, %v1087_v39 }
 0x593   : > { %v1130_v54 = vpack.c.bf16 %v1093_v32, %v1089_v34 }
 0x594   : > { %1172 = vxpose.xlu1.c.b16.end [2/2] (short) %v1129_v15, 128  ;;  %v1443_v2 = vpop.f32.mrb[84].mxu1 }
 0x595   : > { %v1480_v50 = vmax.f32 %v1478_v9, %v1443_v2  ;;  %1188 = vxpose.xlu0.c.b16.end [2/2] (short) %v1130_v54, 128  ;;  %v9352_v36 = vpop.f32.mrb[85].mxu1  ;;  %v1096_v20 = vpop.f32.mrb[20].mxu0 }
 0x596   : > { %v1517_v17 = vmax.f32 %v1515_v21, %v9352_v36  ;;  %v1447_v41 = vpop.f32.mrb[86].mxu1  ;;  %v1097_v44 = vadd.f32 %v1096_v20, %v8967_v11  ;;  %v9356_v23 = vpop.f32.mrb[21].mxu0 }
 0x597   : > { %13405 = vst [vmem:[#allocation87_spill] sm:$0xff] %v9356_v23  ;;  %v1481_v46 = vmax.f32 %v1479_v4, %v1447_v41  ;;  %v9358_v6 = vpop.f32.mrb[87].mxu1  ;;  %v1100_v7 = vpop.f32.mrb[22].mxu0 }
 0x598   : > { %v1518_v30 = vmax.f32 %v1516_v38, %v9358_v6  ;;  %v1101_v39 = vadd.f32 %v1100_v7, %v8977_v60  ;;  %v9362_v9 = vpop.f32.mrb[23].mxu0 }
 0x599   : > { %13406 = vst [vmem:[#allocation88_spill] sm:$0xff] %v9362_v9  ;;  %v1482_v25 = vmax.f32 %v1480_v50, %v1481_v46 }
 0x59a   : > { %v1519_v57 = vmax.f32 %v1517_v17, %v1518_v30  ;;  %v9364_v34 = vpack.c.bf16 %v1101_v39, %v1097_v44 }
 0x59b   : > { %v1483_v21 = vrot.slane %v1482_v25, 4 }
 0x59c   : > { %13407 = vst [vmem:[#allocation89_spill] sm:$0xff] %v9364_v34  ;;  %v1520_v32 = vrot.slane %v1519_v57, 4 }
 0x59d   : > { %v1484_v15 = vmax.f32 %v1482_v25, %v1483_v21  ;;  %v1106_v20 = vpop.f32.mrb[24].mxu0 }
 0x59e   : > { %v1521_v54 = vmax.f32 %v1519_v57, %v1520_v32  ;;  %v1107_v4 = vadd.f32 %v1106_v20, %v9132_v16  ;;  %v9367_v23 = vpop.f32.mrb[25].mxu0  ;;  %v13419_v32 = vld [vmem:[#allocation63_spill] sm:$0xff] }
 0x59f   : > { %13408 = vst [vmem:[#allocation90_spill] sm:$0xff] %v9367_v23  ;;  %v1485_v11 = vrot.slane %v1484_v15, 2  ;;  %v1110_v5 = vpop.f32.mrb[26].mxu0 }
 0x5a0   : > { %v1522_v38 = vrot.slane %v1521_v54, 2  ;;  %v1111_v7 = vadd.f32 %v1110_v5, %v9136_v49  ;;  %v9370_v60 = vpop.f32.mrb[27].mxu0 }
 0x5a1   : > { %13409 = vst [vmem:[#allocation91_spill] sm:$0xff] %v9370_v60  ;;  %v1486_v50 = vmax.f32 %v1484_v15, %v1485_v11  ;;  %v13418_v15 = vld [vmem:[#allocation62_spill] sm:$0xff]  ;;  %v13420_v11 = vld [vmem:[#allocation64_spill] sm:$0xff] }
 0x5a2   : > { %v1523_v17 = vmax.f32 %v1521_v54, %v1522_v38  ;;  %v9372_v44 = vpack.c.bf16 %v1111_v7, %v1107_v4 }
 0x5a3   : > { %v1487_v46 = vrot.slane %v1486_v50, 1 }
 0x5a4   : > { %13410 = vst [vmem:[#allocation92_spill] sm:$0xff] %v9372_v44  ;;  %v1524_v39 = vrot.slane %v1523_v17, 1 }
 0x5a5   : > { %v9374_v30 = vmax.f32 %v1486_v50, %v1487_v46 }
 0x5a6   : > { %v9412_v46 = vmax.f32 %v1523_v17, %v1524_v39 }
 0x5a7   : > { %13411 = vst [vmem:[#allocation93_spill] sm:$0xff] %v9374_v30  ;;  %v1586_v25 = vsub.f32 %v1443_v2, %v9374_v30  ;;  %v1588_v57 = vsub.f32 %v1447_v41, %v9374_v30  ;;  %v1536_v2 = vsub.f32 %v9178_v59, %v9374_v30  ;;  %v1538_v41 = vsub.f32 %v9184_v31, %v9374_v30 }
 0x5a8   : > { %v1540_v54 = vsub.f32 %v9190_v18, %v9374_v30  ;;  %v1542_v4 = vsub.f32 %v9196_v42, %v9374_v30  ;;  %v1544_v38 = vsub.f32 %v9202_v29, %v9374_v30  ;;  %v1546_v7 = vsub.f32 %v9208_v24, %v9374_v30 }
 0x5a9   : > { %v9390_v20 = vpack.c.bf16 %v1588_v57, %v1586_v25  ;;  %v1548_v59 = vsub.f32 %v9214_v22, %v9374_v30  ;;  %v1550_v50 = vsub.f32 %v9220_v61, %v9374_v30  ;;  %v1552_v31 = vsub.f32 %v9225_v35, %v9374_v30  ;;  %v13416_v25 = vld [vmem:[#allocation60_spill] sm:$0xff]  ;;  %v13417_v57 = vld [vmem:[#allocation61_spill] sm:$0xff] }
 0x5aa   : > { %v1554_v18 = vsub.f32 %v9232_v33, %v9374_v30  ;;  %v1556_v42 = vsub.f32 %v9237_v3, %v9374_v30  ;;  %v1558_v24 = vsub.f32 %v9244_v27, %v9374_v30  ;;  %v1560_v22 = vsub.f32 %v9250_v26, %v9374_v30 }
 0x5ab   : > { %13412 = vst [vmem:[#allocation94_spill] sm:$0xff] %v9390_v20  ;;  %v1562_v29 = vsub.f32 %v9256_v56, %v9374_v30  ;;  %v1564_v35 = vsub.f32 %v9262_v0, %v9374_v30  ;;  %v1566_v33 = vsub.f32 %v9268_v63, %v9374_v30  ;;  %v1568_v3 = vsub.f32 %v9274_v37, %v9374_v30 }
 0x5ac   : > { %v1570_v61 = vsub.f32 %v9280_v55, %v9374_v30  ;;  %v1572_v27 = vsub.f32 %v9286_v43, %v9374_v30  ;;  %v1574_v26 = vsub.f32 %v9300_v1, %v9374_v30  ;;  %v1576_v56 = vsub.f32 %v9308_v53, %v9374_v30 }
 0x5ad   : > { %v1578_v0 = vsub.f32 %v9320_v28, %v9374_v30  ;;  %v1580_v63 = vsub.f32 %v9326_v13, %v9374_v30  ;;  %v1582_v37 = vsub.f32 %v9336_v48, %v9374_v30  ;;  %v1584_v55 = vsub.f32 %v9342_v58, %v9374_v30 }
 0x5ae   : > { %v1587_v43 = vsub.f32 %v9352_v36, %v9412_v46  ;;  %v1589_v1 = vsub.f32 %v9358_v6, %v9412_v46  ;;  %v1527_v53 = vsub.f32 %v9138_v12, %v9412_v46  ;;  %v1529_v28 = vsub.f32 %v9150_v62, %v9412_v46  ;;  %v13413_v6 = vld [vmem:[#allocation58_spill] sm:$0xff]  ;;  %v13415_v12 = vld [vmem:[#allocation59_spill] sm:$0xff] }
 0x5af   : > { %v1531_v13 = vsub.f32 %v9160_v14, %v9412_v46  ;;  %v1533_v48 = vsub.f32 %v9168_v51, %v9412_v46  ;;  %v1535_v58 = vsub.f32 %v9175_v19, %v9412_v46  ;;  %v1537_v36 = vsub.f32 %v9181_v47, %v9412_v46 }
 0x5b0   : > { %v1539_v17 = vsub.f32 %v13413_v6, %v9412_v46  ;;  %v9460_v39 = vpack.c.bf16 %v1589_v1, %v1587_v43  ;;  %v1541_v62 = vsub.f32 %v13415_v12, %v9412_v46  ;;  %v1543_v14 = vsub.f32 %v13416_v25, %v9412_v46  ;;  %v13421_v43 = vld [vmem:[#allocation65_spill] sm:$0xff]  ;;  %v13422_v12 = vld [vmem:[#allocation66_spill] sm:$0xff]  ;;  %v13423_v25 = vld [vmem:[#allocation67_spill] sm:$0xff] }
 0x5b1   : > { %v1545_v51 = vsub.f32 %v13417_v57, %v9412_v46  ;;  %v1547_v19 = vsub.f32 %v13418_v15, %v9412_v46  ;;  %v1549_v47 = vsub.f32 %v13419_v32, %v9412_v46  ;;  %v1551_v6 = vsub.f32 %v13420_v11, %v9412_v46  ;;  %v13424_v57 = vld [vmem:[#allocation68_spill] sm:$0xff]  ;;  %v13425_v15 = vld [vmem:[#allocation69_spill] sm:$0xff]  ;;  %v13426_v32 = vld [vmem:[#allocation70_spill] sm:$0xff] }
 0x5b2   : > { %13414 = vst [vmem:[#allocation58_spill] sm:$0xff] %v9460_v39  ;;  %v1553_v1 = vsub.f32 %v13421_v43, %v9412_v46  ;;  %v1555_v5 = vsub.f32 %v13422_v12, %v9412_v46  ;;  %v1557_v21 = vsub.f32 %v13423_v25, %v9412_v46  ;;  %v1559_v44 = vsub.f32 %v13424_v57, %v9412_v46  ;;  %v13427_v11 = vld [vmem:[#allocation71_spill] sm:$0xff]  ;;  %v13428_v43 = vld [vmem:[#allocation72_spill] sm:$0xff]  ;;  %v13429_v12 = vld [vmem:[#allocation73_spill] sm:$0xff] }
 0x5b3   : > { %v1561_v34 = vsub.f32 %v13425_v15, %v9412_v46  ;;  %v1563_v20 = vsub.f32 %v13426_v32, %v9412_v46  ;;  %v1565_v60 = vsub.f32 %v13427_v11, %v9412_v46  ;;  %v1567_v49 = vsub.f32 %v13428_v43, %v9412_v46  ;;  %v13430_v25 = vld [vmem:[#allocation74_spill] sm:$0xff]  ;;  %v13431_v57 = vld [vmem:[#allocation75_spill] sm:$0xff]  ;;  %v13433_v32 = vld [vmem:[#allocation80_spill] sm:$0xff] }
 0x5b4   : > { %v1569_v23 = vsub.f32 %v13429_v12, %v9412_v46  ;;  %v1571_v16 = vsub.f32 %v13430_v25, %v9412_v46  ;;  %v1573_v39 = vsub.f32 %v13431_v57, %v9412_v46  ;;  %v13432_v15 = vld [vmem:[#allocation78_spill] sm:$0xff]  ;;  %v1577_v45 = vsub.f32 %v13433_v32, %v9412_v46  ;;  %v13434_v11 = vld [vmem:[#allocation83_spill] sm:$0xff]  ;;  %v13435_v43 = vld [vmem:[#allocation84_spill] sm:$0xff] }
 0x5b5   : > { %v1575_v9 = vsub.f32 %v13432_v15, %v9412_v46  ;;  %v1579_v10 = vsub.f32 %v13434_v11, %v9412_v46  ;;  %v1581_v52 = vsub.f32 %v13435_v43, %v9412_v46  ;;  %v13436_v12 = vld [vmem:[#allocation85_spill] sm:$0xff]  ;;  %v13437_v25 = vld [vmem:[#allocation86_spill] sm:$0xff]  ;;  %v13440_v32 = vld [vmem:[#allocation52_spill] sm:$0xff] }
 0x5b6   : > { %v1583_v40 = vsub.f32 %v13436_v12, %v9412_v46  ;;  %v1585_v30 = vsub.f32 %v13437_v25, %v9412_v46  ;;  %v13438_v57 = vld [vmem:[#allocation93_spill] sm:$0xff]  ;;  %v13442_v12 = vld [vmem:[#allocation55_spill] sm:$0xff]  ;;  %v13444_v46 = vld [vmem:[#allocation56_spill] sm:$0xff] }
 0x5b7   : > { %v13439_v15 = vsub.f32 %v9134_v8, %v13438_v57  ;;  %v13441_v11 = vsub.f32 %v13440_v32, %v13438_v57  ;;  %v13443_v25 = vsub.f32 %v13442_v12, %v13438_v57  ;;  %v13445_v8 = vsub.f32 %v13444_v46, %v13438_v57 }
 0x5b8   : > { %v1596_v46 = vpack.c.bf16 %v1540_v54, %v1538_v41  ;;  %v9533_v41 = vpack.c.bf16 %v1568_v3, %v1566_v33  ;;  %v9535_v54 = vpack.c.bf16 %v1572_v27, %v1570_v61  ;;  %v9551_v33 = vpack.c.bf16 %v1569_v23, %v1567_v49  ;;  %v9563_v49 = vpop.permute.xlu0 %3385 }
 0x5b9   : > { %v1590_v43 = vpack.c.bf16 %v13441_v11, %v13439_v15  ;;  %v1592_v32 = vpack.c.bf16 %v13445_v8, %v13443_v25  ;;  %v13446_v11 = vld [vmem:[#allocation57_spill] sm:$0xff]  ;;  %v1598_v8 = vpack.c.bf16 %v1544_v38, %v1542_v4  ;;  %v9523_v25 = vpack.c.bf16 %v1548_v59, %v1546_v7  ;;  %13450 = vst [vmem:[#allocation61_spill] sm:$0xff] %v9563_v49 }
 0x5ba   : > { %v13447_v15 = vsub.f32 %v13446_v11, %v13438_v57  ;;  %v9525_v11 = vpack.c.bf16 %v1552_v31, %v1550_v50  ;;  %v9527_v57 = vpack.c.bf16 %v1556_v42, %v1554_v18  ;;  %v9537_v4 = vpack.c.bf16 %v1576_v56, %v1574_v26 }
 0x5bb   : > { %13448 = vst [vmem:[#allocation59_spill] sm:$0xff] %v9523_v25  ;;  %v9539_v38 = vpack.c.bf16 %v1580_v63, %v1578_v0  ;;  %v9541_v7 = vpack.c.bf16 %v1584_v55, %v1582_v37  ;;  %v1591_v59 = vpack.c.bf16 %v1529_v28, %v1527_v53  ;;  %v1593_v25 = vpack.c.bf16 %v1533_v48, %v1531_v13 }
 0x5bc   : > { %v1594_v12 = vpack.c.bf16 %v1536_v2, %v13447_v15  ;;  %v9529_v2 = vpack.c.bf16 %v1560_v22, %v1558_v24  ;;  %v9531_v15 = vpack.c.bf16 %v1564_v35, %v1562_v29  ;;  %v1595_v50 = vpack.c.bf16 %v1537_v36, %v1535_v58  ;;  %v9568_v53 = vpop.permute.xlu0 %3389 }
 0x5bd   : > { %v1597_v31 = vpack.c.bf16 %v1541_v62, %v1539_v17  ;;  %v1599_v18 = vpack.c.bf16 %v1545_v51, %v1543_v14  ;;  %v1601_v42 = vpack.c.bf16 %v1549_v47, %v1547_v19  ;;  %v9543_v24 = vpack.c.bf16 %v1553_v1, %v1551_v6  ;;  %13453 = vst [vmem:[#allocation63_spill] sm:$0xff] %v9568_v53 }
 0x5be   : > { %v9545_v22 = vpack.c.bf16 %v1557_v21, %v1555_v5  ;;  %v9547_v29 = vpack.c.bf16 %v1561_v34, %v1559_v44  ;;  %v9549_v35 = vpack.c.bf16 %v1565_v60, %v1563_v20  ;;  %v9553_v3 = vpack.c.bf16 %v1573_v39, %v1571_v16  ;;  %v9561_v16 = vpop.permute.xlu1 %3383 }
 0x5bf   : > { %v9555_v61 = vpack.c.bf16 %v1577_v45, %v1575_v9  ;;  %v9557_v27 = vpack.c.bf16 %v1581_v52, %v1579_v10  ;;  %v9559_v26 = vpack.c.bf16 %v1585_v30, %v1583_v40  ;;  %v1623_v56 = vmul.bf16 1069105081, %v1590_v43  ;;  %13449 = vst [vmem:[#allocation60_spill] sm:$0xff] %v9561_v16 }
 0x5c0   : > { %v1626_v0 = vmul.bf16 1069105081, %v1591_v59  ;;  %v1629_v63 = vmul.bf16 1069105081, %v1592_v32  ;;  %v1632_v37 = vmul.bf16 1069105081, %v1593_v25  ;;  %v9574_v59 = vpop.permute.xlu0 %3393 }
 0x5c1   : > { %7626 = vpow.bf16 %v1623_v56  ;;  %v1635_v21 = vmul.bf16 1069105081, %v1594_v12  ;;  %v1638_v34 = vmul.bf16 1069105081, %v1595_v50  ;;  %v1641_v60 = vmul.bf16 1069105081, %v1596_v46 }
 0x5c2   : > { %7628 = vpow.bf16 %v1626_v0  ;;  %v1644_v23 = vmul.bf16 1069105081, %v1597_v31  ;;  %v1647_v40 = vmul.bf16 1069105081, %v1598_v8  ;;  %v1650_v52 = vmul.bf16 1069105081, %v1599_v18  ;;  %v9565_v9 = vpop.permute.xlu1 %3387 }
 0x5c3   : > { %7630 = vpow.bf16 %v1629_v63  ;;  %13451 = vst [vmem:[#allocation62_spill] sm:$0xff] %v9565_v9  ;;  %v13452_v44 = vld [vmem:[#allocation59_spill] sm:$0xff]  ;;  %v1656_v28 = vmul.bf16 1069105081, %v1601_v42  ;;  %v1659_v19 = vmul.bf16 1069105081, %v9525_v11 }
 0x5c4   : > { %7632 = vpow.bf16 %v1632_v37  ;;  %v1653_v30 = vmul.bf16 1069105081, %v13452_v44  ;;  %v1662_v1 = vmul.bf16 1069105081, %v9543_v24  ;;  %13455 = vst [vmem:[#allocation65_spill] sm:$0xff] %v9574_v59  ;;  %v9581_v44 = vpop.permute.xlu0 %3397 }
 0x5c5   : > { %7634 = vpow.bf16 %v1635_v21  ;;  %v1665_v11 = vmul.bf16 1069105081, %v9527_v57  ;;  %v1668_v24 = vmul.bf16 1069105081, %v9545_v22  ;;  %v1671_v57 = vmul.bf16 1069105081, %v9529_v2 }
 0x5c6   : > { %7636 = vpow.bf16 %v1638_v34  ;;  %v9572_v12 = vpop.permute.xlu1 %3391  ;;  %13457 = vst [vmem:[#allocation67_spill] sm:$0xff] %v9581_v44  ;;  %v1674_v22 = vmul.bf16 1069105081, %v9547_v29 }
 0x5c7   : > { %7638 = vpow.bf16 %v1641_v60  ;;  %13454 = vst [vmem:[#allocation64_spill] sm:$0xff] %v9572_v12 }
 0x5c8   : > { %7640 = vpow.bf16 %v1644_v23 }
 0x5c9   : > { %7642 = vpow.bf16 %v1647_v40 }
 0x5ca   : > { %7644 = vpow.bf16 %v1650_v52  ;;  %v9578_v52 = vpop.permute.xlu1 %3395 }
 0x5cb   : > { %7646 = vpow.bf16 %v1653_v30  ;;  %13456 = vst [vmem:[#allocation66_spill] sm:$0xff] %v9578_v52 }
 0x5cc   : > { %v7627_v10 = vpop.eup %7626  ;;  %7648 = vpow.bf16 %v1656_v28  ;;  %v13458_v28 = vld [vmem:[#allocation11_spill] sm:$0xff] }
 0x5cd   : > { %v7629_v45 = vpop.eup %7628  ;;  %v1718_v5 = vunpack.c.l.bf16 %v7627_v10  ;;  %v1720_v20 = vunpack.c.h.bf16 %v7627_v10  ;;  %7650 = vpow.bf16 %v1659_v19 }
 0x5ce   : > { %v7631_v55 = vpop.eup %7630  ;;  %v1719_v13 = vunpack.c.l.bf16 %v7629_v45  ;;  %v1721_v48 = vunpack.c.h.bf16 %v7629_v45  ;;  %1856 = vmatprep.subr.bf16.mxu0 %v7629_v45  ;;  %7652 = vpow.bf16 %v1662_v1 }
 0x5cf   : > { %v7633_v58 = vpop.eup %7632  ;;  %v1722_v36 = vunpack.c.l.bf16 %v7631_v55  ;;  %v1782_v17 = vadd.f32 %v1720_v20, %v1718_v5  ;;  %1857 = vmatpush1.bf16.msra.mxu0 %v7627_v10  ;;  %v1724_v47 = vunpack.c.h.bf16 %v7631_v55  ;;  %7654 = vpow.bf16 %v1665_v11 }
 0x5d0   : > { %v7635_v39 = vpop.eup %7634  ;;  %v1723_v62 = vunpack.c.l.bf16 %v7633_v58  ;;  %v1819_v14 = vadd.f32 %v1721_v48, %v1719_v13  ;;  %1858 = vmatprep.subr.bf16.mxu0 %v7633_v58  ;;  %v1725_v43 = vunpack.c.h.bf16 %v7633_v58  ;;  %7656 = vpow.bf16 %v1668_v24  ;;  %v13459_v13 = vld [vmem:[#allocation87_spill] sm:$0xff]  ;;  %v13460_v58 = vld [vmem:[#allocation12_spill] sm:$0xff] }
 0x5d1   : > { %v7637_v51 = vpop.eup %7636  ;;  %v1783_v6 = vadd.f32 %v1782_v17, %v1722_v36  ;;  %v1726_v46 = vunpack.c.l.bf16 %v7635_v39  ;;  %v1728_v42 = vunpack.c.h.bf16 %v7635_v39  ;;  %v1099_v48 = vadd.f32 %v13459_v13, %v13458_v28  ;;  %v13461_v36 = vld [vmem:[#allocation88_spill] sm:$0xff] }
 0x5d2   : > { %v1820_v32 = vadd.f32 %v1819_v14, %v1723_v62  ;;  %v7639_v25 = vpop.eup %7638  ;;  %v1727_v50 = vunpack.c.l.bf16 %v7637_v51  ;;  %v1729_v0 = vunpack.c.h.bf16 %v7637_v51  ;;  %v1103_v17 = vadd.f32 %v13461_v36, %v13460_v58 }
 0x5d3   : > { %v1784_v8 = vadd.f32 %v1783_v6, %v1724_v47  ;;  %1859 = vmatpush1.bf16.msra.mxu0 %v7631_v55  ;;  %v7641_v18 = vpop.eup %7640  ;;  %v1730_v37 = vunpack.c.l.bf16 %v7639_v25  ;;  %v1732_v10 = vunpack.c.h.bf16 %v7639_v25  ;;  %7658 = vpow.bf16 %v1671_v57 }
 0x5d4   : > { %v1821_v31 = vadd.f32 %v1820_v32, %v1725_v43  ;;  %1860 = vmatprep.subr.bf16.mxu0 %v7637_v51  ;;  %v7643_v34 = vpop.eup %7642  ;;  %v1731_v60 = vunpack.c.l.bf16 %v7641_v18  ;;  %v1733_v30 = vunpack.c.h.bf16 %v7641_v18  ;;  %v1677_v51 = vmul.bf16 1069105081, %v9531_v15  ;;  %v9590_v43 = vpop.permute.xlu1 %3399 }
 0x5d5   : > { %v1785_v56 = vadd.f32 %v1784_v8, %v1726_v46  ;;  %v7645_v40 = vpop.eup %7644  ;;  %v1734_v20 = vunpack.c.l.bf16 %v7643_v34  ;;  %v1736_v29 = vunpack.c.h.bf16 %v7643_v34  ;;  %7660 = vpow.bf16 %v1674_v22  ;;  %13462 = vst [vmem:[#allocation68_spill] sm:$0xff] %v9590_v43 }
 0x5d6   : > { %v1822_v63 = vadd.f32 %v1821_v31, %v1727_v50  ;;  %v1735_v2 = vunpack.c.l.bf16 %v7645_v40  ;;  %v1680_v47 = vmul.bf16 1069105081, %v9549_v35  ;;  %v1737_v6 = vunpack.c.h.bf16 %v7645_v40  ;;  %v9594_v50 = vpop.permute.xlu0 %3401 }
 0x5d7   : > { %v1786_v21 = vadd.f32 %v1785_v56, %v1728_v42  ;;  %1861 = vmatpush1.bf16.msra.mxu0 %v7635_v39  ;;  %v7647_v39 = vpop.eup %7646  ;;  %v9592_v8 = vpack.c.bf16 %v1103_v17, %v1099_v48  ;;  %13464 = vst [vmem:[#allocation70_spill] sm:$0xff] %v9594_v50  ;;  %7662 = vpow.bf16 %v1677_v51  ;;  %v1683_v11 = vmul.bf16 1069105081, %v9533_v41 }
 0x5d8   : > { %v1823_v23 = vadd.f32 %v1822_v63, %v1729_v0  ;;  %1862 = vmatprep.subr.bf16.mxu0 %v7641_v18  ;;  %v7649_v14 = vpop.eup %7648  ;;  %v1738_v32 = vunpack.c.l.bf16 %v7647_v39  ;;  %v1740_v35 = vunpack.c.h.bf16 %v7647_v39  ;;  %7664 = vpow.bf16 %v1680_v47 }
 0x5d9   : > { %v1787_v45 = vadd.f32 %v1786_v21, %v1730_v37  ;;  %13463 = vst [vmem:[#allocation69_spill] sm:$0xff] %v9592_v8  ;;  %v1739_v31 = vunpack.c.l.bf16 %v7649_v14  ;;  %v1686_v56 = vmul.bf16 1069105081, %v9551_v33  ;;  %v1741_v24 = vunpack.c.h.bf16 %v7649_v14 }
 0x5da   : > { %v1824_v5 = vadd.f32 %v1823_v23, %v1731_v60  ;;  %7666 = vpow.bf16 %v1683_v11  ;;  %v1689_v41 = vmul.bf16 1069105081, %v9535_v54  ;;  %v1692_v33 = vmul.bf16 1069105081, %v9553_v3 }
 0x5db   : > { %v1788_v55 = vadd.f32 %v1787_v45, %v1732_v10  ;;  %1863 = vmatpush1.bf16.msra.mxu0 %v7639_v25  ;;  %v7651_v25 = vpop.eup %7650  ;;  %v9601_v45 = vpop.permute.xlu0 %3405  ;;  %7668 = vpow.bf16 %v1686_v56  ;;  %v1695_v54 = vmul.bf16 1069105081, %v9537_v4  ;;  %v1698_v17 = vmul.bf16 1069105081, %v9555_v61 }
 0x5dc   : > { %v1825_v62 = vadd.f32 %v1824_v5, %v1733_v30  ;;  %1864 = vmatprep.subr.bf16.mxu0 %v7645_v40  ;;  %v7653_v15 = vpop.eup %7652  ;;  %v1742_v63 = vunpack.c.l.bf16 %v7651_v25  ;;  %v9598_v40 = vpop.permute.xlu1 %3403  ;;  %v1744_v57 = vunpack.c.h.bf16 %v7651_v25  ;;  %13466 = vst [vmem:[#allocation72_spill] sm:$0xff] %v9601_v45  ;;  %7670 = vpow.bf16 %v1689_v41 }
 0x5dd   : > { %v1789_v19 = vadd.f32 %v1788_v55, %v1734_v20  ;;  %v7655_v21 = vpop.eup %7654  ;;  %13465 = vst [vmem:[#allocation71_spill] sm:$0xff] %v9598_v40  ;;  %v1745_v22 = vunpack.c.h.bf16 %v7653_v15  ;;  %7672 = vpow.bf16 %v1692_v33  ;;  %v1701_v4 = vmul.bf16 1069105081, %v9539_v38 }
 0x5de   : > { %v1826_v1 = vadd.f32 %v1825_v62, %v1735_v2  ;;  %v7657_v23 = vpop.eup %7656  ;;  %v1746_v5 = vunpack.c.l.bf16 %v7655_v21  ;;  %v1748_v58 = vunpack.c.h.bf16 %v7655_v21  ;;  %7674 = vpow.bf16 %v1695_v54  ;;  %v13475_v54 = vld [vmem:[#allocation90_spill] sm:$0xff] }
 0x5df   : > { %v1790_v46 = vadd.f32 %v1789_v19, %v1736_v29  ;;  %1865 = vmatpush1.bf16.msra.mxu0 %v7643_v34  ;;  %v1743_v34 = vunpack.c.l.bf16 %v7653_v15  ;;  %v7659_v55 = vpop.eup %7658  ;;  %v1747_v28 = vunpack.c.l.bf16 %v7657_v23  ;;  %v9608_v29 = vpop.permute.xlu0 %3409  ;;  %7676 = vpow.bf16 %v1698_v17  ;;  %v13477_v17 = vld [vmem:[#allocation91_spill] sm:$0xff] }
 0x5e0   : > { %v1827_v18 = vadd.f32 %v1826_v1, %v1737_v6  ;;  %1866 = vmatprep.subr.bf16.mxu0 %v7649_v14  ;;  %v7661_v48 = vpop.eup %7660  ;;  %v9606_v2 = vpop.permute.xlu1 %3407  ;;  %v1750_v62 = vunpack.c.l.bf16 %v7659_v55  ;;  %13468 = vst [vmem:[#allocation74_spill] sm:$0xff] %v9608_v29  ;;  %v1752_v1 = vunpack.c.h.bf16 %v7659_v55  ;;  %v1704_v61 = vmul.bf16 1069105081, %v9557_v27 }
 0x5e1   : > { %v1791_v42 = vadd.f32 %v1790_v46, %v1738_v32  ;;  %13467 = vst [vmem:[#allocation73_spill] sm:$0xff] %v9606_v2  ;;  %v1751_v19 = vunpack.c.l.bf16 %v7661_v48  ;;  %v1753_v46 = vunpack.c.h.bf16 %v7661_v48  ;;  %7678 = vpow.bf16 %v1701_v4 }
 0x5e2   : > { %v1828_v0 = vadd.f32 %v1827_v18, %v1739_v31  ;;  %v7663_v51 = vpop.eup %7662  ;;  %v1707_v38 = vmul.bf16 1069105081, %v9541_v7  ;;  %7680 = vpow.bf16 %v1704_v61  ;;  %v1710_v27 = vmul.bf16 1069105081, %v9559_v26 }
 0x5e3   : > { %v1792_v37 = vadd.f32 %v1791_v42, %v1740_v35  ;;  %1867 = vmatpush1.bf16.msra.mxu0 %v7647_v39  ;;  %v1749_v39 = vunpack.c.h.bf16 %v7657_v23  ;;  %v7665_v6 = vpop.eup %7664  ;;  %v1754_v31 = vunpack.c.l.bf16 %v7663_v51 }
 0x5e4   : > { %v1829_v60 = vadd.f32 %v1828_v0, %v1741_v24  ;;  %1868 = vmatprep.subr.bf16.mxu0 %v7653_v15  ;;  %v1755_v11 = vunpack.c.l.bf16 %v7665_v6  ;;  %v9612_v56 = vpop.permute.xlu1 %3411  ;;  %v1756_v24 = vunpack.c.h.bf16 %v7663_v51  ;;  %7682 = vpow.bf16 %v1707_v38 }
 0x5e5   : > { %v1793_v10 = vadd.f32 %v1792_v37, %v1742_v63  ;;  %v7667_v15 = vpop.eup %7666  ;;  %13469 = vst [vmem:[#allocation75_spill] sm:$0xff] %v9612_v56  ;;  %v9615_v63 = vpop.permute.xlu0 %3413  ;;  %v1757_v37 = vunpack.c.h.bf16 %v7665_v6  ;;  %7684 = vpow.bf16 %v1710_v27 }
 0x5e6   : > { %v1830_v30 = vadd.f32 %v1829_v60, %v1743_v34  ;;  %v7669_v42 = vpop.eup %7668  ;;  %13470 = vst [vmem:[#allocation78_spill] sm:$0xff] %v9615_v63  ;;  %v1758_v34 = vunpack.c.l.bf16 %v7667_v15  ;;  %v1760_v33 = vunpack.c.h.bf16 %v7667_v15 }
 0x5e7   : > { %v1794_v20 = vadd.f32 %v1793_v10, %v1744_v57  ;;  %1869 = vmatpush1.bf16.msra.mxu0 %v7651_v25  ;;  %v1759_v41 = vunpack.c.l.bf16 %v7669_v42 }
 0x5e8   : > { %v1831_v13 = vadd.f32 %v1830_v30, %v1745_v22  ;;  %1870 = vmatprep.subr.bf16.mxu0 %v7657_v23  ;;  %v7671_v23 = vpop.eup %7670  ;;  %v13472_v30 = vld [vmem:[#allocation58_spill] sm:$0xff] }
 0x5e9   : > { %v1795_v36 = vadd.f32 %v1794_v20, %v1746_v5  ;;  %v7673_v10 = vpop.eup %7672  ;;  %v1716_v5 = vmul.bf16 1069105081, %v13472_v30  ;;  %v1761_v20 = vunpack.c.h.bf16 %v7669_v42 }
 0x5ea   : > { %v1832_v3 = vadd.f32 %v1831_v13, %v1747_v28  ;;  %v1762_v28 = vunpack.c.l.bf16 %v7671_v23  ;;  %v1765_v4 = vunpack.c.h.bf16 %v7673_v10 }
 0x5eb   : > { %v1796_v14 = vadd.f32 %v1795_v36, %v1748_v58  ;;  %1871 = vmatpush1.bf16.msra.mxu0 %v7655_v21  ;;  %v13476_v36 = vld [vmem:[#allocation51_spill] sm:$0xff]  ;;  %7686 = vpow.bf16 %v1716_v5 }
 0x5ec   : > { %v1833_v47 = vadd.f32 %v1832_v3, %v1749_v39  ;;  %1872 = vmatprep.subr.bf16.mxu0 %v7661_v48  ;;  %v13474_v48 = vld [vmem:[#allocation50_spill] sm:$0xff]  ;;  %v1113_v39 = vadd.f32 %v13477_v17, %v13476_v36  ;;  %v7675_v3 = vpop.eup %7674 }
 0x5ed   : > { %v1797_v32 = vadd.f32 %v1796_v14, %v1750_v62  ;;  %v1109_v58 = vadd.f32 %v13475_v54, %v13474_v48  ;;  %v1763_v62 = vunpack.c.l.bf16 %v7673_v10  ;;  %v1768_v38 = vunpack.c.h.bf16 %v7675_v3 }
 0x5ee   : > { %v1834_v25 = vadd.f32 %v1833_v47, %v1751_v19  ;;  %v1764_v19 = vunpack.c.h.bf16 %v7671_v23 }
 0x5ef   : > { %v1798_v18 = vadd.f32 %v1797_v32, %v1752_v1  ;;  %1873 = vmatpush1.bf16.msra.mxu0 %v7659_v55  ;;  %v13479_v32 = vld [vmem:[#allocation94_spill] sm:$0xff] }
 0x5f0   : > { %v1835_v35 = vadd.f32 %v1834_v25, %v1753_v46  ;;  %1874 = vmatprep.subr.bf16.mxu0 %v7665_v6  ;;  %v1713_v61 = vmul.bf16 1069105081, %v13479_v32  ;;  %v1766_v46 = vunpack.c.l.bf16 %v7675_v3 }
 0x5f1   : > { %v1799_v0 = vadd.f32 %v1798_v18, %v1754_v31  ;;  %v9634_v31 = vpack.c.bf16 %v1113_v39, %v1109_v58 }
 0x5f2   : > { %v1836_v21 = vadd.f32 %v1835_v35, %v1755_v11  ;;  %7688 = vpow.bf16 %v1713_v61  ;;  %v13489_v61 = vld [vmem:[#allocation9_spill] sm:$0xff] }
 0x5f3   : > { %v1800_v60 = vadd.f32 %v1799_v0, %v1756_v24  ;;  %1875 = vmatpush1.bf16.msra.mxu0 %v7663_v51  ;;  %v7677_v51 = vpop.eup %7676  ;;  %13480 = vst [vmem:[#allocation85_spill] sm:$0xff] %v9634_v31 }
 0x5f4   : > { %v1837_v57 = vadd.f32 %v1836_v21, %v1757_v37  ;;  %1876 = vmatprep.subr.bf16.mxu0 %v7669_v42  ;;  %v7679_v18 = vpop.eup %7678  ;;  %v1769_v27 = vunpack.c.h.bf16 %v7677_v51 }
 0x5f5   : > { %v1801_v7 = vadd.f32 %v1800_v60, %v1758_v34  ;;  %v7681_v42 = vpop.eup %7680  ;;  %v1770_v21 = vunpack.c.l.bf16 %v7679_v18 }
 0x5f6   : > { %v9618_v22 = vpop.trf.xlu1  ;;  %v1838_v26 = vadd.f32 %v1837_v57, %v1759_v41  ;;  %v7683_v60 = vpop.eup %7682  ;;  %v1773_v5 = vunpack.c.h.bf16 %v7681_v42 }
 0x5f7   : > { %13471 = vst [vmem:[#allocation80_spill] sm:$0xff] %v9618_v22  ;;  %v9621_v55 = vpop.trf.xlu0  ;;  %4833 = vrot.lane.b32.xlu0 %v9618_v22, %s8290_s10  ;;  %v1802_v13 = vadd.f32 %v1801_v7, %v1760_v33  ;;  %1877 = vmatpush1.bf16.msra.mxu0 %v7667_v15  ;;  %v1767_v15 = vunpack.c.l.bf16 %v7677_v51  ;;  %v7685_v57 = vpop.eup %7684  ;;  %v1772_v33 = vunpack.c.h.bf16 %v7679_v18  ;;  %v1776_v36 = vunpack.c.h.bf16 %v7683_v60 }
 0x5f8   : > { %13473 = vst [vmem:[#allocation83_spill] sm:$0xff] %v9621_v55  ;;  %v1839_v14 = vadd.f32 %v1838_v26, %v1761_v20  ;;  %1878 = vmatprep.subr.bf16.mxu0 %v7673_v10  ;;  %v1774_v26 = vunpack.c.l.bf16 %v7683_v60  ;;  %v7687_v54 = vpop.eup %7686  ;;  %v1777_v39 = vunpack.c.h.bf16 %v7685_v57 }
 0x5f9   : > { %v1803_v47 = vadd.f32 %v1802_v13, %v1762_v28  ;;  %v1775_v13 = vunpack.c.l.bf16 %v7685_v57 }
 0x5fa   : > { %v9629_v6 = vpop.trf.xlu1  ;;  %v1840_v1 = vadd.f32 %v1839_v14, %v1763_v62 }
 0x5fb   : > { %13478 = vst [vmem:[#allocation84_spill] sm:$0xff] %v9629_v6  ;;  %4835 = vrot.lane.b32.xlu1 %v9629_v6, %s8290_s10  ;;  %v1804_v25 = vadd.f32 %v1803_v47, %v1764_v19  ;;  %1879 = vmatpush1.bf16.msra.mxu0 %v7671_v23  ;;  %v9636_v35 = vpop.trf.xlu0  ;;  %v1771_v23 = vunpack.c.l.bf16 %v7681_v42 }
 0x5fc   : > { %v1841_v11 = vadd.f32 %v1840_v1, %v1765_v4  ;;  %1880 = vmatprep.subr.bf16.mxu0 %v7677_v51  ;;  %13481 = vst [vmem:[#allocation86_spill] sm:$0xff] %v9636_v35  ;;  %v1779_v51 = vunpack.c.l.bf16 %v7687_v54  ;;  %v13488_v1 = vld [vmem:[#allocation10_spill] sm:$0xff] }
 0x5fd   : > { %v1805_v24 = vadd.f32 %v1804_v25, %v1766_v46  ;;  %v9658_v4 = vpop.eup %7688  ;;  %v1952_v32 = vrot.slane %v13488_v1, 4  ;;  %v1951_v46 = vrot.slane %v13489_v61, 4  ;;  %v1781_v25 = vunpack.c.h.bf16 %v7687_v54  ;;  %v7051_v1 = vld [vmem:[%s13041_s7 + $0x10] sm:$0xff]  ;;  %v13513_v61 = vld [vmem:[#allocation24_spill] sm:$0xff] }
 0x5fe   : > { %v9638_v0 = vpop.trf.xlu1  ;;  %v1842_v37 = vadd.f32 %v1841_v11, %v1767_v15  ;;  %v13490_v15 = vld [vmem:[#allocation30_spill] sm:$0xff]  ;;  %v13491_v11 = vld [vmem:[#allocation79_spill] sm:$0xff] }
 0x5ff   : > { %13482 = vst [vmem:[#allocation93_spill] sm:$0xff] %v9638_v0  ;;  %4837 = vrot.lane.b32.xlu1 %v9638_v0, %s8290_s10  ;;  %1881 = vmatpush1.bf16.msra.mxu0 %v7675_v3  ;;  %v1806_v34 = vadd.f32 %v1805_v24, %v1768_v38  ;;  %v9646_v30 = vpop.trf.xlu0  ;;  %v13492_v38 = vld [vmem:[#allocation32_spill] sm:$0xff]  ;;  %v13493_v24 = vld [vmem:[#allocation81_spill] sm:$0xff] }
 0x600   : > { %1882 = vmatprep.subr.bf16.mxu0 %v7681_v42  ;;  %v1843_v41 = vadd.f32 %v1842_v37, %v1769_v27  ;;  %13484 = vst [vmem:[#allocation55_spill] sm:$0xff] %v9646_v30  ;;  %v1067_v42 = vadd.f32 %v13491_v11, %v13490_v15  ;;  %v1071_v27 = vadd.f32 %v13493_v24, %v13492_v38  ;;  %v13516_v15 = vld [vmem:[#allocation27_spill] sm:$0xff]  ;;  %v13517_v11 = vld [vmem:[#allocation28_spill] sm:$0xff]  ;;  %v13519_v38 = vld [vmem:[#allocation54_spill] sm:$0xff]  ;;  %v1778_v24 = vunpack.c.l.bf16 %v9658_v4 }
 0x601   : > { %v1807_v7 = vadd.f32 %v1806_v34, %v1770_v21  ;;  %v13495_v34 = vld [vmem:[#allocation13_spill] sm:$0xff] }
 0x602   : > { %v9642_v10 = vpop.trf.xlu1  ;;  %v1844_v20 = vadd.f32 %v1843_v41, %v1771_v23  ;;  %v13497_v41 = vmov 0  }
 0x603   : > { %13483 = vst [vmem:[#allocation52_spill] sm:$0xff] %v9642_v10  ;;  %4839 = vrot.lane.b32.xlu0 %v9642_v10, %s8290_s10  ;;  %1883 = vmatpush1.bf16.msra.mxu0 %v7679_v18  ;;  %v1808_v28 = vadd.f32 %v1807_v7, %v1772_v33  ;;  %v9654_v14 = vpop.trf.xlu0 }
 0x604   : > { %1884 = vmatprep.subr.bf16.mxu0 %v7685_v57  ;;  %v1845_v48 = vadd.f32 %v1844_v20, %v1773_v5  ;;  %13486 = vst [vmem:[#allocation57_spill] sm:$0xff] %v9654_v14  ;;  %v9681_v57 = vpack.c.bf16 %v1071_v27, %v1067_v42  ;;  %v13501_v5 = vld [vmem:[#allocation14_spill] sm:$0xff]  ;;  %v13518_v42 = vld [vmem:[#allocation29_spill] sm:$0xff] }
 0x605   : > { %v1809_v17 = vadd.f32 %v1808_v28, %v1774_v26  ;;  %v13503_v26 = vld [vmem:[#allocation16_spill] sm:$0xff] }
 0x606   : > { %v9648_v58 = vpop.trf.xlu1  ;;  %v1846_v3 = vadd.f32 %v1845_v48, %v1775_v13  ;;  %13498 = vst [vmem:[#allocation12_spill] sm:$0xff] %v9681_v57  ;;  %v13505_v13 = vld [vmem:[#allocation15_spill] sm:$0xff]  ;;  %v13506_v48 = vld [vmem:[#allocation18_spill] sm:$0xff] }
 0x607   : > { %13485 = vst [vmem:[#allocation56_spill] sm:$0xff] %v9648_v58  ;;  %4841 = vrot.lane.b32.xlu1 %v9648_v58, %s8290_s10  ;;  %1885 = vmatpush1.bf16.msra.mxu0 %v7683_v60  ;;  %v9652_v62 = vadd.f32 %v1809_v17, %v1776_v36  ;;  %v2002_v60 = vsel %vm1252_vm4, %v1951_v46, 0  ;;  %v9678_v23 = vpop.trf.xlu0  ;;  %v13508_v36 = vld [vmem:[#allocation19_spill] sm:$0xff]  ;;  %v13509_v17 = vld [vmem:[#allocation20_spill] sm:$0xff] }
 0x608   : > { %1886 = vmatprep.subr.bf16.mxu0 %v7687_v54  ;;  %v1847_v19 = vadd.f32 %v1846_v3, %v1777_v39  ;;  %13496 = vst [vmem:[#allocation87_spill] sm:$0xff] %v9678_v23  ;;  %v13507_v54 = vld [vmem:[#allocation17_spill] sm:$0xff]  ;;  %v13511_v3 = vld [vmem:[#allocation22_spill] sm:$0xff]  ;;  %v7052_v46 = vld [vmem:[%s13041_s7 + $0x18] sm:$0xff] }
 0x609   : > { %v13510_v39 = vld [vmem:[#allocation21_spill] sm:$0xff]  ;;  %v1811_v27 = vadd.f32 %v9652_v62, %v1778_v24 }
 0x60a   : > { %v9656_v47 = vpop.trf.xlu1  ;;  %v1848_v18 = vadd.f32 %v1847_v19, %v1779_v51  ;;  %v13512_v51 = vld [vmem:[#allocation23_spill] sm:$0xff]  ;;  %v7049_v19 = vld [vmem:[%s13041_s7] sm:$0xff] }
 0x60b   : > { %13487 = vst [vmem:[#allocation59_spill] sm:$0xff] %v9656_v47  ;;  %4843 = vrot.lane.b32.xlu0 %v9656_v47, %s8290_s10  ;;  %1887 = vmatpush1.bf16.msra.mxu0 %v9658_v4  ;;  %v9689_v7 = vpop.trf.xlu0 }
 0x60c   : > { %7371 = vmatprep.subr.msk.bf16.mxu0 %vm1252_vm4, %v1952_v32  ;;  %v9670_v37 = vadd.f32 %v1848_v18, %v1781_v25  ;;  %13500 = vst [vmem:[#allocation58_spill] sm:$0xff] %v9689_v7  ;;  %v7050_v32 = vld [vmem:[%s13041_s7 + $0x8] sm:$0xff]  ;;  %v13514_v25 = vld [vmem:[#allocation25_spill] sm:$0xff] }
 0x60d   : > { %v13515_v18 = vld [vmem:[#allocation26_spill] sm:$0xff] }
 0x60e   : > { %v9672_v21 = vpop.trf.xlu1  ;;  %1889 = vmatmul.mubr.bf16.vlgmr.msra.gmra.mrb[28].mxu0 %v13495_v34 }
 0x60f   : > { %13494 = vst [vmem:[#allocation11_spill] sm:$0xff] %v9672_v21  ;;  %4845 = vrot.lane.b32.xlu1 %v9672_v21, %s8290_s10  ;;  %2008 = vmatpush1.bf16.msra.mxu0 %v2002_v60  ;;  %v9700_v20 = vpop.trf.xlu0  ;;  %v1780_v60 = vunpack.c.h.bf16 %v9658_v4 }
 0x610   : > { %2039 = vmatprep.mubr.bf16.mxu0 %v13497_v41  ;;  %13502 = vst [vmem:[#allocation50_spill] sm:$0xff] %v9700_v20 }
 0x612   : > { %v9683_v33 = vpop.trf.xlu1 }
 0x613   : > { %13499 = vst [vmem:[#allocation88_spill] sm:$0xff] %v9683_v33  ;;  %4849 = vrot.lane.b32.xlu1 %v9621_v55, %s8290_s10  ;;  %4847 = vrot.lane.b32.xlu0 %v9683_v33, %s8290_s10  ;;  %v9711_v28 = vpop.trf.xlu0 }
 0x614   : > { %13504 = vst [vmem:[#allocation90_spill] sm:$0xff] %v9711_v28 }
 0x616   : > { %7372 = vmatmul.mubr.msk.bf16.vlgmr.msra.gmra.mrb[32].mxu0 %vm1203_vm5, %v13501_v5  ;;  %v1812_v5 = vadd.f32 %v1811_v27, %v1780_v60 }
 0x617   : > { %4853 = vrot.lane.b32.xlu1 %v9646_v30, %s8290_s10  ;;  %2049 = vmatprep.mubr.bf16.mxu0 %v13497_v41 }
 0x618   : > { %4851 = vrot.lane.b32.xlu0 %v9636_v35, %s8290_s10 }
 0x61b   : > { %4857 = vrot.lane.b32.xlu1 %v9678_v23, %s8290_s10 }
 0x61c   : > { %4855 = vrot.lane.b32.xlu0 %v9654_v14, %s8290_s10 }
 0x61e   : > { %7373 = vmatmul.mubr.msk.bf16.gmra.mrb[36].mxu0 %vm1203_vm5, %v13503_v26  ;;  %v1813_v26 = vrot.slane %v1812_v5, 4 }
 0x61f   : > { %4861 = vrot.lane.b32.xlu1 %v9700_v20, %s8290_s10  ;;  %2059 = vmatprep.mubr.bf16.mxu0 %v13497_v41 }
 0x620   : > { %4859 = vrot.lane.b32.xlu0 %v9689_v7, %s8290_s10 }
 0x623   : > { %5571 = vrot.lane.b32.xlu1 %v9618_v22, %s8291_s18 }
 0x624   : > { %4863 = vrot.lane.b32.xlu0 %v9711_v28, %s8290_s10 }
 0x626   : > { %7374 = vmatmul.mubr.msk.bf16.gmra.mrb[40].mxu0 %vm1203_vm5, %v13505_v13  ;;  %v1850_v13 = vrot.slane %v9670_v37, 4 }
 0x627   : > { %5575 = vrot.lane.b32.xlu1 %v9638_v0, %s8291_s18  ;;  %2069 = vmatprep.mubr.bf16.mxu0 %v13497_v41 }
 0x628   : > { %5573 = vrot.lane.b32.xlu0 %v9629_v6, %s8291_s18 }
 0x62b   : > { %5579 = vrot.lane.b32.xlu1 %v9648_v58, %s8291_s18 }
 0x62c   : > { %5577 = vrot.lane.b32.xlu0 %v9642_v10, %s8291_s18 }
 0x62e   : > { %7375 = vmatmul.mubr.msk.bf16.gmra.mrb[44].mxu0 %vm1203_vm5, %v13506_v48  ;;  %v1814_v48 = vadd.f32 %v1813_v26, %v1812_v5 }
 0x62f   : > { %5583 = vrot.lane.b32.xlu1 %v9672_v21, %s8291_s18  ;;  %2079 = vmatprep.mubr.bf16.mxu0 %v13497_v41 }
 0x630   : > { %5581 = vrot.lane.b32.xlu0 %v9656_v47, %s8291_s18 }
 0x633   : > { %5587 = vrot.lane.b32.xlu1 %v9621_v55, %s8291_s18 }
 0x634   : > { %5585 = vrot.lane.b32.xlu0 %v9683_v33, %s8291_s18 }
 0x636   : > { %7376 = vmatmul.mubr.msk.bf16.gmra.mrb[48].mxu0 %vm1203_vm5, %v13507_v54  ;;  %v1851_v54 = vadd.f32 %v1850_v13, %v9670_v37 }
 0x637   : > { %5591 = vrot.lane.b32.xlu1 %v9646_v30, %s8291_s18  ;;  %2089 = vmatprep.mubr.bf16.mxu0 %v13497_v41 }
 0x638   : > { %5589 = vrot.lane.b32.xlu0 %v9636_v35, %s8291_s18 }
 0x63b   : > { %5595 = vrot.lane.b32.xlu1 %v9678_v23, %s8291_s18 }
 0x63c   : > { %5593 = vrot.lane.b32.xlu0 %v9654_v14, %s8291_s18 }
 0x63e   : > { %7377 = vmatmul.mubr.msk.bf16.gmra.mrb[52].mxu0 %vm1203_vm5, %v13508_v36  ;;  %v1815_v36 = vrot.slane %v1814_v48, 2 }
 0x63f   : > { %5599 = vrot.lane.b32.xlu1 %v9700_v20, %s8291_s18  ;;  %2099 = vmatprep.mubr.bf16.mxu0 %v13497_v41 }
 0x640   : > { %5597 = vrot.lane.b32.xlu0 %v9689_v7, %s8291_s18 }
 0x643   : > { %6299 = vrot.lane.b32.xlu1 %v9618_v22, %s8292_s12 }
 0x644   : > { %5601 = vrot.lane.b32.xlu0 %v9711_v28, %s8291_s18 }
 0x646   : > { %7378 = vmatmul.mubr.msk.bf16.gmra.mrb[56].mxu0 %vm1203_vm5, %v13509_v17  ;;  %v1852_v17 = vrot.slane %v1851_v54, 2 }
 0x647   : > { %6303 = vrot.lane.b32.xlu1 %v9638_v0, %s8292_s12  ;;  %2109 = vmatprep.mubr.bf16.mxu0 %v13497_v41 }
 0x648   : > { %6301 = vrot.lane.b32.xlu0 %v9629_v6, %s8292_s12 }
 0x64b   : > { %6307 = vrot.lane.b32.xlu1 %v9648_v58, %s8292_s12 }
 0x64c   : > { %6305 = vrot.lane.b32.xlu0 %v9642_v10, %s8292_s12 }
 0x64e   : > { %7379 = vmatmul.mubr.msk.bf16.gmra.mrb[60].mxu0 %vm1203_vm5, %v13510_v39  ;;  %v1816_v39 = vadd.f32 %v1815_v36, %v1814_v48 }
 0x64f   : > { %6311 = vrot.lane.b32.xlu1 %v9672_v21, %s8292_s12  ;;  %2119 = vmatprep.mubr.bf16.mxu0 %v13497_v41 }
 0x650   : > { %6309 = vrot.lane.b32.xlu0 %v9656_v47, %s8292_s12 }
 0x653   : > { %6315 = vrot.lane.b32.xlu1 %v9621_v55, %s8292_s12 }
 0x654   : > { %6313 = vrot.lane.b32.xlu0 %v9683_v33, %s8292_s12 }
 0x656   : > { %7380 = vmatmul.mubr.msk.bf16.gmra.mrb[64].mxu0 %vm1203_vm5, %v13511_v3  ;;  %v1853_v3 = vadd.f32 %v1852_v17, %v1851_v54 }
 0x657   : > { %6319 = vrot.lane.b32.xlu1 %v9646_v30, %s8292_s12  ;;  %2129 = vmatprep.mubr.bf16.mxu0 %v13497_v41 }
 0x658   : > { %6317 = vrot.lane.b32.xlu0 %v9636_v35, %s8292_s12 }
 0x65b   : > { %6323 = vrot.lane.b32.xlu1 %v9678_v23, %s8292_s12 }
 0x65c   : > { %6321 = vrot.lane.b32.xlu0 %v9654_v14, %s8292_s12 }
 0x65e   : > { %7381 = vmatmul.mubr.msk.bf16.gmra.mrb[68].mxu0 %vm1203_vm5, %v13512_v51  ;;  %v1817_v51 = vrot.slane %v1816_v39, 1 }
 0x65f   : > { %6327 = vrot.lane.b32.xlu1 %v9700_v20, %s8292_s12  ;;  %2139 = vmatprep.mubr.bf16.mxu0 %v13497_v41 }
 0x660   : > { %6325 = vrot.lane.b32.xlu0 %v9689_v7, %s8292_s12 }
 0x663   : > { %7055 = vperm.xlu1 %7609, %v7049_v19   ;;  %v1854_v19 = vrot.slane %v1853_v3, 1 }
 0x664   : > { %6329 = vrot.lane.b32.xlu0 %v9711_v28, %s8292_s12  ;;  %s8218_s12 = sshll.u32 %s8293_s26, 4  ;;  %s8219_s12 = int_to_ptr.vmem [resolvable:$false] %s8218_s12 }
 0x665   : > { %s8220_s10 = scalar_lea.vmem %s8219_s12, 4096  ;;  %p8221_p4 = scmp.lt.s32.totalorder %s12984_s15, %s8219_s12 }
 0x666   : > { %7382 = vmatmul.mubr.msk.bf16.gmra.mrb[72].mxu0 %vm1203_vm5, %v13513_v61  ;;  %p8222_p7 = scmp.lt.s32.totalorder %s8220_s10, %s8214_s24 }
 0x667   : > { %7065 = vperm.xlu1 %7609, %v7051_v1   ;;  %2149 = vmatprep.mubr.bf16.mxu0 %v13497_v41  ;;  %v1818_v1 = vadd.f32 %v1817_v51, %v1816_v39 }
 0x668   : > { %7060 = vperm.xlu0 %7608, %v7050_v32   ;;  %v1855_v32 = vadd.f32 %v1854_v19, %v1853_v3  ;;  %p8223_p8 = por %p8222_p7, %p8221_p4 }
 0x669   : > { %7690 = vrcp.f32 %v1818_v1 }
 0x66a   : > { %7692 = vrcp.f32 %v1855_v32  ;;  %p8224_p9 = pnand %p8223_p8, %p8217_p3 }
 0x66c   : > { %7070 = vperm.xlu0 %7608, %v7052_v46  }
 0x66e   : > { %7383 = vmatmul.mubr.msk.bf16.gmra.mrb[76].mxu0 %vm1203_vm5, %v13514_v25 }
 0x66f   : > { %2159 = vmatprep.mubr.bf16.mxu0 %v13497_v41 }
 0x673   : > { %v7691_v62 = vpop.eup %7690 }
 0x674   : > { %v7693_v4 = vpop.eup %7692 }
 0x676   : > { %7384 = vmatmul.mubr.msk.bf16.gmra.mrb[80].mxu0 %vm1203_vm5, %v13515_v18 }
 0x677   : > { %2169 = vmatprep.mubr.bf16.mxu0 %v13497_v41 }
 0x67e   : > { %7385 = vmatmul.mubr.msk.bf16.gmra.mrb[84].mxu0 %vm1203_vm5, %v13516_v15 }
 0x67f   : > { %2179 = vmatprep.mubr.bf16.mxu0 %v13497_v41 }
 0x686   : > { %7386 = vmatmul.mubr.msk.bf16.gmra.mrb[88].mxu0 %vm1203_vm5, %v13517_v11 }
 0x687   : > { %2189 = vmatprep.mubr.bf16.mxu0 %v13497_v41 }
 0x68e   : > { %7387 = vmatmul.mubr.msk.bf16.gmra.mrb[92].mxu0 %vm1203_vm5, %v13518_v42 }
 0x68f   : > { %3370 = vmatprep.mubr.bf16.mxu0 %v13519_v38 }
 0x6e1   : > { %v1890_v61 = vpop.f32.mrb[28].mxu0 }
 0x6e2   : > { %v9838_v46 = vmul.f32 %v7691_v62, %v1890_v61  ;;  %v1892_v25 = vpop.f32.mrb[29].mxu0 }
 0x6e3   : > { %v9840_v18 = vmul.f32 %v7693_v4, %v1892_v25  ;;  %v1894_v15 = vpop.f32.mrb[30].mxu0 }
 0x6e4   : > { %13520 = vst [vmem:[#allocation51_spill] sm:$0xff] %v9838_v46  ;;  %v1895_v37 = vpop.f32.mrb[31].mxu0 }
 0x6e5   : > { %13521 = vst [vmem:[#allocation91_spill] sm:$0xff] %v9840_v18 }
 0x6e9   : > { %v9842_v11 = vpop.f32.mrb[32].mxu0 }
 0x6ea   : > { %v9844_v42 = vpop.f32.mrb[33].mxu0 }
 0x6eb   : > { %v9846_v24 = vpop.f32.mrb[34].mxu0 }
 0x6ec   : > { %13522 = vst [vmem:[#allocation94_spill] sm:$0xff] %v9846_v24  ;;  %v9848_v27 = vpop.f32.mrb[35].mxu0 }
 0x6f1   : > { %v9850_v60 = vpop.f32.mrb[36].mxu0 }
 0x6f2   : > { %13523 = vst [vmem:[#allocation10_spill] sm:$0xff] %v9850_v60  ;;  %v9852_v5 = vpop.f32.mrb[37].mxu0  ;;  %v2200_v26 = vmax.f32 %v9842_v11, %v9850_v60 }
 0x6f3   : > { %v9856_v13 = vpop.f32.mrb[38].mxu0  ;;  %v2237_v48 = vmax.f32 %v9844_v42, %v9852_v5 }
 0x6f4   : > { %13524 = vst [vmem:[#allocation9_spill] sm:$0xff] %v9856_v13  ;;  %v9860_v54 = vpop.f32.mrb[39].mxu0  ;;  %v2201_v36 = vmax.f32 %v9846_v24, %v9856_v13 }
 0x6f5   : > { %v2238_v17 = vmax.f32 %v9848_v27, %v9860_v54 }
 0x6f9   : > { %v9866_v39 = vpop.f32.mrb[40].mxu0 }
 0x6fa   : > { %13525 = vst [vmem:[#allocation30_spill] sm:$0xff] %v9866_v39  ;;  %v9868_v3 = vpop.f32.mrb[41].mxu0  ;;  %v2202_v51 = vmax.f32 %v2200_v26, %v9866_v39 }
 0x6fb   : > { %v9871_v19 = vpop.f32.mrb[42].mxu0  ;;  %v2239_v1 = vmax.f32 %v2237_v48, %v9868_v3 }
 0x6fc   : > { %v9874_v32 = vpop.f32.mrb[43].mxu0  ;;  %v2203_v62 = vmax.f32 %v2201_v36, %v9871_v19 }
 0x6fd   : > { %v2240_v61 = vmax.f32 %v2238_v17, %v9874_v32 }
 0x701   : > { %v9878_v4 = vpop.f32.mrb[44].mxu0 }
 0x702   : > { %v2204_v25 = vmax.f32 %v2202_v51, %v9878_v4  ;;  %v9881_v15 = vpop.f32.mrb[45].mxu0 }
 0x703   : > { %v2241_v37 = vmax.f32 %v2239_v1, %v9881_v15  ;;  %v9884_v57 = vpop.f32.mrb[46].mxu0 }
 0x704   : > { %v2205_v26 = vmax.f32 %v2203_v62, %v9884_v57  ;;  %v9887_v31 = vpop.f32.mrb[47].mxu0 }
 0x705   : > { %v2242_v48 = vmax.f32 %v2240_v61, %v9887_v31 }
 0x709   : > { %v9890_v28 = vpop.f32.mrb[48].mxu0 }
 0x70a   : > { %v2206_v36 = vmax.f32 %v2204_v25, %v9890_v28  ;;  %v9893_v17 = vpop.f32.mrb[49].mxu0 }
 0x70b   : > { %v2243_v51 = vmax.f32 %v2241_v37, %v9893_v17  ;;  %v9896_v20 = vpop.f32.mrb[50].mxu0 }
 0x70c   : > { %v2207_v1 = vmax.f32 %v2205_v26, %v9896_v20  ;;  %v9899_v7 = vpop.f32.mrb[51].mxu0 }
 0x70d   : > { %v2244_v62 = vmax.f32 %v2242_v48, %v9899_v7 }
 0x711   : > { %v9902_v23 = vpop.f32.mrb[52].mxu0 }
 0x712   : > { %v2208_v61 = vmax.f32 %v2206_v36, %v9902_v23  ;;  %v9905_v14 = vpop.f32.mrb[53].mxu0 }
 0x713   : > { %13526 = vst [vmem:[#allocation79_spill] sm:$0xff] %v9905_v14  ;;  %v2245_v25 = vmax.f32 %v2243_v51, %v9905_v14  ;;  %v9908_v30 = vpop.f32.mrb[54].mxu0 }
 0x714   : > { %v2209_v37 = vmax.f32 %v2207_v1, %v9908_v30  ;;  %v9911_v35 = vpop.f32.mrb[55].mxu0 }
 0x715   : > { %13527 = vst [vmem:[#allocation32_spill] sm:$0xff] %v9911_v35  ;;  %v2246_v26 = vmax.f32 %v2244_v62, %v9911_v35 }
 0x719   : > { %v9914_v55 = vpop.f32.mrb[56].mxu0 }
 0x71a   : > { %v2210_v48 = vmax.f32 %v2208_v61, %v9914_v55  ;;  %v9917_v33 = vpop.f32.mrb[57].mxu0 }
 0x71b   : > { %13528 = vst [vmem:[#allocation81_spill] sm:$0xff] %v9917_v33  ;;  %v2247_v36 = vmax.f32 %v2245_v25, %v9917_v33  ;;  %v9920_v21 = vpop.f32.mrb[58].mxu0 }
 0x71c   : > { %v2211_v51 = vmax.f32 %v2209_v37, %v9920_v21  ;;  %v9923_v47 = vpop.f32.mrb[59].mxu0 }
 0x71d   : > { %13529 = vst [vmem:[#allocation14_spill] sm:$0xff] %v9923_v47  ;;  %v2248_v1 = vmax.f32 %v2246_v26, %v9923_v47 }
 0x721   : > { %v9926_v58 = vpop.f32.mrb[60].mxu0 }
 0x722   : > { %v2212_v62 = vmax.f32 %v2210_v48, %v9926_v58  ;;  %v9929_v10 = vpop.f32.mrb[61].mxu0 }
 0x723   : > { %13530 = vst [vmem:[#allocation16_spill] sm:$0xff] %v9929_v10  ;;  %v2249_v61 = vmax.f32 %v2247_v36, %v9929_v10  ;;  %v9932_v0 = vpop.f32.mrb[62].mxu0 }
 0x724   : > { %v2213_v25 = vmax.f32 %v2211_v51, %v9932_v0  ;;  %v9935_v6 = vpop.f32.mrb[63].mxu0 }
 0x725   : > { %13531 = vst [vmem:[#allocation15_spill] sm:$0xff] %v9935_v6  ;;  %v2250_v37 = vmax.f32 %v2248_v1, %v9935_v6 }
 0x729   : > { %v9938_v22 = vpop.f32.mrb[64].mxu0 }
 0x72a   : > { %v2214_v26 = vmax.f32 %v2212_v62, %v9938_v22  ;;  %v9941_v8 = vpop.f32.mrb[65].mxu0 }
 0x72b   : > { %13532 = vst [vmem:[#allocation18_spill] sm:$0xff] %v9941_v8  ;;  %v2251_v48 = vmax.f32 %v2249_v61, %v9941_v8  ;;  %v9944_v63 = vpop.f32.mrb[66].mxu0 }
 0x72c   : > { %v2215_v36 = vmax.f32 %v2213_v25, %v9944_v63  ;;  %v9947_v56 = vpop.f32.mrb[67].mxu0 }
 0x72d   : > { %13533 = vst [vmem:[#allocation17_spill] sm:$0xff] %v9947_v56  ;;  %v2252_v51 = vmax.f32 %v2250_v37, %v9947_v56 }
 0x731   : > { %v9950_v29 = vpop.f32.mrb[68].mxu0 }
 0x732   : > { %v2216_v1 = vmax.f32 %v2214_v26, %v9950_v29  ;;  %v9953_v2 = vpop.f32.mrb[69].mxu0 }
 0x733   : > { %13534 = vst [vmem:[#allocation19_spill] sm:$0xff] %v9953_v2  ;;  %v2253_v62 = vmax.f32 %v2251_v48, %v9953_v2  ;;  %v9956_v45 = vpop.f32.mrb[70].mxu0 }
 0x734   : > { %v2217_v61 = vmax.f32 %v2215_v36, %v9956_v45  ;;  %v9959_v40 = vpop.f32.mrb[71].mxu0 }
 0x735   : > { %13535 = vst [vmem:[#allocation20_spill] sm:$0xff] %v9959_v40  ;;  %v2254_v25 = vmax.f32 %v2252_v51, %v9959_v40 }
 0x739   : > { %v9962_v50 = vpop.f32.mrb[72].mxu0 }
 0x73a   : > { %v2218_v37 = vmax.f32 %v2216_v1, %v9962_v50  ;;  %v9965_v43 = vpop.f32.mrb[73].mxu0 }
 0x73b   : > { %13536 = vst [vmem:[#allocation21_spill] sm:$0xff] %v9965_v43  ;;  %v2255_v26 = vmax.f32 %v2253_v62, %v9965_v43  ;;  %v9968_v44 = vpop.f32.mrb[74].mxu0 }
 0x73c   : > { %v2219_v48 = vmax.f32 %v2217_v61, %v9968_v44  ;;  %v9971_v52 = vpop.f32.mrb[75].mxu0 }
 0x73d   : > { %13537 = vst [vmem:[#allocation22_spill] sm:$0xff] %v9971_v52  ;;  %v2256_v36 = vmax.f32 %v2254_v25, %v9971_v52 }
 0x741   : > { %v9974_v59 = vpop.f32.mrb[76].mxu0 }
 0x742   : > { %v2220_v51 = vmax.f32 %v2218_v37, %v9974_v59  ;;  %v9977_v12 = vpop.f32.mrb[77].mxu0 }
 0x743   : > { %13538 = vst [vmem:[#allocation23_spill] sm:$0xff] %v9977_v12  ;;  %v2257_v1 = vmax.f32 %v2255_v26, %v9977_v12  ;;  %v9980_v53 = vpop.f32.mrb[78].mxu0 }
 0x744   : > { %v2221_v62 = vmax.f32 %v2219_v48, %v9980_v53  ;;  %v9983_v9 = vpop.f32.mrb[79].mxu0 }
 0x745   : > { %13539 = vst [vmem:[#allocation24_spill] sm:$0xff] %v9983_v9  ;;  %v2258_v61 = vmax.f32 %v2256_v36, %v9983_v9 }
 0x749   : > { %v9986_v49 = vpop.f32.mrb[80].mxu0 }
 0x74a   : > { %v2222_v25 = vmax.f32 %v2220_v51, %v9986_v49  ;;  %v9989_v16 = vpop.f32.mrb[81].mxu0 }
 0x74b   : > { %13540 = vst [vmem:[#allocation25_spill] sm:$0xff] %v9989_v16  ;;  %v2259_v37 = vmax.f32 %v2257_v1, %v9989_v16  ;;  %v9992_v18 = vpop.f32.mrb[82].mxu0 }
 0x74c   : > { %v2223_v26 = vmax.f32 %v2221_v62, %v9992_v18  ;;  %v9995_v46 = vpop.f32.mrb[83].mxu0 }
 0x74d   : > { %13541 = vst [vmem:[#allocation26_spill] sm:$0xff] %v9995_v46  ;;  %v2260_v48 = vmax.f32 %v2258_v61, %v9995_v46 }
 0x751   : > { %v9998_v38 = vpop.f32.mrb[84].mxu0 }
 0x752   : > { %v2224_v36 = vmax.f32 %v2222_v25, %v9998_v38  ;;  %v10001_v41 = vpop.f32.mrb[85].mxu0 }
 0x753   : > { %13542 = vst [vmem:[#allocation27_spill] sm:$0xff] %v10001_v41  ;;  %v2261_v51 = vmax.f32 %v2259_v37, %v10001_v41  ;;  %v10004_v34 = vpop.f32.mrb[86].mxu0 }
 0x754   : > { %v2225_v1 = vmax.f32 %v2223_v26, %v10004_v34  ;;  %v10007_v16 = vpop.f32.mrb[87].mxu0 }
 0x755   : > { %13543 = vst [vmem:[#allocation28_spill] sm:$0xff] %v10007_v16  ;;  %v2262_v62 = vmax.f32 %v2260_v48, %v10007_v16 }
 0x759   : > { %v10010_v9 = vpop.f32.mrb[88].mxu0 }
 0x75a   : > { %v2226_v61 = vmax.f32 %v2224_v36, %v10010_v9  ;;  %v10013_v46 = vpop.f32.mrb[89].mxu0 }
 0x75b   : > { %13544 = vst [vmem:[#allocation29_spill] sm:$0xff] %v10013_v46  ;;  %v2263_v25 = vmax.f32 %v2261_v51, %v10013_v46  ;;  %v10016_v12 = vpop.f32.mrb[90].mxu0 }
 0x75c   : > { %v2227_v37 = vmax.f32 %v2225_v1, %v10016_v12  ;;  %v10019_v41 = vpop.f32.mrb[91].mxu0 }
 0x75d   : > { %13545 = vst [vmem:[#allocation95_spill] sm:$0xff] %v10019_v41  ;;  %v2264_v26 = vmax.f32 %v2262_v62, %v10019_v41 }
 0x761   : > { %v2191_v52 = vpop.f32.mrb[92].mxu0 }
 0x762   : > { %v2228_v43 = vmax.f32 %v2226_v61, %v2191_v52  ;;  %v10022_v40 = vpop.f32.mrb[93].mxu0 }
 0x763   : > { %v2265_v48 = vmax.f32 %v2263_v25, %v10022_v40  ;;  %v2195_v16 = vpop.f32.mrb[94].mxu0 }
 0x764   : > { %v2229_v36 = vmax.f32 %v2227_v37, %v2195_v16  ;;  %v2197_v2 = vpop.f32.mrb[95].mxu0 }
 0x765   : > { %v2266_v56 = vmax.f32 %v2264_v26, %v2197_v2 }
 0x766   : > { %v2230_v8 = vmax.f32 %v2228_v43, %v2229_v36  ;;  %v13550_v36 = vld [vmem:[#allocation32_spill] sm:$0xff] }
 0x767   : > { %v2267_v51 = vmax.f32 %v2265_v48, %v2266_v56 }
 0x768   : > { %v2231_v46 = vrot.slane %v2230_v8, 4 }
 0x769   : > { %v2268_v6 = vrot.slane %v2267_v51, 4 }
 0x76a   : > { %v2232_v10 = vmax.f32 %v2230_v8, %v2231_v46 }
 0x76b   : > { %v2269_v1 = vmax.f32 %v2267_v51, %v2268_v6  ;;  %v13551_v51 = vld [vmem:[#allocation81_spill] sm:$0xff] }
 0x76c   : > { %v2233_v47 = vrot.slane %v2232_v10, 2 }
 0x76d   : > { %v2270_v33 = vrot.slane %v2269_v1, 2 }
 0x76e   : > { %v2234_v35 = vmax.f32 %v2232_v10, %v2233_v47 }
 0x76f   : > { %v2271_v62 = vmax.f32 %v2269_v1, %v2270_v33  ;;  %v13552_v1 = vld [vmem:[#allocation14_spill] sm:$0xff] }
 0x770   : > { %v2235_v41 = vrot.slane %v2234_v35, 1 }
 0x771   : > { %v2272_v14 = vrot.slane %v2271_v62, 1 }
 0x772   : > { %v10025_v61 = vmax.f32 %v2234_v35, %v2235_v41 }
 0x773   : > { %v10063_v48 = vmax.f32 %v2271_v62, %v2272_v14 }
 0x774   : > { %13546 = vst [vmem:[#allocation96_spill] sm:$0xff] %v10025_v61  ;;  %v2334_v25 = vsub.f32 %v2191_v52, %v10025_v61  ;;  %v2336_v37 = vsub.f32 %v2195_v16, %v10025_v61  ;;  %v2284_v52 = vsub.f32 %v9871_v19, %v10025_v61  ;;  %v2286_v16 = vsub.f32 %v9878_v4, %v10025_v61 }
 0x775   : > { %v2288_v47 = vsub.f32 %v9884_v57, %v10025_v61  ;;  %v2290_v41 = vsub.f32 %v9890_v28, %v10025_v61  ;;  %v2292_v33 = vsub.f32 %v9896_v20, %v10025_v61  ;;  %v2294_v46 = vsub.f32 %v9902_v23, %v10025_v61 }
 0x776   : > { %v10041_v10 = vpack.c.bf16 %v2336_v37, %v2334_v25  ;;  %v2296_v19 = vsub.f32 %v9908_v30, %v10025_v61  ;;  %v2298_v26 = vsub.f32 %v9914_v55, %v10025_v61  ;;  %v2300_v4 = vsub.f32 %v9920_v21, %v10025_v61 }
 0x777   : > { %v2302_v57 = vsub.f32 %v9926_v58, %v10025_v61  ;;  %v2304_v28 = vsub.f32 %v9932_v0, %v10025_v61  ;;  %v2306_v23 = vsub.f32 %v9938_v22, %v10025_v61  ;;  %v2308_v30 = vsub.f32 %v9944_v63, %v10025_v61 }
 0x778   : > { %13547 = vst [vmem:[#allocation97_spill] sm:$0xff] %v10041_v10  ;;  %v2310_v55 = vsub.f32 %v9950_v29, %v10025_v61  ;;  %v2312_v21 = vsub.f32 %v9956_v45, %v10025_v61  ;;  %v2314_v58 = vsub.f32 %v9962_v50, %v10025_v61  ;;  %v2316_v0 = vsub.f32 %v9968_v44, %v10025_v61 }
 0x779   : > { %v2318_v14 = vsub.f32 %v9974_v59, %v10025_v61  ;;  %v2320_v22 = vsub.f32 %v9980_v53, %v10025_v61  ;;  %v2322_v63 = vsub.f32 %v9986_v49, %v10025_v61  ;;  %v2324_v29 = vsub.f32 %v9992_v18, %v10025_v61 }
 0x77a   : > { %v2326_v45 = vsub.f32 %v9998_v38, %v10025_v61  ;;  %v2328_v50 = vsub.f32 %v10004_v34, %v10025_v61  ;;  %v2330_v44 = vsub.f32 %v10010_v9, %v10025_v61  ;;  %v2332_v59 = vsub.f32 %v10016_v12, %v10025_v61 }
 0x77b   : > { %v2335_v53 = vsub.f32 %v10022_v40, %v10063_v48  ;;  %v2337_v49 = vsub.f32 %v2197_v2, %v10063_v48  ;;  %v2275_v20 = vsub.f32 %v9844_v42, %v10063_v48  ;;  %v2277_v38 = vsub.f32 %v9848_v27, %v10063_v48 }
 0x77c   : > { %v2279_v34 = vsub.f32 %v9852_v5, %v10063_v48  ;;  %v2281_v9 = vsub.f32 %v9860_v54, %v10063_v48  ;;  %v2283_v12 = vsub.f32 %v9868_v3, %v10063_v48  ;;  %v2285_v40 = vsub.f32 %v9874_v32, %v10063_v48  ;;  %v13549_v54 = vld [vmem:[#allocation79_spill] sm:$0xff] }
 0x77d   : > { %v2287_v2 = vsub.f32 %v9881_v15, %v10063_v48  ;;  %v10110_v18 = vpack.c.bf16 %v2337_v49, %v2335_v53  ;;  %v2289_v42 = vsub.f32 %v9887_v31, %v10063_v48  ;;  %v2291_v27 = vsub.f32 %v9893_v17, %v10063_v48  ;;  %v13553_v31 = vld [vmem:[#allocation16_spill] sm:$0xff]  ;;  %v13554_v17 = vld [vmem:[#allocation15_spill] sm:$0xff]  ;;  %v13556_v49 = vld [vmem:[#allocation17_spill] sm:$0xff] }
 0x77e   : > { %v2293_v5 = vsub.f32 %v9899_v7, %v10063_v48  ;;  %v2295_v3 = vsub.f32 %v13549_v54, %v10063_v48  ;;  %v2297_v32 = vsub.f32 %v13550_v36, %v10063_v48  ;;  %v2299_v15 = vsub.f32 %v13551_v51, %v10063_v48  ;;  %v13555_v7 = vld [vmem:[#allocation18_spill] sm:$0xff]  ;;  %v13557_v36 = vld [vmem:[#allocation19_spill] sm:$0xff]  ;;  %v13558_v51 = vld [vmem:[#allocation20_spill] sm:$0xff] }
 0x77f   : > { %13548 = vst [vmem:[#allocation98_spill] sm:$0xff] %v10110_v18  ;;  %v2301_v62 = vsub.f32 %v13552_v1, %v10063_v48  ;;  %v2303_v25 = vsub.f32 %v13553_v31, %v10063_v48  ;;  %v2305_v37 = vsub.f32 %v13554_v17, %v10063_v48  ;;  %v2307_v53 = vsub.f32 %v13555_v7, %v10063_v48  ;;  %v13559_v1 = vld [vmem:[#allocation21_spill] sm:$0xff]  ;;  %v13560_v31 = vld [vmem:[#allocation22_spill] sm:$0xff]  ;;  %v13561_v17 = vld [vmem:[#allocation23_spill] sm:$0xff] }
 0x780   : > { %v2309_v54 = vsub.f32 %v13556_v49, %v10063_v48  ;;  %v2311_v35 = vsub.f32 %v13557_v36, %v10063_v48  ;;  %v2313_v6 = vsub.f32 %v13558_v51, %v10063_v48  ;;  %v2315_v8 = vsub.f32 %v13559_v1, %v10063_v48  ;;  %v13562_v7 = vld [vmem:[#allocation24_spill] sm:$0xff]  ;;  %v13563_v49 = vld [vmem:[#allocation25_spill] sm:$0xff]  ;;  %v13564_v36 = vld [vmem:[#allocation26_spill] sm:$0xff] }
 0x781   : > { %v2317_v56 = vsub.f32 %v13560_v31, %v10063_v48  ;;  %v2319_v43 = vsub.f32 %v13561_v17, %v10063_v48  ;;  %v2321_v10 = vsub.f32 %v13562_v7, %v10063_v48  ;;  %v2323_v18 = vsub.f32 %v13563_v49, %v10063_v48  ;;  %v13565_v51 = vld [vmem:[#allocation27_spill] sm:$0xff]  ;;  %v13566_v1 = vld [vmem:[#allocation28_spill] sm:$0xff]  ;;  %v13567_v31 = vld [vmem:[#allocation29_spill] sm:$0xff] }
 0x782   : > { %v2325_v39 = vsub.f32 %v13564_v36, %v10063_v48  ;;  %v2327_v13 = vsub.f32 %v13565_v51, %v10063_v48  ;;  %v2329_v60 = vsub.f32 %v13566_v1, %v10063_v48  ;;  %v2331_v24 = vsub.f32 %v13567_v31, %v10063_v48  ;;  %v13568_v17 = vld [vmem:[#allocation95_spill] sm:$0xff]  ;;  %v13569_v7 = vld [vmem:[#allocation96_spill] sm:$0xff]  ;;  %v13571_v36 = vld [vmem:[#allocation94_spill] sm:$0xff] }
 0x783   : > { %v2333_v61 = vsub.f32 %v13568_v17, %v10063_v48  ;;  %v13570_v49 = vsub.f32 %v9842_v11, %v13569_v7  ;;  %v13572_v51 = vsub.f32 %v13571_v36, %v13569_v7  ;;  %v13573_v31 = vld [vmem:[#allocation10_spill] sm:$0xff]  ;;  %v13575_v48 = vld [vmem:[#allocation9_spill] sm:$0xff] }
 0x784   : > { %v13574_v17 = vsub.f32 %v13573_v31, %v13569_v7  ;;  %v13576_v11 = vsub.f32 %v13575_v48, %v13569_v7  ;;  %v2344_v48 = vpack.c.bf16 %v2288_v47, %v2286_v16  ;;  %v10183_v16 = vpack.c.bf16 %v2316_v0, %v2314_v58 }
 0x785   : > { %v2338_v1 = vpack.c.bf16 %v13572_v51, %v13570_v49  ;;  %v13577_v49 = vld [vmem:[#allocation30_spill] sm:$0xff]  ;;  %v10185_v47 = vpack.c.bf16 %v2320_v22, %v2318_v14  ;;  %v10201_v58 = vpack.c.bf16 %v2317_v56, %v2315_v8  ;;  %v10203_v0 = vpack.c.bf16 %v2321_v10, %v2319_v43 }
 0x786   : > { %v2340_v36 = vpack.c.bf16 %v13576_v11, %v13574_v17  ;;  %v13578_v51 = vsub.f32 %v13577_v49, %v13569_v7  ;;  %v2346_v11 = vpack.c.bf16 %v2292_v33, %v2290_v41  ;;  %v10173_v17 = vpack.c.bf16 %v2296_v19, %v2294_v46 }
 0x787   : > { %v10175_v7 = vpack.c.bf16 %v2300_v4, %v2298_v26  ;;  %v10177_v49 = vpack.c.bf16 %v2304_v28, %v2302_v57  ;;  %v10187_v33 = vpack.c.bf16 %v2324_v29, %v2322_v63  ;;  %v10189_v41 = vpack.c.bf16 %v2328_v50, %v2326_v45 }
 0x788   : > { %v2342_v31 = vpack.c.bf16 %v2284_v52, %v13578_v51  ;;  %13579 = vst [vmem:[#allocation79_spill] sm:$0xff] %v10173_v17  ;;  %v10179_v51 = vpack.c.bf16 %v2308_v30, %v2306_v23  ;;  %v10181_v52 = vpack.c.bf16 %v2312_v21, %v2310_v55  ;;  %v10191_v19 = vpack.c.bf16 %v2332_v59, %v2330_v44 }
 0x789   : > { %v2339_v46 = vpack.c.bf16 %v2277_v38, %v2275_v20  ;;  %v2341_v17 = vpack.c.bf16 %v2281_v9, %v2279_v34  ;;  %v2343_v26 = vpack.c.bf16 %v2285_v40, %v2283_v12  ;;  %v2345_v4 = vpack.c.bf16 %v2289_v42, %v2287_v2 }
 0x78a   : > { %v2347_v57 = vpack.c.bf16 %v2293_v5, %v2291_v27  ;;  %v2349_v28 = vpack.c.bf16 %v2297_v32, %v2295_v3  ;;  %v10193_v23 = vpack.c.bf16 %v2301_v62, %v2299_v15  ;;  %v10195_v30 = vpack.c.bf16 %v2305_v37, %v2303_v25 }
 0x78b   : > { %v10197_v55 = vpack.c.bf16 %v2309_v54, %v2307_v53  ;;  %v10199_v21 = vpack.c.bf16 %v2313_v6, %v2311_v35  ;;  %v10205_v14 = vpack.c.bf16 %v2325_v39, %v2323_v18  ;;  %v10207_v22 = vpack.c.bf16 %v2329_v60, %v2327_v13 }
 0x78c   : > { %v10209_v63 = vpack.c.bf16 %v2333_v61, %v2331_v24  ;;  %v2371_v29 = vmul.bf16 1069105081, %v2338_v1  ;;  %v2374_v45 = vmul.bf16 1069105081, %v2339_v46  ;;  %v2377_v50 = vmul.bf16 1069105081, %v2340_v36 }
 0x78d   : > { %v2380_v44 = vmul.bf16 1069105081, %v2341_v17  ;;  %v2383_v59 = vmul.bf16 1069105081, %v2342_v31  ;;  %v2386_v20 = vmul.bf16 1069105081, %v2343_v26 }
 0x78e   : > { %7694 = vpow.bf16 %v2371_v29  ;;  %v2389_v56 = vmul.bf16 1069105081, %v2344_v48  ;;  %v2392_v43 = vmul.bf16 1069105081, %v2345_v4  ;;  %v2395_v39 = vmul.bf16 1069105081, %v2346_v11 }
 0x78f   : > { %7696 = vpow.bf16 %v2374_v45  ;;  %v2398_v60 = vmul.bf16 1069105081, %v2347_v57  ;;  %v13580_v61 = vld [vmem:[#allocation79_spill] sm:$0xff]  ;;  %v2404_v38 = vmul.bf16 1069105081, %v2349_v28 }
 0x790   : > { %7698 = vpow.bf16 %v2377_v50  ;;  %v2401_v8 = vmul.bf16 1069105081, %v13580_v61  ;;  %v2407_v3 = vmul.bf16 1069105081, %v10175_v7  ;;  %v2410_v62 = vmul.bf16 1069105081, %v10193_v23 }
 0x791   : > { %7700 = vpow.bf16 %v2380_v44  ;;  %v2413_v11 = vmul.bf16 1069105081, %v10177_v49  ;;  %v2416_v46 = vmul.bf16 1069105081, %v10195_v30  ;;  %v2419_v44 = vmul.bf16 1069105081, %v10179_v51 }
 0x792   : > { %7702 = vpow.bf16 %v2383_v59 }
 0x793   : > { %7704 = vpow.bf16 %v2386_v20  ;;  %v2422_v20 = vmul.bf16 1069105081, %v10197_v55 }
 0x794   : > { %7706 = vpow.bf16 %v2389_v56 }
 0x795   : > { %7708 = vpow.bf16 %v2392_v43 }
 0x796   : > { %7710 = vpow.bf16 %v2395_v39 }
 0x797   : > { %7712 = vpow.bf16 %v2398_v60 }
 0x798   : > { %7714 = vpow.bf16 %v2401_v8  ;;  %v2425_v8 = vmul.bf16 1069105081, %v10181_v52 }
 0x799   : > { %v7695_v24 = vpop.eup %7694  ;;  %7716 = vpow.bf16 %v2404_v38 }
 0x79a   : > { %v7697_v13 = vpop.eup %7696  ;;  %v2466_v6 = vunpack.c.l.bf16 %v7695_v24  ;;  %v2468_v35 = vunpack.c.h.bf16 %v7695_v24  ;;  %7718 = vpow.bf16 %v2407_v3 }
 0x79b   : > { %v7699_v10 = vpop.eup %7698  ;;  %v2467_v34 = vunpack.c.l.bf16 %v7697_v13  ;;  %v2469_v9 = vunpack.c.h.bf16 %v7697_v13  ;;  %2610 = vmatprep.subr.bf16.mxu1 %v7697_v13  ;;  %7720 = vpow.bf16 %v2410_v62 }
 0x79c   : > { %v7701_v12 = vpop.eup %7700  ;;  %v2470_v40 = vunpack.c.l.bf16 %v7699_v10  ;;  %v2530_v2 = vadd.f32 %v2468_v35, %v2466_v6  ;;  %2611 = vmatpush1.bf16.msra.mxu1 %v7695_v24  ;;  %v2472_v32 = vunpack.c.h.bf16 %v7699_v10  ;;  %7722 = vpow.bf16 %v2413_v11 }
 0x79d   : > { %v7703_v18 = vpop.eup %7702  ;;  %v2471_v42 = vunpack.c.l.bf16 %v7701_v12  ;;  %v2567_v27 = vadd.f32 %v2469_v9, %v2467_v34  ;;  %2612 = vmatprep.subr.bf16.mxu1 %v7701_v12  ;;  %v2473_v25 = vunpack.c.h.bf16 %v7701_v12  ;;  %7724 = vpow.bf16 %v2416_v46 }
 0x79e   : > { %v7705_v5 = vpop.eup %7704  ;;  %v2531_v15 = vadd.f32 %v2530_v2, %v2470_v40  ;;  %v2474_v53 = vunpack.c.l.bf16 %v7703_v18  ;;  %v2476_v17 = vunpack.c.h.bf16 %v7703_v18  ;;  %7726 = vpow.bf16 %v2419_v44 }
 0x79f   : > { %v2568_v37 = vadd.f32 %v2567_v27, %v2471_v42  ;;  %v7707_v1 = vpop.eup %7706  ;;  %v2475_v36 = vunpack.c.l.bf16 %v7705_v5  ;;  %v2477_v26 = vunpack.c.h.bf16 %v7705_v5  ;;  %7728 = vpow.bf16 %v2422_v20 }
 0x7a0   : > { %v2532_v54 = vadd.f32 %v2531_v15, %v2472_v32  ;;  %2613 = vmatpush1.bf16.msra.mxu1 %v7699_v10  ;;  %v7709_v48 = vpop.eup %7708  ;;  %v2478_v57 = vunpack.c.l.bf16 %v7707_v1  ;;  %v2480_v59 = vunpack.c.h.bf16 %v7707_v1  ;;  %v2428_v35 = vmul.bf16 1069105081, %v10199_v21 }
 0x7a1   : > { %v2569_v31 = vadd.f32 %v2568_v37, %v2473_v25  ;;  %2614 = vmatprep.subr.bf16.mxu1 %v7705_v5  ;;  %v7711_v23 = vpop.eup %7710  ;;  %v2479_v29 = vunpack.c.l.bf16 %v7709_v48  ;;  %v2481_v56 = vunpack.c.h.bf16 %v7709_v48  ;;  %7730 = vpow.bf16 %v2425_v8 }
 0x7a2   : > { %v2533_v7 = vadd.f32 %v2532_v54, %v2474_v53  ;;  %v7713_v50 = vpop.eup %7712  ;;  %v2482_v43 = vunpack.c.l.bf16 %v7711_v23  ;;  %v2484_v6 = vunpack.c.h.bf16 %v7711_v23  ;;  %7732 = vpow.bf16 %v2428_v35 }
 0x7a3   : > { %v2570_v4 = vadd.f32 %v2569_v31, %v2475_v36  ;;  %v7715_v60 = vpop.eup %7714  ;;  %v2483_v24 = vunpack.c.l.bf16 %v7713_v50  ;;  %v2485_v10 = vunpack.c.h.bf16 %v7713_v50  ;;  %v2434_v27 = vmul.bf16 1069105081, %v10201_v58 }
 0x7a4   : > { %v2534_v28 = vadd.f32 %v2533_v7, %v2476_v17  ;;  %2615 = vmatpush1.bf16.msra.mxu1 %v7703_v18  ;;  %v7717_v61 = vpop.eup %7716  ;;  %v2486_v38 = vunpack.c.l.bf16 %v7715_v60  ;;  %v2431_v18 = vmul.bf16 1069105081, %v10183_v16  ;;  %v2488_v42 = vunpack.c.h.bf16 %v7715_v60 }
 0x7a5   : > { %v2571_v45 = vadd.f32 %v2570_v4, %v2477_v26  ;;  %2616 = vmatprep.subr.bf16.mxu1 %v7709_v48  ;;  %v7719_v9 = vpop.eup %7718  ;;  %v2487_v12 = vunpack.c.l.bf16 %v7717_v61  ;;  %v2489_v5 = vunpack.c.h.bf16 %v7717_v61  ;;  %v2437_v53 = vmul.bf16 1069105081, %v10185_v47 }
 0x7a6   : > { %v2535_v49 = vadd.f32 %v2534_v28, %v2478_v57  ;;  %v7721_v2 = vpop.eup %7720  ;;  %v2490_v3 = vunpack.c.l.bf16 %v7719_v9  ;;  %7734 = vpow.bf16 %v2431_v18  ;;  %v2492_v54 = vunpack.c.h.bf16 %v7719_v9  ;;  %v13581_v18 = vld [vmem:[#allocation98_spill] sm:$0xff] }
 0x7a7   : > { %v2572_v30 = vadd.f32 %v2571_v45, %v2479_v29  ;;  %v7723_v15 = vpop.eup %7722  ;;  %v2491_v62 = vunpack.c.l.bf16 %v7721_v2  ;;  %7736 = vpow.bf16 %v2434_v27  ;;  %v2493_v36 = vunpack.c.h.bf16 %v7721_v2 }
 0x7a8   : > { %v2536_v39 = vadd.f32 %v2535_v49, %v2480_v59  ;;  %2617 = vmatpush1.bf16.msra.mxu1 %v7707_v1  ;;  %v7725_v37 = vpop.eup %7724  ;;  %v2440_v1 = vmul.bf16 1069105081, %v10203_v0  ;;  %v2494_v31 = vunpack.c.l.bf16 %v7723_v15  ;;  %7738 = vpow.bf16 %v2437_v53  ;;  %v13582_v53 = vld [vmem:[#allocation97_spill] sm:$0xff] }
 0x7a9   : > { %v2573_v13 = vadd.f32 %v2572_v30, %v2481_v56  ;;  %2618 = vmatprep.subr.bf16.mxu1 %v7713_v50  ;;  %v7727_v11 = vpop.eup %7726  ;;  %v2495_v17 = vunpack.c.l.bf16 %v7725_v37  ;;  %v2443_v26 = vmul.bf16 1069105081, %v10187_v33  ;;  %v2496_v4 = vunpack.c.h.bf16 %v7723_v15 }
 0x7aa   : > { %v2537_v51 = vadd.f32 %v2536_v39, %v2482_v43  ;;  %v7729_v46 = vpop.eup %7728  ;;  %7740 = vpow.bf16 %v2440_v1  ;;  %v2446_v57 = vmul.bf16 1069105081, %v10205_v14  ;;  %v2497_v28 = vunpack.c.h.bf16 %v7725_v37 }
 0x7ab   : > { %v2574_v55 = vadd.f32 %v2573_v13, %v2483_v24  ;;  %v2499_v50 = vunpack.c.l.bf16 %v7729_v46  ;;  %7742 = vpow.bf16 %v2443_v26  ;;  %v2449_v49 = vmul.bf16 1069105081, %v10189_v41 }
 0x7ac   : > { %v2538_v34 = vadd.f32 %v2537_v51, %v2484_v6  ;;  %2619 = vmatpush1.bf16.msra.mxu1 %v7711_v23  ;;  %v2498_v23 = vunpack.c.l.bf16 %v7727_v11  ;;  %v7731_v45 = vpop.eup %7730  ;;  %v2500_v20 = vunpack.c.h.bf16 %v7727_v11  ;;  %7744 = vpow.bf16 %v2446_v57 }
 0x7ad   : > { %v2575_v40 = vadd.f32 %v2574_v55, %v2485_v10  ;;  %2620 = vmatprep.subr.bf16.mxu1 %v7717_v61  ;;  %v7733_v59 = vpop.eup %7732  ;;  %v2452_v56 = vmul.bf16 1069105081, %v10207_v22  ;;  %v2501_v30 = vunpack.c.h.bf16 %v7729_v46  ;;  %v2502_v43 = vunpack.c.l.bf16 %v7731_v45 }
 0x7ae   : > { %v2539_v52 = vadd.f32 %v2538_v34, %v2486_v38  ;;  %v2503_v24 = vunpack.c.l.bf16 %v7733_v59  ;;  %7746 = vpow.bf16 %v2449_v49  ;;  %v2455_v8 = vmul.bf16 1069105081, %v10191_v19 }
 0x7af   : > { %v2576_v21 = vadd.f32 %v2575_v40, %v2487_v12  ;;  %v2504_v6 = vunpack.c.h.bf16 %v7731_v45  ;;  %7748 = vpow.bf16 %v2452_v56  ;;  %v2458_v51 = vmul.bf16 1069105081, %v10209_v63 }
 0x7b0   : > { %v2540_v32 = vadd.f32 %v2539_v52, %v2488_v42  ;;  %2621 = vmatpush1.bf16.msra.mxu1 %v7715_v60  ;;  %v2505_v35 = vunpack.c.h.bf16 %v7733_v59  ;;  %7750 = vpow.bf16 %v2455_v8  ;;  %v2464_v19 = vmul.bf16 1069105081, %v13581_v18  ;;  %v13593_v18 = vld [vmem:[#allocation39_spill] sm:$0xff] }
 0x7b1   : > { %v2577_v25 = vadd.f32 %v2576_v21, %v2489_v5  ;;  %2622 = vmatprep.subr.bf16.mxu1 %v7721_v2  ;;  %v7735_v60 = vpop.eup %7734  ;;  %7752 = vpow.bf16 %v2458_v51  ;;  %v13584_v51 = vld [vmem:[#allocation34_spill] sm:$0xff] }
 0x7b2   : > { %v2541_v16 = vadd.f32 %v2540_v32, %v2490_v3  ;;  %v7737_v61 = vpop.eup %7736  ;;  %v2506_v10 = vunpack.c.l.bf16 %v7735_v60  ;;  %v2508_v40 = vunpack.c.h.bf16 %v7735_v60  ;;  %7754 = vpow.bf16 %v2464_v19  ;;  %v13594_v19 = vld [vmem:[#allocation42_spill] sm:$0xff] }
 0x7b3   : > { %v2578_v58 = vadd.f32 %v2577_v25, %v2491_v62  ;;  %v7739_v38 = vpop.eup %7738  ;;  %v2507_v34 = vunpack.c.l.bf16 %v7737_v61  ;;  %v2509_v42 = vunpack.c.h.bf16 %v7737_v61 }
 0x7b4   : > { %v2542_v48 = vadd.f32 %v2541_v16, %v2492_v54  ;;  %2623 = vmatpush1.bf16.msra.mxu1 %v7719_v9  ;;  %v2510_v27 = vunpack.c.l.bf16 %v7739_v38  ;;  %v2461_v54 = vmul.bf16 1069105081, %v13582_v53 }
 0x7b5   : > { %v2579_v7 = vadd.f32 %v2578_v58, %v2493_v36  ;;  %2624 = vmatprep.subr.bf16.mxu1 %v7725_v37  ;;  %v7741_v12 = vpop.eup %7740 }
 0x7b6   : > { %v2543_v47 = vadd.f32 %v2542_v48, %v2494_v31  ;;  %v7743_v5 = vpop.eup %7742  ;;  %v2511_v21 = vunpack.c.l.bf16 %v7741_v12  ;;  %v2513_v25 = vunpack.c.h.bf16 %v7741_v12  ;;  %7756 = vpow.bf16 %v2461_v54 }
 0x7b7   : > { %v2580_v0 = vadd.f32 %v2579_v7, %v2495_v17  ;;  %v7745_v32 = vpop.eup %7744  ;;  %v2514_v16 = vunpack.c.l.bf16 %v7743_v5 }
 0x7b8   : > { %v2544_v29 = vadd.f32 %v2543_v47, %v2496_v4  ;;  %2625 = vmatpush1.bf16.msra.mxu1 %v7723_v15  ;;  %v2512_v15 = vunpack.c.h.bf16 %v7739_v38  ;;  %v2515_v58 = vunpack.c.l.bf16 %v7745_v32  ;;  %v2517_v7 = vunpack.c.h.bf16 %v7745_v32 }
 0x7b9   : > { %v2581_v44 = vadd.f32 %v2580_v0, %v2497_v28  ;;  %2626 = vmatprep.subr.bf16.mxu1 %v7729_v46  ;;  %v7747_v36 = vpop.eup %7746 }
 0x7ba   : > { %v2545_v33 = vadd.f32 %v2544_v29, %v2498_v23  ;;  %v7749_v48 = vpop.eup %7748  ;;  %v2518_v26 = vunpack.c.l.bf16 %v7747_v36  ;;  %v2520_v23 = vunpack.c.h.bf16 %v7747_v36 }
 0x7bb   : > { %v2582_v14 = vadd.f32 %v2581_v44, %v2499_v50  ;;  %v7751_v47 = vpop.eup %7750  ;;  %v2519_v57 = vunpack.c.l.bf16 %v7749_v48 }
 0x7bc   : > { %v2546_v39 = vadd.f32 %v2545_v33, %v2500_v20  ;;  %2627 = vmatpush1.bf16.msra.mxu1 %v7727_v11  ;;  %v2516_v11 = vunpack.c.h.bf16 %v7743_v5  ;;  %v7753_v0 = vpop.eup %7752  ;;  %v2522_v44 = vunpack.c.l.bf16 %v7751_v47  ;;  %v2524_v56 = vunpack.c.h.bf16 %v7751_v47 }
 0x7bd   : > { %v2583_v13 = vadd.f32 %v2582_v14, %v2501_v30  ;;  %2628 = vmatprep.subr.bf16.mxu1 %v7733_v59  ;;  %v2523_v49 = vunpack.c.l.bf16 %v7753_v0  ;;  %v7755_v33 = vpop.eup %7754  ;;  %v2525_v14 = vunpack.c.h.bf16 %v7753_v0 }
 0x7be   : > { %v2547_v41 = vadd.f32 %v2546_v39, %v2502_v43 }
 0x7bf   : > { %v2584_v22 = vadd.f32 %v2583_v13, %v2503_v24 }
 0x7c0   : > { %v2548_v55 = vadd.f32 %v2547_v41, %v2504_v6  ;;  %2629 = vmatpush1.bf16.msra.mxu1 %v7731_v45  ;;  %v2521_v45 = vunpack.c.h.bf16 %v7749_v48  ;;  %v13583_v6 = vld [vmem:[#allocation13_spill] sm:$0xff] }
 0x7c1   : > { %v2585_v9 = vadd.f32 %v2584_v22, %v2505_v35  ;;  %2630 = vmatprep.subr.bf16.mxu1 %v7737_v61  ;;  %v7757_v13 = vpop.eup %7756  ;;  %v2529_v61 = vunpack.c.h.bf16 %v7755_v33  ;;  %v2606_v41 = vrot.slane %v13583_v6, 4  ;;  %v13585_v22 = vld [vmem:[#allocation35_spill] sm:$0xff] }
 0x7c2   : > { %v2549_v2 = vadd.f32 %v2548_v55, %v2506_v10  ;;  %v2736_v10 = vsel %vm1252_vm4, %v13585_v22, 0  ;;  %v13586_v55 = vmov 0   ;;  %v2528_v53 = vunpack.c.h.bf16 %v7757_v13 }
 0x7c3   : > { %v2586_v52 = vadd.f32 %v2585_v9, %v2507_v34  ;;  %v13588_v34 = vld [vmem:[#allocation36_spill] sm:$0xff]  ;;  %v13589_v9 = vld [vmem:[#allocation33_spill] sm:$0xff] }
 0x7c4   : > { %v2550_v63 = vadd.f32 %v2549_v2, %v2508_v40  ;;  %2631 = vmatpush1.bf16.msra.mxu1 %v7735_v60  ;;  %v2527_v60 = vunpack.c.l.bf16 %v7755_v33  ;;  %v13591_v40 = vld [vmem:[#allocation37_spill] sm:$0xff]  ;;  %v13592_v2 = vld [vmem:[#allocation40_spill] sm:$0xff] }
 0x7c5   : > { %v2587_v3 = vadd.f32 %v2586_v52, %v2509_v42  ;;  %2632 = vmatprep.subr.bf16.mxu1 %v7741_v12  ;;  %v13590_v12 = vld [vmem:[#allocation38_spill] sm:$0xff]  ;;  %v13595_v42 = vld [vmem:[#allocation41_spill] sm:$0xff]  ;;  %v13596_v52 = vld [vmem:[#allocation44_spill] sm:$0xff] }
 0x7c6   : > { %v2551_v62 = vadd.f32 %v2550_v63, %v2510_v27  ;;  %v13597_v27 = vld [vmem:[#allocation43_spill] sm:$0xff]  ;;  %v13598_v63 = vld [vmem:[#allocation46_spill] sm:$0xff] }
 0x7c7   : > { %v2588_v37 = vadd.f32 %v2587_v3, %v2511_v21  ;;  %v13600_v21 = vld [vmem:[#allocation47_spill] sm:$0xff]  ;;  %v13601_v3 = vld [vmem:[#allocation48_spill] sm:$0xff] }
 0x7c8   : > { %v2552_v1 = vadd.f32 %v2551_v62, %v2512_v15  ;;  %2633 = vmatpush1.bf16.msra.mxu1 %v7739_v38  ;;  %v13587_v38 = vld [vmem:[#allocation31_spill] sm:$0xff]  ;;  %v13603_v62 = vld [vmem:[#allocation49_spill] sm:$0xff] }
 0x7c9   : > { %v2589_v31 = vadd.f32 %v2588_v37, %v2513_v25  ;;  %2634 = vmatprep.subr.bf16.mxu1 %v7745_v32  ;;  %v13602_v32 = vld [vmem:[#allocation54_spill] sm:$0xff]  ;;  %v2526_v25 = vunpack.c.l.bf16 %v7757_v13 }
 0x7ca   : > { %v2553_v17 = vadd.f32 %v2552_v1, %v2514_v16  ;;  %v4073_v15 = vrot.slane %v13602_v32, 4 }
 0x7cb   : > { %v2590_v46 = vadd.f32 %v2589_v31, %v2515_v58 }
 0x7cc   : > { %2635 = vmatpush1.bf16.msra.mxu1 %v7743_v5  ;;  %v2554_v4 = vadd.f32 %v2553_v17, %v2516_v11  ;;  %v13599_v5 = vld [vmem:[#allocation45_spill] sm:$0xff] }
 0x7cd   : > { %2636 = vmatprep.subr.bf16.mxu1 %v7749_v48  ;;  %v2591_v28 = vadd.f32 %v2590_v46, %v2517_v7 }
 0x7ce   : > { %v2555_v29 = vadd.f32 %v2554_v4, %v2518_v26 }
 0x7cf   : > { %v2592_v50 = vadd.f32 %v2591_v28, %v2519_v57 }
 0x7d0   : > { %2637 = vmatpush1.bf16.msra.mxu1 %v7747_v36  ;;  %v2556_v59 = vadd.f32 %v2555_v29, %v2520_v23 }
 0x7d1   : > { %2638 = vmatprep.subr.bf16.mxu1 %v7753_v0  ;;  %v2593_v20 = vadd.f32 %v2592_v50, %v2521_v45 }
 0x7d2   : > { %v2557_v30 = vadd.f32 %v2556_v59, %v2522_v44 }
 0x7d3   : > { %v2594_v43 = vadd.f32 %v2593_v20, %v2523_v49 }
 0x7d4   : > { %2639 = vmatpush1.bf16.msra.mxu1 %v7751_v47  ;;  %v2558_v39 = vadd.f32 %v2557_v30, %v2524_v56 }
 0x7d5   : > { %2640 = vmatprep.subr.bf16.mxu1 %v7755_v33  ;;  %v2595_v24 = vadd.f32 %v2594_v43, %v2525_v14 }
 0x7d6   : > { %v2559_v37 = vadd.f32 %v2558_v39, %v2526_v25 }
 0x7d7   : > { %v2596_v8 = vadd.f32 %v2595_v24, %v2527_v60 }
 0x7d8   : > { %2641 = vmatpush1.bf16.msra.mxu1 %v7757_v13  ;;  %v2560_v54 = vadd.f32 %v2559_v37, %v2528_v53 }
 0x7d9   : > { %7388 = vmatprep.subr.msk.bf16.mxu1 %vm1252_vm4, %v13584_v51  ;;  %v2597_v35 = vadd.f32 %v2596_v8, %v2529_v61 }
 0x7da   : > { %v2561_v16 = vrot.slane %v2560_v54, 4 }
 0x7db   : > { %2643 = vmatmul.mubr.bf16.vlgmr.msra.gmra.mrb[88].mxu1 %v2606_v41  ;;  %v2598_v1 = vrot.slane %v2597_v35, 4 }
 0x7dc   : > { %2742 = vmatpush1.bf16.msra.mxu1 %v2736_v10  ;;  %2773 = vmatprep.mubr.bf16.mxu1 %v13586_v55  ;;  %v2562_v36 = vadd.f32 %v2561_v16, %v2560_v54 }
 0x7dd   : > { %v2599_v58 = vadd.f32 %v2598_v1, %v2597_v35 }
 0x7de   : > { %v2563_v31 = vrot.slane %v2562_v36, 2 }
 0x7df   : > { %v2600_v48 = vrot.slane %v2599_v58, 2 }
 0x7e0   : > { %v2564_v11 = vadd.f32 %v2563_v31, %v2562_v36 }
 0x7e1   : > { %v2601_v17 = vadd.f32 %v2600_v48, %v2599_v58 }
 0x7e2   : > { %v2565_v7 = vrot.slane %v2564_v11, 1 }
 0x7e3   : > { %7389 = vmatmul.mubr.msk.bf16.vlgmr.msra.gmra.mrb[92].mxu1 %vm1203_vm5, %v13587_v38  ;;  %v2602_v46 = vrot.slane %v2601_v17, 1 }
 0x7e4   : > { %2783 = vmatprep.mubr.bf16.mxu1 %v13586_v55  ;;  %v2566_v26 = vadd.f32 %v2565_v7, %v2564_v11 }
 0x7e5   : > { %v2603_v4 = vadd.f32 %v2602_v46, %v2601_v17 }
 0x7e6   : > { %7758 = vrcp.f32 %v2566_v26 }
 0x7e7   : > { %7760 = vrcp.f32 %v2603_v4 }
 0x7eb   : > { %7390 = vmatmul.mubr.msk.bf16.gmra.mrb[96].mxu1 %vm1203_vm5, %v13588_v34 }
 0x7ec   : > { %2793 = vmatprep.mubr.bf16.mxu1 %v13586_v55 }
 0x7f0   : > { %v7759_v47 = vpop.eup %7758 }
 0x7f1   : > { %v7761_v28 = vpop.eup %7760 }
 0x7f3   : > { %7391 = vmatmul.mubr.msk.bf16.gmra.mrb[100].mxu1 %vm1203_vm5, %v13589_v9 }
 0x7f4   : > { %2803 = vmatprep.mubr.bf16.mxu1 %v13586_v55 }
 0x7fb   : > { %7392 = vmatmul.mubr.msk.bf16.gmra.mrb[104].mxu1 %vm1203_vm5, %v13590_v12 }
 0x7fc   : > { %2813 = vmatprep.mubr.bf16.mxu1 %v13586_v55 }
 0x803   : > { %7393 = vmatmul.mubr.msk.bf16.gmra.mrb[108].mxu1 %vm1203_vm5, %v13591_v40 }
 0x804   : > { %2823 = vmatprep.mubr.bf16.mxu1 %v13586_v55 }
 0x80b   : > { %7394 = vmatmul.mubr.msk.bf16.gmra.mrb[112].mxu1 %vm1203_vm5, %v13592_v2 }
 0x80c   : > { %2833 = vmatprep.mubr.bf16.mxu1 %v13586_v55 }
 0x813   : > { %7395 = vmatmul.mubr.msk.bf16.gmra.mrb[116].mxu1 %vm1203_vm5, %v13593_v18 }
 0x814   : > { %2843 = vmatprep.mubr.bf16.mxu1 %v13586_v55 }
 0x81b   : > { %7396 = vmatmul.mubr.msk.bf16.gmra.mrb[120].mxu1 %vm1203_vm5, %v13594_v19 }
 0x81c   : > { %2853 = vmatprep.mubr.bf16.mxu1 %v13586_v55 }
 0x823   : > { %7397 = vmatmul.mubr.msk.bf16.gmra.mrb[124].mxu1 %vm1203_vm5, %v13595_v42 }
 0x824   : > { %2863 = vmatprep.mubr.bf16.mxu1 %v13586_v55 }
 0x82b   : > { %7398 = vmatmul.mubr.msk.bf16.gmra.mrb[128].mxu1 %vm1203_vm5, %v13596_v52 }
 0x82c   : > { %2873 = vmatprep.mubr.bf16.mxu1 %v13586_v55 }
 0x833   : > { %7399 = vmatmul.mubr.msk.bf16.gmra.mrb[132].mxu1 %vm1203_vm5, %v13597_v27 }
 0x834   : > { %2883 = vmatprep.mubr.bf16.mxu1 %v13586_v55 }
 0x83b   : > { %7400 = vmatmul.mubr.msk.bf16.gmra.mrb[136].mxu1 %vm1203_vm5, %v13598_v63 }
 0x83c   : > { %2893 = vmatprep.mubr.bf16.mxu1 %v13586_v55 }
 0x843   : > { %7401 = vmatmul.mubr.msk.bf16.gmra.mrb[140].mxu1 %vm1203_vm5, %v13599_v5 }
 0x844   : > { %2903 = vmatprep.mubr.bf16.mxu1 %v13586_v55 }
 0x84b   : > { %7402 = vmatmul.mubr.msk.bf16.gmra.mrb[144].mxu1 %vm1203_vm5, %v13600_v21 }
 0x84c   : > { %2913 = vmatprep.mubr.bf16.mxu1 %v13586_v55 }
 0x853   : > { %7403 = vmatmul.mubr.msk.bf16.gmra.mrb[148].mxu1 %vm1203_vm5, %v13601_v3 }
 0x854   : > { %2923 = vmatprep.mubr.bf16.mxu1 %v13586_v55 }
 0x85b   : > { %7404 = vmatmul.mubr.msk.bf16.gmra.mrb[152].mxu1 %vm1203_vm5, %v13603_v62 }
 0x85c   : > { %4108 = vmatprep.mubr.bf16.mxu1 %v4073_v15 }
 0x8ae   : > { %v2644_v57 = vpop.f32.mrb[88].mxu1 }
 0x8af   : > { %v10286_v0 = vmul.f32 %v7759_v47, %v2644_v57  ;;  %v2646_v23 = vpop.f32.mrb[89].mxu1 }
 0x8b0   : > { %v10288_v29 = vmul.f32 %v7761_v28, %v2646_v23  ;;  %v2648_v45 = vpop.f32.mrb[90].mxu1 }
 0x8b1   : > { %13604 = vst [vmem:[#allocation32_spill] sm:$0xff] %v10286_v0  ;;  %v2649_v59 = vpop.f32.mrb[91].mxu1 }
 0x8b2   : > { %13605 = vst [vmem:[#allocation81_spill] sm:$0xff] %v10288_v29 }
 0x8b6   : > { %v10294_v33 = vpop.f32.mrb[92].mxu1 }
 0x8b7   : > { %v10296_v56 = vpop.f32.mrb[93].mxu1 }
 0x8b8   : > { %v10298_v30 = vpop.f32.mrb[94].mxu1 }
 0x8b9   : > { %13608 = vst [vmem:[#allocation14_spill] sm:$0xff] %v10298_v30  ;;  %v10300_v14 = vpop.f32.mrb[95].mxu1 }
 0x8be   : > { %v10302_v43 = vpop.f32.mrb[96].mxu1 }
 0x8bf   : > { %13609 = vst [vmem:[#allocation16_spill] sm:$0xff] %v10302_v43  ;;  %v2934_v39 = vmax.f32 %v10294_v33, %v10302_v43  ;;  %v10306_v60 = vpop.f32.mrb[97].mxu1 }
 0x8c0   : > { %v2971_v24 = vmax.f32 %v10296_v56, %v10306_v60  ;;  %v10310_v13 = vpop.f32.mrb[98].mxu1 }
 0x8c1   : > { %13610 = vst [vmem:[#allocation15_spill] sm:$0xff] %v10310_v13  ;;  %v2935_v61 = vmax.f32 %v10298_v30, %v10310_v13  ;;  %v10314_v8 = vpop.f32.mrb[99].mxu1 }
 0x8c2   : > { %v2972_v6 = vmax.f32 %v10300_v14, %v10314_v8 }
 0x8c6   : > { %v10318_v41 = vpop.f32.mrb[100].mxu1 }
 0x8c7   : > { %13611 = vst [vmem:[#allocation18_spill] sm:$0xff] %v10318_v41  ;;  %v2936_v35 = vmax.f32 %v2934_v39, %v10318_v41  ;;  %v10321_v10 = vpop.f32.mrb[101].mxu1 }
 0x8c8   : > { %v2973_v38 = vmax.f32 %v2971_v24, %v10321_v10  ;;  %v10324_v34 = vpop.f32.mrb[102].mxu1 }
 0x8c9   : > { %v2937_v9 = vmax.f32 %v2935_v61, %v10324_v34  ;;  %v10327_v12 = vpop.f32.mrb[103].mxu1 }
 0x8ca   : > { %v2974_v40 = vmax.f32 %v2972_v6, %v10327_v12 }
 0x8ce   : > { %v10330_v2 = vpop.f32.mrb[104].mxu1 }
 0x8cf   : > { %v2938_v18 = vmax.f32 %v2936_v35, %v10330_v2  ;;  %v10333_v19 = vpop.f32.mrb[105].mxu1 }
 0x8d0   : > { %v2975_v42 = vmax.f32 %v2973_v38, %v10333_v19  ;;  %v10336_v52 = vpop.f32.mrb[106].mxu1 }
 0x8d1   : > { %v2939_v27 = vmax.f32 %v2937_v9, %v10336_v52  ;;  %v10339_v63 = vpop.f32.mrb[107].mxu1 }
 0x8d2   : > { %v2976_v5 = vmax.f32 %v2974_v40, %v10339_v63 }
 0x8d6   : > { %v10342_v21 = vpop.f32.mrb[108].mxu1 }
 0x8d7   : > { %v2940_v3 = vmax.f32 %v2938_v18, %v10342_v21  ;;  %v10345_v32 = vpop.f32.mrb[109].mxu1 }
 0x8d8   : > { %v2977_v15 = vmax.f32 %v2975_v42, %v10345_v32  ;;  %v10348_v62 = vpop.f32.mrb[110].mxu1 }
 0x8d9   : > { %v2941_v25 = vmax.f32 %v2939_v27, %v10348_v62  ;;  %v10351_v37 = vpop.f32.mrb[111].mxu1 }
 0x8da   : > { %v2978_v53 = vmax.f32 %v2976_v5, %v10351_v37 }
 0x8de   : > { %v10354_v54 = vpop.f32.mrb[112].mxu1 }
 0x8df   : > { %v2942_v16 = vmax.f32 %v2940_v3, %v10354_v54  ;;  %v10357_v1 = vpop.f32.mrb[113].mxu1 }
 0x8e0   : > { %13612 = vst [vmem:[#allocation17_spill] sm:$0xff] %v10357_v1  ;;  %v2979_v36 = vmax.f32 %v2977_v15, %v10357_v1  ;;  %v10360_v58 = vpop.f32.mrb[114].mxu1 }
 0x8e1   : > { %v2943_v31 = vmax.f32 %v2941_v25, %v10360_v58  ;;  %v10363_v48 = vpop.f32.mrb[115].mxu1 }
 0x8e2   : > { %13613 = vst [vmem:[#allocation19_spill] sm:$0xff] %v10363_v48  ;;  %v2980_v11 = vmax.f32 %v2978_v53, %v10363_v48 }
 0x8e6   : > { %v10366_v17 = vpop.f32.mrb[116].mxu1 }
 0x8e7   : > { %v2944_v7 = vmax.f32 %v2942_v16, %v10366_v17  ;;  %v10369_v46 = vpop.f32.mrb[117].mxu1 }
 0x8e8   : > { %13614 = vst [vmem:[#allocation20_spill] sm:$0xff] %v10369_v46  ;;  %v2981_v26 = vmax.f32 %v2979_v36, %v10369_v46  ;;  %v10372_v4 = vpop.f32.mrb[118].mxu1 }
 0x8e9   : > { %v2945_v47 = vmax.f32 %v2943_v31, %v10372_v4  ;;  %v10375_v57 = vpop.f32.mrb[119].mxu1 }
 0x8ea   : > { %13615 = vst [vmem:[#allocation21_spill] sm:$0xff] %v10375_v57  ;;  %v2982_v28 = vmax.f32 %v2980_v11, %v10375_v57 }
 0x8ee   : > { %v10378_v23 = vpop.f32.mrb[120].mxu1 }
 0x8ef   : > { %v2946_v45 = vmax.f32 %v2944_v7, %v10378_v23  ;;  %v10381_v59 = vpop.f32.mrb[121].mxu1 }
 0x8f0   : > { %13616 = vst [vmem:[#allocation22_spill] sm:$0xff] %v10381_v59  ;;  %v2983_v39 = vmax.f32 %v2981_v26, %v10381_v59  ;;  %v10384_v24 = vpop.f32.mrb[122].mxu1 }
 0x8f1   : > { %v2947_v61 = vmax.f32 %v2945_v47, %v10384_v24  ;;  %v10387_v6 = vpop.f32.mrb[123].mxu1 }
 0x8f2   : > { %13617 = vst [vmem:[#allocation23_spill] sm:$0xff] %v10387_v6  ;;  %v2984_v35 = vmax.f32 %v2982_v28, %v10387_v6 }
 0x8f6   : > { %v10390_v38 = vpop.f32.mrb[124].mxu1 }
 0x8f7   : > { %v2948_v9 = vmax.f32 %v2946_v45, %v10390_v38  ;;  %v10393_v40 = vpop.f32.mrb[125].mxu1 }
 0x8f8   : > { %13618 = vst [vmem:[#allocation24_spill] sm:$0xff] %v10393_v40  ;;  %v2985_v18 = vmax.f32 %v2983_v39, %v10393_v40  ;;  %v10396_v42 = vpop.f32.mrb[126].mxu1 }
 0x8f9   : > { %v2949_v27 = vmax.f32 %v2947_v61, %v10396_v42  ;;  %v10399_v5 = vpop.f32.mrb[127].mxu1 }
 0x8fa   : > { %13619 = vst [vmem:[#allocation25_spill] sm:$0xff] %v10399_v5  ;;  %v2986_v3 = vmax.f32 %v2984_v35, %v10399_v5 }
 0x8fe   : > { %v10402_v15 = vpop.f32.mrb[128].mxu1 }
 0x8ff   : > { %v2950_v25 = vmax.f32 %v2948_v9, %v10402_v15  ;;  %v10405_v53 = vpop.f32.mrb[129].mxu1 }
 0x900   : > { %13620 = vst [vmem:[#allocation26_spill] sm:$0xff] %v10405_v53  ;;  %v2987_v16 = vmax.f32 %v2985_v18, %v10405_v53  ;;  %v10408_v36 = vpop.f32.mrb[130].mxu1 }
 0x901   : > { %v2951_v31 = vmax.f32 %v2949_v27, %v10408_v36  ;;  %v10411_v11 = vpop.f32.mrb[131].mxu1 }
 0x902   : > { %13621 = vst [vmem:[#allocation27_spill] sm:$0xff] %v10411_v11  ;;  %v2988_v7 = vmax.f32 %v2986_v3, %v10411_v11 }
 0x906   : > { %v10414_v26 = vpop.f32.mrb[132].mxu1 }
 0x907   : > { %v2952_v47 = vmax.f32 %v2950_v25, %v10414_v26  ;;  %v10417_v28 = vpop.f32.mrb[133].mxu1 }
 0x908   : > { %13622 = vst [vmem:[#allocation28_spill] sm:$0xff] %v10417_v28  ;;  %v2989_v45 = vmax.f32 %v2987_v16, %v10417_v28  ;;  %v10420_v39 = vpop.f32.mrb[134].mxu1 }
 0x909   : > { %v2953_v61 = vmax.f32 %v2951_v31, %v10420_v39  ;;  %v10423_v35 = vpop.f32.mrb[135].mxu1 }
 0x90a   : > { %13623 = vst [vmem:[#allocation29_spill] sm:$0xff] %v10423_v35  ;;  %v2990_v9 = vmax.f32 %v2988_v7, %v10423_v35 }
 0x90e   : > { %v10426_v18 = vpop.f32.mrb[136].mxu1 }
 0x90f   : > { %v2954_v27 = vmax.f32 %v2952_v47, %v10426_v18  ;;  %v10429_v3 = vpop.f32.mrb[137].mxu1 }
 0x910   : > { %13624 = vst [vmem:[#allocation95_spill] sm:$0xff] %v10429_v3  ;;  %v2991_v25 = vmax.f32 %v2989_v45, %v10429_v3  ;;  %v10432_v44 = vpop.f32.mrb[138].mxu1 }
 0x911   : > { %v2955_v16 = vmax.f32 %v2953_v61, %v10432_v44  ;;  %v10435_v20 = vpop.f32.mrb[139].mxu1 }
 0x912   : > { %13625 = vst [vmem:[#allocation96_spill] sm:$0xff] %v10435_v20  ;;  %v2992_v31 = vmax.f32 %v2990_v9, %v10435_v20 }
 0x916   : > { %v10438_v50 = vpop.f32.mrb[140].mxu1 }
 0x917   : > { %v2956_v7 = vmax.f32 %v2954_v27, %v10438_v50  ;;  %v10441_v0 = vpop.f32.mrb[141].mxu1 }
 0x918   : > { %13626 = vst [vmem:[#allocation94_spill] sm:$0xff] %v10441_v0  ;;  %v2993_v47 = vmax.f32 %v2991_v25, %v10441_v0  ;;  %v10444_v49 = vpop.f32.mrb[142].mxu1 }
 0x919   : > { %v2957_v45 = vmax.f32 %v2955_v16, %v10444_v49  ;;  %v10447_v29 = vpop.f32.mrb[143].mxu1 }
 0x91a   : > { %13627 = vst [vmem:[#allocation10_spill] sm:$0xff] %v10447_v29  ;;  %v2994_v61 = vmax.f32 %v2992_v31, %v10447_v29 }
 0x91e   : > { %v10450_v55 = vpop.f32.mrb[144].mxu1 }
 0x91f   : > { %v2958_v9 = vmax.f32 %v2956_v7, %v10450_v55  ;;  %v10453_v22 = vpop.f32.mrb[145].mxu1 }
 0x920   : > { %13628 = vst [vmem:[#allocation9_spill] sm:$0xff] %v10453_v22  ;;  %v2995_v27 = vmax.f32 %v2993_v47, %v10453_v22  ;;  %v10456_v51 = vpop.f32.mrb[146].mxu1 }
 0x921   : > { %v2959_v25 = vmax.f32 %v2957_v45, %v10456_v51  ;;  %v10459_v0 = vpop.f32.mrb[147].mxu1 }
 0x922   : > { %13629 = vst [vmem:[#allocation30_spill] sm:$0xff] %v10459_v0  ;;  %v2996_v16 = vmax.f32 %v2994_v61, %v10459_v0 }
 0x926   : > { %v10462_v20 = vpop.f32.mrb[148].mxu1 }
 0x927   : > { %v2960_v31 = vmax.f32 %v2958_v9, %v10462_v20  ;;  %v10465_v29 = vpop.f32.mrb[149].mxu1 }
 0x928   : > { %13630 = vst [vmem:[#allocation79_spill] sm:$0xff] %v10465_v29  ;;  %v2997_v7 = vmax.f32 %v2995_v27, %v10465_v29  ;;  %v10468_v3 = vpop.f32.mrb[150].mxu1 }
 0x929   : > { %v2961_v47 = vmax.f32 %v2959_v25, %v10468_v3  ;;  %v10471_v22 = vpop.f32.mrb[151].mxu1 }
 0x92a   : > { %13631 = vst [vmem:[#allocation98_spill] sm:$0xff] %v10471_v22  ;;  %v2998_v45 = vmax.f32 %v2996_v16, %v10471_v22 }
 0x92e   : > { %v2925_v35 = vpop.f32.mrb[152].mxu1 }
 0x92f   : > { %v2962_v28 = vmax.f32 %v2960_v31, %v2925_v35  ;;  %v10474_v11 = vpop.f32.mrb[153].mxu1 }
 0x930   : > { %v2999_v61 = vmax.f32 %v2997_v7, %v10474_v11  ;;  %v2929_v0 = vpop.f32.mrb[154].mxu1 }
 0x931   : > { %v2963_v9 = vmax.f32 %v2961_v47, %v2929_v0  ;;  %v2931_v53 = vpop.f32.mrb[155].mxu1 }
 0x932   : > { %v3000_v5 = vmax.f32 %v2998_v45, %v2931_v53 }
 0x933   : > { %v2964_v40 = vmax.f32 %v2962_v28, %v2963_v9  ;;  %v13636_v9 = vld [vmem:[#allocation19_spill] sm:$0xff] }
 0x934   : > { %v3001_v27 = vmax.f32 %v2999_v61, %v3000_v5 }
 0x935   : > { %v2965_v29 = vrot.slane %v2964_v40, 4 }
 0x936   : > { %v3002_v6 = vrot.slane %v3001_v27, 4 }
 0x937   : > { %v2966_v59 = vmax.f32 %v2964_v40, %v2965_v29 }
 0x938   : > { %v3003_v25 = vmax.f32 %v3001_v27, %v3002_v6  ;;  %v13637_v27 = vld [vmem:[#allocation20_spill] sm:$0xff] }
 0x939   : > { %v2967_v57 = vrot.slane %v2966_v59, 2 }
 0x93a   : > { %v3004_v46 = vrot.slane %v3003_v25, 2 }
 0x93b   : > { %v2968_v48 = vmax.f32 %v2966_v59, %v2967_v57 }
 0x93c   : > { %v3005_v16 = vmax.f32 %v3003_v25, %v3004_v46  ;;  %v13638_v25 = vld [vmem:[#allocation21_spill] sm:$0xff] }
 0x93d   : > { %v2969_v22 = vrot.slane %v2968_v48, 1 }
 0x93e   : > { %v3006_v1 = vrot.slane %v3005_v16, 1 }
 0x93f   : > { %v10477_v31 = vmax.f32 %v2968_v48, %v2969_v22 }
 0x940   : > { %v10515_v61 = vmax.f32 %v3005_v16, %v3006_v1 }
 0x941   : > { %13632 = vst [vmem:[#allocation97_spill] sm:$0xff] %v10477_v31  ;;  %v3068_v7 = vsub.f32 %v2925_v35, %v10477_v31  ;;  %v3070_v47 = vsub.f32 %v2929_v0, %v10477_v31  ;;  %v3018_v48 = vsub.f32 %v10324_v34, %v10477_v31  ;;  %v3020_v0 = vsub.f32 %v10330_v2, %v10477_v31 }
 0x942   : > { %v3022_v59 = vsub.f32 %v10336_v52, %v10477_v31  ;;  %v3024_v6 = vsub.f32 %v10342_v21, %v10477_v31  ;;  %v3026_v40 = vsub.f32 %v10348_v62, %v10477_v31  ;;  %v3028_v35 = vsub.f32 %v10354_v54, %v10477_v31 }
 0x943   : > { %v10493_v57 = vpack.c.bf16 %v3070_v47, %v3068_v7  ;;  %v3030_v34 = vsub.f32 %v10360_v58, %v10477_v31  ;;  %v3032_v45 = vsub.f32 %v10366_v17, %v10477_v31  ;;  %v3034_v2 = vsub.f32 %v10372_v4, %v10477_v31 }
 0x944   : > { %v3036_v52 = vsub.f32 %v10378_v23, %v10477_v31  ;;  %v3038_v21 = vsub.f32 %v10384_v24, %v10477_v31  ;;  %v3040_v62 = vsub.f32 %v10390_v38, %v10477_v31  ;;  %v3042_v54 = vsub.f32 %v10396_v42, %v10477_v31 }
 0x945   : > { %13633 = vst [vmem:[#allocation13_spill] sm:$0xff] %v10493_v57  ;;  %v3044_v58 = vsub.f32 %v10402_v15, %v10477_v31  ;;  %v3046_v17 = vsub.f32 %v10408_v36, %v10477_v31  ;;  %v3048_v4 = vsub.f32 %v10414_v26, %v10477_v31  ;;  %v3050_v23 = vsub.f32 %v10420_v39, %v10477_v31 }
 0x946   : > { %v3052_v1 = vsub.f32 %v10426_v18, %v10477_v31  ;;  %v3054_v24 = vsub.f32 %v10432_v44, %v10477_v31  ;;  %v3056_v38 = vsub.f32 %v10438_v50, %v10477_v31  ;;  %v3058_v42 = vsub.f32 %v10444_v49, %v10477_v31 }
 0x947   : > { %v3060_v15 = vsub.f32 %v10450_v55, %v10477_v31  ;;  %v3062_v36 = vsub.f32 %v10456_v51, %v10477_v31  ;;  %v3064_v26 = vsub.f32 %v10462_v20, %v10477_v31  ;;  %v3066_v39 = vsub.f32 %v10468_v3, %v10477_v31 }
 0x948   : > { %v3069_v44 = vsub.f32 %v10474_v11, %v10515_v61  ;;  %v3071_v50 = vsub.f32 %v2931_v53, %v10515_v61  ;;  %v3009_v49 = vsub.f32 %v10296_v56, %v10515_v61  ;;  %v3011_v55 = vsub.f32 %v10300_v14, %v10515_v61 }
 0x949   : > { %v3013_v51 = vsub.f32 %v10306_v60, %v10515_v61  ;;  %v3015_v20 = vsub.f32 %v10314_v8, %v10515_v61  ;;  %v3017_v18 = vsub.f32 %v10321_v10, %v10515_v61  ;;  %v3019_v11 = vsub.f32 %v10327_v12, %v10515_v61  ;;  %v13635_v8 = vld [vmem:[#allocation17_spill] sm:$0xff] }
 0x94a   : > { %v3021_v53 = vsub.f32 %v10333_v19, %v10515_v61  ;;  %v10562_v3 = vpack.c.bf16 %v3071_v50, %v3069_v44  ;;  %v3023_v56 = vsub.f32 %v10339_v63, %v10515_v61  ;;  %v3025_v14 = vsub.f32 %v10345_v32, %v10515_v61  ;;  %v13639_v63 = vld [vmem:[#allocation22_spill] sm:$0xff]  ;;  %v13640_v32 = vld [vmem:[#allocation23_spill] sm:$0xff]  ;;  %v13642_v50 = vld [vmem:[#allocation25_spill] sm:$0xff] }
 0x94b   : > { %v3027_v60 = vsub.f32 %v10351_v37, %v10515_v61  ;;  %v3029_v10 = vsub.f32 %v13635_v8, %v10515_v61  ;;  %v3031_v12 = vsub.f32 %v13636_v9, %v10515_v61  ;;  %v3033_v19 = vsub.f32 %v13637_v27, %v10515_v61  ;;  %v13641_v37 = vld [vmem:[#allocation24_spill] sm:$0xff]  ;;  %v13643_v9 = vld [vmem:[#allocation26_spill] sm:$0xff]  ;;  %v13644_v27 = vld [vmem:[#allocation27_spill] sm:$0xff] }
 0x94c   : > { %13634 = vst [vmem:[#allocation31_spill] sm:$0xff] %v10562_v3  ;;  %v3035_v16 = vsub.f32 %v13638_v25, %v10515_v61  ;;  %v3037_v7 = vsub.f32 %v13639_v63, %v10515_v61  ;;  %v3039_v47 = vsub.f32 %v13640_v32, %v10515_v61  ;;  %v3041_v44 = vsub.f32 %v13641_v37, %v10515_v61  ;;  %v13645_v25 = vld [vmem:[#allocation28_spill] sm:$0xff]  ;;  %v13646_v63 = vld [vmem:[#allocation29_spill] sm:$0xff]  ;;  %v13647_v32 = vld [vmem:[#allocation95_spill] sm:$0xff] }
 0x94d   : > { %v3043_v8 = vsub.f32 %v13642_v50, %v10515_v61  ;;  %v3045_v22 = vsub.f32 %v13643_v9, %v10515_v61  ;;  %v3047_v46 = vsub.f32 %v13644_v27, %v10515_v61  ;;  %v3049_v29 = vsub.f32 %v13645_v25, %v10515_v61  ;;  %v13648_v37 = vld [vmem:[#allocation96_spill] sm:$0xff]  ;;  %v13649_v50 = vld [vmem:[#allocation94_spill] sm:$0xff]  ;;  %v13651_v27 = vld [vmem:[#allocation9_spill] sm:$0xff] }
 0x94e   : > { %v3051_v5 = vsub.f32 %v13646_v63, %v10515_v61  ;;  %v3053_v28 = vsub.f32 %v13647_v32, %v10515_v61  ;;  %v3055_v57 = vsub.f32 %v13648_v37, %v10515_v61  ;;  %v3057_v3 = vsub.f32 %v13649_v50, %v10515_v61  ;;  %v13650_v9 = vld [vmem:[#allocation10_spill] sm:$0xff]  ;;  %v13653_v63 = vld [vmem:[#allocation79_spill] sm:$0xff]  ;;  %v13655_v37 = vld [vmem:[#allocation97_spill] sm:$0xff] }
 0x94f   : > { %v3059_v41 = vsub.f32 %v13650_v9, %v10515_v61  ;;  %v3061_v13 = vsub.f32 %v13651_v27, %v10515_v61  ;;  %v13652_v25 = vld [vmem:[#allocation30_spill] sm:$0xff]  ;;  %v3065_v30 = vsub.f32 %v13653_v63, %v10515_v61  ;;  %v13656_v50 = vsub.f32 %v10294_v33, %v13655_v37  ;;  %v13659_v63 = vld [vmem:[#allocation16_spill] sm:$0xff] }
 0x950   : > { %v3063_v43 = vsub.f32 %v13652_v25, %v10515_v61  ;;  %v13654_v32 = vld [vmem:[#allocation98_spill] sm:$0xff] }
 0x951   : > { %v3067_v31 = vsub.f32 %v13654_v32, %v10515_v61  ;;  %v13657_v9 = vld [vmem:[#allocation14_spill] sm:$0xff]  ;;  %v13660_v32 = vsub.f32 %v13659_v63, %v13655_v37  ;;  %v13661_v61 = vld [vmem:[#allocation15_spill] sm:$0xff] }
 0x952   : > { %v13658_v27 = vsub.f32 %v13657_v9, %v13655_v37  ;;  %v13662_v33 = vsub.f32 %v13661_v61, %v13655_v37  ;;  %v3078_v61 = vpack.c.bf16 %v3022_v59, %v3020_v0  ;;  %v10635_v0 = vpack.c.bf16 %v3050_v23, %v3048_v4 }
 0x953   : > { %v10637_v59 = vpack.c.bf16 %v3054_v24, %v3052_v1  ;;  %v10653_v4 = vpack.c.bf16 %v3051_v5, %v3049_v29  ;;  %v10655_v23 = vpack.c.bf16 %v3055_v57, %v3053_v28  ;;  %v10657_v1 = vpack.c.bf16 %v3059_v41, %v3057_v3 }
 0x954   : > { %v3072_v25 = vpack.c.bf16 %v13658_v27, %v13656_v50  ;;  %v3074_v9 = vpack.c.bf16 %v13662_v33, %v13660_v32  ;;  %v13663_v27 = vld [vmem:[#allocation18_spill] sm:$0xff]  ;;  %v3080_v32 = vpack.c.bf16 %v3026_v40, %v3024_v6  ;;  %v10625_v33 = vpack.c.bf16 %v3030_v34, %v3028_v35 }
 0x955   : > { %v13664_v50 = vsub.f32 %v13663_v27, %v13655_v37  ;;  %v10627_v27 = vpack.c.bf16 %v3034_v2, %v3032_v45  ;;  %v10629_v37 = vpack.c.bf16 %v3038_v21, %v3036_v52  ;;  %v10639_v6 = vpack.c.bf16 %v3058_v42, %v3056_v38 }
 0x956   : > { %13665 = vst [vmem:[#allocation36_spill] sm:$0xff] %v10625_v33  ;;  %v10641_v40 = vpack.c.bf16 %v3062_v36, %v3060_v15  ;;  %v10643_v34 = vpack.c.bf16 %v3066_v39, %v3064_v26  ;;  %v3073_v35 = vpack.c.bf16 %v3011_v55, %v3009_v49  ;;  %v3075_v33 = vpack.c.bf16 %v3015_v20, %v3013_v51 }
 0x957   : > { %v3076_v63 = vpack.c.bf16 %v3018_v48, %v13664_v50  ;;  %v10631_v48 = vpack.c.bf16 %v3042_v54, %v3040_v62  ;;  %v10633_v50 = vpack.c.bf16 %v3046_v17, %v3044_v58  ;;  %v3077_v45 = vpack.c.bf16 %v3019_v11, %v3017_v18 }
 0x958   : > { %v3079_v2 = vpack.c.bf16 %v3023_v56, %v3021_v53  ;;  %v3081_v52 = vpack.c.bf16 %v3027_v60, %v3025_v14  ;;  %v3083_v21 = vpack.c.bf16 %v3031_v12, %v3029_v10  ;;  %v10645_v62 = vpack.c.bf16 %v3035_v16, %v3033_v19 }
 0x959   : > { %v10647_v54 = vpack.c.bf16 %v3039_v47, %v3037_v7  ;;  %v10649_v58 = vpack.c.bf16 %v3043_v8, %v3041_v44  ;;  %v10651_v17 = vpack.c.bf16 %v3047_v46, %v3045_v22  ;;  %v10659_v24 = vpack.c.bf16 %v3063_v43, %v3061_v13 }
 0x95a   : > { %v10661_v38 = vpack.c.bf16 %v3067_v31, %v3065_v30  ;;  %v3105_v42 = vmul.bf16 1069105081, %v3072_v25  ;;  %v3108_v15 = vmul.bf16 1069105081, %v3073_v35  ;;  %v3111_v36 = vmul.bf16 1069105081, %v3074_v9 }
 0x95b   : > { %v3114_v26 = vmul.bf16 1069105081, %v3075_v33  ;;  %v3117_v39 = vmul.bf16 1069105081, %v3076_v63  ;;  %v3120_v49 = vmul.bf16 1069105081, %v3077_v45 }
 0x95c   : > { %7762 = vpow.bf16 %v3105_v42  ;;  %v3123_v5 = vmul.bf16 1069105081, %v3078_v61  ;;  %v3126_v28 = vmul.bf16 1069105081, %v3079_v2  ;;  %v3129_v41 = vmul.bf16 1069105081, %v3080_v32 }
 0x95d   : > { %7764 = vpow.bf16 %v3108_v15  ;;  %v3132_v43 = vmul.bf16 1069105081, %v3081_v52  ;;  %v13666_v31 = vld [vmem:[#allocation36_spill] sm:$0xff]  ;;  %v3138_v55 = vmul.bf16 1069105081, %v3083_v21 }
 0x95e   : > { %7766 = vpow.bf16 %v3111_v36  ;;  %v3135_v29 = vmul.bf16 1069105081, %v13666_v31  ;;  %v3141_v10 = vmul.bf16 1069105081, %v10627_v27  ;;  %v3144_v16 = vmul.bf16 1069105081, %v10645_v62 }
 0x95f   : > { %7768 = vpow.bf16 %v3114_v26  ;;  %v3147_v32 = vmul.bf16 1069105081, %v10629_v37  ;;  %v3150_v35 = vmul.bf16 1069105081, %v10647_v54  ;;  %v3153_v26 = vmul.bf16 1069105081, %v10631_v48 }
 0x960   : > { %7770 = vpow.bf16 %v3117_v39 }
 0x961   : > { %7772 = vpow.bf16 %v3120_v49  ;;  %v3156_v49 = vmul.bf16 1069105081, %v10649_v58 }
 0x962   : > { %7774 = vpow.bf16 %v3123_v5 }
 0x963   : > { %7776 = vpow.bf16 %v3126_v28 }
 0x964   : > { %7778 = vpow.bf16 %v3129_v41 }
 0x965   : > { %7780 = vpow.bf16 %v3132_v43 }
 0x966   : > { %7782 = vpow.bf16 %v3135_v29  ;;  %v3159_v29 = vmul.bf16 1069105081, %v10633_v50 }
 0x967   : > { %v7763_v30 = vpop.eup %7762  ;;  %7784 = vpow.bf16 %v3138_v55 }
 0x968   : > { %v7765_v13 = vpop.eup %7764  ;;  %v3200_v46 = vunpack.c.l.bf16 %v7763_v30  ;;  %v3202_v22 = vunpack.c.h.bf16 %v7763_v30  ;;  %7786 = vpow.bf16 %v3141_v10 }
 0x969   : > { %v7767_v57 = vpop.eup %7766  ;;  %v3201_v51 = vunpack.c.l.bf16 %v7765_v13  ;;  %v3203_v20 = vunpack.c.h.bf16 %v7765_v13  ;;  %3338 = vmatprep.subr.bf16.mxu0 %v7765_v13  ;;  %7788 = vpow.bf16 %v3144_v16 }
 0x96a   : > { %v7769_v18 = vpop.eup %7768  ;;  %v3204_v11 = vunpack.c.l.bf16 %v7767_v57  ;;  %v3264_v53 = vadd.f32 %v3202_v22, %v3200_v46  ;;  %3339 = vmatpush1.bf16.msra.mxu0 %v7763_v30  ;;  %v3206_v12 = vunpack.c.h.bf16 %v7767_v57  ;;  %7790 = vpow.bf16 %v3147_v32 }
 0x96b   : > { %v7771_v3 = vpop.eup %7770  ;;  %v3205_v56 = vunpack.c.l.bf16 %v7769_v18  ;;  %v3301_v14 = vadd.f32 %v3203_v20, %v3201_v51  ;;  %3340 = vmatprep.subr.bf16.mxu0 %v7769_v18  ;;  %v3207_v7 = vunpack.c.h.bf16 %v7769_v18  ;;  %7792 = vpow.bf16 %v3150_v35 }
 0x96c   : > { %v7773_v60 = vpop.eup %7772  ;;  %v3265_v19 = vadd.f32 %v3264_v53, %v3204_v11  ;;  %v3208_v44 = vunpack.c.l.bf16 %v7771_v3  ;;  %v3210_v33 = vunpack.c.h.bf16 %v7771_v3  ;;  %7794 = vpow.bf16 %v3153_v26 }
 0x96d   : > { %v3302_v47 = vadd.f32 %v3301_v14, %v3205_v56  ;;  %v7775_v25 = vpop.eup %7774  ;;  %v3209_v9 = vunpack.c.l.bf16 %v7773_v60  ;;  %v3211_v45 = vunpack.c.h.bf16 %v7773_v60  ;;  %7796 = vpow.bf16 %v3156_v49 }
 0x96e   : > { %v3266_v8 = vadd.f32 %v3265_v19, %v3206_v12  ;;  %3341 = vmatpush1.bf16.msra.mxu0 %v7767_v57  ;;  %v7777_v61 = vpop.eup %7776  ;;  %v3212_v52 = vunpack.c.l.bf16 %v7775_v25  ;;  %v3214_v39 = vunpack.c.h.bf16 %v7775_v25  ;;  %v3162_v22 = vmul.bf16 1069105081, %v10651_v17 }
 0x96f   : > { %v3303_v63 = vadd.f32 %v3302_v47, %v3207_v7  ;;  %3342 = vmatprep.subr.bf16.mxu0 %v7773_v60  ;;  %v7779_v62 = vpop.eup %7778  ;;  %v3213_v42 = vunpack.c.l.bf16 %v7777_v61  ;;  %v3215_v5 = vunpack.c.h.bf16 %v7777_v61  ;;  %7798 = vpow.bf16 %v3159_v29 }
 0x970   : > { %v3267_v27 = vadd.f32 %v3266_v8, %v3208_v44  ;;  %v7781_v36 = vpop.eup %7780  ;;  %v3216_v28 = vunpack.c.l.bf16 %v7779_v62  ;;  %v3218_v46 = vunpack.c.h.bf16 %v7779_v62  ;;  %7800 = vpow.bf16 %v3162_v22 }
 0x971   : > { %v3304_v2 = vadd.f32 %v3303_v63, %v3209_v9  ;;  %v7783_v43 = vpop.eup %7782  ;;  %v3217_v30 = vunpack.c.l.bf16 %v7781_v36  ;;  %v3219_v57 = vunpack.c.h.bf16 %v7781_v36  ;;  %v3168_v14 = vmul.bf16 1069105081, %v10653_v4 }
 0x972   : > { %v3268_v21 = vadd.f32 %v3267_v27, %v3210_v33  ;;  %3343 = vmatpush1.bf16.msra.mxu0 %v7771_v3  ;;  %v7785_v31 = vpop.eup %7784  ;;  %v3220_v55 = vunpack.c.l.bf16 %v7783_v43  ;;  %v3165_v3 = vmul.bf16 1069105081, %v10635_v0  ;;  %v3222_v56 = vunpack.c.h.bf16 %v7783_v43 }
 0x973   : > { %v3305_v15 = vadd.f32 %v3304_v2, %v3211_v45  ;;  %3344 = vmatprep.subr.bf16.mxu0 %v7777_v61  ;;  %v7787_v20 = vpop.eup %7786  ;;  %v3221_v18 = vunpack.c.l.bf16 %v7785_v31  ;;  %v3223_v60 = vunpack.c.h.bf16 %v7785_v31  ;;  %v3171_v44 = vmul.bf16 1069105081, %v10637_v59 }
 0x974   : > { %v3269_v37 = vadd.f32 %v3268_v21, %v3212_v52  ;;  %v7789_v53 = vpop.eup %7788  ;;  %v3224_v10 = vunpack.c.l.bf16 %v7787_v20  ;;  %7802 = vpow.bf16 %v3165_v3  ;;  %v3226_v8 = vunpack.c.h.bf16 %v7787_v20  ;;  %v13667_v3 = vld [vmem:[#allocation31_spill] sm:$0xff] }
 0x975   : > { %v3306_v54 = vadd.f32 %v3305_v15, %v3213_v42  ;;  %v7791_v19 = vpop.eup %7790  ;;  %v3225_v16 = vunpack.c.l.bf16 %v7789_v53  ;;  %7804 = vpow.bf16 %v3168_v14  ;;  %v3227_v9 = vunpack.c.h.bf16 %v7789_v53 }
 0x976   : > { %v3270_v41 = vadd.f32 %v3269_v37, %v3214_v39  ;;  %3345 = vmatpush1.bf16.msra.mxu0 %v7775_v25  ;;  %v7793_v47 = vpop.eup %7792  ;;  %v3174_v25 = vmul.bf16 1069105081, %v10655_v23  ;;  %v3228_v63 = vunpack.c.l.bf16 %v7791_v19  ;;  %7806 = vpow.bf16 %v3171_v44  ;;  %v13668_v44 = vld [vmem:[#allocation13_spill] sm:$0xff] }
 0x977   : > { %v3307_v13 = vadd.f32 %v3306_v54, %v3215_v5  ;;  %3346 = vmatprep.subr.bf16.mxu0 %v7781_v36  ;;  %v7795_v32 = vpop.eup %7794  ;;  %v3229_v33 = vunpack.c.l.bf16 %v7793_v47  ;;  %v3177_v45 = vmul.bf16 1069105081, %v10639_v6  ;;  %v3230_v2 = vunpack.c.h.bf16 %v7791_v19 }
 0x978   : > { %v3271_v48 = vadd.f32 %v3270_v41, %v3216_v28  ;;  %v7797_v35 = vpop.eup %7796  ;;  %7808 = vpow.bf16 %v3174_v25  ;;  %v3180_v52 = vmul.bf16 1069105081, %v10657_v1  ;;  %v3231_v21 = vunpack.c.h.bf16 %v7793_v47 }
 0x979   : > { %v3308_v58 = vadd.f32 %v3307_v13, %v3217_v30  ;;  %v3233_v36 = vunpack.c.l.bf16 %v7797_v35  ;;  %7810 = vpow.bf16 %v3177_v45  ;;  %v3183_v37 = vmul.bf16 1069105081, %v10641_v40 }
 0x97a   : > { %v3272_v51 = vadd.f32 %v3271_v48, %v3218_v46  ;;  %3347 = vmatpush1.bf16.msra.mxu0 %v7779_v62  ;;  %v3232_v62 = vunpack.c.l.bf16 %v7795_v32  ;;  %v7799_v15 = vpop.eup %7798  ;;  %v3234_v49 = vunpack.c.h.bf16 %v7795_v32  ;;  %7812 = vpow.bf16 %v3180_v52 }
 0x97b   : > { %v3309_v11 = vadd.f32 %v3308_v58, %v3219_v57  ;;  %3348 = vmatprep.subr.bf16.mxu0 %v7785_v31  ;;  %v7801_v39 = vpop.eup %7800  ;;  %v3186_v5 = vmul.bf16 1069105081, %v10659_v24  ;;  %v3235_v54 = vunpack.c.h.bf16 %v7797_v35  ;;  %v3236_v28 = vunpack.c.l.bf16 %v7799_v15 }
 0x97c   : > { %v3273_v50 = vadd.f32 %v3272_v51, %v3220_v55  ;;  %v3237_v30 = vunpack.c.l.bf16 %v7801_v39  ;;  %7814 = vpow.bf16 %v3183_v37  ;;  %v3189_v29 = vmul.bf16 1069105081, %v10643_v34 }
 0x97d   : > { %v3310_v17 = vadd.f32 %v3309_v11, %v3221_v18  ;;  %v3238_v46 = vunpack.c.h.bf16 %v7799_v15  ;;  %7816 = vpow.bf16 %v3186_v5  ;;  %v3192_v48 = vmul.bf16 1069105081, %v10661_v38 }
 0x97e   : > { %v3274_v12 = vadd.f32 %v3273_v50, %v3222_v56  ;;  %3349 = vmatpush1.bf16.msra.mxu0 %v7783_v43  ;;  %v3239_v22 = vunpack.c.h.bf16 %v7801_v39  ;;  %7818 = vpow.bf16 %v3189_v29  ;;  %v3198_v34 = vmul.bf16 1069105081, %v13667_v3  ;;  %v13678_v3 = vld [vmem:[#allocation65_spill] sm:$0xff] }
 0x97f   : > { %v3311_v7 = vadd.f32 %v3310_v17, %v3223_v60  ;;  %3350 = vmatprep.subr.bf16.mxu0 %v7789_v53  ;;  %v7803_v43 = vpop.eup %7802  ;;  %7820 = vpow.bf16 %v3192_v48 }
 0x980   : > { %v3275_v0 = vadd.f32 %v3274_v12, %v3224_v10  ;;  %v7805_v31 = vpop.eup %7804  ;;  %v3240_v57 = vunpack.c.l.bf16 %v7803_v43  ;;  %v3242_v11 = vunpack.c.h.bf16 %v7803_v43  ;;  %7822 = vpow.bf16 %v3198_v34  ;;  %v13679_v34 = vld [vmem:[#allocation66_spill] sm:$0xff] }
 0x981   : > { %v3312_v4 = vadd.f32 %v3311_v7, %v3225_v16  ;;  %v7807_v55 = vpop.eup %7806  ;;  %v3241_v51 = vunpack.c.l.bf16 %v7805_v31  ;;  %v3243_v56 = vunpack.c.h.bf16 %v7805_v31 }
 0x982   : > { %v3276_v61 = vadd.f32 %v3275_v0, %v3226_v8  ;;  %3351 = vmatpush1.bf16.msra.mxu0 %v7787_v20  ;;  %v3244_v14 = vunpack.c.l.bf16 %v7807_v55  ;;  %v3195_v8 = vmul.bf16 1069105081, %v13668_v44 }
 0x983   : > { %v3313_v27 = vadd.f32 %v3312_v4, %v3227_v9  ;;  %3352 = vmatprep.subr.bf16.mxu0 %v7793_v47  ;;  %v7809_v18 = vpop.eup %7808 }
 0x984   : > { %v3277_v59 = vadd.f32 %v3276_v61, %v3228_v63  ;;  %v7811_v60 = vpop.eup %7810  ;;  %v3245_v17 = vunpack.c.l.bf16 %v7809_v18  ;;  %v3247_v7 = vunpack.c.h.bf16 %v7809_v18  ;;  %7824 = vpow.bf16 %v3195_v8 }
 0x985   : > { %v3314_v23 = vadd.f32 %v3313_v27, %v3229_v33  ;;  %v7813_v12 = vpop.eup %7812  ;;  %v3248_v0 = vunpack.c.l.bf16 %v7811_v60 }
 0x986   : > { %v3278_v42 = vadd.f32 %v3277_v59, %v3230_v2  ;;  %3353 = vmatpush1.bf16.msra.mxu0 %v7791_v19  ;;  %v3246_v19 = vunpack.c.h.bf16 %v7807_v55  ;;  %v3249_v4 = vunpack.c.l.bf16 %v7813_v12  ;;  %v3251_v27 = vunpack.c.h.bf16 %v7813_v12 }
 0x987   : > { %v3315_v26 = vadd.f32 %v3314_v23, %v3231_v21  ;;  %3354 = vmatprep.subr.bf16.mxu0 %v7797_v35  ;;  %v7815_v9 = vpop.eup %7814 }
 0x988   : > { %v3279_v6 = vadd.f32 %v3278_v42, %v3232_v62  ;;  %v7817_v61 = vpop.eup %7816  ;;  %v3252_v45 = vunpack.c.l.bf16 %v7815_v9  ;;  %v3254_v62 = vunpack.c.h.bf16 %v7815_v9 }
 0x989   : > { %v3316_v1 = vadd.f32 %v3315_v26, %v3233_v36  ;;  %v7819_v59 = vpop.eup %7818  ;;  %v3253_v52 = vunpack.c.l.bf16 %v7817_v61 }
 0x98a   : > { %v3280_v41 = vadd.f32 %v3279_v6, %v3234_v49  ;;  %3355 = vmatpush1.bf16.msra.mxu0 %v7795_v32  ;;  %v3250_v32 = vunpack.c.h.bf16 %v7811_v60  ;;  %v7821_v23 = vpop.eup %7820  ;;  %v3256_v26 = vunpack.c.l.bf16 %v7819_v59  ;;  %v3258_v5 = vunpack.c.h.bf16 %v7819_v59 }
 0x98b   : > { %v3317_v13 = vadd.f32 %v3316_v1, %v3235_v54  ;;  %3356 = vmatprep.subr.bf16.mxu0 %v7801_v39  ;;  %v3257_v37 = vunpack.c.l.bf16 %v7821_v23  ;;  %v7823_v6 = vpop.eup %7822  ;;  %v3259_v1 = vunpack.c.h.bf16 %v7821_v23 }
 0x98c   : > { %v3281_v40 = vadd.f32 %v3280_v41, %v3236_v28  ;;  %v3263_v48 = vunpack.c.h.bf16 %v7823_v6 }
 0x98d   : > { %v3318_v24 = vadd.f32 %v3317_v13, %v3237_v30 }
 0x98e   : > { %v3282_v58 = vadd.f32 %v3281_v40, %v3238_v46  ;;  %3357 = vmatpush1.bf16.msra.mxu0 %v7799_v15  ;;  %v3255_v15 = vunpack.c.h.bf16 %v7817_v61  ;;  %v13670_v46 = vld [vmem:[#allocation35_spill] sm:$0xff] }
 0x98f   : > { %v3319_v20 = vadd.f32 %v3318_v24, %v3239_v22  ;;  %3358 = vmatprep.subr.bf16.mxu0 %v7805_v31  ;;  %v7825_v13 = vpop.eup %7824  ;;  %v13669_v31 = vld [vmem:[#allocation34_spill] sm:$0xff]  ;;  %v3417_v40 = vrot.slane %v13670_v46, 4 }
 0x990   : > { %v3283_v53 = vadd.f32 %v3282_v58, %v3240_v57  ;;  %v3418_v29 = vrot.slane %v13669_v31, 4  ;;  %v13671_v57 = vld [vmem:[#allocation53_spill] sm:$0xff]  ;;  %v3262_v44 = vunpack.c.h.bf16 %v7825_v13 }
 0x991   : > { %v3320_v50 = vadd.f32 %v3319_v20, %v3241_v51  ;;  %v3468_v58 = vsel %vm1252_vm4, %v3417_v40, 0  ;;  %v13673_v51 = vld [vmem:[#allocation60_spill] sm:$0xff]  ;;  %v13674_v20 = vld [vmem:[#allocation61_spill] sm:$0xff] }
 0x992   : > { %v3284_v38 = vadd.f32 %v3283_v53, %v3242_v11  ;;  %3359 = vmatpush1.bf16.msra.mxu0 %v7803_v43  ;;  %v3261_v43 = vunpack.c.l.bf16 %v7823_v6  ;;  %v13676_v11 = vld [vmem:[#allocation63_spill] sm:$0xff]  ;;  %v13677_v53 = vld [vmem:[#allocation64_spill] sm:$0xff] }
 0x993   : > { %v3321_v10 = vadd.f32 %v3320_v50, %v3243_v56  ;;  %3360 = vmatprep.subr.bf16.mxu0 %v7809_v18  ;;  %v13675_v18 = vld [vmem:[#allocation62_spill] sm:$0xff]  ;;  %v13680_v56 = vld [vmem:[#allocation67_spill] sm:$0xff]  ;;  %v13681_v50 = vld [vmem:[#allocation68_spill] sm:$0xff] }
 0x994   : > { %v3285_v16 = vadd.f32 %v3284_v38, %v3244_v14  ;;  %v13682_v14 = vld [vmem:[#allocation70_spill] sm:$0xff]  ;;  %v13683_v38 = vld [vmem:[#allocation71_spill] sm:$0xff] }
 0x995   : > { %v3322_v47 = vadd.f32 %v3321_v10, %v3245_v17  ;;  %v13685_v17 = vld [vmem:[#allocation73_spill] sm:$0xff]  ;;  %v13686_v10 = vld [vmem:[#allocation74_spill] sm:$0xff] }
 0x996   : > { %v3286_v25 = vadd.f32 %v3285_v16, %v3246_v19  ;;  %3361 = vmatpush1.bf16.msra.mxu0 %v7807_v55  ;;  %v13672_v55 = vmov 0   ;;  %v13688_v19 = vld [vmem:[#allocation78_spill] sm:$0xff]  ;;  %v13689_v16 = vld [vmem:[#allocation69_spill] sm:$0xff] }
 0x997   : > { %v3323_v63 = vadd.f32 %v3322_v47, %v3247_v7  ;;  %3362 = vmatprep.subr.bf16.mxu0 %v7813_v12  ;;  %v13687_v12 = vld [vmem:[#allocation75_spill] sm:$0xff]  ;;  %v3260_v7 = vunpack.c.l.bf16 %v7825_v13 }
 0x998   : > { %v3287_v33 = vadd.f32 %v3286_v25, %v3248_v0 }
 0x999   : > { %v3324_v35 = vadd.f32 %v3323_v63, %v3249_v4 }
 0x99a   : > { %3363 = vmatpush1.bf16.msra.mxu0 %v7811_v60  ;;  %v3288_v2 = vadd.f32 %v3287_v33, %v3250_v32  ;;  %v13684_v60 = vld [vmem:[#allocation72_spill] sm:$0xff] }
 0x99b   : > { %3364 = vmatprep.subr.bf16.mxu0 %v7817_v61  ;;  %v3325_v21 = vadd.f32 %v3324_v35, %v3251_v27 }
 0x99c   : > { %v3289_v42 = vadd.f32 %v3288_v2, %v3252_v45 }
 0x99d   : > { %v3326_v36 = vadd.f32 %v3325_v21, %v3253_v52 }
 0x99e   : > { %3365 = vmatpush1.bf16.msra.mxu0 %v7815_v9  ;;  %v3290_v39 = vadd.f32 %v3289_v42, %v3254_v62 }
 0x99f   : > { %3366 = vmatprep.subr.bf16.mxu0 %v7821_v23  ;;  %v3327_v49 = vadd.f32 %v3326_v36, %v3255_v15 }
 0x9a0   : > { %v3291_v54 = vadd.f32 %v3290_v39, %v3256_v26 }
 0x9a1   : > { %v3328_v28 = vadd.f32 %v3327_v49, %v3257_v37 }
 0x9a2   : > { %3367 = vmatpush1.bf16.msra.mxu0 %v7819_v59  ;;  %v3292_v41 = vadd.f32 %v3291_v54, %v3258_v5 }
 0x9a3   : > { %3368 = vmatprep.subr.bf16.mxu0 %v7823_v6  ;;  %v3329_v30 = vadd.f32 %v3328_v28, %v3259_v1 }
 0x9a4   : > { %v3293_v47 = vadd.f32 %v3292_v41, %v3260_v7 }
 0x9a5   : > { %v3330_v22 = vadd.f32 %v3329_v30, %v3261_v43 }
 0x9a6   : > { %3369 = vmatpush1.bf16.msra.mxu0 %v7825_v13  ;;  %v3294_v8 = vadd.f32 %v3293_v47, %v3262_v44 }
 0x9a7   : > { %7405 = vmatprep.subr.msk.bf16.mxu0 %vm1252_vm4, %v3418_v29  ;;  %v3331_v24 = vadd.f32 %v3330_v22, %v3263_v48 }
 0x9a8   : > { %v3295_v0 = vrot.slane %v3294_v8, 4 }
 0x9a9   : > { %3371 = vmatmul.mubr.bf16.vlgmr.msra.gmra.mrb[96].mxu0 %v13671_v57  ;;  %v3332_v25 = vrot.slane %v3331_v24, 4 }
 0x9aa   : > { %3474 = vmatpush1.bf16.msra.mxu0 %v3468_v58  ;;  %3505 = vmatprep.mubr.bf16.mxu0 %v13672_v55  ;;  %v3296_v9 = vadd.f32 %v3295_v0, %v3294_v8 }
 0x9ab   : > { %v3333_v4 = vadd.f32 %v3332_v25, %v3331_v24 }
 0x9ac   : > { %v3297_v63 = vrot.slane %v3296_v9, 2 }
 0x9ad   : > { %v3334_v61 = vrot.slane %v3333_v4, 2 }
 0x9ae   : > { %v3298_v32 = vadd.f32 %v3297_v63, %v3296_v9 }
 0x9af   : > { %v3335_v33 = vadd.f32 %v3334_v61, %v3333_v4 }
 0x9b0   : > { %v3299_v27 = vrot.slane %v3298_v32, 1 }
 0x9b1   : > { %7406 = vmatmul.mubr.msk.bf16.vlgmr.msra.gmra.mrb[100].mxu0 %vm1203_vm5, %v13673_v51  ;;  %v3336_v35 = vrot.slane %v3335_v33, 1 }
 0x9b2   : > { %3515 = vmatprep.mubr.bf16.mxu0 %v13672_v55  ;;  %v3300_v45 = vadd.f32 %v3299_v27, %v3298_v32 }
 0x9b3   : > { %v3337_v2 = vadd.f32 %v3336_v35, %v3335_v33 }
 0x9b4   : > { %7826 = vrcp.f32 %v3300_v45 }
 0x9b5   : > { %7828 = vrcp.f32 %v3337_v2 }
 0x9b9   : > { %7407 = vmatmul.mubr.msk.bf16.gmra.mrb[104].mxu0 %vm1203_vm5, %v13674_v20 }
 0x9ba   : > { %3525 = vmatprep.mubr.bf16.mxu0 %v13672_v55 }
 0x9be   : > { %v7827_v59 = vpop.eup %7826 }
 0x9bf   : > { %v7829_v21 = vpop.eup %7828 }
 0x9c1   : > { %7408 = vmatmul.mubr.msk.bf16.gmra.mrb[108].mxu0 %vm1203_vm5, %v13675_v18 }
 0x9c2   : > { %3535 = vmatprep.mubr.bf16.mxu0 %v13672_v55 }
 0x9c9   : > { %7409 = vmatmul.mubr.msk.bf16.gmra.mrb[112].mxu0 %vm1203_vm5, %v13676_v11 }
 0x9ca   : > { %3545 = vmatprep.mubr.bf16.mxu0 %v13672_v55 }
 0x9d1   : > { %7410 = vmatmul.mubr.msk.bf16.gmra.mrb[116].mxu0 %vm1203_vm5, %v13677_v53 }
 0x9d2   : > { %3555 = vmatprep.mubr.bf16.mxu0 %v13672_v55 }
 0x9d9   : > { %7411 = vmatmul.mubr.msk.bf16.gmra.mrb[120].mxu0 %vm1203_vm5, %v13678_v3 }
 0x9da   : > { %3565 = vmatprep.mubr.bf16.mxu0 %v13672_v55 }
 0x9e1   : > { %7412 = vmatmul.mubr.msk.bf16.gmra.mrb[124].mxu0 %vm1203_vm5, %v13679_v34 }
 0x9e2   : > { %3575 = vmatprep.mubr.bf16.mxu0 %v13672_v55 }
 0x9e9   : > { %7413 = vmatmul.mubr.msk.bf16.gmra.mrb[128].mxu0 %vm1203_vm5, %v13680_v56 }
 0x9ea   : > { %3585 = vmatprep.mubr.bf16.mxu0 %v13672_v55 }
 0x9f1   : > { %7414 = vmatmul.mubr.msk.bf16.gmra.mrb[132].mxu0 %vm1203_vm5, %v13681_v50 }
 0x9f2   : > { %3595 = vmatprep.mubr.bf16.mxu0 %v13672_v55 }
 0x9f9   : > { %7415 = vmatmul.mubr.msk.bf16.gmra.mrb[136].mxu0 %vm1203_vm5, %v13682_v14 }
 0x9fa   : > { %3605 = vmatprep.mubr.bf16.mxu0 %v13672_v55 }
 0xa01   : > { %7416 = vmatmul.mubr.msk.bf16.gmra.mrb[140].mxu0 %vm1203_vm5, %v13683_v38 }
 0xa02   : > { %3615 = vmatprep.mubr.bf16.mxu0 %v13672_v55 }
 0xa09   : > { %7417 = vmatmul.mubr.msk.bf16.gmra.mrb[144].mxu0 %vm1203_vm5, %v13684_v60 }
 0xa0a   : > { %3625 = vmatprep.mubr.bf16.mxu0 %v13672_v55 }
 0xa11   : > { %7418 = vmatmul.mubr.msk.bf16.gmra.mrb[148].mxu0 %vm1203_vm5, %v13685_v17 }
 0xa12   : > { %3635 = vmatprep.mubr.bf16.mxu0 %v13672_v55 }
 0xa19   : > { %7419 = vmatmul.mubr.msk.bf16.gmra.mrb[152].mxu0 %vm1203_vm5, %v13686_v10 }
 0xa1a   : > { %3645 = vmatprep.mubr.bf16.mxu0 %v13672_v55 }
 0xa21   : > { %7420 = vmatmul.mubr.msk.bf16.gmra.mrb[156].mxu0 %vm1203_vm5, %v13687_v12 }
 0xa22   : > { %3655 = vmatprep.mubr.bf16.mxu0 %v13672_v55 }
 0xa29   : > { %7421 = vmatmul.mubr.msk.bf16.gmra.mrb[160].mxu0 %vm1203_vm5, %v13688_v19 }
 0xa2a   : > { %4804 = vmatprep.mubr.bf16.mxu0 %v13689_v16 }
 0xa7c   : > { %v3372_v52 = vpop.f32.mrb[96].mxu0 }
 0xa7d   : > { %v10738_v23 = vmul.f32 %v7827_v59, %v3372_v52  ;;  %v3374_v62 = vpop.f32.mrb[97].mxu0 }
 0xa7e   : > { %v10740_v42 = vmul.f32 %v7829_v21, %v3374_v62  ;;  %v3376_v15 = vpop.f32.mrb[98].mxu0 }
 0xa7f   : > { %13690 = vst [vmem:[#allocation33_spill] sm:$0xff] %v10738_v23  ;;  %v3377_v36 = vpop.f32.mrb[99].mxu0 }
 0xa80   : > { %13691 = vst [vmem:[#allocation38_spill] sm:$0xff] %v10740_v42 }
 0xa84   : > { %v10742_v26 = vpop.f32.mrb[100].mxu0 }
 0xa85   : > { %v10744_v39 = vpop.f32.mrb[101].mxu0 }
 0xa86   : > { %v10746_v37 = vpop.f32.mrb[102].mxu0 }
 0xa87   : > { %13692 = vst [vmem:[#allocation37_spill] sm:$0xff] %v10746_v37  ;;  %v10748_v49 = vpop.f32.mrb[103].mxu0 }
 0xa8c   : > { %v10750_v6 = vpop.f32.mrb[104].mxu0 }
 0xa8d   : > { %13693 = vst [vmem:[#allocation40_spill] sm:$0xff] %v10750_v6  ;;  %v3666_v5 = vmax.f32 %v10742_v26, %v10750_v6  ;;  %v10754_v54 = vpop.f32.mrb[105].mxu0 }
 0xa8e   : > { %v3703_v1 = vmax.f32 %v10744_v39, %v10754_v54  ;;  %v10758_v28 = vpop.f32.mrb[106].mxu0 }
 0xa8f   : > { %13694 = vst [vmem:[#allocation39_spill] sm:$0xff] %v10758_v28  ;;  %v3667_v41 = vmax.f32 %v10746_v37, %v10758_v28  ;;  %v10762_v43 = vpop.f32.mrb[107].mxu0 }
 0xa90   : > { %v3704_v30 = vmax.f32 %v10748_v49, %v10762_v43 }
 0xa94   : > { %v10766_v13 = vpop.f32.mrb[108].mxu0 }
 0xa95   : > { %13695 = vst [vmem:[#allocation42_spill] sm:$0xff] %v10766_v13  ;;  %v3668_v31 = vmax.f32 %v3666_v5, %v10766_v13  ;;  %v10769_v29 = vpop.f32.mrb[109].mxu0 }
 0xa96   : > { %v3705_v46 = vmax.f32 %v3703_v1, %v10769_v29  ;;  %v10772_v40 = vpop.f32.mrb[110].mxu0 }
 0xa97   : > { %v3669_v48 = vmax.f32 %v3667_v41, %v10772_v40  ;;  %v10775_v22 = vpop.f32.mrb[111].mxu0 }
 0xa98   : > { %v3706_v24 = vmax.f32 %v3704_v30, %v10775_v22 }
 0xa9c   : > { %v10778_v58 = vpop.f32.mrb[112].mxu0 }
 0xa9d   : > { %v3670_v51 = vmax.f32 %v3668_v31, %v10778_v58  ;;  %v10781_v20 = vpop.f32.mrb[113].mxu0 }
 0xa9e   : > { %v3707_v18 = vmax.f32 %v3705_v46, %v10781_v20  ;;  %v10784_v11 = vpop.f32.mrb[114].mxu0 }
 0xa9f   : > { %v3671_v53 = vmax.f32 %v3669_v48, %v10784_v11  ;;  %v10787_v3 = vpop.f32.mrb[115].mxu0 }
 0xaa0   : > { %v3708_v34 = vmax.f32 %v3706_v24, %v10787_v3 }
 0xaa4   : > { %v10790_v56 = vpop.f32.mrb[116].mxu0 }
 0xaa5   : > { %v3672_v50 = vmax.f32 %v3670_v51, %v10790_v56  ;;  %v10793_v14 = vpop.f32.mrb[117].mxu0 }
 0xaa6   : > { %v3709_v38 = vmax.f32 %v3707_v18, %v10793_v14  ;;  %v10796_v60 = vpop.f32.mrb[118].mxu0 }
 0xaa7   : > { %v3673_v17 = vmax.f32 %v3671_v53, %v10796_v60  ;;  %v10799_v10 = vpop.f32.mrb[119].mxu0 }
 0xaa8   : > { %v3710_v12 = vmax.f32 %v3708_v34, %v10799_v10 }
 0xaac   : > { %v10802_v19 = vpop.f32.mrb[120].mxu0 }
 0xaad   : > { %v3674_v7 = vmax.f32 %v3672_v50, %v10802_v19  ;;  %v10805_v47 = vpop.f32.mrb[121].mxu0 }
 0xaae   : > { %13696 = vst [vmem:[#allocation41_spill] sm:$0xff] %v10805_v47  ;;  %v3711_v44 = vmax.f32 %v3709_v38, %v10805_v47  ;;  %v10808_v8 = vpop.f32.mrb[122].mxu0 }
 0xaaf   : > { %v3675_v0 = vmax.f32 %v3673_v17, %v10808_v8  ;;  %v10811_v25 = vpop.f32.mrb[123].mxu0 }
 0xab0   : > { %13697 = vst [vmem:[#allocation44_spill] sm:$0xff] %v10811_v25  ;;  %v3712_v9 = vmax.f32 %v3710_v12, %v10811_v25 }
 0xab4   : > { %v10814_v4 = vpop.f32.mrb[124].mxu0 }
 0xab5   : > { %v3676_v63 = vmax.f32 %v3674_v7, %v10814_v4  ;;  %v10817_v61 = vpop.f32.mrb[125].mxu0 }
 0xab6   : > { %13698 = vst [vmem:[#allocation43_spill] sm:$0xff] %v10817_v61  ;;  %v3713_v32 = vmax.f32 %v3711_v44, %v10817_v61  ;;  %v10820_v33 = vpop.f32.mrb[126].mxu0 }
 0xab7   : > { %v3677_v27 = vmax.f32 %v3675_v0, %v10820_v33  ;;  %v10823_v35 = vpop.f32.mrb[127].mxu0 }
 0xab8   : > { %13699 = vst [vmem:[#allocation46_spill] sm:$0xff] %v10823_v35  ;;  %v3714_v45 = vmax.f32 %v3712_v9, %v10823_v35 }
 0xabc   : > { %v10826_v2 = vpop.f32.mrb[128].mxu0 }
 0xabd   : > { %v3678_v59 = vmax.f32 %v3676_v63, %v10826_v2  ;;  %v10829_v52 = vpop.f32.mrb[129].mxu0 }
 0xabe   : > { %13700 = vst [vmem:[#allocation45_spill] sm:$0xff] %v10829_v52  ;;  %v3715_v21 = vmax.f32 %v3713_v32, %v10829_v52  ;;  %v10832_v62 = vpop.f32.mrb[130].mxu0 }
 0xabf   : > { %v3679_v15 = vmax.f32 %v3677_v27, %v10832_v62  ;;  %v10835_v36 = vpop.f32.mrb[131].mxu0 }
 0xac0   : > { %13701 = vst [vmem:[#allocation47_spill] sm:$0xff] %v10835_v36  ;;  %v3716_v5 = vmax.f32 %v3714_v45, %v10835_v36 }
 0xac4   : > { %v10838_v1 = vpop.f32.mrb[132].mxu0 }
 0xac5   : > { %v3680_v41 = vmax.f32 %v3678_v59, %v10838_v1  ;;  %v10841_v30 = vpop.f32.mrb[133].mxu0 }
 0xac6   : > { %13702 = vst [vmem:[#allocation48_spill] sm:$0xff] %v10841_v30  ;;  %v3717_v31 = vmax.f32 %v3715_v21, %v10841_v30  ;;  %v10844_v46 = vpop.f32.mrb[134].mxu0 }
 0xac7   : > { %v3681_v48 = vmax.f32 %v3679_v15, %v10844_v46  ;;  %v10847_v24 = vpop.f32.mrb[135].mxu0 }
 0xac8   : > { %13703 = vst [vmem:[#allocation54_spill] sm:$0xff] %v10847_v24  ;;  %v3718_v51 = vmax.f32 %v3716_v5, %v10847_v24 }
 0xacc   : > { %v10850_v18 = vpop.f32.mrb[136].mxu0 }
 0xacd   : > { %v3682_v53 = vmax.f32 %v3680_v41, %v10850_v18  ;;  %v10853_v34 = vpop.f32.mrb[137].mxu0 }
 0xace   : > { %13704 = vst [vmem:[#allocation49_spill] sm:$0xff] %v10853_v34  ;;  %v3719_v50 = vmax.f32 %v3717_v31, %v10853_v34  ;;  %v10856_v38 = vpop.f32.mrb[138].mxu0 }
 0xacf   : > { %v3683_v17 = vmax.f32 %v3681_v48, %v10856_v38  ;;  %v10859_v12 = vpop.f32.mrb[139].mxu0 }
 0xad0   : > { %13705 = vst [vmem:[#allocation17_spill] sm:$0xff] %v10859_v12  ;;  %v3720_v7 = vmax.f32 %v3718_v51, %v10859_v12 }
 0xad4   : > { %v10862_v44 = vpop.f32.mrb[140].mxu0 }
 0xad5   : > { %v3684_v0 = vmax.f32 %v3682_v53, %v10862_v44  ;;  %v10865_v9 = vpop.f32.mrb[141].mxu0 }
 0xad6   : > { %13706 = vst [vmem:[#allocation19_spill] sm:$0xff] %v10865_v9  ;;  %v3721_v63 = vmax.f32 %v3719_v50, %v10865_v9  ;;  %v10868_v32 = vpop.f32.mrb[142].mxu0 }
 0xad7   : > { %v3685_v27 = vmax.f32 %v3683_v17, %v10868_v32  ;;  %v10871_v45 = vpop.f32.mrb[143].mxu0 }
 0xad8   : > { %13707 = vst [vmem:[#allocation20_spill] sm:$0xff] %v10871_v45  ;;  %v3722_v59 = vmax.f32 %v3720_v7, %v10871_v45 }
 0xadc   : > { %v10874_v21 = vpop.f32.mrb[144].mxu0 }
 0xadd   : > { %v3686_v15 = vmax.f32 %v3684_v0, %v10874_v21  ;;  %v10877_v5 = vpop.f32.mrb[145].mxu0 }
 0xade   : > { %13708 = vst [vmem:[#allocation21_spill] sm:$0xff] %v10877_v5  ;;  %v3723_v41 = vmax.f32 %v3721_v63, %v10877_v5  ;;  %v10880_v31 = vpop.f32.mrb[146].mxu0 }
 0xadf   : > { %v3687_v48 = vmax.f32 %v3685_v27, %v10880_v31  ;;  %v10883_v51 = vpop.f32.mrb[147].mxu0 }
 0xae0   : > { %13709 = vst [vmem:[#allocation22_spill] sm:$0xff] %v10883_v51  ;;  %v3724_v53 = vmax.f32 %v3722_v59, %v10883_v51 }
 0xae4   : > { %v10886_v50 = vpop.f32.mrb[148].mxu0 }
 0xae5   : > { %v3688_v17 = vmax.f32 %v3686_v15, %v10886_v50  ;;  %v10889_v7 = vpop.f32.mrb[149].mxu0 }
 0xae6   : > { %13710 = vst [vmem:[#allocation23_spill] sm:$0xff] %v10889_v7  ;;  %v3725_v0 = vmax.f32 %v3723_v41, %v10889_v7  ;;  %v10892_v42 = vpop.f32.mrb[150].mxu0 }
 0xae7   : > { %v3689_v63 = vmax.f32 %v3687_v48, %v10892_v42  ;;  %v10895_v23 = vpop.f32.mrb[151].mxu0 }
 0xae8   : > { %13711 = vst [vmem:[#allocation24_spill] sm:$0xff] %v10895_v23  ;;  %v3726_v27 = vmax.f32 %v3724_v53, %v10895_v23 }
 0xaec   : > { %v10898_v16 = vpop.f32.mrb[152].mxu0 }
 0xaed   : > { %v3690_v59 = vmax.f32 %v3688_v17, %v10898_v16  ;;  %v10901_v55 = vpop.f32.mrb[153].mxu0 }
 0xaee   : > { %13712 = vst [vmem:[#allocation25_spill] sm:$0xff] %v10901_v55  ;;  %v3727_v15 = vmax.f32 %v3725_v0, %v10901_v55  ;;  %v10904_v57 = vpop.f32.mrb[154].mxu0 }
 0xaef   : > { %v3691_v41 = vmax.f32 %v3689_v63, %v10904_v57  ;;  %v10907_v7 = vpop.f32.mrb[155].mxu0 }
 0xaf0   : > { %13713 = vst [vmem:[#allocation26_spill] sm:$0xff] %v10907_v7  ;;  %v3728_v48 = vmax.f32 %v3726_v27, %v10907_v7 }
 0xaf4   : > { %v10910_v51 = vpop.f32.mrb[156].mxu0 }
 0xaf5   : > { %v3692_v53 = vmax.f32 %v3690_v59, %v10910_v51  ;;  %v10913_v23 = vpop.f32.mrb[157].mxu0 }
 0xaf6   : > { %13714 = vst [vmem:[#allocation27_spill] sm:$0xff] %v10913_v23  ;;  %v3729_v17 = vmax.f32 %v3727_v15, %v10913_v23  ;;  %v10916_v5 = vpop.f32.mrb[158].mxu0 }
 0xaf7   : > { %v3693_v0 = vmax.f32 %v3691_v41, %v10916_v5  ;;  %v10919_v55 = vpop.f32.mrb[159].mxu0 }
 0xaf8   : > { %13715 = vst [vmem:[#allocation28_spill] sm:$0xff] %v10919_v55  ;;  %v3730_v63 = vmax.f32 %v3728_v48, %v10919_v55 }
 0xafc   : > { %v3657_v45 = vpop.f32.mrb[160].mxu0 }
 0xafd   : > { %v3694_v9 = vmax.f32 %v3692_v53, %v3657_v45  ;;  %v10922_v12 = vpop.f32.mrb[161].mxu0 }
 0xafe   : > { %v3731_v27 = vmax.f32 %v3729_v17, %v10922_v12  ;;  %v3661_v7 = vpop.f32.mrb[162].mxu0 }
 0xaff   : > { %v3695_v59 = vmax.f32 %v3693_v0, %v3661_v7  ;;  %v3663_v34 = vpop.f32.mrb[163].mxu0 }
 0xb00   : > { %v3732_v24 = vmax.f32 %v3730_v63, %v3663_v34 }
 0xb01   : > { %v3696_v30 = vmax.f32 %v3694_v9, %v3695_v59  ;;  %v13720_v59 = vld [vmem:[#allocation44_spill] sm:$0xff] }
 0xb02   : > { %v3733_v15 = vmax.f32 %v3731_v27, %v3732_v24 }
 0xb03   : > { %v3697_v23 = vrot.slane %v3696_v30, 4 }
 0xb04   : > { %v3734_v36 = vrot.slane %v3733_v15, 4 }
 0xb05   : > { %v3698_v52 = vmax.f32 %v3696_v30, %v3697_v23 }
 0xb06   : > { %v3735_v41 = vmax.f32 %v3733_v15, %v3734_v36  ;;  %v13721_v15 = vld [vmem:[#allocation43_spill] sm:$0xff] }
 0xb07   : > { %v3699_v35 = vrot.slane %v3698_v52, 2 }
 0xb08   : > { %v3736_v61 = vrot.slane %v3735_v41, 2 }
 0xb09   : > { %v3700_v25 = vmax.f32 %v3698_v52, %v3699_v35 }
 0xb0a   : > { %v3737_v48 = vmax.f32 %v3735_v41, %v3736_v61  ;;  %v13722_v41 = vld [vmem:[#allocation46_spill] sm:$0xff] }
 0xb0b   : > { %v3701_v55 = vrot.slane %v3700_v25, 1 }
 0xb0c   : > { %v3738_v47 = vrot.slane %v3737_v48, 1 }
 0xb0d   : > { %v10925_v53 = vmax.f32 %v3700_v25, %v3701_v55 }
 0xb0e   : > { %v10963_v27 = vmax.f32 %v3737_v48, %v3738_v47 }
 0xb0f   : > { %13716 = vst [vmem:[#allocation29_spill] sm:$0xff] %v10925_v53  ;;  %v3800_v17 = vsub.f32 %v3657_v45, %v10925_v53  ;;  %v3802_v0 = vsub.f32 %v3661_v7, %v10925_v53  ;;  %v3750_v25 = vsub.f32 %v10772_v40, %v10925_v53  ;;  %v3752_v52 = vsub.f32 %v10778_v58, %v10925_v53 }
 0xb10   : > { %v3754_v36 = vsub.f32 %v10784_v11, %v10925_v53  ;;  %v3756_v30 = vsub.f32 %v10790_v56, %v10925_v53  ;;  %v3758_v45 = vsub.f32 %v10796_v60, %v10925_v53  ;;  %v3760_v7 = vsub.f32 %v10802_v19, %v10925_v53 }
 0xb11   : > { %v10941_v35 = vpack.c.bf16 %v3802_v0, %v3800_v17  ;;  %v3762_v40 = vsub.f32 %v10808_v8, %v10925_v53  ;;  %v3764_v63 = vsub.f32 %v10814_v4, %v10925_v53  ;;  %v3766_v58 = vsub.f32 %v10820_v33, %v10925_v53 }
 0xb12   : > { %v3768_v11 = vsub.f32 %v10826_v2, %v10925_v53  ;;  %v3770_v56 = vsub.f32 %v10832_v62, %v10925_v53  ;;  %v3772_v60 = vsub.f32 %v10838_v1, %v10925_v53  ;;  %v3774_v19 = vsub.f32 %v10844_v46, %v10925_v53 }
 0xb13   : > { %13717 = vst [vmem:[#allocation95_spill] sm:$0xff] %v10941_v35  ;;  %v3776_v8 = vsub.f32 %v10850_v18, %v10925_v53  ;;  %v3778_v4 = vsub.f32 %v10856_v38, %v10925_v53  ;;  %v3780_v33 = vsub.f32 %v10862_v44, %v10925_v53  ;;  %v3782_v2 = vsub.f32 %v10868_v32, %v10925_v53 }
 0xb14   : > { %v3784_v47 = vsub.f32 %v10874_v21, %v10925_v53  ;;  %v3786_v62 = vsub.f32 %v10880_v31, %v10925_v53  ;;  %v3788_v1 = vsub.f32 %v10886_v50, %v10925_v53  ;;  %v3790_v46 = vsub.f32 %v10892_v42, %v10925_v53 }
 0xb15   : > { %v3792_v18 = vsub.f32 %v10898_v16, %v10925_v53  ;;  %v3794_v38 = vsub.f32 %v10904_v57, %v10925_v53  ;;  %v3796_v44 = vsub.f32 %v10910_v51, %v10925_v53  ;;  %v3798_v32 = vsub.f32 %v10916_v5, %v10925_v53 }
 0xb16   : > { %v3801_v21 = vsub.f32 %v10922_v12, %v10963_v27  ;;  %v3803_v31 = vsub.f32 %v3663_v34, %v10963_v27  ;;  %v3741_v42 = vsub.f32 %v10744_v39, %v10963_v27  ;;  %v3743_v16 = vsub.f32 %v10748_v49, %v10963_v27 }
 0xb17   : > { %v3745_v57 = vsub.f32 %v10754_v54, %v10963_v27  ;;  %v3747_v51 = vsub.f32 %v10762_v43, %v10963_v27  ;;  %v3749_v5 = vsub.f32 %v10769_v29, %v10963_v27  ;;  %v3751_v12 = vsub.f32 %v10775_v22, %v10963_v27  ;;  %v13719_v43 = vld [vmem:[#allocation41_spill] sm:$0xff] }
 0xb18   : > { %v3753_v34 = vsub.f32 %v10781_v20, %v10963_v27  ;;  %v11010_v50 = vpack.c.bf16 %v3803_v31, %v3801_v21  ;;  %v3755_v39 = vsub.f32 %v10787_v3, %v10963_v27  ;;  %v3757_v49 = vsub.f32 %v10793_v14, %v10963_v27  ;;  %v13723_v3 = vld [vmem:[#allocation45_spill] sm:$0xff]  ;;  %v13724_v14 = vld [vmem:[#allocation47_spill] sm:$0xff]  ;;  %v13726_v31 = vld [vmem:[#allocation54_spill] sm:$0xff] }
 0xb19   : > { %v3759_v54 = vsub.f32 %v10799_v10, %v10963_v27  ;;  %v3761_v29 = vsub.f32 %v13719_v43, %v10963_v27  ;;  %v3763_v22 = vsub.f32 %v13720_v59, %v10963_v27  ;;  %v3765_v20 = vsub.f32 %v13721_v15, %v10963_v27  ;;  %v13725_v10 = vld [vmem:[#allocation48_spill] sm:$0xff]  ;;  %v13727_v59 = vld [vmem:[#allocation49_spill] sm:$0xff] }
 0xb1a   : > { %13718 = vst [vmem:[#allocation96_spill] sm:$0xff] %v11010_v50  ;;  %v3767_v48 = vsub.f32 %v13722_v41, %v10963_v27  ;;  %v3769_v17 = vsub.f32 %v13723_v3, %v10963_v27  ;;  %v3771_v0 = vsub.f32 %v13724_v14, %v10963_v27  ;;  %v3773_v21 = vsub.f32 %v13725_v10, %v10963_v27  ;;  %v13728_v15 = vld [vmem:[#allocation17_spill] sm:$0xff]  ;;  %v13729_v41 = vld [vmem:[#allocation19_spill] sm:$0xff]  ;;  %v13730_v3 = vld [vmem:[#allocation20_spill] sm:$0xff] }
 0xb1b   : > { %v3775_v43 = vsub.f32 %v13726_v31, %v10963_v27  ;;  %v3777_v55 = vsub.f32 %v13727_v59, %v10963_v27  ;;  %v3779_v61 = vsub.f32 %v13728_v15, %v10963_v27  ;;  %v3781_v23 = vsub.f32 %v13729_v41, %v10963_v27  ;;  %v13731_v14 = vld [vmem:[#allocation21_spill] sm:$0xff]  ;;  %v13732_v10 = vld [vmem:[#allocation22_spill] sm:$0xff]  ;;  %v13733_v31 = vld [vmem:[#allocation23_spill] sm:$0xff] }
 0xb1c   : > { %v3783_v24 = vsub.f32 %v13730_v3, %v10963_v27  ;;  %v3785_v9 = vsub.f32 %v13731_v14, %v10963_v27  ;;  %v3787_v35 = vsub.f32 %v13732_v10, %v10963_v27  ;;  %v3789_v50 = vsub.f32 %v13733_v31, %v10963_v27  ;;  %v13734_v59 = vld [vmem:[#allocation24_spill] sm:$0xff]  ;;  %v13735_v15 = vld [vmem:[#allocation25_spill] sm:$0xff]  ;;  %v13736_v41 = vld [vmem:[#allocation26_spill] sm:$0xff] }
 0xb1d   : > { %v3791_v13 = vsub.f32 %v13734_v59, %v10963_v27  ;;  %v3793_v28 = vsub.f32 %v13735_v15, %v10963_v27  ;;  %v3795_v6 = vsub.f32 %v13736_v41, %v10963_v27  ;;  %v13737_v3 = vld [vmem:[#allocation27_spill] sm:$0xff]  ;;  %v13738_v14 = vld [vmem:[#allocation28_spill] sm:$0xff]  ;;  %v13739_v10 = vld [vmem:[#allocation29_spill] sm:$0xff] }
 0xb1e   : > { %v3797_v37 = vsub.f32 %v13737_v3, %v10963_v27  ;;  %v3799_v53 = vsub.f32 %v13738_v14, %v10963_v27  ;;  %v13740_v31 = vsub.f32 %v10742_v26, %v13739_v10  ;;  %v13741_v59 = vld [vmem:[#allocation37_spill] sm:$0xff]  ;;  %v13743_v3 = vld [vmem:[#allocation40_spill] sm:$0xff]  ;;  %v13745_v27 = vld [vmem:[#allocation39_spill] sm:$0xff] }
 0xb1f   : > { %v13742_v15 = vsub.f32 %v13741_v59, %v13739_v10  ;;  %v13744_v14 = vsub.f32 %v13743_v3, %v13739_v10  ;;  %v13746_v26 = vsub.f32 %v13745_v27, %v13739_v10  ;;  %v3810_v27 = vpack.c.bf16 %v3754_v36, %v3752_v52 }
 0xb20   : > { %v11083_v36 = vpack.c.bf16 %v3782_v2, %v3780_v33  ;;  %v11085_v52 = vpack.c.bf16 %v3786_v62, %v3784_v47  ;;  %v11101_v33 = vpack.c.bf16 %v3783_v24, %v3781_v23  ;;  %v11103_v2 = vpack.c.bf16 %v3787_v35, %v3785_v9 }
 0xb21   : > { %v3804_v41 = vpack.c.bf16 %v13742_v15, %v13740_v31  ;;  %v3806_v59 = vpack.c.bf16 %v13746_v26, %v13744_v14  ;;  %v13747_v15 = vld [vmem:[#allocation42_spill] sm:$0xff]  ;;  %v3812_v14 = vpack.c.bf16 %v3758_v45, %v3756_v30  ;;  %v11073_v26 = vpack.c.bf16 %v3762_v40, %v3760_v7 }
 0xb22   : > { %v13748_v31 = vsub.f32 %v13747_v15, %v13739_v10  ;;  %v11075_v10 = vpack.c.bf16 %v3766_v58, %v3764_v63  ;;  %v11077_v15 = vpack.c.bf16 %v3770_v56, %v3768_v11  ;;  %v11087_v30 = vpack.c.bf16 %v3790_v46, %v3788_v1 }
 0xb23   : > { %13749 = vst [vmem:[#allocation94_spill] sm:$0xff] %v11073_v26  ;;  %v11089_v45 = vpack.c.bf16 %v3794_v38, %v3792_v18  ;;  %v11091_v7 = vpack.c.bf16 %v3798_v32, %v3796_v44  ;;  %v3805_v40 = vpack.c.bf16 %v3743_v16, %v3741_v42  ;;  %v3807_v26 = vpack.c.bf16 %v3747_v51, %v3745_v57 }
 0xb24   : > { %v3808_v3 = vpack.c.bf16 %v3750_v25, %v13748_v31  ;;  %v11079_v25 = vpack.c.bf16 %v3774_v19, %v3772_v60  ;;  %v11081_v31 = vpack.c.bf16 %v3778_v4, %v3776_v8  ;;  %v3809_v63 = vpack.c.bf16 %v3751_v12, %v3749_v5 }
 0xb25   : > { %v3811_v58 = vpack.c.bf16 %v3755_v39, %v3753_v34  ;;  %v3813_v11 = vpack.c.bf16 %v3759_v54, %v3757_v49  ;;  %v3815_v56 = vpack.c.bf16 %v3763_v22, %v3761_v29  ;;  %v11093_v60 = vpack.c.bf16 %v3767_v48, %v3765_v20 }
 0xb26   : > { %v11095_v19 = vpack.c.bf16 %v3771_v0, %v3769_v17  ;;  %v11097_v8 = vpack.c.bf16 %v3775_v43, %v3773_v21  ;;  %v11099_v4 = vpack.c.bf16 %v3779_v61, %v3777_v55  ;;  %v11105_v47 = vpack.c.bf16 %v3791_v13, %v3789_v50 }
 0xb27   : > { %v11107_v62 = vpack.c.bf16 %v3795_v6, %v3793_v28  ;;  %v11109_v1 = vpack.c.bf16 %v3799_v53, %v3797_v37  ;;  %v3837_v46 = vmul.bf16 1069105081, %v3804_v41  ;;  %v3840_v18 = vmul.bf16 1069105081, %v3805_v40 }
 0xb28   : > { %v3843_v38 = vmul.bf16 1069105081, %v3806_v59  ;;  %v3846_v44 = vmul.bf16 1069105081, %v3807_v26  ;;  %v3849_v32 = vmul.bf16 1069105081, %v3808_v3 }
 0xb29   : > { %7830 = vpow.bf16 %v3837_v46  ;;  %v3852_v42 = vmul.bf16 1069105081, %v3809_v63  ;;  %v3855_v24 = vmul.bf16 1069105081, %v3810_v27  ;;  %v3858_v9 = vmul.bf16 1069105081, %v3811_v58 }
 0xb2a   : > { %7832 = vpow.bf16 %v3840_v18  ;;  %v3861_v13 = vmul.bf16 1069105081, %v3812_v14  ;;  %v3864_v6 = vmul.bf16 1069105081, %v3813_v11  ;;  %v13750_v53 = vld [vmem:[#allocation94_spill] sm:$0xff] }
 0xb2b   : > { %7834 = vpow.bf16 %v3843_v38  ;;  %v3867_v23 = vmul.bf16 1069105081, %v13750_v53  ;;  %v3870_v16 = vmul.bf16 1069105081, %v3815_v56  ;;  %v3873_v29 = vmul.bf16 1069105081, %v11075_v10 }
 0xb2c   : > { %7836 = vpow.bf16 %v3846_v44  ;;  %v3876_v48 = vmul.bf16 1069105081, %v11093_v60  ;;  %v3879_v14 = vmul.bf16 1069105081, %v11077_v15  ;;  %v3882_v40 = vmul.bf16 1069105081, %v11095_v19 }
 0xb2d   : > { %7838 = vpow.bf16 %v3849_v32  ;;  %v3885_v44 = vmul.bf16 1069105081, %v11079_v25 }
 0xb2e   : > { %7840 = vpow.bf16 %v3852_v42  ;;  %v3888_v42 = vmul.bf16 1069105081, %v11097_v8 }
 0xb2f   : > { %7842 = vpow.bf16 %v3855_v24 }
 0xb30   : > { %7844 = vpow.bf16 %v3858_v9 }
 0xb31   : > { %7846 = vpow.bf16 %v3861_v13 }
 0xb32   : > { %7848 = vpow.bf16 %v3864_v6 }
 0xb33   : > { %7850 = vpow.bf16 %v3867_v23  ;;  %v3891_v23 = vmul.bf16 1069105081, %v11081_v31 }
 0xb34   : > { %v7831_v37 = vpop.eup %7830  ;;  %7852 = vpow.bf16 %v3870_v16 }
 0xb35   : > { %v7833_v28 = vpop.eup %7832  ;;  %v3932_v61 = vunpack.c.l.bf16 %v7831_v37  ;;  %v3934_v55 = vunpack.c.h.bf16 %v7831_v37  ;;  %7854 = vpow.bf16 %v3873_v29 }
 0xb36   : > { %v7835_v35 = vpop.eup %7834  ;;  %v3933_v57 = vunpack.c.l.bf16 %v7833_v28  ;;  %v3935_v51 = vunpack.c.h.bf16 %v7833_v28  ;;  %4076 = vmatprep.subr.bf16.mxu1 %v7833_v28  ;;  %7856 = vpow.bf16 %v3876_v48 }
 0xb37   : > { %v7837_v5 = vpop.eup %7836  ;;  %v3936_v12 = vunpack.c.l.bf16 %v7835_v35  ;;  %v3996_v34 = vadd.f32 %v3934_v55, %v3932_v61  ;;  %4077 = vmatpush1.bf16.msra.mxu1 %v7831_v37  ;;  %v3938_v22 = vunpack.c.h.bf16 %v7835_v35  ;;  %7858 = vpow.bf16 %v3879_v14 }
 0xb38   : > { %v7839_v50 = vpop.eup %7838  ;;  %v3937_v39 = vunpack.c.l.bf16 %v7837_v5  ;;  %v4033_v49 = vadd.f32 %v3935_v51, %v3933_v57  ;;  %4078 = vmatprep.subr.bf16.mxu1 %v7837_v5  ;;  %v3939_v17 = vunpack.c.h.bf16 %v7837_v5  ;;  %7860 = vpow.bf16 %v3882_v40 }
 0xb39   : > { %v7841_v54 = vpop.eup %7840  ;;  %v3997_v20 = vadd.f32 %v3996_v34, %v3936_v12  ;;  %v3940_v21 = vunpack.c.l.bf16 %v7839_v50  ;;  %v3942_v26 = vunpack.c.h.bf16 %v7839_v50  ;;  %7862 = vpow.bf16 %v3885_v44 }
 0xb3a   : > { %v4034_v0 = vadd.f32 %v4033_v49, %v3937_v39  ;;  %v7843_v41 = vpop.eup %7842  ;;  %v3941_v59 = vunpack.c.l.bf16 %v7841_v54  ;;  %v3943_v63 = vunpack.c.h.bf16 %v7841_v54  ;;  %7864 = vpow.bf16 %v3888_v42 }
 0xb3b   : > { %v3998_v43 = vadd.f32 %v3997_v20, %v3938_v22  ;;  %4079 = vmatpush1.bf16.msra.mxu1 %v7835_v35  ;;  %v7845_v27 = vpop.eup %7844  ;;  %v3944_v11 = vunpack.c.l.bf16 %v7843_v41  ;;  %v3946_v32 = vunpack.c.h.bf16 %v7843_v41  ;;  %v3894_v55 = vmul.bf16 1069105081, %v11099_v4 }
 0xb3c   : > { %v4035_v3 = vadd.f32 %v4034_v0, %v3939_v17  ;;  %4080 = vmatprep.subr.bf16.mxu1 %v7841_v54  ;;  %v7847_v60 = vpop.eup %7846  ;;  %v3945_v46 = vunpack.c.l.bf16 %v7845_v27  ;;  %v3947_v24 = vunpack.c.h.bf16 %v7845_v27  ;;  %7866 = vpow.bf16 %v3891_v23 }
 0xb3d   : > { %v3999_v10 = vadd.f32 %v3998_v43, %v3940_v21  ;;  %v7849_v38 = vpop.eup %7848  ;;  %v3948_v9 = vunpack.c.l.bf16 %v7847_v60  ;;  %v3950_v61 = vunpack.c.h.bf16 %v7847_v60  ;;  %7868 = vpow.bf16 %v3894_v55 }
 0xb3e   : > { %v4036_v58 = vadd.f32 %v4035_v3, %v3941_v59  ;;  %v7851_v6 = vpop.eup %7850  ;;  %v3949_v37 = vunpack.c.l.bf16 %v7849_v38  ;;  %v3951_v35 = vunpack.c.h.bf16 %v7849_v38  ;;  %v3900_v49 = vmul.bf16 1069105081, %v11101_v33 }
 0xb3f   : > { %v4000_v56 = vadd.f32 %v3999_v10, %v3942_v26  ;;  %4081 = vmatpush1.bf16.msra.mxu1 %v7839_v50  ;;  %v7853_v53 = vpop.eup %7852  ;;  %v3952_v16 = vunpack.c.l.bf16 %v7851_v6  ;;  %v3897_v50 = vmul.bf16 1069105081, %v11083_v36  ;;  %v3954_v39 = vunpack.c.h.bf16 %v7851_v6 }
 0xb40   : > { %v4037_v18 = vadd.f32 %v4036_v58, %v3943_v63  ;;  %4082 = vmatprep.subr.bf16.mxu1 %v7845_v27  ;;  %v7855_v51 = vpop.eup %7854  ;;  %v3953_v5 = vunpack.c.l.bf16 %v7853_v53  ;;  %v3955_v54 = vunpack.c.h.bf16 %v7853_v53  ;;  %v3903_v21 = vmul.bf16 1069105081, %v11085_v52 }
 0xb41   : > { %v4001_v15 = vadd.f32 %v4000_v56, %v3944_v11  ;;  %v7857_v34 = vpop.eup %7856  ;;  %v3956_v29 = vunpack.c.l.bf16 %v7855_v51  ;;  %7870 = vpow.bf16 %v3897_v50  ;;  %v3958_v43 = vunpack.c.h.bf16 %v7855_v51  ;;  %v13751_v50 = vld [vmem:[#allocation96_spill] sm:$0xff] }
 0xb42   : > { %v4038_v19 = vadd.f32 %v4037_v18, %v3945_v46  ;;  %v7859_v20 = vpop.eup %7858  ;;  %v3957_v48 = vunpack.c.l.bf16 %v7857_v34  ;;  %7872 = vpow.bf16 %v3900_v49  ;;  %v3959_v59 = vunpack.c.h.bf16 %v7857_v34 }
 0xb43   : > { %v4002_v13 = vadd.f32 %v4001_v15, %v3946_v32  ;;  %4083 = vmatpush1.bf16.msra.mxu1 %v7843_v41  ;;  %v7861_v0 = vpop.eup %7860  ;;  %v3906_v41 = vmul.bf16 1069105081, %v11103_v2  ;;  %v3960_v3 = vunpack.c.l.bf16 %v7859_v20  ;;  %7874 = vpow.bf16 %v3903_v21  ;;  %v13752_v21 = vld [vmem:[#allocation95_spill] sm:$0xff] }
 0xb44   : > { %v4039_v28 = vadd.f32 %v4038_v19, %v3947_v24  ;;  %4084 = vmatprep.subr.bf16.mxu1 %v7849_v38  ;;  %v7863_v14 = vpop.eup %7862  ;;  %v3961_v26 = vunpack.c.l.bf16 %v7861_v0  ;;  %v3909_v63 = vmul.bf16 1069105081, %v11087_v30  ;;  %v3962_v58 = vunpack.c.h.bf16 %v7859_v20 }
 0xb45   : > { %v4003_v25 = vadd.f32 %v4002_v13, %v3948_v9  ;;  %v7865_v40 = vpop.eup %7864  ;;  %7876 = vpow.bf16 %v3906_v41  ;;  %v3912_v11 = vmul.bf16 1069105081, %v11105_v47  ;;  %v3963_v56 = vunpack.c.h.bf16 %v7861_v0 }
 0xb46   : > { %v4040_v8 = vadd.f32 %v4039_v28, %v3949_v37  ;;  %v3965_v38 = vunpack.c.l.bf16 %v7865_v40  ;;  %7878 = vpow.bf16 %v3909_v63  ;;  %v3915_v15 = vmul.bf16 1069105081, %v11089_v45 }
 0xb47   : > { %v4004_v57 = vadd.f32 %v4003_v25, %v3950_v61  ;;  %4085 = vmatpush1.bf16.msra.mxu1 %v7847_v60  ;;  %v3964_v60 = vunpack.c.l.bf16 %v7863_v14  ;;  %v7867_v18 = vpop.eup %7866  ;;  %v3966_v42 = vunpack.c.h.bf16 %v7863_v14  ;;  %7880 = vpow.bf16 %v3912_v11 }
 0xb48   : > { %v4041_v12 = vadd.f32 %v4040_v8, %v3951_v35  ;;  %4086 = vmatprep.subr.bf16.mxu1 %v7853_v53  ;;  %v7869_v32 = vpop.eup %7868  ;;  %v3918_v24 = vmul.bf16 1069105081, %v11107_v62  ;;  %v3967_v19 = vunpack.c.h.bf16 %v7865_v40  ;;  %v3968_v9 = vunpack.c.l.bf16 %v7867_v18 }
 0xb49   : > { %v4005_v31 = vadd.f32 %v4004_v57, %v3952_v16  ;;  %v3969_v37 = vunpack.c.l.bf16 %v7869_v32  ;;  %7882 = vpow.bf16 %v3915_v15  ;;  %v3921_v23 = vmul.bf16 1069105081, %v11091_v7 }
 0xb4a   : > { %v4042_v4 = vadd.f32 %v4041_v12, %v3953_v5  ;;  %v3970_v61 = vunpack.c.h.bf16 %v7867_v18  ;;  %7884 = vpow.bf16 %v3918_v24  ;;  %v3924_v25 = vmul.bf16 1069105081, %v11109_v1 }
 0xb4b   : > { %v4006_v22 = vadd.f32 %v4005_v31, %v3954_v39  ;;  %4087 = vmatpush1.bf16.msra.mxu1 %v7851_v6  ;;  %v3971_v55 = vunpack.c.h.bf16 %v7869_v32  ;;  %7886 = vpow.bf16 %v3921_v23  ;;  %v3930_v7 = vmul.bf16 1069105081, %v13751_v50  ;;  %v13763_v50 = vld [vmem:[#allocation11_spill] sm:$0xff] }
 0xb4c   : > { %v4043_v17 = vadd.f32 %v4042_v4, %v3955_v54  ;;  %4088 = vmatprep.subr.bf16.mxu1 %v7857_v34  ;;  %v7871_v6 = vpop.eup %7870  ;;  %7888 = vpow.bf16 %v3924_v25  ;;  %v13754_v25 = vld [vmem:[#allocation77_spill] sm:$0xff] }
 0xb4d   : > { %v4007_v36 = vadd.f32 %v4006_v22, %v3956_v29  ;;  %v7873_v53 = vpop.eup %7872  ;;  %v3972_v35 = vunpack.c.l.bf16 %v7871_v6  ;;  %v3974_v12 = vunpack.c.h.bf16 %v7871_v6  ;;  %7890 = vpow.bf16 %v3930_v7  ;;  %v13764_v7 = vld [vmem:[#allocation88_spill] sm:$0xff] }
 0xb4e   : > { %v4044_v33 = vadd.f32 %v4043_v17, %v3957_v48  ;;  %v7875_v16 = vpop.eup %7874  ;;  %v3973_v57 = vunpack.c.l.bf16 %v7873_v53  ;;  %v3975_v39 = vunpack.c.h.bf16 %v7873_v53 }
 0xb4f   : > { %v4008_v27 = vadd.f32 %v4007_v36, %v3958_v43  ;;  %4089 = vmatpush1.bf16.msra.mxu1 %v7855_v51  ;;  %v3976_v49 = vunpack.c.l.bf16 %v7875_v16  ;;  %v3927_v43 = vmul.bf16 1069105081, %v13752_v21 }
 0xb50   : > { %v4045_v10 = vadd.f32 %v4044_v33, %v3959_v59  ;;  %4090 = vmatprep.subr.bf16.mxu1 %v7861_v0  ;;  %v7877_v5 = vpop.eup %7876 }
 0xb51   : > { %v4009_v52 = vadd.f32 %v4008_v27, %v3960_v3  ;;  %v7879_v54 = vpop.eup %7878  ;;  %v3977_v4 = vunpack.c.l.bf16 %v7877_v5  ;;  %v3979_v17 = vunpack.c.h.bf16 %v7877_v5  ;;  %7892 = vpow.bf16 %v3927_v43 }
 0xb52   : > { %v4046_v2 = vadd.f32 %v4045_v10, %v3961_v26  ;;  %v7881_v22 = vpop.eup %7880  ;;  %v3980_v36 = vunpack.c.l.bf16 %v7879_v54 }
 0xb53   : > { %v4010_v46 = vadd.f32 %v4009_v52, %v3962_v58  ;;  %4091 = vmatpush1.bf16.msra.mxu1 %v7859_v20  ;;  %v3978_v20 = vunpack.c.h.bf16 %v7875_v16  ;;  %v3981_v33 = vunpack.c.l.bf16 %v7881_v22  ;;  %v3983_v10 = vunpack.c.h.bf16 %v7881_v22 }
 0xb54   : > { %v4047_v44 = vadd.f32 %v4046_v2, %v3963_v56  ;;  %4092 = vmatprep.subr.bf16.mxu1 %v7865_v40  ;;  %v7883_v59 = vpop.eup %7882 }
 0xb55   : > { %v4011_v30 = vadd.f32 %v4010_v46, %v3964_v60  ;;  %v7885_v27 = vpop.eup %7884  ;;  %v3984_v63 = vunpack.c.l.bf16 %v7883_v59  ;;  %v3986_v60 = vunpack.c.h.bf16 %v7883_v59 }
 0xb56   : > { %v4048_v47 = vadd.f32 %v4047_v44, %v3965_v38  ;;  %v7887_v52 = vpop.eup %7886  ;;  %v3985_v11 = vunpack.c.l.bf16 %v7885_v27 }
 0xb57   : > { %v4012_v13 = vadd.f32 %v4011_v30, %v3966_v42  ;;  %4093 = vmatpush1.bf16.msra.mxu1 %v7863_v14  ;;  %v3982_v14 = vunpack.c.h.bf16 %v7879_v54  ;;  %v7889_v2 = vpop.eup %7888  ;;  %v3988_v44 = vunpack.c.l.bf16 %v7887_v52  ;;  %v3990_v24 = vunpack.c.h.bf16 %v7887_v52 }
 0xb58   : > { %v4049_v28 = vadd.f32 %v4048_v47, %v3967_v19  ;;  %4094 = vmatprep.subr.bf16.mxu1 %v7869_v32  ;;  %v3989_v15 = vunpack.c.l.bf16 %v7889_v2  ;;  %v7891_v30 = vpop.eup %7890  ;;  %v3991_v47 = vunpack.c.h.bf16 %v7889_v2 }
 0xb59   : > { %v4013_v45 = vadd.f32 %v4012_v13, %v3968_v9 }
 0xb5a   : > { %v4050_v62 = vadd.f32 %v4049_v28, %v3969_v37 }
 0xb5b   : > { %v4014_v8 = vadd.f32 %v4013_v45, %v3970_v61  ;;  %4095 = vmatpush1.bf16.msra.mxu1 %v7867_v18  ;;  %v3987_v18 = vunpack.c.h.bf16 %v7885_v27  ;;  %v13753_v61 = vld [vmem:[#allocation53_spill] sm:$0xff] }
 0xb5c   : > { %v4051_v51 = vadd.f32 %v4050_v62, %v3971_v55  ;;  %4096 = vmatprep.subr.bf16.mxu1 %v7873_v53  ;;  %v7893_v28 = vpop.eup %7892  ;;  %v3995_v53 = vunpack.c.h.bf16 %v7891_v30  ;;  %v4072_v45 = vrot.slane %v13753_v61, 4  ;;  %v13755_v62 = vld [vmem:[#allocation76_spill] sm:$0xff] }
 0xb5d   : > { %v4015_v34 = vadd.f32 %v4014_v8, %v3972_v35  ;;  %v4170_v35 = vsel %vm1252_vm4, %v13755_v62, 0  ;;  %v13756_v8 = vmov 0   ;;  %v3994_v21 = vunpack.c.h.bf16 %v7893_v28 }
 0xb5e   : > { %v4052_v31 = vadd.f32 %v4051_v51, %v3973_v57  ;;  %v13758_v57 = vld [vmem:[#allocation84_spill] sm:$0xff]  ;;  %v13759_v51 = vld [vmem:[#allocation93_spill] sm:$0xff] }
 0xb5f   : > { %v4016_v1 = vadd.f32 %v4015_v34, %v3974_v12  ;;  %4097 = vmatpush1.bf16.msra.mxu1 %v7871_v6  ;;  %v3993_v6 = vunpack.c.l.bf16 %v7891_v30  ;;  %v13761_v12 = vld [vmem:[#allocation56_spill] sm:$0xff]  ;;  %v13762_v34 = vld [vmem:[#allocation59_spill] sm:$0xff] }
 0xb60   : > { %v4053_v29 = vadd.f32 %v4052_v31, %v3975_v39  ;;  %4098 = vmatprep.subr.bf16.mxu1 %v7877_v5  ;;  %v13760_v5 = vld [vmem:[#allocation52_spill] sm:$0xff]  ;;  %v13765_v39 = vld [vmem:[#allocation83_spill] sm:$0xff]  ;;  %v13766_v31 = vld [vmem:[#allocation86_spill] sm:$0xff] }
 0xb61   : > { %v4017_v48 = vadd.f32 %v4016_v1, %v3976_v49  ;;  %v13767_v49 = vld [vmem:[#allocation55_spill] sm:$0xff]  ;;  %v13768_v1 = vld [vmem:[#allocation57_spill] sm:$0xff] }
 0xb62   : > { %v4054_v0 = vadd.f32 %v4053_v29, %v3977_v4  ;;  %v13770_v4 = vld [vmem:[#allocation58_spill] sm:$0xff] }
 0xb63   : > { %v4018_v41 = vadd.f32 %v4017_v48, %v3978_v20  ;;  %4099 = vmatpush1.bf16.msra.mxu1 %v7875_v16  ;;  %v13757_v16 = vld [vmem:[#allocation80_spill] sm:$0xff]  ;;  %v13771_v29 = vld [vmem:[#allocation50_spill] sm:$0xff] }
 0xb64   : > { %v4055_v3 = vadd.f32 %v4054_v0, %v3979_v17  ;;  %4100 = vmatprep.subr.bf16.mxu1 %v7881_v22  ;;  %v13772_v22 = vld [vmem:[#allocation69_spill] sm:$0xff]  ;;  %v13773_v48 = vld [vmem:[#allocation90_spill] sm:$0xff]  ;;  %v3992_v17 = vunpack.c.l.bf16 %v7893_v28 }
 0xb65   : > { %v4019_v26 = vadd.f32 %v4018_v41, %v3980_v36  ;;  %v5523_v20 = vrot.slane %v13772_v22, 4 }
 0xb66   : > { %v4056_v40 = vadd.f32 %v4055_v3, %v3981_v33 }
 0xb67   : > { %4101 = vmatpush1.bf16.msra.mxu1 %v7879_v54  ;;  %v4020_v58 = vadd.f32 %v4019_v26, %v3982_v14  ;;  %v13769_v54 = vld [vmem:[#allocation87_spill] sm:$0xff] }
 0xb68   : > { %4102 = vmatprep.subr.bf16.mxu1 %v7885_v27  ;;  %v4057_v56 = vadd.f32 %v4056_v40, %v3983_v10 }
 0xb69   : > { %v4021_v46 = vadd.f32 %v4020_v58, %v3984_v63 }
 0xb6a   : > { %v4058_v38 = vadd.f32 %v4057_v56, %v3985_v11 }
 0xb6b   : > { %4103 = vmatpush1.bf16.msra.mxu1 %v7883_v59  ;;  %v4022_v32 = vadd.f32 %v4021_v46, %v3986_v60 }
 0xb6c   : > { %4104 = vmatprep.subr.bf16.mxu1 %v7889_v2  ;;  %v4059_v42 = vadd.f32 %v4058_v38, %v3987_v18 }
 0xb6d   : > { %v4023_v19 = vadd.f32 %v4022_v32, %v3988_v44 }
 0xb6e   : > { %v4060_v9 = vadd.f32 %v4059_v42, %v3989_v15 }
 0xb6f   : > { %4105 = vmatpush1.bf16.msra.mxu1 %v7887_v52  ;;  %v4024_v13 = vadd.f32 %v4023_v19, %v3990_v24 }
 0xb70   : > { %4106 = vmatprep.subr.bf16.mxu1 %v7891_v30  ;;  %v4061_v37 = vadd.f32 %v4060_v9, %v3991_v47 }
 0xb71   : > { %v4025_v0 = vadd.f32 %v4024_v13, %v3992_v17 }
 0xb72   : > { %v4062_v23 = vadd.f32 %v4061_v37, %v3993_v6 }
 0xb73   : > { %4107 = vmatpush1.bf16.msra.mxu1 %v7893_v28  ;;  %v4026_v43 = vadd.f32 %v4025_v0, %v3994_v21 }
 0xb74   : > { %7422 = vmatprep.subr.msk.bf16.mxu1 %vm1252_vm4, %v13754_v25  ;;  %v4063_v55 = vadd.f32 %v4062_v23, %v3995_v53 }
 0xb75   : > { %v4027_v36 = vrot.slane %v4026_v43, 4 }
 0xb76   : > { %4109 = vmatmul.mubr.bf16.vlgmr.msra.gmra.mrb[156].mxu1 %v4072_v45  ;;  %v4064_v41 = vrot.slane %v4063_v55, 4 }
 0xb77   : > { %4176 = vmatpush1.bf16.msra.mxu1 %v4170_v35  ;;  %4207 = vmatprep.mubr.bf16.mxu1 %v13756_v8  ;;  %v4028_v59 = vadd.f32 %v4027_v36, %v4026_v43 }
 0xb78   : > { %v4065_v33 = vadd.f32 %v4064_v41, %v4063_v55 }
 0xb79   : > { %v4029_v3 = vrot.slane %v4028_v59, 2 }
 0xb7a   : > { %v4066_v27 = vrot.slane %v4065_v33, 2 }
 0xb7b   : > { %v4030_v14 = vadd.f32 %v4029_v3, %v4028_v59 }
 0xb7c   : > { %v4067_v26 = vadd.f32 %v4066_v27, %v4065_v33 }
 0xb7d   : > { %v4031_v10 = vrot.slane %v4030_v14, 1 }
 0xb7e   : > { %7423 = vmatmul.mubr.msk.bf16.vlgmr.msra.gmra.mrb[160].mxu1 %vm1203_vm5, %v13757_v16  ;;  %v4068_v40 = vrot.slane %v4067_v26, 1 }
 0xb7f   : > { %4217 = vmatprep.mubr.bf16.mxu1 %v13756_v8  ;;  %v4032_v63 = vadd.f32 %v4031_v10, %v4030_v14 }
 0xb80   : > { %v4069_v58 = vadd.f32 %v4068_v40, %v4067_v26 }
 0xb81   : > { %7894 = vrcp.f32 %v4032_v63 }
 0xb82   : > { %7896 = vrcp.f32 %v4069_v58 }
 0xb86   : > { %7424 = vmatmul.mubr.msk.bf16.gmra.mrb[164].mxu1 %vm1203_vm5, %v13758_v57 }
 0xb87   : > { %4227 = vmatprep.mubr.bf16.mxu1 %v13756_v8 }
 0xb8b   : > { %v7895_v52 = vpop.eup %7894 }
 0xb8c   : > { %v7897_v56 = vpop.eup %7896 }
 0xb8e   : > { %7425 = vmatmul.mubr.msk.bf16.gmra.mrb[168].mxu1 %vm1203_vm5, %v13759_v51 }
 0xb8f   : > { %4237 = vmatprep.mubr.bf16.mxu1 %v13756_v8 }
 0xb96   : > { %7426 = vmatmul.mubr.msk.bf16.gmra.mrb[172].mxu1 %vm1203_vm5, %v13760_v5 }
 0xb97   : > { %4247 = vmatprep.mubr.bf16.mxu1 %v13756_v8 }
 0xb9e   : > { %7427 = vmatmul.mubr.msk.bf16.gmra.mrb[176].mxu1 %vm1203_vm5, %v13761_v12 }
 0xb9f   : > { %4257 = vmatprep.mubr.bf16.mxu1 %v13756_v8 }
 0xba6   : > { %7428 = vmatmul.mubr.msk.bf16.gmra.mrb[180].mxu1 %vm1203_vm5, %v13762_v34 }
 0xba7   : > { %4267 = vmatprep.mubr.bf16.mxu1 %v13756_v8 }
 0xbae   : > { %7429 = vmatmul.mubr.msk.bf16.gmra.mrb[184].mxu1 %vm1203_vm5, %v13763_v50 }
 0xbaf   : > { %4277 = vmatprep.mubr.bf16.mxu1 %v13756_v8 }
 0xbb6   : > { %7430 = vmatmul.mubr.msk.bf16.gmra.mrb[188].mxu1 %vm1203_vm5, %v13764_v7 }
 0xbb7   : > { %4287 = vmatprep.mubr.bf16.mxu1 %v13756_v8 }
 0xbbe   : > { %7431 = vmatmul.mubr.msk.bf16.gmra.mrb[192].mxu1 %vm1203_vm5, %v13765_v39 }
 0xbbf   : > { %4297 = vmatprep.mubr.bf16.mxu1 %v13756_v8 }
 0xbc6   : > { %7432 = vmatmul.mubr.msk.bf16.gmra.mrb[196].mxu1 %vm1203_vm5, %v13766_v31 }
 0xbc7   : > { %4307 = vmatprep.mubr.bf16.mxu1 %v13756_v8 }
 0xbce   : > { %7433 = vmatmul.mubr.msk.bf16.gmra.mrb[200].mxu1 %vm1203_vm5, %v13767_v49 }
 0xbcf   : > { %4317 = vmatprep.mubr.bf16.mxu1 %v13756_v8 }
 0xbd6   : > { %7434 = vmatmul.mubr.msk.bf16.gmra.mrb[204].mxu1 %vm1203_vm5, %v13768_v1 }
 0xbd7   : > { %4327 = vmatprep.mubr.bf16.mxu1 %v13756_v8 }
 0xbde   : > { %7435 = vmatmul.mubr.msk.bf16.gmra.mrb[208].mxu1 %vm1203_vm5, %v13769_v54 }
 0xbdf   : > { %4337 = vmatprep.mubr.bf16.mxu1 %v13756_v8 }
 0xbe6   : > { %7436 = vmatmul.mubr.msk.bf16.gmra.mrb[212].mxu1 %vm1203_vm5, %v13770_v4 }
 0xbe7   : > { %4347 = vmatprep.mubr.bf16.mxu1 %v13756_v8 }
 0xbee   : > { %7437 = vmatmul.mubr.msk.bf16.gmra.mrb[216].mxu1 %vm1203_vm5, %v13771_v29 }
 0xbef   : > { %4357 = vmatprep.mubr.bf16.mxu1 %v13756_v8 }
 0xbf6   : > { %7438 = vmatmul.mubr.msk.bf16.gmra.mrb[220].mxu1 %vm1203_vm5, %v13773_v48 }
 0xbf7   : > { %5558 = vmatprep.mubr.bf16.mxu1 %v5523_v20 }
 0xc49   : > { %v4110_v11 = vpop.f32.mrb[156].mxu1 }
 0xc4a   : > { %v11186_v2 = vmul.f32 %v7895_v52, %v4110_v11  ;;  %v4112_v60 = vpop.f32.mrb[157].mxu1 }
 0xc4b   : > { %v11188_v46 = vmul.f32 %v7897_v56, %v4112_v60  ;;  %v4114_v18 = vpop.f32.mrb[158].mxu1 }
 0xc4c   : > { %13774 = vst [vmem:[#allocation10_spill] sm:$0xff] %v11186_v2  ;;  %v4115_v32 = vpop.f32.mrb[159].mxu1 }
 0xc4d   : > { %13775 = vst [vmem:[#allocation9_spill] sm:$0xff] %v11188_v46 }
 0xc51   : > { %v11194_v30 = vpop.f32.mrb[160].mxu1 }
 0xc52   : > { %v11196_v24 = vpop.f32.mrb[161].mxu1 }
 0xc53   : > { %v11198_v19 = vpop.f32.mrb[162].mxu1 }
 0xc54   : > { %13778 = vst [vmem:[#allocation30_spill] sm:$0xff] %v11198_v19  ;;  %v11200_v47 = vpop.f32.mrb[163].mxu1 }
 0xc59   : > { %v11202_v9 = vpop.f32.mrb[164].mxu1 }
 0xc5a   : > { %13779 = vst [vmem:[#allocation79_spill] sm:$0xff] %v11202_v9  ;;  %v4368_v13 = vmax.f32 %v11194_v30, %v11202_v9  ;;  %v11206_v6 = vpop.f32.mrb[165].mxu1 }
 0xc5b   : > { %v4405_v37 = vmax.f32 %v11196_v24, %v11206_v6  ;;  %v11210_v28 = vpop.f32.mrb[166].mxu1 }
 0xc5c   : > { %13780 = vst [vmem:[#allocation98_spill] sm:$0xff] %v11210_v28  ;;  %v4369_v53 = vmax.f32 %v11198_v19, %v11210_v28  ;;  %v11214_v23 = vpop.f32.mrb[167].mxu1 }
 0xc5d   : > { %v4406_v61 = vmax.f32 %v11200_v47, %v11214_v23 }
 0xc61   : > { %v11218_v45 = vpop.f32.mrb[168].mxu1 }
 0xc62   : > { %13781 = vst [vmem:[#allocation97_spill] sm:$0xff] %v11218_v45  ;;  %v4370_v55 = vmax.f32 %v4368_v13, %v11218_v45  ;;  %v11221_v35 = vpop.f32.mrb[169].mxu1 }
 0xc63   : > { %v4407_v16 = vmax.f32 %v4405_v37, %v11221_v35  ;;  %v11224_v57 = vpop.f32.mrb[170].mxu1 }
 0xc64   : > { %v4371_v51 = vmax.f32 %v4369_v53, %v11224_v57  ;;  %v11227_v5 = vpop.f32.mrb[171].mxu1 }
 0xc65   : > { %v4408_v12 = vmax.f32 %v4406_v61, %v11227_v5 }
 0xc69   : > { %v11230_v34 = vpop.f32.mrb[172].mxu1 }
 0xc6a   : > { %v4372_v50 = vmax.f32 %v4370_v55, %v11230_v34  ;;  %v11233_v7 = vpop.f32.mrb[173].mxu1 }
 0xc6b   : > { %v4409_v39 = vmax.f32 %v4407_v16, %v11233_v7  ;;  %v11236_v31 = vpop.f32.mrb[174].mxu1 }
 0xc6c   : > { %v4373_v49 = vmax.f32 %v4371_v51, %v11236_v31  ;;  %v11239_v1 = vpop.f32.mrb[175].mxu1 }
 0xc6d   : > { %v4410_v54 = vmax.f32 %v4408_v12, %v11239_v1 }
 0xc71   : > { %v11242_v4 = vpop.f32.mrb[176].mxu1 }
 0xc72   : > { %v4374_v29 = vmax.f32 %v4372_v50, %v11242_v4  ;;  %v11245_v22 = vpop.f32.mrb[177].mxu1 }
 0xc73   : > { %v4411_v20 = vmax.f32 %v4409_v39, %v11245_v22  ;;  %v11248_v48 = vpop.f32.mrb[178].mxu1 }
 0xc74   : > { %v4375_v17 = vmax.f32 %v4373_v49, %v11248_v48  ;;  %v11251_v0 = vpop.f32.mrb[179].mxu1 }
 0xc75   : > { %v4412_v21 = vmax.f32 %v4410_v54, %v11251_v0 }
 0xc79   : > { %v11254_v43 = vpop.f32.mrb[180].mxu1 }
 0xc7a   : > { %v4376_v36 = vmax.f32 %v4374_v29, %v11254_v43  ;;  %v11257_v41 = vpop.f32.mrb[181].mxu1 }
 0xc7b   : > { %13782 = vst [vmem:[#allocation14_spill] sm:$0xff] %v11257_v41  ;;  %v4413_v59 = vmax.f32 %v4411_v20, %v11257_v41  ;;  %v11260_v33 = vpop.f32.mrb[182].mxu1 }
 0xc7c   : > { %v4377_v3 = vmax.f32 %v4375_v17, %v11260_v33  ;;  %v11263_v27 = vpop.f32.mrb[183].mxu1 }
 0xc7d   : > { %13783 = vst [vmem:[#allocation16_spill] sm:$0xff] %v11263_v27  ;;  %v4414_v14 = vmax.f32 %v4412_v21, %v11263_v27 }
 0xc81   : > { %v11266_v26 = vpop.f32.mrb[184].mxu1 }
 0xc82   : > { %v4378_v10 = vmax.f32 %v4376_v36, %v11266_v26  ;;  %v11269_v40 = vpop.f32.mrb[185].mxu1 }
 0xc83   : > { %13784 = vst [vmem:[#allocation15_spill] sm:$0xff] %v11269_v40  ;;  %v4415_v63 = vmax.f32 %v4413_v59, %v11269_v40  ;;  %v11272_v58 = vpop.f32.mrb[186].mxu1 }
 0xc84   : > { %v4379_v52 = vmax.f32 %v4377_v3, %v11272_v58  ;;  %v11275_v11 = vpop.f32.mrb[187].mxu1 }
 0xc85   : > { %13785 = vst [vmem:[#allocation18_spill] sm:$0xff] %v11275_v11  ;;  %v4416_v56 = vmax.f32 %v4414_v14, %v11275_v11 }
 0xc89   : > { %v11278_v60 = vpop.f32.mrb[188].mxu1 }
 0xc8a   : > { %v4380_v18 = vmax.f32 %v4378_v10, %v11278_v60  ;;  %v11281_v32 = vpop.f32.mrb[189].mxu1 }
 0xc8b   : > { %13786 = vst [vmem:[#allocation36_spill] sm:$0xff] %v11281_v32  ;;  %v4417_v13 = vmax.f32 %v4415_v63, %v11281_v32  ;;  %v11284_v37 = vpop.f32.mrb[190].mxu1 }
 0xc8c   : > { %v4381_v53 = vmax.f32 %v4379_v52, %v11284_v37  ;;  %v11287_v61 = vpop.f32.mrb[191].mxu1 }
 0xc8d   : > { %13787 = vst [vmem:[#allocation31_spill] sm:$0xff] %v11287_v61  ;;  %v4418_v55 = vmax.f32 %v4416_v56, %v11287_v61 }
 0xc91   : > { %v11290_v16 = vpop.f32.mrb[192].mxu1 }
 0xc92   : > { %v4382_v51 = vmax.f32 %v4380_v18, %v11290_v16  ;;  %v11293_v12 = vpop.f32.mrb[193].mxu1 }
 0xc93   : > { %13788 = vst [vmem:[#allocation13_spill] sm:$0xff] %v11293_v12  ;;  %v4419_v50 = vmax.f32 %v4417_v13, %v11293_v12  ;;  %v11296_v39 = vpop.f32.mrb[194].mxu1 }
 0xc94   : > { %v4383_v49 = vmax.f32 %v4381_v53, %v11296_v39  ;;  %v11299_v54 = vpop.f32.mrb[195].mxu1 }
 0xc95   : > { %13789 = vst [vmem:[#allocation34_spill] sm:$0xff] %v11299_v54  ;;  %v4420_v29 = vmax.f32 %v4418_v55, %v11299_v54 }
 0xc99   : > { %v11302_v20 = vpop.f32.mrb[196].mxu1 }
 0xc9a   : > { %v4384_v17 = vmax.f32 %v4382_v51, %v11302_v20  ;;  %v11305_v21 = vpop.f32.mrb[197].mxu1 }
 0xc9b   : > { %13790 = vst [vmem:[#allocation35_spill] sm:$0xff] %v11305_v21  ;;  %v4421_v36 = vmax.f32 %v4419_v50, %v11305_v21  ;;  %v11308_v59 = vpop.f32.mrb[198].mxu1 }
 0xc9c   : > { %v4385_v3 = vmax.f32 %v4383_v49, %v11308_v59  ;;  %v11311_v14 = vpop.f32.mrb[199].mxu1 }
 0xc9d   : > { %13791 = vst [vmem:[#allocation60_spill] sm:$0xff] %v11311_v14  ;;  %v4422_v10 = vmax.f32 %v4420_v29, %v11311_v14 }
 0xca1   : > { %v11314_v63 = vpop.f32.mrb[200].mxu1 }
 0xca2   : > { %v4386_v52 = vmax.f32 %v4384_v17, %v11314_v63  ;;  %v11317_v56 = vpop.f32.mrb[201].mxu1 }
 0xca3   : > { %13792 = vst [vmem:[#allocation61_spill] sm:$0xff] %v11317_v56  ;;  %v4423_v18 = vmax.f32 %v4421_v36, %v11317_v56  ;;  %v11320_v13 = vpop.f32.mrb[202].mxu1 }
 0xca4   : > { %v4387_v53 = vmax.f32 %v4385_v3, %v11320_v13  ;;  %v11323_v55 = vpop.f32.mrb[203].mxu1 }
 0xca5   : > { %13793 = vst [vmem:[#allocation62_spill] sm:$0xff] %v11323_v55  ;;  %v4424_v51 = vmax.f32 %v4422_v10, %v11323_v55 }
 0xca9   : > { %v11326_v50 = vpop.f32.mrb[204].mxu1 }
 0xcaa   : > { %v4388_v49 = vmax.f32 %v4386_v52, %v11326_v50  ;;  %v11329_v29 = vpop.f32.mrb[205].mxu1 }
 0xcab   : > { %13794 = vst [vmem:[#allocation63_spill] sm:$0xff] %v11329_v29  ;;  %v4425_v17 = vmax.f32 %v4423_v18, %v11329_v29  ;;  %v11332_v44 = vpop.f32.mrb[206].mxu1 }
 0xcac   : > { %v4389_v36 = vmax.f32 %v4387_v53, %v11332_v44  ;;  %v11335_v42 = vpop.f32.mrb[207].mxu1 }
 0xcad   : > { %13795 = vst [vmem:[#allocation64_spill] sm:$0xff] %v11335_v42  ;;  %v4426_v3 = vmax.f32 %v4424_v51, %v11335_v42 }
 0xcb1   : > { %v11338_v38 = vpop.f32.mrb[208].mxu1 }
 0xcb2   : > { %v4390_v10 = vmax.f32 %v4388_v49, %v11338_v38  ;;  %v11341_v2 = vpop.f32.mrb[209].mxu1 }
 0xcb3   : > { %13796 = vst [vmem:[#allocation65_spill] sm:$0xff] %v11341_v2  ;;  %v4427_v52 = vmax.f32 %v4425_v17, %v11341_v2  ;;  %v11344_v15 = vpop.f32.mrb[210].mxu1 }
 0xcb4   : > { %v4391_v18 = vmax.f32 %v4389_v36, %v11344_v15  ;;  %v11347_v46 = vpop.f32.mrb[211].mxu1 }
 0xcb5   : > { %13797 = vst [vmem:[#allocation66_spill] sm:$0xff] %v11347_v46  ;;  %v4428_v53 = vmax.f32 %v4426_v3, %v11347_v46 }
 0xcb9   : > { %v11350_v8 = vpop.f32.mrb[212].mxu1 }
 0xcba   : > { %v4392_v51 = vmax.f32 %v4390_v10, %v11350_v8  ;;  %v11353_v62 = vpop.f32.mrb[213].mxu1 }
 0xcbb   : > { %13798 = vst [vmem:[#allocation67_spill] sm:$0xff] %v11353_v62  ;;  %v4429_v49 = vmax.f32 %v4427_v52, %v11353_v62  ;;  %v11356_v25 = vpop.f32.mrb[214].mxu1 }
 0xcbc   : > { %v4393_v17 = vmax.f32 %v4391_v18, %v11356_v25  ;;  %v11359_v2 = vpop.f32.mrb[215].mxu1 }
 0xcbd   : > { %13799 = vst [vmem:[#allocation68_spill] sm:$0xff] %v11359_v2  ;;  %v4430_v36 = vmax.f32 %v4428_v53, %v11359_v2 }
 0xcc1   : > { %v11362_v42 = vpop.f32.mrb[216].mxu1 }
 0xcc2   : > { %v4394_v3 = vmax.f32 %v4392_v51, %v11362_v42  ;;  %v11365_v46 = vpop.f32.mrb[217].mxu1 }
 0xcc3   : > { %13800 = vst [vmem:[#allocation70_spill] sm:$0xff] %v11365_v46  ;;  %v4431_v10 = vmax.f32 %v4429_v49, %v11365_v46  ;;  %v11368_v29 = vpop.f32.mrb[218].mxu1 }
 0xcc4   : > { %v4395_v52 = vmax.f32 %v4393_v17, %v11368_v29  ;;  %v11371_v62 = vpop.f32.mrb[219].mxu1 }
 0xcc5   : > { %13801 = vst [vmem:[#allocation71_spill] sm:$0xff] %v11371_v62  ;;  %v4432_v18 = vmax.f32 %v4430_v36, %v11371_v62 }
 0xcc9   : > { %v4359_v55 = vpop.f32.mrb[220].mxu1 }
 0xcca   : > { %v4396_v56 = vmax.f32 %v4394_v3, %v4359_v55  ;;  %v11374_v14 = vpop.f32.mrb[221].mxu1 }
 0xccb   : > { %v4433_v53 = vmax.f32 %v4431_v10, %v11374_v14  ;;  %v4363_v2 = vpop.f32.mrb[222].mxu1 }
 0xccc   : > { %v4397_v51 = vmax.f32 %v4395_v52, %v4363_v2  ;;  %v4365_v21 = vpop.f32.mrb[223].mxu1 }
 0xccd   : > { %v4434_v54 = vmax.f32 %v4432_v18, %v4365_v21 }
 0xcce   : > { %v4398_v12 = vmax.f32 %v4396_v56, %v4397_v51  ;;  %v13806_v51 = vld [vmem:[#allocation16_spill] sm:$0xff] }
 0xccf   : > { %v4435_v49 = vmax.f32 %v4433_v53, %v4434_v54 }
 0xcd0   : > { %v4399_v46 = vrot.slane %v4398_v12, 4 }
 0xcd1   : > { %v4436_v61 = vrot.slane %v4435_v49, 4 }
 0xcd2   : > { %v4400_v32 = vmax.f32 %v4398_v12, %v4399_v46 }
 0xcd3   : > { %v4437_v17 = vmax.f32 %v4435_v49, %v4436_v61  ;;  %v13807_v49 = vld [vmem:[#allocation15_spill] sm:$0xff] }
 0xcd4   : > { %v4401_v11 = vrot.slane %v4400_v32, 2 }
 0xcd5   : > { %v4438_v40 = vrot.slane %v4437_v17, 2 }
 0xcd6   : > { %v4402_v27 = vmax.f32 %v4400_v32, %v4401_v11 }
 0xcd7   : > { %v4439_v36 = vmax.f32 %v4437_v17, %v4438_v40  ;;  %v13808_v17 = vld [vmem:[#allocation18_spill] sm:$0xff] }
 0xcd8   : > { %v4403_v62 = vrot.slane %v4402_v27, 1 }
 0xcd9   : > { %v4440_v41 = vrot.slane %v4439_v36, 1 }
 0xcda   : > { %v11377_v3 = vmax.f32 %v4402_v27, %v4403_v62 }
 0xcdb   : > { %v11415_v53 = vmax.f32 %v4439_v36, %v4440_v41 }
 0xcdc   : > { %13802 = vst [vmem:[#allocation72_spill] sm:$0xff] %v11377_v3  ;;  %v4502_v10 = vsub.f32 %v4359_v55, %v11377_v3  ;;  %v4504_v52 = vsub.f32 %v4363_v2, %v11377_v3  ;;  %v4452_v27 = vsub.f32 %v11224_v57, %v11377_v3  ;;  %v4454_v2 = vsub.f32 %v11230_v34, %v11377_v3 }
 0xcdd   : > { %v4456_v32 = vsub.f32 %v11236_v31, %v11377_v3  ;;  %v4458_v61 = vsub.f32 %v11242_v4, %v11377_v3  ;;  %v4460_v12 = vsub.f32 %v11248_v48, %v11377_v3  ;;  %v4462_v55 = vsub.f32 %v11254_v43, %v11377_v3 }
 0xcde   : > { %v11393_v11 = vpack.c.bf16 %v4504_v52, %v4502_v10  ;;  %v4464_v57 = vsub.f32 %v11260_v33, %v11377_v3  ;;  %v4466_v18 = vsub.f32 %v11266_v26, %v11377_v3  ;;  %v4468_v34 = vsub.f32 %v11272_v58, %v11377_v3 }
 0xcdf   : > { %v4470_v31 = vsub.f32 %v11278_v60, %v11377_v3  ;;  %v4472_v4 = vsub.f32 %v11284_v37, %v11377_v3  ;;  %v4474_v48 = vsub.f32 %v11290_v16, %v11377_v3  ;;  %v4476_v43 = vsub.f32 %v11296_v39, %v11377_v3 }
 0xce0   : > { %13803 = vst [vmem:[#allocation73_spill] sm:$0xff] %v11393_v11  ;;  %v4478_v33 = vsub.f32 %v11302_v20, %v11377_v3  ;;  %v4480_v26 = vsub.f32 %v11308_v59, %v11377_v3  ;;  %v4482_v58 = vsub.f32 %v11314_v63, %v11377_v3  ;;  %v4484_v60 = vsub.f32 %v11320_v13, %v11377_v3 }
 0xce1   : > { %v4486_v41 = vsub.f32 %v11326_v50, %v11377_v3  ;;  %v4488_v37 = vsub.f32 %v11332_v44, %v11377_v3  ;;  %v4490_v16 = vsub.f32 %v11338_v38, %v11377_v3  ;;  %v4492_v39 = vsub.f32 %v11344_v15, %v11377_v3 }
 0xce2   : > { %v4494_v20 = vsub.f32 %v11350_v8, %v11377_v3  ;;  %v4496_v59 = vsub.f32 %v11356_v25, %v11377_v3  ;;  %v4498_v63 = vsub.f32 %v11362_v42, %v11377_v3  ;;  %v4500_v13 = vsub.f32 %v11368_v29, %v11377_v3 }
 0xce3   : > { %v4503_v44 = vsub.f32 %v11374_v14, %v11415_v53  ;;  %v4505_v38 = vsub.f32 %v4365_v21, %v11415_v53  ;;  %v4443_v15 = vsub.f32 %v11196_v24, %v11415_v53  ;;  %v4445_v8 = vsub.f32 %v11200_v47, %v11415_v53 }
 0xce4   : > { %v4447_v25 = vsub.f32 %v11206_v6, %v11415_v53  ;;  %v4449_v42 = vsub.f32 %v11214_v23, %v11415_v53  ;;  %v4451_v50 = vsub.f32 %v11221_v35, %v11415_v53  ;;  %v4453_v14 = vsub.f32 %v11227_v5, %v11415_v53  ;;  %v13805_v23 = vld [vmem:[#allocation14_spill] sm:$0xff] }
 0xce5   : > { %v4455_v21 = vsub.f32 %v11233_v7, %v11415_v53  ;;  %v11462_v29 = vpack.c.bf16 %v4505_v38, %v4503_v44  ;;  %v4457_v24 = vsub.f32 %v11239_v1, %v11415_v53  ;;  %v4459_v47 = vsub.f32 %v11245_v22, %v11415_v53  ;;  %v13809_v1 = vld [vmem:[#allocation36_spill] sm:$0xff]  ;;  %v13810_v22 = vld [vmem:[#allocation31_spill] sm:$0xff]  ;;  %v13812_v38 = vld [vmem:[#allocation34_spill] sm:$0xff] }
 0xce6   : > { %v4461_v6 = vsub.f32 %v11251_v0, %v11415_v53  ;;  %v4463_v35 = vsub.f32 %v13805_v23, %v11415_v53  ;;  %v4465_v5 = vsub.f32 %v13806_v51, %v11415_v53  ;;  %v4467_v7 = vsub.f32 %v13807_v49, %v11415_v53  ;;  %v13811_v0 = vld [vmem:[#allocation13_spill] sm:$0xff]  ;;  %v13813_v51 = vld [vmem:[#allocation35_spill] sm:$0xff]  ;;  %v13814_v49 = vld [vmem:[#allocation60_spill] sm:$0xff] }
 0xce7   : > { %13804 = vst [vmem:[#allocation74_spill] sm:$0xff] %v11462_v29  ;;  %v4469_v36 = vsub.f32 %v13808_v17, %v11415_v53  ;;  %v4471_v10 = vsub.f32 %v13809_v1, %v11415_v53  ;;  %v4473_v52 = vsub.f32 %v13810_v22, %v11415_v53  ;;  %v4475_v44 = vsub.f32 %v13811_v0, %v11415_v53  ;;  %v13815_v17 = vld [vmem:[#allocation61_spill] sm:$0xff]  ;;  %v13816_v1 = vld [vmem:[#allocation62_spill] sm:$0xff]  ;;  %v13817_v22 = vld [vmem:[#allocation63_spill] sm:$0xff] }
 0xce8   : > { %v4477_v23 = vsub.f32 %v13812_v38, %v11415_v53  ;;  %v4479_v62 = vsub.f32 %v13813_v51, %v11415_v53  ;;  %v4481_v40 = vsub.f32 %v13814_v49, %v11415_v53  ;;  %v4483_v46 = vsub.f32 %v13815_v17, %v11415_v53  ;;  %v13818_v0 = vld [vmem:[#allocation64_spill] sm:$0xff]  ;;  %v13819_v38 = vld [vmem:[#allocation65_spill] sm:$0xff]  ;;  %v13820_v51 = vld [vmem:[#allocation66_spill] sm:$0xff] }
 0xce9   : > { %v4485_v54 = vsub.f32 %v13816_v1, %v11415_v53  ;;  %v4487_v56 = vsub.f32 %v13817_v22, %v11415_v53  ;;  %v4489_v11 = vsub.f32 %v13818_v0, %v11415_v53  ;;  %v4491_v29 = vsub.f32 %v13819_v38, %v11415_v53  ;;  %v13821_v49 = vld [vmem:[#allocation67_spill] sm:$0xff]  ;;  %v13822_v17 = vld [vmem:[#allocation68_spill] sm:$0xff]  ;;  %v13823_v1 = vld [vmem:[#allocation70_spill] sm:$0xff] }
 0xcea   : > { %v4493_v45 = vsub.f32 %v13820_v51, %v11415_v53  ;;  %v4495_v28 = vsub.f32 %v13821_v49, %v11415_v53  ;;  %v4497_v9 = vsub.f32 %v13822_v17, %v11415_v53  ;;  %v4499_v19 = vsub.f32 %v13823_v1, %v11415_v53  ;;  %v13824_v22 = vld [vmem:[#allocation71_spill] sm:$0xff]  ;;  %v13825_v0 = vld [vmem:[#allocation72_spill] sm:$0xff]  ;;  %v13827_v51 = vld [vmem:[#allocation30_spill] sm:$0xff] }
 0xceb   : > { %v4501_v3 = vsub.f32 %v13824_v22, %v11415_v53  ;;  %v13826_v38 = vsub.f32 %v11194_v30, %v13825_v0  ;;  %v13828_v49 = vsub.f32 %v13827_v51, %v13825_v0  ;;  %v13829_v1 = vld [vmem:[#allocation79_spill] sm:$0xff]  ;;  %v13831_v53 = vld [vmem:[#allocation98_spill] sm:$0xff] }
 0xcec   : > { %v13830_v22 = vsub.f32 %v13829_v1, %v13825_v0  ;;  %v13832_v30 = vsub.f32 %v13831_v53, %v13825_v0  ;;  %v4512_v53 = vpack.c.bf16 %v4456_v32, %v4454_v2  ;;  %v11535_v2 = vpack.c.bf16 %v4484_v60, %v4482_v58 }
 0xced   : > { %v4506_v17 = vpack.c.bf16 %v13828_v49, %v13826_v38  ;;  %v13833_v38 = vld [vmem:[#allocation97_spill] sm:$0xff]  ;;  %v11537_v32 = vpack.c.bf16 %v4488_v37, %v4486_v41  ;;  %v11553_v58 = vpack.c.bf16 %v4485_v54, %v4483_v46  ;;  %v11555_v60 = vpack.c.bf16 %v4489_v11, %v4487_v56 }
 0xcee   : > { %v4508_v51 = vpack.c.bf16 %v13832_v30, %v13830_v22  ;;  %v13834_v49 = vsub.f32 %v13833_v38, %v13825_v0  ;;  %v4514_v22 = vpack.c.bf16 %v4460_v12, %v4458_v61  ;;  %v11525_v30 = vpack.c.bf16 %v4464_v57, %v4462_v55 }
 0xcef   : > { %v11527_v0 = vpack.c.bf16 %v4468_v34, %v4466_v18  ;;  %v11529_v38 = vpack.c.bf16 %v4472_v4, %v4470_v31  ;;  %v11539_v12 = vpack.c.bf16 %v4492_v39, %v4490_v16  ;;  %v11541_v61 = vpack.c.bf16 %v4496_v59, %v4494_v20 }
 0xcf0   : > { %v4510_v1 = vpack.c.bf16 %v4452_v27, %v13834_v49  ;;  %13835 = vst [vmem:[#allocation75_spill] sm:$0xff] %v11525_v30  ;;  %v11531_v27 = vpack.c.bf16 %v4476_v43, %v4474_v48  ;;  %v11533_v49 = vpack.c.bf16 %v4480_v26, %v4478_v33  ;;  %v11543_v55 = vpack.c.bf16 %v4500_v13, %v4498_v63 }
 0xcf1   : > { %v4507_v57 = vpack.c.bf16 %v4445_v8, %v4443_v15  ;;  %v4509_v30 = vpack.c.bf16 %v4449_v42, %v4447_v25  ;;  %v4511_v18 = vpack.c.bf16 %v4453_v14, %v4451_v50  ;;  %v4513_v34 = vpack.c.bf16 %v4457_v24, %v4455_v21 }
 0xcf2   : > { %v4515_v31 = vpack.c.bf16 %v4461_v6, %v4459_v47  ;;  %v4517_v4 = vpack.c.bf16 %v4465_v5, %v4463_v35  ;;  %v11545_v48 = vpack.c.bf16 %v4469_v36, %v4467_v7  ;;  %v11547_v43 = vpack.c.bf16 %v4473_v52, %v4471_v10 }
 0xcf3   : > { %v11549_v33 = vpack.c.bf16 %v4477_v23, %v4475_v44  ;;  %v11551_v26 = vpack.c.bf16 %v4481_v40, %v4479_v62  ;;  %v11557_v41 = vpack.c.bf16 %v4493_v45, %v4491_v29  ;;  %v11559_v37 = vpack.c.bf16 %v4497_v9, %v4495_v28 }
 0xcf4   : > { %v11561_v16 = vpack.c.bf16 %v4501_v3, %v4499_v19  ;;  %v4539_v39 = vmul.bf16 1069105081, %v4506_v17  ;;  %v4542_v20 = vmul.bf16 1069105081, %v4507_v57  ;;  %v4545_v59 = vmul.bf16 1069105081, %v4508_v51 }
 0xcf5   : > { %v4548_v63 = vmul.bf16 1069105081, %v4509_v30  ;;  %v4551_v13 = vmul.bf16 1069105081, %v4510_v1  ;;  %v4554_v15 = vmul.bf16 1069105081, %v4511_v18 }
 0xcf6   : > { %7898 = vpow.bf16 %v4539_v39  ;;  %v4557_v54 = vmul.bf16 1069105081, %v4512_v53  ;;  %v4560_v56 = vmul.bf16 1069105081, %v4513_v34  ;;  %v4563_v45 = vmul.bf16 1069105081, %v4514_v22 }
 0xcf7   : > { %7900 = vpow.bf16 %v4542_v20  ;;  %v4566_v9 = vmul.bf16 1069105081, %v4515_v31  ;;  %v13836_v3 = vld [vmem:[#allocation75_spill] sm:$0xff]  ;;  %v4572_v8 = vmul.bf16 1069105081, %v4517_v4 }
 0xcf8   : > { %7902 = vpow.bf16 %v4545_v59  ;;  %v4569_v46 = vmul.bf16 1069105081, %v13836_v3  ;;  %v4575_v35 = vmul.bf16 1069105081, %v11527_v0  ;;  %v4578_v36 = vmul.bf16 1069105081, %v11545_v48 }
 0xcf9   : > { %7904 = vpow.bf16 %v4548_v63  ;;  %v4581_v22 = vmul.bf16 1069105081, %v11529_v38  ;;  %v4584_v57 = vmul.bf16 1069105081, %v11547_v43  ;;  %v4587_v63 = vmul.bf16 1069105081, %v11531_v27 }
 0xcfa   : > { %7906 = vpow.bf16 %v4551_v13 }
 0xcfb   : > { %7908 = vpow.bf16 %v4554_v15  ;;  %v4590_v15 = vmul.bf16 1069105081, %v11549_v33 }
 0xcfc   : > { %7910 = vpow.bf16 %v4557_v54 }
 0xcfd   : > { %7912 = vpow.bf16 %v4560_v56 }
 0xcfe   : > { %7914 = vpow.bf16 %v4563_v45 }
 0xcff   : > { %7916 = vpow.bf16 %v4566_v9 }
 0xd00   : > { %7918 = vpow.bf16 %v4569_v46  ;;  %v4593_v46 = vmul.bf16 1069105081, %v11533_v49 }
 0xd01   : > { %v7899_v19 = vpop.eup %7898  ;;  %7920 = vpow.bf16 %v4572_v8 }
 0xd02   : > { %v7901_v28 = vpop.eup %7900  ;;  %v4634_v40 = vunpack.c.l.bf16 %v7899_v19  ;;  %v4636_v62 = vunpack.c.h.bf16 %v7899_v19  ;;  %7922 = vpow.bf16 %v4575_v35 }
 0xd03   : > { %v7903_v11 = vpop.eup %7902  ;;  %v4635_v25 = vunpack.c.l.bf16 %v7901_v28  ;;  %v4637_v42 = vunpack.c.h.bf16 %v7901_v28  ;;  %4772 = vmatprep.subr.bf16.mxu0 %v7901_v28  ;;  %7924 = vpow.bf16 %v4578_v36 }
 0xd04   : > { %v7905_v50 = vpop.eup %7904  ;;  %v4638_v14 = vunpack.c.l.bf16 %v7903_v11  ;;  %v4698_v21 = vadd.f32 %v4636_v62, %v4634_v40  ;;  %4773 = vmatpush1.bf16.msra.mxu0 %v7899_v19  ;;  %v4640_v5 = vunpack.c.h.bf16 %v7903_v11  ;;  %7926 = vpow.bf16 %v4581_v22 }
 0xd05   : > { %v7907_v29 = vpop.eup %7906  ;;  %v4639_v24 = vunpack.c.l.bf16 %v7905_v50  ;;  %v4735_v47 = vadd.f32 %v4637_v42, %v4635_v25  ;;  %4774 = vmatprep.subr.bf16.mxu0 %v7905_v50  ;;  %v4641_v10 = vunpack.c.h.bf16 %v7905_v50  ;;  %7928 = vpow.bf16 %v4584_v57 }
 0xd06   : > { %v7909_v6 = vpop.eup %7908  ;;  %v4699_v7 = vadd.f32 %v4698_v21, %v4638_v14  ;;  %v4642_v44 = vunpack.c.l.bf16 %v7907_v29  ;;  %v4644_v30 = vunpack.c.h.bf16 %v7907_v29  ;;  %7930 = vpow.bf16 %v4587_v63 }
 0xd07   : > { %v4736_v52 = vadd.f32 %v4735_v47, %v4639_v24  ;;  %v7911_v17 = vpop.eup %7910  ;;  %v4643_v51 = vunpack.c.l.bf16 %v7909_v6  ;;  %v4645_v18 = vunpack.c.h.bf16 %v7909_v6  ;;  %7932 = vpow.bf16 %v4590_v15 }
 0xd08   : > { %v4700_v23 = vadd.f32 %v4699_v7, %v4640_v5  ;;  %4775 = vmatpush1.bf16.msra.mxu0 %v7903_v11  ;;  %v7913_v53 = vpop.eup %7912  ;;  %v4646_v31 = vunpack.c.l.bf16 %v7911_v17  ;;  %v4648_v13 = vunpack.c.h.bf16 %v7911_v17  ;;  %v4596_v62 = vmul.bf16 1069105081, %v11551_v26 }
 0xd09   : > { %v4737_v1 = vadd.f32 %v4736_v52, %v4641_v10  ;;  %4776 = vmatprep.subr.bf16.mxu0 %v7909_v6  ;;  %v7915_v48 = vpop.eup %7914  ;;  %v4647_v39 = vunpack.c.l.bf16 %v7913_v53  ;;  %v4649_v54 = vunpack.c.h.bf16 %v7913_v53  ;;  %7934 = vpow.bf16 %v4593_v46 }
 0xd0a   : > { %v4701_v0 = vadd.f32 %v4700_v23, %v4642_v44  ;;  %v7917_v59 = vpop.eup %7916  ;;  %v4650_v56 = vunpack.c.l.bf16 %v7915_v48  ;;  %v4652_v40 = vunpack.c.h.bf16 %v7915_v48  ;;  %7936 = vpow.bf16 %v4596_v62 }
 0xd0b   : > { %v4738_v34 = vadd.f32 %v4737_v1, %v4643_v51  ;;  %v7919_v9 = vpop.eup %7918  ;;  %v4651_v19 = vunpack.c.l.bf16 %v7917_v59  ;;  %v4653_v11 = vunpack.c.h.bf16 %v7917_v59  ;;  %v4602_v47 = vmul.bf16 1069105081, %v11553_v58 }
 0xd0c   : > { %v4702_v4 = vadd.f32 %v4701_v0, %v4644_v30  ;;  %4777 = vmatpush1.bf16.msra.mxu0 %v7907_v29  ;;  %v7921_v3 = vpop.eup %7920  ;;  %v4654_v8 = vunpack.c.l.bf16 %v7919_v9  ;;  %v4599_v29 = vmul.bf16 1069105081, %v11535_v2  ;;  %v4656_v24 = vunpack.c.h.bf16 %v7919_v9 }
 0xd0d   : > { %v4739_v20 = vadd.f32 %v4738_v34, %v4645_v18  ;;  %4778 = vmatprep.subr.bf16.mxu0 %v7913_v53  ;;  %v7923_v42 = vpop.eup %7922  ;;  %v4655_v50 = vunpack.c.l.bf16 %v7921_v3  ;;  %v4657_v6 = vunpack.c.h.bf16 %v7921_v3  ;;  %v4605_v44 = vmul.bf16 1069105081, %v11537_v32 }
 0xd0e   : > { %v4703_v38 = vadd.f32 %v4702_v4, %v4646_v31  ;;  %v7925_v21 = vpop.eup %7924  ;;  %v4658_v35 = vunpack.c.l.bf16 %v7923_v42  ;;  %7938 = vpow.bf16 %v4599_v29  ;;  %v4660_v23 = vunpack.c.h.bf16 %v7923_v42  ;;  %v13837_v29 = vld [vmem:[#allocation74_spill] sm:$0xff] }
 0xd0f   : > { %v4740_v43 = vadd.f32 %v4739_v20, %v4647_v39  ;;  %v7927_v7 = vpop.eup %7926  ;;  %v4659_v36 = vunpack.c.l.bf16 %v7925_v21  ;;  %7940 = vpow.bf16 %v4602_v47  ;;  %v4661_v51 = vunpack.c.h.bf16 %v7925_v21 }
 0xd10   : > { %v4704_v45 = vadd.f32 %v4703_v38, %v4648_v13  ;;  %4779 = vmatpush1.bf16.msra.mxu0 %v7911_v17  ;;  %v7929_v52 = vpop.eup %7928  ;;  %v4608_v17 = vmul.bf16 1069105081, %v11555_v60  ;;  %v4662_v1 = vunpack.c.l.bf16 %v7927_v7  ;;  %7942 = vpow.bf16 %v4605_v44  ;;  %v13838_v44 = vld [vmem:[#allocation73_spill] sm:$0xff] }
 0xd11   : > { %v4741_v28 = vadd.f32 %v4740_v43, %v4649_v54  ;;  %4780 = vmatprep.subr.bf16.mxu0 %v7917_v59  ;;  %v7931_v22 = vpop.eup %7930  ;;  %v4663_v30 = vunpack.c.l.bf16 %v7929_v52  ;;  %v4611_v18 = vmul.bf16 1069105081, %v11539_v12  ;;  %v4664_v34 = vunpack.c.h.bf16 %v7927_v7 }
 0xd12   : > { %v4705_v27 = vadd.f32 %v4704_v45, %v4650_v56  ;;  %v7933_v57 = vpop.eup %7932  ;;  %7944 = vpow.bf16 %v4608_v17  ;;  %v4614_v31 = vmul.bf16 1069105081, %v11557_v41  ;;  %v4665_v4 = vunpack.c.h.bf16 %v7929_v52 }
 0xd13   : > { %v4742_v33 = vadd.f32 %v4741_v28, %v4651_v19  ;;  %v4667_v59 = vunpack.c.l.bf16 %v7933_v57  ;;  %7946 = vpow.bf16 %v4611_v18  ;;  %v4617_v38 = vmul.bf16 1069105081, %v11541_v61 }
 0xd14   : > { %v4706_v25 = vadd.f32 %v4705_v27, %v4652_v40  ;;  %4781 = vmatpush1.bf16.msra.mxu0 %v7915_v48  ;;  %v4666_v48 = vunpack.c.l.bf16 %v7931_v22  ;;  %v7935_v20 = vpop.eup %7934  ;;  %v4668_v15 = vunpack.c.h.bf16 %v7931_v22  ;;  %7948 = vpow.bf16 %v4614_v31 }
 0xd15   : > { %v4743_v14 = vadd.f32 %v4742_v33, %v4653_v11  ;;  %4782 = vmatprep.subr.bf16.mxu0 %v7921_v3  ;;  %v7937_v13 = vpop.eup %7936  ;;  %v4620_v54 = vmul.bf16 1069105081, %v11559_v37  ;;  %v4669_v43 = vunpack.c.h.bf16 %v7933_v57  ;;  %v4670_v56 = vunpack.c.l.bf16 %v7935_v20 }
 0xd16   : > { %v4707_v49 = vadd.f32 %v4706_v25, %v4654_v8  ;;  %v4671_v19 = vunpack.c.l.bf16 %v7937_v13  ;;  %7950 = vpow.bf16 %v4617_v38  ;;  %v4623_v46 = vmul.bf16 1069105081, %v11543_v55 }
 0xd17   : > { %v4744_v26 = vadd.f32 %v4743_v14, %v4655_v50  ;;  %v4672_v40 = vunpack.c.h.bf16 %v7935_v20  ;;  %7952 = vpow.bf16 %v4620_v54  ;;  %v4626_v27 = vmul.bf16 1069105081, %v11561_v16 }
 0xd18   : > { %v4708_v5 = vadd.f32 %v4707_v49, %v4656_v24  ;;  %4783 = vmatpush1.bf16.msra.mxu0 %v7919_v9  ;;  %v4673_v62 = vunpack.c.h.bf16 %v7937_v13  ;;  %7954 = vpow.bf16 %v4623_v46  ;;  %v4632_v55 = vmul.bf16 1069105081, %v13837_v29 }
 0xd19   : > { %v4745_v10 = vadd.f32 %v4744_v26, %v4657_v6  ;;  %4784 = vmatprep.subr.bf16.mxu0 %v7925_v21  ;;  %v7939_v9 = vpop.eup %7938  ;;  %7956 = vpow.bf16 %v4626_v27 }
 0xd1a   : > { %v4709_v2 = vadd.f32 %v4708_v5, %v4658_v35  ;;  %v7941_v3 = vpop.eup %7940  ;;  %v4674_v11 = vunpack.c.l.bf16 %v7939_v9  ;;  %v4676_v14 = vunpack.c.h.bf16 %v7939_v9  ;;  %7958 = vpow.bf16 %v4632_v55 }
 0xd1b   : > { %v4746_v58 = vadd.f32 %v4745_v10, %v4659_v36  ;;  %v7943_v8 = vpop.eup %7942  ;;  %v4675_v25 = vunpack.c.l.bf16 %v7941_v3  ;;  %v4677_v24 = vunpack.c.h.bf16 %v7941_v3 }
 0xd1c   : > { %v4710_v53 = vadd.f32 %v4709_v2, %v4660_v23  ;;  %4785 = vmatpush1.bf16.msra.mxu0 %v7923_v42  ;;  %v4678_v47 = vunpack.c.l.bf16 %v7943_v8  ;;  %v4629_v23 = vmul.bf16 1069105081, %v13838_v44 }
 0xd1d   : > { %v4747_v0 = vadd.f32 %v4746_v58, %v4661_v51  ;;  %4786 = vmatprep.subr.bf16.mxu0 %v7929_v52  ;;  %v7945_v50 = vpop.eup %7944 }
 0xd1e   : > { %v4711_v32 = vadd.f32 %v4710_v53, %v4662_v1  ;;  %v7947_v6 = vpop.eup %7946  ;;  %v4679_v26 = vunpack.c.l.bf16 %v7945_v50  ;;  %v4681_v10 = vunpack.c.h.bf16 %v7945_v50  ;;  %7960 = vpow.bf16 %v4629_v23 }
 0xd1f   : > { %v4748_v60 = vadd.f32 %v4747_v0, %v4663_v30  ;;  %v7949_v5 = vpop.eup %7948  ;;  %v4682_v2 = vunpack.c.l.bf16 %v7947_v6 }
 0xd20   : > { %v4712_v39 = vadd.f32 %v4711_v32, %v4664_v34  ;;  %4787 = vmatpush1.bf16.msra.mxu0 %v7927_v7  ;;  %v4680_v7 = vunpack.c.h.bf16 %v7943_v8  ;;  %v4683_v58 = vunpack.c.l.bf16 %v7949_v5  ;;  %v4685_v0 = vunpack.c.h.bf16 %v7949_v5 }
 0xd21   : > { %v4749_v63 = vadd.f32 %v4748_v60, %v4665_v4  ;;  %4788 = vmatprep.subr.bf16.mxu0 %v7933_v57  ;;  %v7951_v51 = vpop.eup %7950 }
 0xd22   : > { %v4713_v12 = vadd.f32 %v4712_v39, %v4666_v48  ;;  %v7953_v53 = vpop.eup %7952  ;;  %v4686_v18 = vunpack.c.l.bf16 %v7951_v51  ;;  %v4688_v48 = vunpack.c.h.bf16 %v7951_v51 }
 0xd23   : > { %v4750_v41 = vadd.f32 %v4749_v63, %v4667_v59  ;;  %v7955_v32 = vpop.eup %7954  ;;  %v4687_v31 = vunpack.c.l.bf16 %v7953_v53 }
 0xd24   : > { %v4714_v45 = vadd.f32 %v4713_v12, %v4668_v15  ;;  %4789 = vmatpush1.bf16.msra.mxu0 %v7931_v22  ;;  %v4684_v22 = vunpack.c.h.bf16 %v7947_v6  ;;  %v7957_v60 = vpop.eup %7956  ;;  %v4690_v63 = vunpack.c.l.bf16 %v7955_v32  ;;  %v4692_v54 = vunpack.c.h.bf16 %v7955_v32 }
 0xd25   : > { %v4751_v28 = vadd.f32 %v4750_v41, %v4669_v43  ;;  %4790 = vmatprep.subr.bf16.mxu0 %v7937_v13  ;;  %v4691_v38 = vunpack.c.l.bf16 %v7957_v60  ;;  %v7959_v12 = vpop.eup %7958  ;;  %v4693_v41 = vunpack.c.h.bf16 %v7957_v60 }
 0xd26   : > { %v4715_v61 = vadd.f32 %v4714_v45, %v4670_v56  ;;  %v4697_v27 = vunpack.c.h.bf16 %v7959_v12 }
 0xd27   : > { %v4752_v37 = vadd.f32 %v4751_v28, %v4671_v19 }
 0xd28   : > { %v4716_v33 = vadd.f32 %v4715_v61, %v4672_v40  ;;  %4791 = vmatpush1.bf16.msra.mxu0 %v7935_v20  ;;  %v4689_v20 = vunpack.c.h.bf16 %v7953_v53  ;;  %v13840_v40 = vld [vmem:[#allocation76_spill] sm:$0xff] }
 0xd29   : > { %v4753_v42 = vadd.f32 %v4752_v37, %v4673_v62  ;;  %4792 = vmatprep.subr.bf16.mxu0 %v7941_v3  ;;  %v11586_v28 = vpop.eup %7960  ;;  %v13839_v3 = vld [vmem:[#allocation77_spill] sm:$0xff]  ;;  %v4867_v61 = vrot.slane %v13840_v40, 4 }
 0xd2a   : > { %v4717_v21 = vadd.f32 %v4716_v33, %v4674_v11  ;;  %v4868_v46 = vrot.slane %v13839_v3, 4  ;;  %v13841_v11 = vld [vmem:[#allocation89_spill] sm:$0xff]  ;;  %v4696_v44 = vunpack.c.h.bf16 %v11586_v28 }
 0xd2b   : > { %v4754_v49 = vadd.f32 %v4753_v42, %v4675_v25  ;;  %v4918_v33 = vsel %vm1252_vm4, %v4867_v61, 0  ;;  %v4834_v25 = vpop.permute.xlu0 %4833  ;;  %v4836_v42 = vpop.permute.xlu1 %4835 }
 0xd2c   : > { %v4718_v16 = vadd.f32 %v4717_v21, %v4676_v14  ;;  %4793 = vmatpush1.bf16.msra.mxu0 %v7939_v9  ;;  %v4695_v9 = vunpack.c.l.bf16 %v7959_v12 }
 0xd2d   : > { %v4755_v35 = vadd.f32 %v4754_v49, %v4677_v24  ;;  %4794 = vmatprep.subr.bf16.mxu0 %v7945_v50 }
 0xd2e   : > { %v4719_v36 = vadd.f32 %v4718_v16, %v4678_v47 }
 0xd2f   : > { %v4756_v52 = vadd.f32 %v4755_v35, %v4679_v26  ;;  %v4838_v50 = vpop.permute.xlu1 %4837  ;;  %v4840_v14 = vpop.permute.xlu0 %4839 }
 0xd30   : > { %v4720_v17 = vadd.f32 %v4719_v36, %v4680_v7  ;;  %4795 = vmatpush1.bf16.msra.mxu0 %v7943_v8  ;;  %v13842_v8 = vmov 0   ;;  %v13843_v36 = vld [vmem:[#allocation85_spill] sm:$0xff] }
 0xd31   : > { %v4757_v1 = vadd.f32 %v4756_v52, %v4681_v10  ;;  %4796 = vmatprep.subr.bf16.mxu0 %v7949_v5  ;;  %v4694_v10 = vunpack.c.l.bf16 %v11586_v28 }
 0xd32   : > { %v4721_v30 = vadd.f32 %v4720_v17, %v4682_v2 }
 0xd33   : > { %v4758_v57 = vadd.f32 %v4757_v1, %v4683_v58  ;;  %v4842_v21 = vpop.permute.xlu1 %4841  ;;  %v4844_v29 = vpop.permute.xlu0 %4843 }
 0xd34   : > { %4797 = vmatpush1.bf16.msra.mxu0 %v7947_v6  ;;  %v4722_v34 = vadd.f32 %v4721_v30, %v4684_v22 }
 0xd35   : > { %4798 = vmatprep.subr.bf16.mxu0 %v7953_v53  ;;  %v4759_v4 = vadd.f32 %v4758_v57, %v4685_v0 }
 0xd36   : > { %v4723_v39 = vadd.f32 %v4722_v34, %v4686_v18 }
 0xd37   : > { %v4760_v59 = vadd.f32 %v4759_v4, %v4687_v31  ;;  %v4846_v55 = vpop.permute.xlu1 %4845  ;;  %v4848_v24 = vpop.permute.xlu0 %4847 }
 0xd38   : > { %4799 = vmatpush1.bf16.msra.mxu0 %v7951_v51  ;;  %v4724_v13 = vadd.f32 %v4723_v39, %v4688_v48 }
 0xd39   : > { %4800 = vmatprep.subr.bf16.mxu0 %v7957_v60  ;;  %v4761_v15 = vadd.f32 %v4760_v59, %v4689_v20 }
 0xd3a   : > { %v4725_v43 = vadd.f32 %v4724_v13, %v4690_v63 }
 0xd3b   : > { %v4762_v56 = vadd.f32 %v4761_v15, %v4691_v38  ;;  %v4850_v49 = vpop.permute.xlu1 %4849  ;;  %v4852_v47 = vpop.permute.xlu0 %4851 }
 0xd3c   : > { %4801 = vmatpush1.bf16.msra.mxu0 %v7955_v32  ;;  %v11584_v45 = vadd.f32 %v4725_v43, %v4692_v54 }
 0xd3d   : > { %4802 = vmatprep.subr.bf16.mxu0 %v7959_v12  ;;  %v4763_v19 = vadd.f32 %v4762_v56, %v4693_v41 }
 0xd3e   : > { %v4727_v52 = vadd.f32 %v11584_v45, %v4694_v10 }
 0xd3f   : > { %v4764_v62 = vadd.f32 %v4763_v19, %v4695_v9  ;;  %v4854_v16 = vpop.permute.xlu1 %4853  ;;  %v4856_v6 = vpop.permute.xlu0 %4855 }
 0xd40   : > { %4803 = vmatpush1.bf16.msra.mxu0 %v11586_v28  ;;  %v4728_v23 = vadd.f32 %v4727_v52, %v4696_v44 }
 0xd41   : > { %7439 = vmatprep.subr.msk.bf16.mxu0 %vm1252_vm4, %v4868_v46  ;;  %v4765_v37 = vadd.f32 %v4764_v62, %v4697_v27 }
 0xd42   : > { %v4729_v2 = vrot.slane %v4728_v23, 4 }
 0xd43   : > { %4805 = vmatmul.mubr.bf16.vlgmr.msra.gmra.mrb[164].mxu0 %v13841_v11  ;;  %v4858_v26 = vpop.permute.xlu1 %4857  ;;  %v4860_v35 = vpop.permute.xlu0 %4859  ;;  %v4766_v17 = vrot.slane %v4765_v37, 4 }
 0xd44   : > { %4924 = vmatpush1.bf16.msra.mxu0 %v4918_v33  ;;  %4955 = vmatprep.mubr.bf16.mxu0 %v13842_v8  ;;  %v4730_v51 = vadd.f32 %v4729_v2, %v4728_v23 }
 0xd45   : > { %v4767_v58 = vadd.f32 %v4766_v17, %v4765_v37 }
 0xd46   : > { %v4731_v1 = vrot.slane %v4730_v51, 2 }
 0xd47   : > { %v4862_v5 = vpop.permute.xlu1 %4861  ;;  %v4864_v7 = vpop.permute.xlu0 %4863  ;;  %v4768_v53 = vrot.slane %v4767_v58, 2 }
 0xd48   : > { %v4732_v22 = vadd.f32 %v4731_v1, %v4730_v51 }
 0xd49   : > { %v4769_v30 = vadd.f32 %v4768_v53, %v4767_v58 }
 0xd4a   : > { %v4733_v0 = vrot.slane %v4732_v22, 1 }
 0xd4b   : > { %7440 = vmatmul.mubr.msk.bf16.vlgmr.msra.gmra.mrb[168].mxu0 %vm1203_vm5, %v4834_v25  ;;  %v4770_v57 = vrot.slane %v4769_v30, 1 }
 0xd4c   : > { %4965 = vmatprep.mubr.bf16.mxu0 %v13842_v8  ;;  %v4734_v18 = vadd.f32 %v4733_v0, %v4732_v22 }
 0xd4d   : > { %v4771_v34 = vadd.f32 %v4770_v57, %v4769_v30 }
 0xd4e   : > { %7962 = vrcp.f32 %v4734_v18 }
 0xd4f   : > { %7964 = vrcp.f32 %v4771_v34 }
 0xd53   : > { %7441 = vmatmul.mubr.msk.bf16.gmra.mrb[172].mxu0 %vm1203_vm5, %v4836_v42 }
 0xd54   : > { %4975 = vmatprep.mubr.bf16.mxu0 %v13842_v8 }
 0xd58   : > { %v7963_v32 = vpop.eup %7962 }
 0xd59   : > { %v7965_v4 = vpop.eup %7964 }
 0xd5b   : > { %7442 = vmatmul.mubr.msk.bf16.gmra.mrb[176].mxu0 %vm1203_vm5, %v4838_v50 }
 0xd5c   : > { %4985 = vmatprep.mubr.bf16.mxu0 %v13842_v8 }
 0xd63   : > { %7443 = vmatmul.mubr.msk.bf16.gmra.mrb[180].mxu0 %vm1203_vm5, %v4840_v14 }
 0xd64   : > { %4995 = vmatprep.mubr.bf16.mxu0 %v13842_v8 }
 0xd6b   : > { %7444 = vmatmul.mubr.msk.bf16.gmra.mrb[184].mxu0 %vm1203_vm5, %v4842_v21 }
 0xd6c   : > { %5005 = vmatprep.mubr.bf16.mxu0 %v13842_v8 }
 0xd73   : > { %7445 = vmatmul.mubr.msk.bf16.gmra.mrb[188].mxu0 %vm1203_vm5, %v4844_v29 }
 0xd74   : > { %5015 = vmatprep.mubr.bf16.mxu0 %v13842_v8 }
 0xd7b   : > { %7446 = vmatmul.mubr.msk.bf16.gmra.mrb[192].mxu0 %vm1203_vm5, %v4846_v55 }
 0xd7c   : > { %5025 = vmatprep.mubr.bf16.mxu0 %v13842_v8 }
 0xd83   : > { %7447 = vmatmul.mubr.msk.bf16.gmra.mrb[196].mxu0 %vm1203_vm5, %v4848_v24 }
 0xd84   : > { %5035 = vmatprep.mubr.bf16.mxu0 %v13842_v8 }
 0xd8b   : > { %7448 = vmatmul.mubr.msk.bf16.gmra.mrb[200].mxu0 %vm1203_vm5, %v4850_v49 }
 0xd8c   : > { %5045 = vmatprep.mubr.bf16.mxu0 %v13842_v8 }
 0xd93   : > { %7449 = vmatmul.mubr.msk.bf16.gmra.mrb[204].mxu0 %vm1203_vm5, %v4852_v47 }
 0xd94   : > { %5055 = vmatprep.mubr.bf16.mxu0 %v13842_v8 }
 0xd9b   : > { %7450 = vmatmul.mubr.msk.bf16.gmra.mrb[208].mxu0 %vm1203_vm5, %v4854_v16 }
 0xd9c   : > { %5065 = vmatprep.mubr.bf16.mxu0 %v13842_v8 }
 0xda3   : > { %7451 = vmatmul.mubr.msk.bf16.gmra.mrb[212].mxu0 %vm1203_vm5, %v4856_v6 }
 0xda4   : > { %5075 = vmatprep.mubr.bf16.mxu0 %v13842_v8 }
 0xdab   : > { %7452 = vmatmul.mubr.msk.bf16.gmra.mrb[216].mxu0 %vm1203_vm5, %v4858_v26 }
 0xdac   : > { %5085 = vmatprep.mubr.bf16.mxu0 %v13842_v8 }
 0xdb3   : > { %7453 = vmatmul.mubr.msk.bf16.gmra.mrb[220].mxu0 %vm1203_vm5, %v4860_v35 }
 0xdb4   : > { %5095 = vmatprep.mubr.bf16.mxu0 %v13842_v8 }
 0xdbb   : > { %7454 = vmatmul.mubr.msk.bf16.gmra.mrb[224].mxu0 %vm1203_vm5, %v4862_v5 }
 0xdbc   : > { %5105 = vmatprep.mubr.bf16.mxu0 %v13842_v8 }
 0xdc3   : > { %7455 = vmatmul.mubr.msk.bf16.gmra.mrb[228].mxu0 %vm1203_vm5, %v4864_v7 }
 0xdc4   : > { %6286 = vmatprep.mubr.bf16.mxu0 %v13843_v36 }
 0xe16   : > { %v4806_v31 = vpop.f32.mrb[164].mxu0 }
 0xe17   : > { %v11630_v60 = vmul.f32 %v7963_v32, %v4806_v31  ;;  %v4808_v48 = vpop.f32.mrb[165].mxu0 }
 0xe18   : > { %v11632_v39 = vmul.f32 %v7965_v4, %v4808_v48  ;;  %v4810_v20 = vpop.f32.mrb[166].mxu0 }
 0xe19   : > { %13844 = vst [vmem:[#allocation78_spill] sm:$0xff] %v11630_v60  ;;  %v4811_v59 = vpop.f32.mrb[167].mxu0 }
 0xe1a   : > { %13845 = vst [vmem:[#allocation41_spill] sm:$0xff] %v11632_v39 }
 0xe1e   : > { %v11634_v63 = vpop.f32.mrb[168].mxu0 }
 0xe1f   : > { %v11636_v13 = vpop.f32.mrb[169].mxu0 }
 0xe20   : > { %v11638_v38 = vpop.f32.mrb[170].mxu0 }
 0xe21   : > { %13846 = vst [vmem:[#allocation44_spill] sm:$0xff] %v11638_v38  ;;  %v11640_v15 = vpop.f32.mrb[171].mxu0 }
 0xe26   : > { %v11642_v12 = vpop.f32.mrb[172].mxu0 }
 0xe27   : > { %13847 = vst [vmem:[#allocation43_spill] sm:$0xff] %v11642_v12  ;;  %v5116_v54 = vmax.f32 %v11634_v63, %v11642_v12  ;;  %v11646_v43 = vpop.f32.mrb[173].mxu0 }
 0xe28   : > { %v5153_v41 = vmax.f32 %v11636_v13, %v11646_v43  ;;  %v11650_v56 = vpop.f32.mrb[174].mxu0 }
 0xe29   : > { %13848 = vst [vmem:[#allocation46_spill] sm:$0xff] %v11650_v56  ;;  %v5117_v45 = vmax.f32 %v11638_v38, %v11650_v56  ;;  %v11654_v9 = vpop.f32.mrb[175].mxu0 }
 0xe2a   : > { %v5154_v19 = vmax.f32 %v11640_v15, %v11654_v9 }
 0xe2e   : > { %v11658_v28 = vpop.f32.mrb[176].mxu0 }
 0xe2f   : > { %13849 = vst [vmem:[#allocation45_spill] sm:$0xff] %v11658_v28  ;;  %v5118_v3 = vmax.f32 %v5116_v54, %v11658_v28  ;;  %v11661_v46 = vpop.f32.mrb[177].mxu0 }
 0xe30   : > { %v5155_v40 = vmax.f32 %v5153_v41, %v11661_v46  ;;  %v11664_v61 = vpop.f32.mrb[178].mxu0 }
 0xe31   : > { %v5119_v27 = vmax.f32 %v5117_v45, %v11664_v61  ;;  %v11667_v62 = vpop.f32.mrb[179].mxu0 }
 0xe32   : > { %v5156_v37 = vmax.f32 %v5154_v19, %v11667_v62 }
 0xe36   : > { %v11670_v33 = vpop.f32.mrb[180].mxu0 }
 0xe37   : > { %v5120_v25 = vmax.f32 %v5118_v3, %v11670_v33  ;;  %v11673_v42 = vpop.f32.mrb[181].mxu0 }
 0xe38   : > { %v5157_v50 = vmax.f32 %v5155_v40, %v11673_v42  ;;  %v11676_v14 = vpop.f32.mrb[182].mxu0 }
 0xe39   : > { %v5121_v21 = vmax.f32 %v5119_v27, %v11676_v14  ;;  %v11679_v29 = vpop.f32.mrb[183].mxu0 }
 0xe3a   : > { %v5158_v55 = vmax.f32 %v5156_v37, %v11679_v29 }
 0xe3e   : > { %v11682_v24 = vpop.f32.mrb[184].mxu0 }
 0xe3f   : > { %v5122_v49 = vmax.f32 %v5120_v25, %v11682_v24  ;;  %v11685_v47 = vpop.f32.mrb[185].mxu0 }
 0xe40   : > { %v5159_v16 = vmax.f32 %v5157_v50, %v11685_v47  ;;  %v11688_v6 = vpop.f32.mrb[186].mxu0 }
 0xe41   : > { %v5123_v26 = vmax.f32 %v5121_v21, %v11688_v6  ;;  %v11691_v35 = vpop.f32.mrb[187].mxu0 }
 0xe42   : > { %v5160_v5 = vmax.f32 %v5158_v55, %v11691_v35 }
 0xe46   : > { %v11694_v7 = vpop.f32.mrb[188].mxu0 }
 0xe47   : > { %v5124_v10 = vmax.f32 %v5122_v49, %v11694_v7  ;;  %v11697_v52 = vpop.f32.mrb[189].mxu0 }
 0xe48   : > { %13850 = vst [vmem:[#allocation47_spill] sm:$0xff] %v11697_v52  ;;  %v5161_v44 = vmax.f32 %v5159_v16, %v11697_v52  ;;  %v11700_v23 = vpop.f32.mrb[190].mxu0 }
 0xe49   : > { %v5125_v2 = vmax.f32 %v5123_v26, %v11700_v23  ;;  %v11703_v17 = vpop.f32.mrb[191].mxu0 }
 0xe4a   : > { %13851 = vst [vmem:[#allocation48_spill] sm:$0xff] %v11703_v17  ;;  %v5162_v51 = vmax.f32 %v5160_v5, %v11703_v17 }
 0xe4e   : > { %v11706_v58 = vpop.f32.mrb[192].mxu0 }
 0xe4f   : > { %v5126_v1 = vmax.f32 %v5124_v10, %v11706_v58  ;;  %v11709_v53 = vpop.f32.mrb[193].mxu0 }
 0xe50   : > { %13852 = vst [vmem:[#allocation54_spill] sm:$0xff] %v11709_v53  ;;  %v5163_v22 = vmax.f32 %v5161_v44, %v11709_v53  ;;  %v11712_v30 = vpop.f32.mrb[194].mxu0 }
 0xe51   : > { %v5127_v0 = vmax.f32 %v5125_v2, %v11712_v30  ;;  %v11715_v57 = vpop.f32.mrb[195].mxu0 }
 0xe52   : > { %13853 = vst [vmem:[#allocation49_spill] sm:$0xff] %v11715_v57  ;;  %v5164_v18 = vmax.f32 %v5162_v51, %v11715_v57 }
 0xe56   : > { %v11718_v34 = vpop.f32.mrb[196].mxu0 }
 0xe57   : > { %v5128_v32 = vmax.f32 %v5126_v1, %v11718_v34  ;;  %v11721_v31 = vpop.f32.mrb[197].mxu0 }
 0xe58   : > { %13854 = vst [vmem:[#allocation17_spill] sm:$0xff] %v11721_v31  ;;  %v5165_v4 = vmax.f32 %v5163_v22, %v11721_v31  ;;  %v11724_v48 = vpop.f32.mrb[198].mxu0 }
 0xe59   : > { %v5129_v20 = vmax.f32 %v5127_v0, %v11724_v48  ;;  %v11727_v59 = vpop.f32.mrb[199].mxu0 }
 0xe5a   : > { %13855 = vst [vmem:[#allocation19_spill] sm:$0xff] %v11727_v59  ;;  %v5166_v54 = vmax.f32 %v5164_v18, %v11727_v59 }
 0xe5e   : > { %v11730_v41 = vpop.f32.mrb[200].mxu0 }
 0xe5f   : > { %v5130_v45 = vmax.f32 %v5128_v32, %v11730_v41  ;;  %v11733_v19 = vpop.f32.mrb[201].mxu0 }
 0xe60   : > { %13856 = vst [vmem:[#allocation20_spill] sm:$0xff] %v11733_v19  ;;  %v5167_v3 = vmax.f32 %v5165_v4, %v11733_v19  ;;  %v11736_v40 = vpop.f32.mrb[202].mxu0 }
 0xe61   : > { %v5131_v27 = vmax.f32 %v5129_v20, %v11736_v40  ;;  %v11739_v37 = vpop.f32.mrb[203].mxu0 }
 0xe62   : > { %13857 = vst [vmem:[#allocation21_spill] sm:$0xff] %v11739_v37  ;;  %v5168_v25 = vmax.f32 %v5166_v54, %v11739_v37 }
 0xe66   : > { %v11742_v50 = vpop.f32.mrb[204].mxu0 }
 0xe67   : > { %v5132_v21 = vmax.f32 %v5130_v45, %v11742_v50  ;;  %v11745_v55 = vpop.f32.mrb[205].mxu0 }
 0xe68   : > { %13858 = vst [vmem:[#allocation22_spill] sm:$0xff] %v11745_v55  ;;  %v5169_v49 = vmax.f32 %v5167_v3, %v11745_v55  ;;  %v11748_v16 = vpop.f32.mrb[206].mxu0 }
 0xe69   : > { %v5133_v26 = vmax.f32 %v5131_v27, %v11748_v16  ;;  %v11751_v5 = vpop.f32.mrb[207].mxu0 }
 0xe6a   : > { %13859 = vst [vmem:[#allocation23_spill] sm:$0xff] %v11751_v5  ;;  %v5170_v10 = vmax.f32 %v5168_v25, %v11751_v5 }
 0xe6e   : > { %v11754_v44 = vpop.f32.mrb[208].mxu0 }
 0xe6f   : > { %v5134_v2 = vmax.f32 %v5132_v21, %v11754_v44  ;;  %v11757_v51 = vpop.f32.mrb[209].mxu0 }
 0xe70   : > { %13860 = vst [vmem:[#allocation24_spill] sm:$0xff] %v11757_v51  ;;  %v5171_v1 = vmax.f32 %v5169_v49, %v11757_v51  ;;  %v11760_v22 = vpop.f32.mrb[210].mxu0 }
 0xe71   : > { %v5135_v0 = vmax.f32 %v5133_v26, %v11760_v22  ;;  %v11763_v18 = vpop.f32.mrb[211].mxu0 }
 0xe72   : > { %13861 = vst [vmem:[#allocation25_spill] sm:$0xff] %v11763_v18  ;;  %v5172_v32 = vmax.f32 %v5170_v10, %v11763_v18 }
 0xe76   : > { %v11766_v4 = vpop.f32.mrb[212].mxu0 }
 0xe77   : > { %v5136_v20 = vmax.f32 %v5134_v2, %v11766_v4  ;;  %v11769_v54 = vpop.f32.mrb[213].mxu0 }
 0xe78   : > { %13862 = vst [vmem:[#allocation26_spill] sm:$0xff] %v11769_v54  ;;  %v5173_v45 = vmax.f32 %v5171_v1, %v11769_v54  ;;  %v11772_v3 = vpop.f32.mrb[214].mxu0 }
 0xe79   : > { %v5137_v27 = vmax.f32 %v5135_v0, %v11772_v3  ;;  %v11775_v25 = vpop.f32.mrb[215].mxu0 }
 0xe7a   : > { %13863 = vst [vmem:[#allocation27_spill] sm:$0xff] %v11775_v25  ;;  %v5174_v21 = vmax.f32 %v5172_v32, %v11775_v25 }
 0xe7e   : > { %v11778_v49 = vpop.f32.mrb[216].mxu0 }
 0xe7f   : > { %v5138_v26 = vmax.f32 %v5136_v20, %v11778_v49  ;;  %v11781_v10 = vpop.f32.mrb[217].mxu0 }
 0xe80   : > { %13864 = vst [vmem:[#allocation28_spill] sm:$0xff] %v11781_v10  ;;  %v5175_v2 = vmax.f32 %v5173_v45, %v11781_v10  ;;  %v11784_v39 = vpop.f32.mrb[218].mxu0 }
 0xe81   : > { %v5139_v1 = vmax.f32 %v5137_v27, %v11784_v39  ;;  %v11787_v60 = vpop.f32.mrb[219].mxu0 }
 0xe82   : > { %13865 = vst [vmem:[#allocation29_spill] sm:$0xff] %v11787_v60  ;;  %v5176_v0 = vmax.f32 %v5174_v21, %v11787_v60 }
 0xe86   : > { %v11790_v36 = vpop.f32.mrb[220].mxu0 }
 0xe87   : > { %v5140_v32 = vmax.f32 %v5138_v26, %v11790_v36  ;;  %v11793_v8 = vpop.f32.mrb[221].mxu0 }
 0xe88   : > { %13866 = vst [vmem:[#allocation37_spill] sm:$0xff] %v11793_v8  ;;  %v5177_v20 = vmax.f32 %v5175_v2, %v11793_v8  ;;  %v11796_v11 = vpop.f32.mrb[222].mxu0 }
 0xe89   : > { %v5141_v45 = vmax.f32 %v5139_v1, %v11796_v11  ;;  %v11799_v10 = vpop.f32.mrb[223].mxu0 }
 0xe8a   : > { %13867 = vst [vmem:[#allocation40_spill] sm:$0xff] %v11799_v10  ;;  %v5178_v27 = vmax.f32 %v5176_v0, %v11799_v10 }
 0xe8e   : > { %v11802_v25 = vpop.f32.mrb[224].mxu0 }
 0xe8f   : > { %v5142_v21 = vmax.f32 %v5140_v32, %v11802_v25  ;;  %v11805_v60 = vpop.f32.mrb[225].mxu0 }
 0xe90   : > { %13868 = vst [vmem:[#allocation39_spill] sm:$0xff] %v11805_v60  ;;  %v5179_v26 = vmax.f32 %v5177_v20, %v11805_v60  ;;  %v11808_v54 = vpop.f32.mrb[226].mxu0 }
 0xe91   : > { %v5143_v2 = vmax.f32 %v5141_v45, %v11808_v54  ;;  %v11811_v8 = vpop.f32.mrb[227].mxu0 }
 0xe92   : > { %13869 = vst [vmem:[#allocation42_spill] sm:$0xff] %v11811_v8  ;;  %v5180_v1 = vmax.f32 %v5178_v27, %v11811_v8 }
 0xe96   : > { %v5107_v18 = vpop.f32.mrb[228].mxu0 }
 0xe97   : > { %v5144_v51 = vmax.f32 %v5142_v21, %v5107_v18  ;;  %v11814_v5 = vpop.f32.mrb[229].mxu0 }
 0xe98   : > { %v5181_v0 = vmax.f32 %v5179_v26, %v11814_v5  ;;  %v5111_v10 = vpop.f32.mrb[230].mxu0 }
 0xe99   : > { %v5145_v32 = vmax.f32 %v5143_v2, %v5111_v10  ;;  %v5113_v55 = vpop.f32.mrb[231].mxu0 }
 0xe9a   : > { %v5182_v37 = vmax.f32 %v5180_v1, %v5113_v55 }
 0xe9b   : > { %v5146_v19 = vmax.f32 %v5144_v51, %v5145_v32  ;;  %v13874_v32 = vld [vmem:[#allocation48_spill] sm:$0xff] }
 0xe9c   : > { %v5183_v20 = vmax.f32 %v5181_v0, %v5182_v37 }
 0xe9d   : > { %v5147_v60 = vrot.slane %v5146_v19, 4 }
 0xe9e   : > { %v5184_v59 = vrot.slane %v5183_v20, 4 }
 0xe9f   : > { %v5148_v31 = vmax.f32 %v5146_v19, %v5147_v60 }
 0xea0   : > { %v5185_v45 = vmax.f32 %v5183_v20, %v5184_v59  ;;  %v13875_v20 = vld [vmem:[#allocation54_spill] sm:$0xff] }
 0xea1   : > { %v5149_v57 = vrot.slane %v5148_v31, 2 }
 0xea2   : > { %v5186_v53 = vrot.slane %v5185_v45, 2 }
 0xea3   : > { %v5150_v17 = vmax.f32 %v5148_v31, %v5149_v57 }
 0xea4   : > { %v5187_v27 = vmax.f32 %v5185_v45, %v5186_v53  ;;  %v13876_v45 = vld [vmem:[#allocation49_spill] sm:$0xff] }
 0xea5   : > { %v5151_v8 = vrot.slane %v5150_v17, 1 }
 0xea6   : > { %v5188_v52 = vrot.slane %v5187_v27, 1 }
 0xea7   : > { %v11817_v21 = vmax.f32 %v5150_v17, %v5151_v8 }
 0xea8   : > { %v11855_v0 = vmax.f32 %v5187_v27, %v5188_v52 }
 0xea9   : > { %13870 = vst [vmem:[#allocation94_spill] sm:$0xff] %v11817_v21  ;;  %v5250_v26 = vsub.f32 %v5107_v18, %v11817_v21  ;;  %v5252_v2 = vsub.f32 %v5111_v10, %v11817_v21  ;;  %v5200_v17 = vsub.f32 %v11664_v61, %v11817_v21  ;;  %v5202_v31 = vsub.f32 %v11670_v33, %v11817_v21 }
 0xeaa   : > { %v5204_v59 = vsub.f32 %v11676_v14, %v11817_v21  ;;  %v5206_v19 = vsub.f32 %v11682_v24, %v11817_v21  ;;  %v5208_v18 = vsub.f32 %v11688_v6, %v11817_v21  ;;  %v5210_v10 = vsub.f32 %v11694_v7, %v11817_v21 }
 0xeab   : > { %v11833_v57 = vpack.c.bf16 %v5252_v2, %v5250_v26  ;;  %v5212_v61 = vsub.f32 %v11700_v23, %v11817_v21  ;;  %v5214_v1 = vsub.f32 %v11706_v58, %v11817_v21  ;;  %v5216_v33 = vsub.f32 %v11712_v30, %v11817_v21 }
 0xeac   : > { %v5218_v14 = vsub.f32 %v11718_v34, %v11817_v21  ;;  %v5220_v24 = vsub.f32 %v11724_v48, %v11817_v21  ;;  %v5222_v6 = vsub.f32 %v11730_v41, %v11817_v21  ;;  %v5224_v7 = vsub.f32 %v11736_v40, %v11817_v21 }
 0xead   : > { %13871 = vst [vmem:[#allocation96_spill] sm:$0xff] %v11833_v57  ;;  %v5226_v23 = vsub.f32 %v11742_v50, %v11817_v21  ;;  %v5228_v58 = vsub.f32 %v11748_v16, %v11817_v21  ;;  %v5230_v30 = vsub.f32 %v11754_v44, %v11817_v21  ;;  %v5232_v34 = vsub.f32 %v11760_v22, %v11817_v21 }
 0xeae   : > { %v5234_v52 = vsub.f32 %v11766_v4, %v11817_v21  ;;  %v5236_v48 = vsub.f32 %v11772_v3, %v11817_v21  ;;  %v5238_v41 = vsub.f32 %v11778_v49, %v11817_v21  ;;  %v5240_v40 = vsub.f32 %v11784_v39, %v11817_v21 }
 0xeaf   : > { %v5242_v50 = vsub.f32 %v11790_v36, %v11817_v21  ;;  %v5244_v16 = vsub.f32 %v11796_v11, %v11817_v21  ;;  %v5246_v44 = vsub.f32 %v11802_v25, %v11817_v21  ;;  %v5248_v22 = vsub.f32 %v11808_v54, %v11817_v21 }
 0xeb0   : > { %v5251_v4 = vsub.f32 %v11814_v5, %v11855_v0  ;;  %v5253_v3 = vsub.f32 %v5113_v55, %v11855_v0  ;;  %v5191_v39 = vsub.f32 %v11636_v13, %v11855_v0  ;;  %v5193_v36 = vsub.f32 %v11640_v15, %v11855_v0 }
 0xeb1   : > { %v5195_v11 = vsub.f32 %v11646_v43, %v11855_v0  ;;  %v5197_v25 = vsub.f32 %v11654_v9, %v11855_v0  ;;  %v5199_v54 = vsub.f32 %v11661_v46, %v11855_v0  ;;  %v5201_v5 = vsub.f32 %v11667_v62, %v11855_v0  ;;  %v13873_v9 = vld [vmem:[#allocation47_spill] sm:$0xff] }
 0xeb2   : > { %v5203_v55 = vsub.f32 %v11673_v42, %v11855_v0  ;;  %v11902_v49 = vpack.c.bf16 %v5253_v3, %v5251_v4  ;;  %v5205_v13 = vsub.f32 %v11679_v29, %v11855_v0  ;;  %v5207_v15 = vsub.f32 %v11685_v47, %v11855_v0  ;;  %v13877_v29 = vld [vmem:[#allocation17_spill] sm:$0xff]  ;;  %v13878_v47 = vld [vmem:[#allocation19_spill] sm:$0xff] }
 0xeb3   : > { %v5209_v43 = vsub.f32 %v11691_v35, %v11855_v0  ;;  %v5211_v46 = vsub.f32 %v13873_v9, %v11855_v0  ;;  %v5213_v62 = vsub.f32 %v13874_v32, %v11855_v0  ;;  %v5215_v42 = vsub.f32 %v13875_v20, %v11855_v0  ;;  %v13879_v35 = vld [vmem:[#allocation20_spill] sm:$0xff]  ;;  %v13880_v3 = vld [vmem:[#allocation21_spill] sm:$0xff]  ;;  %v13881_v32 = vld [vmem:[#allocation22_spill] sm:$0xff] }
 0xeb4   : > { %13872 = vst [vmem:[#allocation95_spill] sm:$0xff] %v11902_v49  ;;  %v5217_v27 = vsub.f32 %v13876_v45, %v11855_v0  ;;  %v5219_v26 = vsub.f32 %v13877_v29, %v11855_v0  ;;  %v5221_v2 = vsub.f32 %v13878_v47, %v11855_v0  ;;  %v5223_v4 = vsub.f32 %v13879_v35, %v11855_v0  ;;  %v13882_v20 = vld [vmem:[#allocation23_spill] sm:$0xff]  ;;  %v13883_v45 = vld [vmem:[#allocation24_spill] sm:$0xff]  ;;  %v13884_v29 = vld [vmem:[#allocation25_spill] sm:$0xff] }
 0xeb5   : > { %v5225_v9 = vsub.f32 %v13880_v3, %v11855_v0  ;;  %v5227_v8 = vsub.f32 %v13881_v32, %v11855_v0  ;;  %v5229_v53 = vsub.f32 %v13882_v20, %v11855_v0  ;;  %v5231_v60 = vsub.f32 %v13883_v45, %v11855_v0  ;;  %v13885_v47 = vld [vmem:[#allocation26_spill] sm:$0xff]  ;;  %v13886_v35 = vld [vmem:[#allocation27_spill] sm:$0xff]  ;;  %v13887_v3 = vld [vmem:[#allocation28_spill] sm:$0xff] }
 0xeb6   : > { %v5233_v37 = vsub.f32 %v13884_v29, %v11855_v0  ;;  %v5235_v51 = vsub.f32 %v13885_v47, %v11855_v0  ;;  %v5237_v57 = vsub.f32 %v13886_v35, %v11855_v0  ;;  %v5239_v49 = vsub.f32 %v13887_v3, %v11855_v0  ;;  %v13888_v32 = vld [vmem:[#allocation29_spill] sm:$0xff]  ;;  %v13890_v45 = vld [vmem:[#allocation40_spill] sm:$0xff]  ;;  %v13891_v29 = vld [vmem:[#allocation39_spill] sm:$0xff] }
 0xeb7   : > { %v5241_v28 = vsub.f32 %v13888_v32, %v11855_v0  ;;  %v13889_v20 = vld [vmem:[#allocation37_spill] sm:$0xff]  ;;  %v5245_v12 = vsub.f32 %v13890_v45, %v11855_v0  ;;  %v5247_v38 = vsub.f32 %v13891_v29, %v11855_v0  ;;  %v13892_v47 = vld [vmem:[#allocation42_spill] sm:$0xff]  ;;  %v13895_v32 = vld [vmem:[#allocation44_spill] sm:$0xff] }
 0xeb8   : > { %v5243_v56 = vsub.f32 %v13889_v20, %v11855_v0  ;;  %v5249_v21 = vsub.f32 %v13892_v47, %v11855_v0  ;;  %v13893_v35 = vld [vmem:[#allocation94_spill] sm:$0xff]  ;;  %v13897_v29 = vld [vmem:[#allocation43_spill] sm:$0xff] }
 0xeb9   : > { %v13894_v3 = vsub.f32 %v11634_v63, %v13893_v35  ;;  %v13896_v20 = vsub.f32 %v13895_v32, %v13893_v35  ;;  %v13898_v0 = vsub.f32 %v13897_v29, %v13893_v35  ;;  %v13899_v47 = vld [vmem:[#allocation46_spill] sm:$0xff] }
 0xeba   : > { %v13900_v63 = vsub.f32 %v13899_v47, %v13893_v35  ;;  %v5260_v47 = vpack.c.bf16 %v5204_v59, %v5202_v31  ;;  %v11975_v31 = vpack.c.bf16 %v5232_v34, %v5230_v30  ;;  %v11977_v59 = vpack.c.bf16 %v5236_v48, %v5234_v52 }
 0xebb   : > { %v5254_v45 = vpack.c.bf16 %v13896_v20, %v13894_v3  ;;  %v13901_v3 = vld [vmem:[#allocation45_spill] sm:$0xff]  ;;  %v11993_v30 = vpack.c.bf16 %v5233_v37, %v5231_v60  ;;  %v11995_v34 = vpack.c.bf16 %v5237_v57, %v5235_v51  ;;  %v11997_v52 = vpack.c.bf16 %v5241_v28, %v5239_v49 }
 0xebc   : > { %v5256_v32 = vpack.c.bf16 %v13900_v63, %v13898_v0  ;;  %v13902_v20 = vsub.f32 %v13901_v3, %v13893_v35  ;;  %v5262_v0 = vpack.c.bf16 %v5208_v18, %v5206_v19  ;;  %v11965_v63 = vpack.c.bf16 %v5212_v61, %v5210_v10 }
 0xebd   : > { %v11967_v3 = vpack.c.bf16 %v5216_v33, %v5214_v1  ;;  %v11969_v35 = vpack.c.bf16 %v5220_v24, %v5218_v14  ;;  %v11979_v18 = vpack.c.bf16 %v5240_v40, %v5238_v41  ;;  %v11981_v19 = vpack.c.bf16 %v5244_v16, %v5242_v50 }
 0xebe   : > { %v5258_v29 = vpack.c.bf16 %v5200_v17, %v13902_v20  ;;  %13903 = vst [vmem:[#allocation53_spill] sm:$0xff] %v11965_v63  ;;  %v11971_v17 = vpack.c.bf16 %v5224_v7, %v5222_v6  ;;  %v11973_v20 = vpack.c.bf16 %v5228_v58, %v5226_v23  ;;  %v11983_v10 = vpack.c.bf16 %v5248_v22, %v5246_v44 }
 0xebf   : > { %v5255_v61 = vpack.c.bf16 %v5193_v36, %v5191_v39  ;;  %v5257_v63 = vpack.c.bf16 %v5197_v25, %v5195_v11  ;;  %v5259_v1 = vpack.c.bf16 %v5201_v5, %v5199_v54  ;;  %v5261_v33 = vpack.c.bf16 %v5205_v13, %v5203_v55 }
 0xec0   : > { %v5263_v14 = vpack.c.bf16 %v5209_v43, %v5207_v15  ;;  %v5265_v24 = vpack.c.bf16 %v5213_v62, %v5211_v46  ;;  %v11985_v6 = vpack.c.bf16 %v5217_v27, %v5215_v42  ;;  %v11987_v7 = vpack.c.bf16 %v5221_v2, %v5219_v26 }
 0xec1   : > { %v11989_v23 = vpack.c.bf16 %v5225_v9, %v5223_v4  ;;  %v11991_v58 = vpack.c.bf16 %v5229_v53, %v5227_v8  ;;  %v11999_v48 = vpack.c.bf16 %v5245_v12, %v5243_v56  ;;  %v12001_v41 = vpack.c.bf16 %v5249_v21, %v5247_v38 }
 0xec2   : > { %v5287_v40 = vmul.bf16 1069105081, %v5254_v45  ;;  %v5290_v50 = vmul.bf16 1069105081, %v5255_v61  ;;  %v5293_v16 = vmul.bf16 1069105081, %v5256_v32 }
 0xec3   : > { %v5296_v44 = vmul.bf16 1069105081, %v5257_v63  ;;  %v5299_v22 = vmul.bf16 1069105081, %v5258_v29  ;;  %v5302_v39 = vmul.bf16 1069105081, %v5259_v1 }
 0xec4   : > { %7966 = vpow.bf16 %v5287_v40  ;;  %v5305_v37 = vmul.bf16 1069105081, %v5260_v47  ;;  %v5308_v51 = vmul.bf16 1069105081, %v5261_v33  ;;  %v5311_v28 = vmul.bf16 1069105081, %v5262_v0 }
 0xec5   : > { %7968 = vpow.bf16 %v5290_v50  ;;  %v5314_v12 = vmul.bf16 1069105081, %v5263_v14  ;;  %v13904_v21 = vld [vmem:[#allocation53_spill] sm:$0xff]  ;;  %v5320_v36 = vmul.bf16 1069105081, %v5265_v24 }
 0xec6   : > { %7970 = vpow.bf16 %v5293_v16  ;;  %v5317_v60 = vmul.bf16 1069105081, %v13904_v21  ;;  %v5323_v46 = vmul.bf16 1069105081, %v11967_v3  ;;  %v5326_v27 = vmul.bf16 1069105081, %v11985_v6 }
 0xec7   : > { %7972 = vpow.bf16 %v5296_v44  ;;  %v5329_v0 = vmul.bf16 1069105081, %v11969_v35  ;;  %v5332_v61 = vmul.bf16 1069105081, %v11987_v7  ;;  %v5335_v44 = vmul.bf16 1069105081, %v11971_v17 }
 0xec8   : > { %7974 = vpow.bf16 %v5299_v22 }
 0xec9   : > { %7976 = vpow.bf16 %v5302_v39  ;;  %v5338_v39 = vmul.bf16 1069105081, %v11989_v23 }
 0xeca   : > { %7978 = vpow.bf16 %v5305_v37 }
 0xecb   : > { %7980 = vpow.bf16 %v5308_v51 }
 0xecc   : > { %7982 = vpow.bf16 %v5311_v28 }
 0xecd   : > { %7984 = vpow.bf16 %v5314_v12 }
 0xece   : > { %7986 = vpow.bf16 %v5317_v60  ;;  %v5341_v60 = vmul.bf16 1069105081, %v11973_v20 }
 0xecf   : > { %v7967_v38 = vpop.eup %7966  ;;  %7988 = vpow.bf16 %v5320_v36 }
 0xed0   : > { %v7969_v56 = vpop.eup %7968  ;;  %v5382_v53 = vunpack.c.l.bf16 %v7967_v38  ;;  %v5384_v8 = vunpack.c.h.bf16 %v7967_v38  ;;  %7990 = vpow.bf16 %v5323_v46 }
 0xed1   : > { %v7971_v57 = vpop.eup %7970  ;;  %v5383_v11 = vunpack.c.l.bf16 %v7969_v56  ;;  %v5385_v25 = vunpack.c.h.bf16 %v7969_v56  ;;  %5526 = vmatprep.subr.bf16.mxu1 %v7969_v56  ;;  %7992 = vpow.bf16 %v5326_v27 }
 0xed2   : > { %v7973_v54 = vpop.eup %7972  ;;  %v5386_v5 = vunpack.c.l.bf16 %v7971_v57  ;;  %v5446_v55 = vadd.f32 %v5384_v8, %v5382_v53  ;;  %5527 = vmatpush1.bf16.msra.mxu1 %v7967_v38  ;;  %v5388_v62 = vunpack.c.h.bf16 %v7971_v57  ;;  %7994 = vpow.bf16 %v5329_v0 }
 0xed3   : > { %v7975_v49 = vpop.eup %7974  ;;  %v5387_v13 = vunpack.c.l.bf16 %v7973_v54  ;;  %v5483_v15 = vadd.f32 %v5385_v25, %v5383_v11  ;;  %5528 = vmatprep.subr.bf16.mxu1 %v7973_v54  ;;  %v5389_v26 = vunpack.c.h.bf16 %v7973_v54  ;;  %7996 = vpow.bf16 %v5332_v61 }
 0xed4   : > { %v7977_v43 = vpop.eup %7976  ;;  %v5447_v42 = vadd.f32 %v5446_v55, %v5386_v5  ;;  %v5390_v4 = vunpack.c.l.bf16 %v7975_v49  ;;  %v5392_v63 = vunpack.c.h.bf16 %v7975_v49  ;;  %7998 = vpow.bf16 %v5335_v44 }
 0xed5   : > { %v5484_v2 = vadd.f32 %v5483_v15, %v5387_v13  ;;  %v7979_v45 = vpop.eup %7978  ;;  %v5391_v32 = vunpack.c.l.bf16 %v7977_v43  ;;  %v5393_v1 = vunpack.c.h.bf16 %v7977_v43  ;;  %8000 = vpow.bf16 %v5338_v39 }
 0xed6   : > { %v5448_v9 = vadd.f32 %v5447_v42, %v5388_v62  ;;  %5529 = vmatpush1.bf16.msra.mxu1 %v7971_v57  ;;  %v7981_v47 = vpop.eup %7980  ;;  %v5394_v14 = vunpack.c.l.bf16 %v7979_v45  ;;  %v5396_v22 = vunpack.c.h.bf16 %v7979_v45  ;;  %v5344_v8 = vmul.bf16 1069105081, %v11991_v58 }
 0xed7   : > { %v5485_v29 = vadd.f32 %v5484_v2, %v5389_v26  ;;  %5530 = vmatprep.subr.bf16.mxu1 %v7977_v43  ;;  %v7983_v6 = vpop.eup %7982  ;;  %v5395_v40 = vunpack.c.l.bf16 %v7981_v47  ;;  %v5397_v37 = vunpack.c.h.bf16 %v7981_v47  ;;  %8002 = vpow.bf16 %v5341_v60 }
 0xed8   : > { %v5449_v3 = vadd.f32 %v5448_v9, %v5390_v4  ;;  %v7985_v16 = vpop.eup %7984  ;;  %v5398_v51 = vunpack.c.l.bf16 %v7983_v6  ;;  %v5400_v53 = vunpack.c.h.bf16 %v7983_v6  ;;  %8004 = vpow.bf16 %v5344_v8 }
 0xed9   : > { %v5486_v33 = vadd.f32 %v5485_v29, %v5391_v32  ;;  %v7987_v12 = vpop.eup %7986  ;;  %v5399_v38 = vunpack.c.l.bf16 %v7985_v16  ;;  %v5401_v57 = vunpack.c.h.bf16 %v7985_v16  ;;  %v5350_v15 = vmul.bf16 1069105081, %v11993_v30 }
 0xeda   : > { %v5450_v24 = vadd.f32 %v5449_v3, %v5392_v63  ;;  %5531 = vmatpush1.bf16.msra.mxu1 %v7975_v49  ;;  %v7989_v21 = vpop.eup %7988  ;;  %v5402_v36 = vunpack.c.l.bf16 %v7987_v12  ;;  %v5347_v49 = vmul.bf16 1069105081, %v11975_v31  ;;  %v5404_v13 = vunpack.c.h.bf16 %v7987_v12 }
 0xedb   : > { %v5487_v50 = vadd.f32 %v5486_v33, %v5393_v1  ;;  %5532 = vmatprep.subr.bf16.mxu1 %v7981_v47  ;;  %v7991_v25 = vpop.eup %7990  ;;  %v5403_v54 = vunpack.c.l.bf16 %v7989_v21  ;;  %v5405_v43 = vunpack.c.h.bf16 %v7989_v21  ;;  %v5353_v4 = vmul.bf16 1069105081, %v11977_v59 }
 0xedc   : > { %v5451_v35 = vadd.f32 %v5450_v24, %v5394_v14  ;;  %v7993_v55 = vpop.eup %7992  ;;  %v5406_v46 = vunpack.c.l.bf16 %v7991_v25  ;;  %8006 = vpow.bf16 %v5347_v49  ;;  %v5408_v9 = vunpack.c.h.bf16 %v7991_v25  ;;  %v13905_v49 = vld [vmem:[#allocation95_spill] sm:$0xff] }
 0xedd   : > { %v5488_v7 = vadd.f32 %v5487_v50, %v5395_v40  ;;  %v7995_v42 = vpop.eup %7994  ;;  %v5407_v27 = vunpack.c.l.bf16 %v7993_v55  ;;  %8008 = vpow.bf16 %v5350_v15  ;;  %v5409_v32 = vunpack.c.h.bf16 %v7993_v55 }
 0xede   : > { %v5452_v28 = vadd.f32 %v5451_v35, %v5396_v22  ;;  %5533 = vmatpush1.bf16.msra.mxu1 %v7979_v45  ;;  %v7997_v2 = vpop.eup %7996  ;;  %v5356_v45 = vmul.bf16 1069105081, %v11995_v34  ;;  %v5410_v29 = vunpack.c.l.bf16 %v7995_v42  ;;  %8010 = vpow.bf16 %v5353_v4  ;;  %v13906_v4 = vld [vmem:[#allocation96_spill] sm:$0xff] }
 0xedf   : > { %v5489_v56 = vadd.f32 %v5488_v7, %v5397_v37  ;;  %5534 = vmatprep.subr.bf16.mxu1 %v7985_v16  ;;  %v7999_v0 = vpop.eup %7998  ;;  %v5411_v63 = vunpack.c.l.bf16 %v7997_v2  ;;  %v5359_v1 = vmul.bf16 1069105081, %v11979_v18  ;;  %v5412_v33 = vunpack.c.h.bf16 %v7995_v42 }
 0xee0   : > { %v5453_v17 = vadd.f32 %v5452_v28, %v5398_v51  ;;  %v8001_v61 = vpop.eup %8000  ;;  %8012 = vpow.bf16 %v5356_v45  ;;  %v5362_v14 = vmul.bf16 1069105081, %v11997_v52  ;;  %v5413_v24 = vunpack.c.h.bf16 %v7997_v2 }
 0xee1   : > { %v5490_v23 = vadd.f32 %v5489_v56, %v5399_v38  ;;  %v5415_v16 = vunpack.c.l.bf16 %v8001_v61  ;;  %8014 = vpow.bf16 %v5359_v1  ;;  %v5365_v35 = vmul.bf16 1069105081, %v11981_v19 }
 0xee2   : > { %v5454_v11 = vadd.f32 %v5453_v17, %v5400_v53  ;;  %5535 = vmatpush1.bf16.msra.mxu1 %v7983_v6  ;;  %v5414_v6 = vunpack.c.l.bf16 %v7999_v0  ;;  %v8003_v50 = vpop.eup %8002  ;;  %v5416_v39 = vunpack.c.h.bf16 %v7999_v0  ;;  %8016 = vpow.bf16 %v5362_v14 }
 0xee3   : > { %v5491_v5 = vadd.f32 %v5490_v23, %v5401_v57  ;;  %5536 = vmatprep.subr.bf16.mxu1 %v7989_v21  ;;  %v8005_v22 = vpop.eup %8004  ;;  %v5368_v37 = vmul.bf16 1069105081, %v11999_v48  ;;  %v5417_v7 = vunpack.c.h.bf16 %v8001_v61  ;;  %v5418_v51 = vunpack.c.l.bf16 %v8003_v50 }
 0xee4   : > { %v5455_v20 = vadd.f32 %v5454_v11, %v5402_v36  ;;  %v5419_v38 = vunpack.c.l.bf16 %v8005_v22  ;;  %8018 = vpow.bf16 %v5365_v35  ;;  %v5371_v60 = vmul.bf16 1069105081, %v11983_v10 }
 0xee5   : > { %v5492_v58 = vadd.f32 %v5491_v5, %v5403_v54  ;;  %v5420_v53 = vunpack.c.h.bf16 %v8003_v50  ;;  %8020 = vpow.bf16 %v5368_v37  ;;  %v5374_v17 = vmul.bf16 1069105081, %v12001_v41 }
 0xee6   : > { %v5456_v62 = vadd.f32 %v5455_v20, %v5404_v13  ;;  %5537 = vmatpush1.bf16.msra.mxu1 %v7987_v12  ;;  %v5421_v8 = vunpack.c.h.bf16 %v8005_v22  ;;  %8022 = vpow.bf16 %v5371_v60  ;;  %v5380_v10 = vmul.bf16 1069105081, %v13905_v49 }
 0xee7   : > { %v5493_v26 = vadd.f32 %v5492_v58, %v5405_v43  ;;  %5538 = vmatprep.subr.bf16.mxu1 %v7993_v55  ;;  %v8007_v12 = vpop.eup %8006  ;;  %8024 = vpow.bf16 %v5374_v17  ;;  %v13908_v17 = vld [vmem:[#allocation82_spill] sm:$0xff] }
 0xee8   : > { %v5457_v31 = vadd.f32 %v5456_v62, %v5406_v46  ;;  %v8009_v21 = vpop.eup %8008  ;;  %v5422_v57 = vunpack.c.l.bf16 %v8007_v12  ;;  %v5424_v5 = vunpack.c.h.bf16 %v8007_v12  ;;  %8026 = vpow.bf16 %v5380_v10 }
 0xee9   : > { %v5494_v30 = vadd.f32 %v5493_v26, %v5407_v27  ;;  %v8011_v36 = vpop.eup %8010  ;;  %v5423_v11 = vunpack.c.l.bf16 %v8009_v21  ;;  %v5425_v13 = vunpack.c.h.bf16 %v8009_v21 }
 0xeea   : > { %v5458_v47 = vadd.f32 %v5457_v31, %v5408_v9  ;;  %5539 = vmatpush1.bf16.msra.mxu1 %v7991_v25  ;;  %v5426_v15 = vunpack.c.l.bf16 %v8011_v36  ;;  %v5377_v9 = vmul.bf16 1069105081, %v13906_v4 }
 0xeeb   : > { %v5495_v3 = vadd.f32 %v5494_v30, %v5409_v32  ;;  %5540 = vmatprep.subr.bf16.mxu1 %v7997_v2  ;;  %v8013_v54 = vpop.eup %8012 }
 0xeec   : > { %v5459_v59 = vadd.f32 %v5458_v47, %v5410_v29  ;;  %v8015_v43 = vpop.eup %8014  ;;  %v5427_v58 = vunpack.c.l.bf16 %v8013_v54  ;;  %v5429_v26 = vunpack.c.h.bf16 %v8013_v54  ;;  %8028 = vpow.bf16 %v5377_v9 }
 0xeed   : > { %v5496_v34 = vadd.f32 %v5495_v3, %v5411_v63  ;;  %v8017_v62 = vpop.eup %8016  ;;  %v5430_v31 = vunpack.c.l.bf16 %v8015_v43 }
 0xeee   : > { %v5460_v40 = vadd.f32 %v5459_v59, %v5412_v33  ;;  %5541 = vmatpush1.bf16.msra.mxu1 %v7995_v42  ;;  %v5428_v42 = vunpack.c.h.bf16 %v8011_v36  ;;  %v5431_v30 = vunpack.c.l.bf16 %v8017_v62  ;;  %v5433_v3 = vunpack.c.h.bf16 %v8017_v62 }
 0xeef   : > { %v5497_v44 = vadd.f32 %v5496_v34, %v5413_v24  ;;  %5542 = vmatprep.subr.bf16.mxu1 %v8001_v61  ;;  %v8019_v32 = vpop.eup %8018 }
 0xef0   : > { %v5461_v18 = vadd.f32 %v5460_v40, %v5414_v6  ;;  %v8021_v47 = vpop.eup %8020  ;;  %v5434_v1 = vunpack.c.l.bf16 %v8019_v32  ;;  %v5436_v6 = vunpack.c.h.bf16 %v8019_v32 }
 0xef1   : > { %v5498_v52 = vadd.f32 %v5497_v44, %v5415_v16  ;;  %v8023_v59 = vpop.eup %8022  ;;  %v5435_v14 = vunpack.c.l.bf16 %v8021_v47 }
 0xef2   : > { %v5462_v28 = vadd.f32 %v5461_v18, %v5416_v39  ;;  %5543 = vmatpush1.bf16.msra.mxu1 %v7999_v0  ;;  %v5432_v0 = vunpack.c.h.bf16 %v8015_v43  ;;  %v8025_v34 = vpop.eup %8024  ;;  %v5438_v44 = vunpack.c.l.bf16 %v8023_v59  ;;  %v5440_v37 = vunpack.c.h.bf16 %v8023_v59 }
 0xef3   : > { %v5499_v56 = vadd.f32 %v5498_v52, %v5417_v7  ;;  %5544 = vmatprep.subr.bf16.mxu1 %v8005_v22  ;;  %v5439_v35 = vunpack.c.l.bf16 %v8025_v34  ;;  %v8027_v18 = vpop.eup %8026  ;;  %v5441_v52 = vunpack.c.h.bf16 %v8025_v34 }
 0xef4   : > { %v5463_v19 = vadd.f32 %v5462_v28, %v5418_v51 }
 0xef5   : > { %v5500_v48 = vadd.f32 %v5499_v56, %v5419_v38 }
 0xef6   : > { %v5464_v23 = vadd.f32 %v5463_v19, %v5420_v53  ;;  %5545 = vmatpush1.bf16.msra.mxu1 %v8003_v50  ;;  %v5437_v50 = vunpack.c.h.bf16 %v8021_v47  ;;  %v13907_v53 = vld [vmem:[#allocation89_spill] sm:$0xff] }
 0xef7   : > { %v5501_v25 = vadd.f32 %v5500_v48, %v5421_v8  ;;  %5546 = vmatprep.subr.bf16.mxu1 %v8009_v21  ;;  %v12026_v56 = vpop.eup %8028  ;;  %v5445_v21 = vunpack.c.h.bf16 %v8027_v18  ;;  %v5522_v19 = vrot.slane %v13907_v53, 4  ;;  %v13909_v48 = vld [vmem:[#allocation12_spill] sm:$0xff] }
 0xef8   : > { %v5465_v55 = vadd.f32 %v5464_v23, %v5422_v57  ;;  %v5652_v57 = vsel %vm1252_vm4, %v13909_v48, 0  ;;  %v13910_v23 = vmov 0   ;;  %v5444_v4 = vunpack.c.h.bf16 %v12026_v56 }
 0xef9   : > { %v5502_v20 = vadd.f32 %v5501_v25, %v5423_v11  ;;  %v5574_v11 = vpop.permute.xlu0 %5573 }
 0xefa   : > { %v5466_v41 = vadd.f32 %v5465_v55, %v5424_v5  ;;  %5547 = vmatpush1.bf16.msra.mxu1 %v8007_v12  ;;  %v5443_v12 = vunpack.c.l.bf16 %v8027_v18 }
 0xefb   : > { %v5503_v46 = vadd.f32 %v5502_v20, %v5425_v13  ;;  %5548 = vmatprep.subr.bf16.mxu1 %v8013_v54 }
 0xefc   : > { %v5467_v27 = vadd.f32 %v5466_v41, %v5426_v15 }
 0xefd   : > { %v5504_v2 = vadd.f32 %v5503_v46, %v5427_v58  ;;  %v5578_v54 = vpop.permute.xlu0 %5577 }
 0xefe   : > { %v5468_v45 = vadd.f32 %v5467_v27, %v5428_v42  ;;  %5549 = vmatpush1.bf16.msra.mxu1 %v8011_v36  ;;  %v5572_v36 = vpop.permute.xlu1 %5571  ;;  %v13911_v42 = vld [vmem:[#allocation85_spill] sm:$0xff] }
 0xeff   : > { %v5505_v29 = vadd.f32 %v5504_v2, %v5429_v26  ;;  %5550 = vmatprep.subr.bf16.mxu1 %v8017_v62  ;;  %v6989_v27 = vrot.slane %v13911_v42, 4  ;;  %v5442_v26 = vunpack.c.l.bf16 %v12026_v56 }
 0xf00   : > { %v5469_v63 = vadd.f32 %v5468_v45, %v5430_v31 }
 0xf01   : > { %v5506_v61 = vadd.f32 %v5505_v29, %v5431_v30  ;;  %v5582_v55 = vpop.permute.xlu0 %5581 }
 0xf02   : > { %5551 = vmatpush1.bf16.msra.mxu1 %v8015_v43  ;;  %v5470_v33 = vadd.f32 %v5469_v63, %v5432_v0  ;;  %v5576_v25 = vpop.permute.xlu1 %5575 }
 0xf03   : > { %5552 = vmatprep.subr.bf16.mxu1 %v8021_v47  ;;  %v5507_v24 = vadd.f32 %v5506_v61, %v5433_v3 }
 0xf04   : > { %v5471_v40 = vadd.f32 %v5470_v33, %v5434_v1 }
 0xf05   : > { %v5508_v16 = vadd.f32 %v5507_v24, %v5435_v14  ;;  %v5586_v10 = vpop.permute.xlu0 %5585 }
 0xf06   : > { %5553 = vmatpush1.bf16.msra.mxu1 %v8019_v32  ;;  %v5472_v22 = vadd.f32 %v5471_v40, %v5436_v6  ;;  %v5580_v5 = vpop.permute.xlu1 %5579 }
 0xf07   : > { %5554 = vmatprep.subr.bf16.mxu1 %v8025_v34  ;;  %v5509_v39 = vadd.f32 %v5508_v16, %v5437_v50 }
 0xf08   : > { %v5473_v7 = vadd.f32 %v5472_v22, %v5438_v44 }
 0xf09   : > { %v5510_v51 = vadd.f32 %v5509_v39, %v5439_v35  ;;  %v5590_v20 = vpop.permute.xlu0 %5589 }
 0xf0a   : > { %5555 = vmatpush1.bf16.msra.mxu1 %v8023_v59  ;;  %v12024_v28 = vadd.f32 %v5473_v7, %v5440_v37  ;;  %v5584_v49 = vpop.permute.xlu1 %5583 }
 0xf0b   : > { %5556 = vmatprep.subr.bf16.mxu1 %v8027_v18  ;;  %v5511_v38 = vadd.f32 %v5510_v51, %v5441_v52 }
 0xf0c   : > { %v5475_v2 = vadd.f32 %v12024_v28, %v5442_v26 }
 0xf0d   : > { %v5512_v60 = vadd.f32 %v5511_v38, %v5443_v12  ;;  %v5594_v41 = vpop.permute.xlu0 %5593 }
 0xf0e   : > { %5557 = vmatpush1.bf16.msra.mxu1 %v12026_v56  ;;  %v5588_v13 = vpop.permute.xlu1 %5587  ;;  %v5476_v9 = vadd.f32 %v5475_v2, %v5444_v4 }
 0xf0f   : > { %7456 = vmatprep.subr.msk.bf16.mxu1 %vm1252_vm4, %v13908_v17  ;;  %v5513_v8 = vadd.f32 %v5512_v60, %v5445_v21 }
 0xf10   : > { %v5477_v31 = vrot.slane %v5476_v9, 4 }
 0xf11   : > { %5559 = vmatmul.mubr.bf16.vlgmr.msra.gmra.mrb[224].mxu1 %v5522_v19  ;;  %v5598_v58 = vpop.permute.xlu0 %5597  ;;  %v5514_v45 = vrot.slane %v5513_v8, 4 }
 0xf12   : > { %5658 = vmatpush1.bf16.msra.mxu1 %v5652_v57  ;;  %5689 = vmatprep.mubr.bf16.mxu1 %v13910_v23  ;;  %v5592_v15 = vpop.permute.xlu1 %5591  ;;  %v5478_v32 = vadd.f32 %v5477_v31, %v5476_v9 }
 0xf13   : > { %v5515_v30 = vadd.f32 %v5514_v45, %v5513_v8 }
 0xf14   : > { %v5479_v29 = vrot.slane %v5478_v32, 2 }
 0xf15   : > { %v5602_v62 = vpop.permute.xlu0 %5601  ;;  %v5516_v47 = vrot.slane %v5515_v30, 2 }
 0xf16   : > { %v5596_v43 = vpop.permute.xlu1 %5595  ;;  %v5480_v0 = vadd.f32 %v5479_v29, %v5478_v32 }
 0xf17   : > { %v5517_v63 = vadd.f32 %v5516_v47, %v5515_v30 }
 0xf18   : > { %v5481_v3 = vrot.slane %v5480_v0, 1 }
 0xf19   : > { %7457 = vmatmul.mubr.msk.bf16.vlgmr.msra.gmra.mrb[228].mxu1 %vm1203_vm5, %v5572_v36  ;;  %v5518_v61 = vrot.slane %v5517_v63, 1 }
 0xf1a   : > { %5699 = vmatprep.mubr.bf16.mxu1 %v13910_v23  ;;  %v5600_v46 = vpop.permute.xlu1 %5599  ;;  %v5482_v1 = vadd.f32 %v5481_v3, %v5480_v0 }
 0xf1b   : > { %v5519_v33 = vadd.f32 %v5518_v61, %v5517_v63 }
 0xf1c   : > { %8030 = vrcp.f32 %v5482_v1 }
 0xf1d   : > { %8032 = vrcp.f32 %v5519_v33 }
 0xf21   : > { %7458 = vmatmul.mubr.msk.bf16.gmra.mrb[232].mxu1 %vm1203_vm5, %v5574_v11 }
 0xf22   : > { %5709 = vmatprep.mubr.bf16.mxu1 %v13910_v23 }
 0xf26   : > { %v8031_v59 = vpop.eup %8030 }
 0xf27   : > { %v8033_v24 = vpop.eup %8032 }
 0xf29   : > { %7459 = vmatmul.mubr.msk.bf16.gmra.mrb[236].mxu1 %vm1203_vm5, %v5576_v25 }
 0xf2a   : > { %5719 = vmatprep.mubr.bf16.mxu1 %v13910_v23 }
 0xf31   : > { %7460 = vmatmul.mubr.msk.bf16.gmra.mrb[240].mxu1 %vm1203_vm5, %v5578_v54 }
 0xf32   : > { %5729 = vmatprep.mubr.bf16.mxu1 %v13910_v23 }
 0xf39   : > { %7461 = vmatmul.mubr.msk.bf16.gmra.mrb[244].mxu1 %vm1203_vm5, %v5580_v5 }
 0xf3a   : > { %5739 = vmatprep.mubr.bf16.mxu1 %v13910_v23 }
 0xf41   : > { %7462 = vmatmul.mubr.msk.bf16.gmra.mrb[248].mxu1 %vm1203_vm5, %v5582_v55 }
 0xf42   : > { %5749 = vmatprep.mubr.bf16.mxu1 %v13910_v23 }
 0xf49   : > { %7463 = vmatmul.mubr.msk.bf16.gmra.mrb[252].mxu1 %vm1203_vm5, %v5584_v49 }
 0xf4a   : > { %5759 = vmatprep.mubr.bf16.mxu1 %v13910_v23 }
 0xf51   : > { %7464 = vmatmul.mubr.msk.bf16.gmra.mrb[0].mxu1 %vm1203_vm5, %v5586_v10 }
 0xf52   : > { %5769 = vmatprep.mubr.bf16.mxu1 %v13910_v23 }
 0xf59   : > { %7465 = vmatmul.mubr.msk.bf16.gmra.mrb[4].mxu1 %vm1203_vm5, %v5588_v13 }
 0xf5a   : > { %5779 = vmatprep.mubr.bf16.mxu1 %v13910_v23 }
 0xf61   : > { %7466 = vmatmul.mubr.msk.bf16.gmra.mrb[8].mxu1 %vm1203_vm5, %v5590_v20 }
 0xf62   : > { %5789 = vmatprep.mubr.bf16.mxu1 %v13910_v23 }
 0xf69   : > { %7467 = vmatmul.mubr.msk.bf16.gmra.mrb[12].mxu1 %vm1203_vm5, %v5592_v15 }
 0xf6a   : > { %5799 = vmatprep.mubr.bf16.mxu1 %v13910_v23 }
 0xf71   : > { %7468 = vmatmul.mubr.msk.bf16.gmra.mrb[16].mxu1 %vm1203_vm5, %v5594_v41 }
 0xf72   : > { %5809 = vmatprep.mubr.bf16.mxu1 %v13910_v23 }
 0xf79   : > { %7469 = vmatmul.mubr.msk.bf16.gmra.mrb[20].mxu1 %vm1203_vm5, %v5596_v43 }
 0xf7a   : > { %5819 = vmatprep.mubr.bf16.mxu1 %v13910_v23 }
 0xf81   : > { %7470 = vmatmul.mubr.msk.bf16.gmra.mrb[24].mxu1 %vm1203_vm5, %v5598_v58 }
 0xf82   : > { %5829 = vmatprep.mubr.bf16.mxu1 %v13910_v23 }
 0xf89   : > { %7471 = vmatmul.mubr.msk.bf16.gmra.mrb[28].mxu1 %vm1203_vm5, %v5600_v46 }
 0xf8a   : > { %5839 = vmatprep.mubr.bf16.mxu1 %v13910_v23 }
 0xf91   : > { %7472 = vmatmul.mubr.msk.bf16.gmra.mrb[32].mxu1 %vm1203_vm5, %v5602_v62 }
 0xf92   : > { %7024 = vmatprep.mubr.bf16.mxu1 %v6989_v27 }
 0xfe4   : > { %v5560_v14 = vpop.f32.mrb[224].mxu1 }
 0xfe5   : > { %v12070_v34 = vmul.f32 %v8031_v59, %v5560_v14  ;;  %v5562_v6 = vpop.f32.mrb[225].mxu1 }
 0xfe6   : > { %v12072_v40 = vmul.f32 %v8033_v24, %v5562_v6  ;;  %v5564_v50 = vpop.f32.mrb[226].mxu1 }
 0xfe7   : > { %13912 = vst [vmem:[#allocation80_spill] sm:$0xff] %v12070_v34  ;;  %v5565_v22 = vpop.f32.mrb[227].mxu1 }
 0xfe8   : > { %13913 = vst [vmem:[#allocation84_spill] sm:$0xff] %v12072_v40 }
 0xfec   : > { %v12078_v18 = vpop.f32.mrb[228].mxu1 }
 0xfed   : > { %v12080_v37 = vpop.f32.mrb[229].mxu1 }
 0xfee   : > { %v12082_v7 = vpop.f32.mrb[230].mxu1 }
 0xfef   : > { %13916 = vst [vmem:[#allocation93_spill] sm:$0xff] %v12082_v7  ;;  %v12084_v52 = vpop.f32.mrb[231].mxu1 }
 0xff4   : > { %v12086_v51 = vpop.f32.mrb[232].mxu1 }
 0xff5   : > { %13917 = vst [vmem:[#allocation52_spill] sm:$0xff] %v12086_v51  ;;  %v5850_v28 = vmax.f32 %v12078_v18, %v12086_v51  ;;  %v12090_v12 = vpop.f32.mrb[233].mxu1 }
 0xff6   : > { %v5887_v38 = vmax.f32 %v12080_v37, %v12090_v12  ;;  %v12094_v56 = vpop.f32.mrb[234].mxu1 }
 0xff7   : > { %13918 = vst [vmem:[#allocation56_spill] sm:$0xff] %v12094_v56  ;;  %v5851_v21 = vmax.f32 %v12082_v7, %v12094_v56  ;;  %v12098_v60 = vpop.f32.mrb[235].mxu1 }
 0xff8   : > { %v5888_v53 = vmax.f32 %v12084_v52, %v12098_v60 }
 0xffc   : > { %v12102_v19 = vpop.f32.mrb[236].mxu1 }
 0xffd   : > { %13919 = vst [vmem:[#allocation59_spill] sm:$0xff] %v12102_v19  ;;  %v5852_v8 = vmax.f32 %v5850_v28, %v12102_v19  ;;  %v12105_v57 = vpop.f32.mrb[237].mxu1 }
 0xffe   : > { %v5889_v36 = vmax.f32 %v5887_v38, %v12105_v57  ;;  %v12108_v11 = vpop.f32.mrb[238].mxu1 }
 0xfff   : > { %v5853_v25 = vmax.f32 %v5851_v21, %v12108_v11  ;;  %v12111_v54 = vpop.f32.mrb[239].mxu1 }
0x1000   : > { %v5890_v5 = vmax.f32 %v5888_v53, %v12111_v54 }
0x1004   : > { %v12114_v55 = vpop.f32.mrb[240].mxu1 }
0x1005   : > { %v5854_v49 = vmax.f32 %v5852_v8, %v12114_v55  ;;  %v12117_v10 = vpop.f32.mrb[241].mxu1 }
0x1006   : > { %v5891_v13 = vmax.f32 %v5889_v36, %v12117_v10  ;;  %v12120_v20 = vpop.f32.mrb[242].mxu1 }
0x1007   : > { %v5855_v15 = vmax.f32 %v5853_v25, %v12120_v20  ;;  %v12123_v41 = vpop.f32.mrb[243].mxu1 }
0x1008   : > { %v5892_v43 = vmax.f32 %v5890_v5, %v12123_v41 }
0x100c   : > { %v12126_v58 = vpop.f32.mrb[244].mxu1 }
0x100d   : > { %v5856_v46 = vmax.f32 %v5854_v49, %v12126_v58  ;;  %v12129_v62 = vpop.f32.mrb[245].mxu1 }
0x100e   : > { %v5893_v42 = vmax.f32 %v5891_v13, %v12129_v62  ;;  %v12132_v27 = vpop.f32.mrb[246].mxu1 }
0x100f   : > { %v5857_v26 = vmax.f32 %v5855_v15, %v12132_v27  ;;  %v12135_v2 = vpop.f32.mrb[247].mxu1 }
0x1010   : > { %v5894_v4 = vmax.f32 %v5892_v43, %v12135_v2 }
0x1014   : > { %v12138_v9 = vpop.f32.mrb[248].mxu1 }
0x1015   : > { %v5858_v31 = vmax.f32 %v5856_v46, %v12138_v9  ;;  %v12141_v45 = vpop.f32.mrb[249].mxu1 }
0x1016   : > { %13920 = vst [vmem:[#allocation11_spill] sm:$0xff] %v12141_v45  ;;  %v5895_v32 = vmax.f32 %v5893_v42, %v12141_v45  ;;  %v12144_v30 = vpop.f32.mrb[250].mxu1 }
0x1017   : > { %v5859_v29 = vmax.f32 %v5857_v26, %v12144_v30  ;;  %v12147_v47 = vpop.f32.mrb[251].mxu1 }
0x1018   : > { %13921 = vst [vmem:[#allocation88_spill] sm:$0xff] %v12147_v47  ;;  %v5896_v0 = vmax.f32 %v5894_v4, %v12147_v47 }
0x101c   : > { %v12150_v63 = vpop.f32.mrb[252].mxu1 }
0x101d   : > { %v5860_v3 = vmax.f32 %v5858_v31, %v12150_v63  ;;  %v12153_v61 = vpop.f32.mrb[253].mxu1 }
0x101e   : > { %13922 = vst [vmem:[#allocation83_spill] sm:$0xff] %v12153_v61  ;;  %v5897_v1 = vmax.f32 %v5895_v32, %v12153_v61  ;;  %v12156_v33 = vpop.f32.mrb[254].mxu1 }
0x101f   : > { %v5861_v59 = vmax.f32 %v5859_v29, %v12156_v33  ;;  %v12159_v14 = vpop.f32.mrb[255].mxu1 }
0x1020   : > { %13923 = vst [vmem:[#allocation86_spill] sm:$0xff] %v12159_v14  ;;  %v5898_v24 = vmax.f32 %v5896_v0, %v12159_v14 }
0x1024   : > { %v12162_v6 = vpop.f32.mrb[0].mxu1 }
0x1025   : > { %v5862_v50 = vmax.f32 %v5860_v3, %v12162_v6  ;;  %v12165_v22 = vpop.f32.mrb[1].mxu1 }
0x1026   : > { %13924 = vst [vmem:[#allocation55_spill] sm:$0xff] %v12165_v22  ;;  %v5899_v28 = vmax.f32 %v5897_v1, %v12165_v22  ;;  %v12168_v38 = vpop.f32.mrb[2].mxu1 }
0x1027   : > { %v5863_v21 = vmax.f32 %v5861_v59, %v12168_v38  ;;  %v12171_v53 = vpop.f32.mrb[3].mxu1 }
0x1028   : > { %13925 = vst [vmem:[#allocation57_spill] sm:$0xff] %v12171_v53  ;;  %v5900_v8 = vmax.f32 %v5898_v24, %v12171_v53 }
0x102c   : > { %v12174_v36 = vpop.f32.mrb[4].mxu1 }
0x102d   : > { %v5864_v25 = vmax.f32 %v5862_v50, %v12174_v36  ;;  %v12177_v5 = vpop.f32.mrb[5].mxu1 }
0x102e   : > { %13926 = vst [vmem:[#allocation87_spill] sm:$0xff] %v12177_v5  ;;  %v5901_v49 = vmax.f32 %v5899_v28, %v12177_v5  ;;  %v12180_v13 = vpop.f32.mrb[6].mxu1 }
0x102f   : > { %v5865_v15 = vmax.f32 %v5863_v21, %v12180_v13  ;;  %v12183_v43 = vpop.f32.mrb[7].mxu1 }
0x1030   : > { %13927 = vst [vmem:[#allocation58_spill] sm:$0xff] %v12183_v43  ;;  %v5902_v46 = vmax.f32 %v5900_v8, %v12183_v43 }
0x1034   : > { %v12186_v42 = vpop.f32.mrb[8].mxu1 }
0x1035   : > { %v5866_v26 = vmax.f32 %v5864_v25, %v12186_v42  ;;  %v12189_v4 = vpop.f32.mrb[9].mxu1 }
0x1036   : > { %13928 = vst [vmem:[#allocation50_spill] sm:$0xff] %v12189_v4  ;;  %v5903_v31 = vmax.f32 %v5901_v49, %v12189_v4  ;;  %v12192_v32 = vpop.f32.mrb[10].mxu1 }
0x1037   : > { %v5867_v29 = vmax.f32 %v5865_v15, %v12192_v32  ;;  %v12195_v0 = vpop.f32.mrb[11].mxu1 }
0x1038   : > { %13929 = vst [vmem:[#allocation69_spill] sm:$0xff] %v12195_v0  ;;  %v5904_v3 = vmax.f32 %v5902_v46, %v12195_v0 }
0x103c   : > { %v12198_v1 = vpop.f32.mrb[12].mxu1 }
0x103d   : > { %v5868_v59 = vmax.f32 %v5866_v26, %v12198_v1  ;;  %v12201_v24 = vpop.f32.mrb[13].mxu1 }
0x103e   : > { %13930 = vst [vmem:[#allocation90_spill] sm:$0xff] %v12201_v24  ;;  %v5905_v50 = vmax.f32 %v5903_v31, %v12201_v24  ;;  %v12204_v28 = vpop.f32.mrb[14].mxu1 }
0x103f   : > { %v5869_v21 = vmax.f32 %v5867_v29, %v12204_v28  ;;  %v12207_v8 = vpop.f32.mrb[15].mxu1 }
0x1040   : > { %13931 = vst [vmem:[#allocation14_spill] sm:$0xff] %v12207_v8  ;;  %v5906_v25 = vmax.f32 %v5904_v3, %v12207_v8 }
0x1044   : > { %v12210_v49 = vpop.f32.mrb[16].mxu1 }
0x1045   : > { %v5870_v15 = vmax.f32 %v5868_v59, %v12210_v49  ;;  %v12213_v46 = vpop.f32.mrb[17].mxu1 }
0x1046   : > { %13932 = vst [vmem:[#allocation16_spill] sm:$0xff] %v12213_v46  ;;  %v5907_v26 = vmax.f32 %v5905_v50, %v12213_v46  ;;  %v12216_v44 = vpop.f32.mrb[18].mxu1 }
0x1047   : > { %v5871_v31 = vmax.f32 %v5869_v21, %v12216_v44  ;;  %v12219_v39 = vpop.f32.mrb[19].mxu1 }
0x1048   : > { %13933 = vst [vmem:[#allocation15_spill] sm:$0xff] %v12219_v39  ;;  %v5908_v29 = vmax.f32 %v5906_v25, %v12219_v39 }
0x104c   : > { %v12222_v16 = vpop.f32.mrb[20].mxu1 }
0x104d   : > { %v5872_v3 = vmax.f32 %v5870_v15, %v12222_v16  ;;  %v12225_v34 = vpop.f32.mrb[21].mxu1 }
0x104e   : > { %13934 = vst [vmem:[#allocation18_spill] sm:$0xff] %v12225_v34  ;;  %v5909_v59 = vmax.f32 %v5907_v26, %v12225_v34  ;;  %v12228_v35 = vpop.f32.mrb[22].mxu1 }
0x104f   : > { %v5873_v50 = vmax.f32 %v5871_v31, %v12228_v35  ;;  %v12231_v40 = vpop.f32.mrb[23].mxu1 }
0x1050   : > { %13935 = vst [vmem:[#allocation36_spill] sm:$0xff] %v12231_v40  ;;  %v5910_v21 = vmax.f32 %v5908_v29, %v12231_v40 }
0x1054   : > { %v12234_v23 = vpop.f32.mrb[24].mxu1 }
0x1055   : > { %v5874_v25 = vmax.f32 %v5872_v3, %v12234_v23  ;;  %v12237_v48 = vpop.f32.mrb[25].mxu1 }
0x1056   : > { %13936 = vst [vmem:[#allocation31_spill] sm:$0xff] %v12237_v48  ;;  %v5911_v15 = vmax.f32 %v5909_v59, %v12237_v48  ;;  %v12240_v17 = vpop.f32.mrb[26].mxu1 }
0x1057   : > { %v5875_v26 = vmax.f32 %v5873_v50, %v12240_v17  ;;  %v12243_v34 = vpop.f32.mrb[27].mxu1 }
0x1058   : > { %13937 = vst [vmem:[#allocation13_spill] sm:$0xff] %v12243_v34  ;;  %v5912_v31 = vmax.f32 %v5910_v21, %v12243_v34 }
0x105c   : > { %v12246_v39 = vpop.f32.mrb[28].mxu1 }
0x105d   : > { %v5876_v29 = vmax.f32 %v5874_v25, %v12246_v39  ;;  %v12249_v40 = vpop.f32.mrb[29].mxu1 }
0x105e   : > { %13938 = vst [vmem:[#allocation34_spill] sm:$0xff] %v12249_v40  ;;  %v5913_v3 = vmax.f32 %v5911_v15, %v12249_v40  ;;  %v12252_v46 = vpop.f32.mrb[30].mxu1 }
0x105f   : > { %v5877_v59 = vmax.f32 %v5875_v26, %v12252_v46  ;;  %v12255_v48 = vpop.f32.mrb[31].mxu1 }
0x1060   : > { %13939 = vst [vmem:[#allocation35_spill] sm:$0xff] %v12255_v48  ;;  %v5914_v50 = vmax.f32 %v5912_v31, %v12255_v48 }
0x1064   : > { %v5841_v8 = vpop.f32.mrb[32].mxu1 }
0x1065   : > { %v5878_v24 = vmax.f32 %v5876_v29, %v5841_v8  ;;  %v12258_v0 = vpop.f32.mrb[33].mxu1 }
0x1066   : > { %v5915_v21 = vmax.f32 %v5913_v3, %v12258_v0  ;;  %v5845_v34 = vpop.f32.mrb[34].mxu1 }
0x1067   : > { %v5879_v25 = vmax.f32 %v5877_v59, %v5845_v34  ;;  %v5847_v4 = vpop.f32.mrb[35].mxu1 }
0x1068   : > { %v5916_v43 = vmax.f32 %v5914_v50, %v5847_v4 }
0x1069   : > { %v5880_v5 = vmax.f32 %v5878_v24, %v5879_v25  ;;  %v13944_v25 = vld [vmem:[#allocation88_spill] sm:$0xff] }
0x106a   : > { %v5917_v15 = vmax.f32 %v5915_v21, %v5916_v43 }
0x106b   : > { %v5881_v40 = vrot.slane %v5880_v5, 4 }
0x106c   : > { %v5918_v53 = vrot.slane %v5917_v15, 4 }
0x106d   : > { %v5882_v22 = vmax.f32 %v5880_v5, %v5881_v40 }
0x106e   : > { %v5919_v26 = vmax.f32 %v5917_v15, %v5918_v53  ;;  %v13945_v15 = vld [vmem:[#allocation83_spill] sm:$0xff] }
0x106f   : > { %v5883_v14 = vrot.slane %v5882_v22, 2 }
0x1070   : > { %v5920_v61 = vrot.slane %v5919_v26, 2 }
0x1071   : > { %v5884_v47 = vmax.f32 %v5882_v22, %v5883_v14 }
0x1072   : > { %v5921_v31 = vmax.f32 %v5919_v26, %v5920_v61  ;;  %v13946_v26 = vld [vmem:[#allocation86_spill] sm:$0xff] }
0x1073   : > { %v5885_v48 = vrot.slane %v5884_v47, 1 }
0x1074   : > { %v5922_v45 = vrot.slane %v5921_v31, 1 }
0x1075   : > { %v12261_v29 = vmax.f32 %v5884_v47, %v5885_v48 }
0x1076   : > { %v12299_v21 = vmax.f32 %v5921_v31, %v5922_v45 }
0x1077   : > { %13940 = vst [vmem:[#allocation60_spill] sm:$0xff] %v12261_v29  ;;  %v5984_v3 = vsub.f32 %v5841_v8, %v12261_v29  ;;  %v5986_v59 = vsub.f32 %v5845_v34, %v12261_v29  ;;  %v5934_v47 = vsub.f32 %v12108_v11, %v12261_v29  ;;  %v5936_v34 = vsub.f32 %v12114_v55, %v12261_v29 }
0x1078   : > { %v5938_v22 = vsub.f32 %v12120_v20, %v12261_v29  ;;  %v5940_v53 = vsub.f32 %v12126_v58, %v12261_v29  ;;  %v5942_v5 = vsub.f32 %v12132_v27, %v12261_v29  ;;  %v5944_v8 = vsub.f32 %v12138_v9, %v12261_v29 }
0x1079   : > { %v12277_v14 = vpack.c.bf16 %v5986_v59, %v5984_v3  ;;  %v5946_v11 = vsub.f32 %v12144_v30, %v12261_v29  ;;  %v5948_v50 = vsub.f32 %v12150_v63, %v12261_v29  ;;  %v5950_v55 = vsub.f32 %v12156_v33, %v12261_v29 }
0x107a   : > { %v5952_v20 = vsub.f32 %v12162_v6, %v12261_v29  ;;  %v5954_v58 = vsub.f32 %v12168_v38, %v12261_v29  ;;  %v5956_v27 = vsub.f32 %v12174_v36, %v12261_v29  ;;  %v5958_v9 = vsub.f32 %v12180_v13, %v12261_v29 }
0x107b   : > { %13941 = vst [vmem:[#allocation61_spill] sm:$0xff] %v12277_v14  ;;  %v5960_v30 = vsub.f32 %v12186_v42, %v12261_v29  ;;  %v5962_v63 = vsub.f32 %v12192_v32, %v12261_v29  ;;  %v5964_v33 = vsub.f32 %v12198_v1, %v12261_v29  ;;  %v5966_v6 = vsub.f32 %v12204_v28, %v12261_v29 }
0x107c   : > { %v5968_v45 = vsub.f32 %v12210_v49, %v12261_v29  ;;  %v5970_v38 = vsub.f32 %v12216_v44, %v12261_v29  ;;  %v5972_v36 = vsub.f32 %v12222_v16, %v12261_v29  ;;  %v5974_v13 = vsub.f32 %v12228_v35, %v12261_v29 }
0x107d   : > { %v5976_v42 = vsub.f32 %v12234_v23, %v12261_v29  ;;  %v5978_v32 = vsub.f32 %v12240_v17, %v12261_v29  ;;  %v5980_v1 = vsub.f32 %v12246_v39, %v12261_v29  ;;  %v5982_v28 = vsub.f32 %v12252_v46, %v12261_v29 }
0x107e   : > { %v5985_v44 = vsub.f32 %v12258_v0, %v12299_v21  ;;  %v5987_v16 = vsub.f32 %v5847_v4, %v12299_v21  ;;  %v5925_v35 = vsub.f32 %v12080_v37, %v12299_v21  ;;  %v5927_v23 = vsub.f32 %v12084_v52, %v12299_v21 }
0x107f   : > { %v5929_v17 = vsub.f32 %v12090_v12, %v12299_v21  ;;  %v5931_v39 = vsub.f32 %v12098_v60, %v12299_v21  ;;  %v5933_v49 = vsub.f32 %v12105_v57, %v12299_v21  ;;  %v5935_v0 = vsub.f32 %v12111_v54, %v12299_v21  ;;  %v13943_v60 = vld [vmem:[#allocation11_spill] sm:$0xff] }
0x1080   : > { %v5937_v4 = vsub.f32 %v12117_v10, %v12299_v21  ;;  %v12346_v46 = vpack.c.bf16 %v5987_v16, %v5985_v44  ;;  %v5939_v37 = vsub.f32 %v12123_v41, %v12299_v21  ;;  %v5941_v52 = vsub.f32 %v12129_v62, %v12299_v21  ;;  %v13947_v41 = vld [vmem:[#allocation55_spill] sm:$0xff]  ;;  %v13948_v62 = vld [vmem:[#allocation57_spill] sm:$0xff]  ;;  %v13950_v16 = vld [vmem:[#allocation58_spill] sm:$0xff] }
0x1081   : > { %v5943_v12 = vsub.f32 %v12135_v2, %v12299_v21  ;;  %v5945_v57 = vsub.f32 %v13943_v60, %v12299_v21  ;;  %v5947_v54 = vsub.f32 %v13944_v25, %v12299_v21  ;;  %v5949_v10 = vsub.f32 %v13945_v15, %v12299_v21  ;;  %v13949_v2 = vld [vmem:[#allocation87_spill] sm:$0xff]  ;;  %v13951_v25 = vld [vmem:[#allocation50_spill] sm:$0xff]  ;;  %v13952_v15 = vld [vmem:[#allocation69_spill] sm:$0xff] }
0x1082   : > { %13942 = vst [vmem:[#allocation62_spill] sm:$0xff] %v12346_v46  ;;  %v5951_v31 = vsub.f32 %v13946_v26, %v12299_v21  ;;  %v5953_v3 = vsub.f32 %v13947_v41, %v12299_v21  ;;  %v5955_v59 = vsub.f32 %v13948_v62, %v12299_v21  ;;  %v5957_v44 = vsub.f32 %v13949_v2, %v12299_v21  ;;  %v13953_v26 = vld [vmem:[#allocation90_spill] sm:$0xff]  ;;  %v13955_v62 = vld [vmem:[#allocation16_spill] sm:$0xff]  ;;  %v13956_v2 = vld [vmem:[#allocation15_spill] sm:$0xff] }
0x1083   : > { %v5959_v60 = vsub.f32 %v13950_v16, %v12299_v21  ;;  %v5961_v48 = vsub.f32 %v13951_v25, %v12299_v21  ;;  %v5963_v61 = vsub.f32 %v13952_v15, %v12299_v21  ;;  %v5965_v40 = vsub.f32 %v13953_v26, %v12299_v21  ;;  %v13954_v41 = vld [vmem:[#allocation14_spill] sm:$0xff]  ;;  %v13958_v25 = vld [vmem:[#allocation36_spill] sm:$0xff]  ;;  %v13959_v15 = vld [vmem:[#allocation31_spill] sm:$0xff] }
0x1084   : > { %v5967_v43 = vsub.f32 %v13954_v41, %v12299_v21  ;;  %v5969_v24 = vsub.f32 %v13955_v62, %v12299_v21  ;;  %v5971_v14 = vsub.f32 %v13956_v2, %v12299_v21  ;;  %v13957_v16 = vld [vmem:[#allocation18_spill] sm:$0xff]  ;;  %v5975_v19 = vsub.f32 %v13958_v25, %v12299_v21  ;;  %v13960_v26 = vld [vmem:[#allocation13_spill] sm:$0xff]  ;;  %v13962_v62 = vld [vmem:[#allocation35_spill] sm:$0xff] }
0x1085   : > { %v5973_v46 = vsub.f32 %v13957_v16, %v12299_v21  ;;  %v5977_v56 = vsub.f32 %v13959_v15, %v12299_v21  ;;  %v5979_v51 = vsub.f32 %v13960_v26, %v12299_v21  ;;  %v13961_v41 = vld [vmem:[#allocation34_spill] sm:$0xff]  ;;  %v5983_v29 = vsub.f32 %v13962_v62, %v12299_v21  ;;  %v13963_v2 = vld [vmem:[#allocation60_spill] sm:$0xff]  ;;  %v13965_v25 = vld [vmem:[#allocation93_spill] sm:$0xff] }
0x1086   : > { %v5981_v7 = vsub.f32 %v13961_v41, %v12299_v21  ;;  %v13964_v16 = vsub.f32 %v12078_v18, %v13963_v2  ;;  %v13966_v15 = vsub.f32 %v13965_v25, %v13963_v2  ;;  %v13967_v41 = vld [vmem:[#allocation52_spill] sm:$0xff] }
0x1087   : > { %v13968_v21 = vsub.f32 %v13967_v41, %v13963_v2  ;;  %v13969_v62 = vld [vmem:[#allocation56_spill] sm:$0xff] }
0x1088   : > { %v5988_v26 = vpack.c.bf16 %v13966_v15, %v13964_v16  ;;  %v13970_v18 = vsub.f32 %v13969_v62, %v13963_v2  ;;  %v13971_v15 = vld [vmem:[#allocation59_spill] sm:$0xff]  ;;  %v5994_v62 = vpack.c.bf16 %v5938_v22, %v5936_v34  ;;  %v12419_v22 = vpack.c.bf16 %v5966_v6, %v5964_v33 }
0x1089   : > { %v13972_v16 = vsub.f32 %v13971_v15, %v13963_v2  ;;  %v12411_v2 = vpack.c.bf16 %v5950_v55, %v5948_v50  ;;  %v12413_v15 = vpack.c.bf16 %v5954_v58, %v5952_v20  ;;  %v12421_v34 = vpack.c.bf16 %v5970_v38, %v5968_v45 }
0x108a   : > { %v5990_v25 = vpack.c.bf16 %v13970_v18, %v13968_v21  ;;  %v5996_v18 = vpack.c.bf16 %v5942_v5, %v5940_v53  ;;  %v12409_v21 = vpack.c.bf16 %v5946_v11, %v5944_v8  ;;  %v12423_v5 = vpack.c.bf16 %v5974_v13, %v5972_v36 }
0x108b   : > { %v5992_v41 = vpack.c.bf16 %v5934_v47, %v13972_v16  ;;  %v12415_v16 = vpack.c.bf16 %v5958_v9, %v5956_v27  ;;  %v12417_v47 = vpack.c.bf16 %v5962_v63, %v5960_v30  ;;  %v12425_v53 = vpack.c.bf16 %v5978_v32, %v5976_v42 }
0x108c   : > { %13973 = vst [vmem:[#allocation63_spill] sm:$0xff] %v12409_v21  ;;  %v12427_v8 = vpack.c.bf16 %v5982_v28, %v5980_v1  ;;  %v5989_v11 = vpack.c.bf16 %v5927_v23, %v5925_v35  ;;  %v5991_v21 = vpack.c.bf16 %v5931_v39, %v5929_v17  ;;  %v5993_v50 = vpack.c.bf16 %v5935_v0, %v5933_v49 }
0x108d   : > { %v5995_v55 = vpack.c.bf16 %v5939_v37, %v5937_v4  ;;  %v5997_v20 = vpack.c.bf16 %v5943_v12, %v5941_v52  ;;  %v5999_v58 = vpack.c.bf16 %v5947_v54, %v5945_v57  ;;  %v12429_v27 = vpack.c.bf16 %v5951_v31, %v5949_v10 }
0x108e   : > { %v12431_v9 = vpack.c.bf16 %v5955_v59, %v5953_v3  ;;  %v12433_v30 = vpack.c.bf16 %v5959_v60, %v5957_v44  ;;  %v12435_v63 = vpack.c.bf16 %v5963_v61, %v5961_v48  ;;  %v12437_v33 = vpack.c.bf16 %v5967_v43, %v5965_v40 }
0x108f   : > { %v12439_v6 = vpack.c.bf16 %v5971_v14, %v5969_v24  ;;  %v12441_v45 = vpack.c.bf16 %v5975_v19, %v5973_v46  ;;  %v12443_v38 = vpack.c.bf16 %v5979_v51, %v5977_v56  ;;  %v12445_v36 = vpack.c.bf16 %v5983_v29, %v5981_v7 }
0x1090   : > { %v6021_v13 = vmul.bf16 1069105081, %v5988_v26  ;;  %v6024_v42 = vmul.bf16 1069105081, %v5989_v11  ;;  %v6027_v32 = vmul.bf16 1069105081, %v5990_v25 }
0x1091   : > { %v6030_v1 = vmul.bf16 1069105081, %v5991_v21  ;;  %v6033_v28 = vmul.bf16 1069105081, %v5992_v41  ;;  %v6036_v35 = vmul.bf16 1069105081, %v5993_v50 }
0x1092   : > { %8034 = vpow.bf16 %v6021_v13  ;;  %v6039_v43 = vmul.bf16 1069105081, %v5994_v62  ;;  %v6042_v24 = vmul.bf16 1069105081, %v5995_v55  ;;  %v6045_v19 = vmul.bf16 1069105081, %v5996_v18 }
0x1093   : > { %8036 = vpow.bf16 %v6024_v42  ;;  %v6048_v51 = vmul.bf16 1069105081, %v5997_v20  ;;  %v13974_v29 = vld [vmem:[#allocation63_spill] sm:$0xff]  ;;  %v6054_v23 = vmul.bf16 1069105081, %v5999_v58 }
0x1094   : > { %8038 = vpow.bf16 %v6027_v32  ;;  %v6051_v40 = vmul.bf16 1069105081, %v13974_v29  ;;  %v6057_v57 = vmul.bf16 1069105081, %v12411_v2  ;;  %v6060_v31 = vmul.bf16 1069105081, %v12429_v27 }
0x1095   : > { %8040 = vpow.bf16 %v6030_v1  ;;  %v6063_v18 = vmul.bf16 1069105081, %v12413_v15  ;;  %v6066_v11 = vmul.bf16 1069105081, %v12431_v9  ;;  %v6069_v1 = vmul.bf16 1069105081, %v12415_v16 }
0x1096   : > { %8042 = vpow.bf16 %v6033_v28 }
0x1097   : > { %8044 = vpow.bf16 %v6036_v35  ;;  %v6072_v35 = vmul.bf16 1069105081, %v12433_v30 }
0x1098   : > { %8046 = vpow.bf16 %v6039_v43 }
0x1099   : > { %8048 = vpow.bf16 %v6042_v24 }
0x109a   : > { %8050 = vpow.bf16 %v6045_v19 }
0x109b   : > { %8052 = vpow.bf16 %v6048_v51 }
0x109c   : > { %8054 = vpow.bf16 %v6051_v40  ;;  %v6075_v40 = vmul.bf16 1069105081, %v12417_v47 }
0x109d   : > { %v8035_v7 = vpop.eup %8034  ;;  %8056 = vpow.bf16 %v6054_v23 }
0x109e   : > { %v8037_v56 = vpop.eup %8036  ;;  %v6116_v61 = vunpack.c.l.bf16 %v8035_v7  ;;  %v6118_v48 = vunpack.c.h.bf16 %v8035_v7  ;;  %8058 = vpow.bf16 %v6057_v57 }
0x109f   : > { %v8039_v14 = vpop.eup %8038  ;;  %v6117_v17 = vunpack.c.l.bf16 %v8037_v56  ;;  %v6119_v39 = vunpack.c.h.bf16 %v8037_v56  ;;  %6254 = vmatprep.subr.bf16.mxu0 %v8037_v56  ;;  %8060 = vpow.bf16 %v6060_v31 }
0x10a0   : > { %v8041_v49 = vpop.eup %8040  ;;  %v6120_v0 = vunpack.c.l.bf16 %v8039_v14  ;;  %v6180_v4 = vadd.f32 %v6118_v48, %v6116_v61  ;;  %6255 = vmatpush1.bf16.msra.mxu0 %v8035_v7  ;;  %v6122_v54 = vunpack.c.h.bf16 %v8039_v14  ;;  %8062 = vpow.bf16 %v6063_v18 }
0x10a1   : > { %v8043_v46 = vpop.eup %8042  ;;  %v6121_v37 = vunpack.c.l.bf16 %v8041_v49  ;;  %v6217_v52 = vadd.f32 %v6119_v39, %v6117_v17  ;;  %6256 = vmatprep.subr.bf16.mxu0 %v8041_v49  ;;  %v6123_v3 = vunpack.c.h.bf16 %v8041_v49  ;;  %8064 = vpow.bf16 %v6066_v11 }
0x10a2   : > { %v8045_v12 = vpop.eup %8044  ;;  %v6181_v10 = vadd.f32 %v6180_v4, %v6120_v0  ;;  %v6124_v44 = vunpack.c.l.bf16 %v8043_v46  ;;  %v6126_v21 = vunpack.c.h.bf16 %v8043_v46  ;;  %8066 = vpow.bf16 %v6069_v1 }
0x10a3   : > { %v6218_v59 = vadd.f32 %v6217_v52, %v6121_v37  ;;  %v8047_v26 = vpop.eup %8046  ;;  %v6125_v25 = vunpack.c.l.bf16 %v8045_v12  ;;  %v6127_v50 = vunpack.c.h.bf16 %v8045_v12  ;;  %8068 = vpow.bf16 %v6072_v35 }
0x10a4   : > { %v6182_v60 = vadd.f32 %v6181_v10, %v6122_v54  ;;  %6257 = vmatpush1.bf16.msra.mxu0 %v8039_v14  ;;  %v8049_v62 = vpop.eup %8048  ;;  %v6128_v20 = vunpack.c.l.bf16 %v8047_v26  ;;  %v6130_v28 = vunpack.c.h.bf16 %v8047_v26  ;;  %v6078_v48 = vmul.bf16 1069105081, %v12435_v63 }
0x10a5   : > { %v6219_v41 = vadd.f32 %v6218_v59, %v6123_v3  ;;  %6258 = vmatprep.subr.bf16.mxu0 %v8045_v12  ;;  %v8051_v27 = vpop.eup %8050  ;;  %v6129_v13 = vunpack.c.l.bf16 %v8049_v62  ;;  %v6131_v43 = vunpack.c.h.bf16 %v8049_v62  ;;  %8070 = vpow.bf16 %v6075_v40 }
0x10a6   : > { %v6183_v2 = vadd.f32 %v6182_v60, %v6124_v44  ;;  %v8053_v32 = vpop.eup %8052  ;;  %v6132_v24 = vunpack.c.l.bf16 %v8051_v27  ;;  %v6134_v61 = vunpack.c.h.bf16 %v8051_v27  ;;  %8072 = vpow.bf16 %v6078_v48 }
0x10a7   : > { %v6220_v55 = vadd.f32 %v6219_v41, %v6125_v25  ;;  %v8055_v51 = vpop.eup %8054  ;;  %v6133_v7 = vunpack.c.l.bf16 %v8053_v32  ;;  %v6135_v14 = vunpack.c.h.bf16 %v8053_v32  ;;  %v6084_v52 = vmul.bf16 1069105081, %v12437_v33 }
0x10a8   : > { %v6184_v58 = vadd.f32 %v6183_v2, %v6126_v21  ;;  %6259 = vmatpush1.bf16.msra.mxu0 %v8043_v46  ;;  %v8057_v29 = vpop.eup %8056  ;;  %v6136_v23 = vunpack.c.l.bf16 %v8055_v51  ;;  %v6081_v46 = vmul.bf16 1069105081, %v12419_v22  ;;  %v6138_v37 = vunpack.c.h.bf16 %v8055_v51 }
0x10a9   : > { %v6221_v42 = vadd.f32 %v6220_v55, %v6127_v50  ;;  %6260 = vmatprep.subr.bf16.mxu0 %v8049_v62  ;;  %v8059_v39 = vpop.eup %8058  ;;  %v6137_v49 = vunpack.c.l.bf16 %v8057_v29  ;;  %v6139_v12 = vunpack.c.h.bf16 %v8057_v29  ;;  %v6087_v44 = vmul.bf16 1069105081, %v12421_v34 }
0x10aa   : > { %v6185_v15 = vadd.f32 %v6184_v58, %v6128_v20  ;;  %v8061_v4 = vpop.eup %8060  ;;  %v6140_v57 = vunpack.c.l.bf16 %v8059_v39  ;;  %8074 = vpow.bf16 %v6081_v46  ;;  %v6142_v60 = vunpack.c.h.bf16 %v8059_v39  ;;  %v13975_v46 = vld [vmem:[#allocation62_spill] sm:$0xff] }
0x10ab   : > { %v6222_v9 = vadd.f32 %v6221_v42, %v6129_v13  ;;  %v8063_v10 = vpop.eup %8062  ;;  %v6141_v31 = vunpack.c.l.bf16 %v8061_v4  ;;  %8076 = vpow.bf16 %v6084_v52  ;;  %v6143_v25 = vunpack.c.h.bf16 %v8061_v4 }
0x10ac   : > { %v6186_v19 = vadd.f32 %v6185_v15, %v6130_v28  ;;  %6261 = vmatpush1.bf16.msra.mxu0 %v8047_v26  ;;  %v8065_v59 = vpop.eup %8064  ;;  %v6090_v26 = vmul.bf16 1069105081, %v12439_v6  ;;  %v6144_v41 = vunpack.c.l.bf16 %v8063_v10  ;;  %8078 = vpow.bf16 %v6087_v44  ;;  %v13976_v44 = vld [vmem:[#allocation61_spill] sm:$0xff] }
0x10ad   : > { %v6223_v56 = vadd.f32 %v6222_v9, %v6131_v43  ;;  %6262 = vmatprep.subr.bf16.mxu0 %v8053_v32  ;;  %v8067_v18 = vpop.eup %8066  ;;  %v6145_v21 = vunpack.c.l.bf16 %v8065_v59  ;;  %v6093_v50 = vmul.bf16 1069105081, %v12423_v5  ;;  %v6146_v55 = vunpack.c.h.bf16 %v8063_v10 }
0x10ae   : > { %v6187_v16 = vadd.f32 %v6186_v19, %v6132_v24  ;;  %v8069_v11 = vpop.eup %8068  ;;  %8080 = vpow.bf16 %v6090_v26  ;;  %v6096_v20 = vmul.bf16 1069105081, %v12441_v45  ;;  %v6147_v58 = vunpack.c.h.bf16 %v8065_v59 }
0x10af   : > { %v6224_v30 = vadd.f32 %v6223_v56, %v6133_v7  ;;  %v6149_v32 = vunpack.c.l.bf16 %v8069_v11  ;;  %8082 = vpow.bf16 %v6093_v50  ;;  %v6099_v15 = vmul.bf16 1069105081, %v12425_v53 }
0x10b0   : > { %v6188_v17 = vadd.f32 %v6187_v16, %v6134_v61  ;;  %6263 = vmatpush1.bf16.msra.mxu0 %v8051_v27  ;;  %v6148_v27 = vunpack.c.l.bf16 %v8067_v18  ;;  %v8071_v42 = vpop.eup %8070  ;;  %v6150_v35 = vunpack.c.h.bf16 %v8067_v18  ;;  %8084 = vpow.bf16 %v6096_v20 }
0x10b1   : > { %v6225_v0 = vadd.f32 %v6224_v30, %v6135_v14  ;;  %6264 = vmatprep.subr.bf16.mxu0 %v8057_v29  ;;  %v8073_v28 = vpop.eup %8072  ;;  %v6102_v43 = vmul.bf16 1069105081, %v12443_v38  ;;  %v6151_v9 = vunpack.c.h.bf16 %v8069_v11  ;;  %v6152_v24 = vunpack.c.l.bf16 %v8071_v42 }
0x10b2   : > { %v6189_v47 = vadd.f32 %v6188_v17, %v6136_v23  ;;  %v6153_v7 = vunpack.c.l.bf16 %v8073_v28  ;;  %8086 = vpow.bf16 %v6099_v15  ;;  %v6105_v40 = vmul.bf16 1069105081, %v12427_v8 }
0x10b3   : > { %v6226_v63 = vadd.f32 %v6225_v0, %v6137_v49  ;;  %v6154_v61 = vunpack.c.h.bf16 %v8071_v42  ;;  %8088 = vpow.bf16 %v6102_v43  ;;  %v6108_v16 = vmul.bf16 1069105081, %v12445_v36 }
0x10b4   : > { %v6190_v54 = vadd.f32 %v6189_v47, %v6138_v37  ;;  %6265 = vmatpush1.bf16.msra.mxu0 %v8055_v51  ;;  %v6155_v48 = vunpack.c.h.bf16 %v8073_v28  ;;  %8090 = vpow.bf16 %v6105_v40  ;;  %v6114_v8 = vmul.bf16 1069105081, %v13975_v46 }
0x10b5   : > { %v6227_v3 = vadd.f32 %v6226_v63, %v6139_v12  ;;  %6266 = vmatprep.subr.bf16.mxu0 %v8061_v4  ;;  %v8075_v51 = vpop.eup %8074  ;;  %8092 = vpow.bf16 %v6108_v16 }
0x10b6   : > { %v6191_v22 = vadd.f32 %v6190_v54, %v6140_v57  ;;  %v8077_v29 = vpop.eup %8076  ;;  %v6156_v14 = vunpack.c.l.bf16 %v8075_v51  ;;  %v6158_v0 = vunpack.c.h.bf16 %v8075_v51  ;;  %8094 = vpow.bf16 %v6114_v8 }
0x10b7   : > { %v6228_v33 = vadd.f32 %v6227_v3, %v6141_v31  ;;  %v8079_v23 = vpop.eup %8078  ;;  %v6157_v17 = vunpack.c.l.bf16 %v8077_v29  ;;  %v6159_v37 = vunpack.c.h.bf16 %v8077_v29 }
0x10b8   : > { %v6192_v62 = vadd.f32 %v6191_v22, %v6142_v60  ;;  %6267 = vmatpush1.bf16.msra.mxu0 %v8059_v39  ;;  %v6160_v52 = vunpack.c.l.bf16 %v8079_v23  ;;  %v6111_v60 = vmul.bf16 1069105081, %v13976_v44 }
0x10b9   : > { %v6229_v2 = vadd.f32 %v6228_v33, %v6143_v25  ;;  %6268 = vmatprep.subr.bf16.mxu0 %v8065_v59  ;;  %v8081_v49 = vpop.eup %8080 }
0x10ba   : > { %v6193_v34 = vadd.f32 %v6192_v62, %v6144_v41  ;;  %v8083_v12 = vpop.eup %8082  ;;  %v6161_v63 = vunpack.c.l.bf16 %v8081_v49  ;;  %v6163_v3 = vunpack.c.h.bf16 %v8081_v49  ;;  %8096 = vpow.bf16 %v6111_v60 }
0x10bb   : > { %v6230_v6 = vadd.f32 %v6229_v2, %v6145_v21  ;;  %v8085_v54 = vpop.eup %8084  ;;  %v6164_v22 = vunpack.c.l.bf16 %v8083_v12 }
0x10bc   : > { %v6194_v13 = vadd.f32 %v6193_v34, %v6146_v55  ;;  %6269 = vmatpush1.bf16.msra.mxu0 %v8063_v10  ;;  %v6162_v10 = vunpack.c.h.bf16 %v8079_v23  ;;  %v6165_v33 = vunpack.c.l.bf16 %v8085_v54  ;;  %v6167_v2 = vunpack.c.h.bf16 %v8085_v54 }
0x10bd   : > { %v6231_v1 = vadd.f32 %v6230_v6, %v6147_v58  ;;  %6270 = vmatprep.subr.bf16.mxu0 %v8069_v11  ;;  %v8087_v25 = vpop.eup %8086 }
0x10be   : > { %v6195_v5 = vadd.f32 %v6194_v13, %v6148_v27  ;;  %v8089_v62 = vpop.eup %8088  ;;  %v6168_v50 = vunpack.c.l.bf16 %v8087_v25  ;;  %v6170_v27 = vunpack.c.h.bf16 %v8087_v25 }
0x10bf   : > { %v6232_v45 = vadd.f32 %v6231_v1, %v6149_v32  ;;  %v8091_v34 = vpop.eup %8090  ;;  %v6169_v20 = vunpack.c.l.bf16 %v8089_v62 }
0x10c0   : > { %v6196_v19 = vadd.f32 %v6195_v5, %v6150_v35  ;;  %6271 = vmatpush1.bf16.msra.mxu0 %v8067_v18  ;;  %v6166_v18 = vunpack.c.h.bf16 %v8083_v12  ;;  %v8093_v6 = vpop.eup %8092  ;;  %v6172_v1 = vunpack.c.l.bf16 %v8091_v34  ;;  %v6174_v43 = vunpack.c.h.bf16 %v8091_v34 }
0x10c1   : > { %v6233_v56 = vadd.f32 %v6232_v45, %v6151_v9  ;;  %6272 = vmatprep.subr.bf16.mxu0 %v8073_v28  ;;  %v6173_v15 = vunpack.c.l.bf16 %v8093_v6  ;;  %v8095_v5 = vpop.eup %8094  ;;  %v6175_v45 = vunpack.c.h.bf16 %v8093_v6 }
0x10c2   : > { %v6197_v53 = vadd.f32 %v6196_v19, %v6152_v24  ;;  %v6179_v16 = vunpack.c.h.bf16 %v8095_v5 }
0x10c3   : > { %v6234_v38 = vadd.f32 %v6233_v56, %v6153_v7 }
0x10c4   : > { %v6198_v30 = vadd.f32 %v6197_v53, %v6154_v61  ;;  %6273 = vmatpush1.bf16.msra.mxu0 %v8071_v42  ;;  %v6171_v42 = vunpack.c.h.bf16 %v8089_v62  ;;  %v13978_v61 = vld [vmem:[#allocation12_spill] sm:$0xff] }
0x10c5   : > { %v6235_v39 = vadd.f32 %v6234_v38, %v6155_v48  ;;  %6274 = vmatprep.subr.bf16.mxu0 %v8077_v29  ;;  %v12470_v56 = vpop.eup %8096  ;;  %v13977_v29 = vld [vmem:[#allocation82_spill] sm:$0xff]  ;;  %v6333_v53 = vrot.slane %v13978_v61, 4 }
0x10c6   : > { %v6199_v4 = vadd.f32 %v6198_v30, %v6156_v14  ;;  %v6334_v40 = vrot.slane %v13977_v29, 4  ;;  %v13979_v14 = vld [vmem:[#allocation92_spill] sm:$0xff] }
0x10c7   : > { %v6236_v47 = vadd.f32 %v6235_v39, %v6157_v17  ;;  %v6384_v30 = vsel %vm1252_vm4, %v6333_v53, 0  ;;  %v6300_v17 = vpop.permute.xlu1 %6299  ;;  %v6302_v39 = vpop.permute.xlu0 %6301 }
0x10c8   : > { %v6200_v36 = vadd.f32 %v6199_v4, %v6158_v0  ;;  %6275 = vmatpush1.bf16.msra.mxu0 %v8075_v51  ;;  %v6177_v51 = vunpack.c.l.bf16 %v8095_v5 }
0x10c9   : > { %v6237_v57 = vadd.f32 %v6236_v47, %v6159_v37  ;;  %6276 = vmatprep.subr.bf16.mxu0 %v8081_v49 }
0x10ca   : > { %v6201_v31 = vadd.f32 %v6200_v36, %v6160_v52 }
0x10cb   : > { %v6238_v59 = vadd.f32 %v6237_v57, %v6161_v63  ;;  %v6304_v49 = vpop.permute.xlu1 %6303  ;;  %v6306_v0 = vpop.permute.xlu0 %6305 }
0x10cc   : > { %v6202_v26 = vadd.f32 %v6201_v31, %v6162_v10  ;;  %6277 = vmatpush1.bf16.msra.mxu0 %v8079_v23  ;;  %v13980_v23 = vmov 0   ;;  %v6176_v31 = vunpack.c.l.bf16 %v12470_v56 }
0x10cd   : > { %v6239_v41 = vadd.f32 %v6238_v59, %v6163_v3  ;;  %6278 = vmatprep.subr.bf16.mxu0 %v8085_v54  ;;  %v6178_v59 = vunpack.c.h.bf16 %v12470_v56 }
0x10ce   : > { %v6203_v21 = vadd.f32 %v6202_v26, %v6164_v22 }
0x10cf   : > { %v6240_v11 = vadd.f32 %v6239_v41, %v6165_v33  ;;  %v6308_v4 = vpop.permute.xlu1 %6307  ;;  %v6310_v46 = vpop.permute.xlu0 %6309 }
0x10d0   : > { %6279 = vmatpush1.bf16.msra.mxu0 %v8083_v12  ;;  %v6204_v55 = vadd.f32 %v6203_v21, %v6166_v18 }
0x10d1   : > { %6280 = vmatprep.subr.bf16.mxu0 %v8089_v62  ;;  %v6241_v58 = vadd.f32 %v6240_v11, %v6167_v2 }
0x10d2   : > { %v6205_v13 = vadd.f32 %v6204_v55, %v6168_v50 }
0x10d3   : > { %v6242_v32 = vadd.f32 %v6241_v58, %v6169_v20  ;;  %v6312_v8 = vpop.permute.xlu1 %6311  ;;  %v6314_v37 = vpop.permute.xlu0 %6313 }
0x10d4   : > { %6281 = vmatpush1.bf16.msra.mxu0 %v8087_v25  ;;  %v6206_v28 = vadd.f32 %v6205_v13, %v6170_v27 }
0x10d5   : > { %6282 = vmatprep.subr.bf16.mxu0 %v8093_v6  ;;  %v6243_v35 = vadd.f32 %v6242_v32, %v6171_v42 }
0x10d6   : > { %v6207_v9 = vadd.f32 %v6206_v28, %v6172_v1 }
0x10d7   : > { %v6244_v24 = vadd.f32 %v6243_v35, %v6173_v15  ;;  %v6316_v47 = vpop.permute.xlu1 %6315  ;;  %v6318_v52 = vpop.permute.xlu0 %6317 }
0x10d8   : > { %6283 = vmatpush1.bf16.msra.mxu0 %v8091_v34  ;;  %v12468_v19 = vadd.f32 %v6207_v9, %v6174_v43 }
0x10d9   : > { %6284 = vmatprep.subr.bf16.mxu0 %v8095_v5  ;;  %v6245_v7 = vadd.f32 %v6244_v24, %v6175_v45 }
0x10da   : > { %v6209_v3 = vadd.f32 %v12468_v19, %v6176_v31 }
0x10db   : > { %v6246_v48 = vadd.f32 %v6245_v7, %v6177_v51  ;;  %v6320_v36 = vpop.permute.xlu1 %6319  ;;  %v6322_v12 = vpop.permute.xlu0 %6321 }
0x10dc   : > { %6285 = vmatpush1.bf16.msra.mxu0 %v12470_v56  ;;  %v6210_v44 = vadd.f32 %v6209_v3, %v6178_v59 }
0x10dd   : > { %7473 = vmatprep.subr.msk.bf16.mxu0 %vm1252_vm4, %v6334_v40  ;;  %v6247_v38 = vadd.f32 %v6246_v48, %v6179_v16 }
0x10de   : > { %v6211_v60 = vrot.slane %v6210_v44, 4 }
0x10df   : > { %6287 = vmatmul.mubr.bf16.vlgmr.msra.gmra.mrb[232].mxu0 %v13979_v14  ;;  %v6324_v63 = vpop.permute.xlu1 %6323  ;;  %v6326_v57 = vpop.permute.xlu0 %6325  ;;  %v6248_v22 = vrot.slane %v6247_v38, 4 }
0x10e0   : > { %6390 = vmatpush1.bf16.msra.mxu0 %v6384_v30  ;;  %6421 = vmatprep.mubr.bf16.mxu0 %v13980_v23  ;;  %v6212_v26 = vadd.f32 %v6211_v60, %v6210_v44 }
0x10e1   : > { %v6249_v25 = vadd.f32 %v6248_v22, %v6247_v38 }
0x10e2   : > { %v6213_v33 = vrot.slane %v6212_v26, 2 }
0x10e3   : > { %v6328_v54 = vpop.permute.xlu1 %6327  ;;  %v6330_v10 = vpop.permute.xlu0 %6329  ;;  %v6250_v41 = vrot.slane %v6249_v25, 2 }
0x10e4   : > { %v6214_v62 = vadd.f32 %v6213_v33, %v6212_v26 }
0x10e5   : > { %v6251_v18 = vadd.f32 %v6250_v41, %v6249_v25 }
0x10e6   : > { %v6215_v21 = vrot.slane %v6214_v62, 1 }
0x10e7   : > { %7474 = vmatmul.mubr.msk.bf16.vlgmr.msra.gmra.mrb[236].mxu0 %vm1203_vm5, %v6300_v17  ;;  %v6252_v2 = vrot.slane %v6251_v18, 1 }
0x10e8   : > { %6431 = vmatprep.mubr.bf16.mxu0 %v13980_v23  ;;  %v6216_v11 = vadd.f32 %v6215_v21, %v6214_v62 }
0x10e9   : > { %v6253_v50 = vadd.f32 %v6252_v2, %v6251_v18 }
0x10ea   : > { %8098 = vrcp.f32 %v6216_v11 }
0x10eb   : > { %8100 = vrcp.f32 %v6253_v50 }
0x10ef   : > { %7475 = vmatmul.mubr.msk.bf16.gmra.mrb[240].mxu0 %vm1203_vm5, %v6302_v39 }
0x10f0   : > { %6441 = vmatprep.mubr.bf16.mxu0 %v13980_v23 }
0x10f4   : > { %v8099_v55 = vpop.eup %8098 }
0x10f5   : > { %v8101_v20 = vpop.eup %8100 }
0x10f7   : > { %7476 = vmatmul.mubr.msk.bf16.gmra.mrb[244].mxu0 %vm1203_vm5, %v6304_v49 }
0x10f8   : > { %6451 = vmatprep.mubr.bf16.mxu0 %v13980_v23 }
0x10ff   : > { %7477 = vmatmul.mubr.msk.bf16.gmra.mrb[248].mxu0 %vm1203_vm5, %v6306_v0 }
0x1100   : > { %6461 = vmatprep.mubr.bf16.mxu0 %v13980_v23 }
0x1107   : > { %7478 = vmatmul.mubr.msk.bf16.gmra.mrb[252].mxu0 %vm1203_vm5, %v6308_v4 }
0x1108   : > { %6471 = vmatprep.mubr.bf16.mxu0 %v13980_v23 }
0x110f   : > { %7479 = vmatmul.mubr.msk.bf16.gmra.mrb[0].mxu0 %vm1203_vm5, %v6310_v46 }
0x1110   : > { %6481 = vmatprep.mubr.bf16.mxu0 %v13980_v23 }
0x1117   : > { %7480 = vmatmul.mubr.msk.bf16.gmra.mrb[4].mxu0 %vm1203_vm5, %v6312_v8 }
0x1118   : > { %6491 = vmatprep.mubr.bf16.mxu0 %v13980_v23 }
0x111f   : > { %7481 = vmatmul.mubr.msk.bf16.gmra.mrb[8].mxu0 %vm1203_vm5, %v6314_v37 }
0x1120   : > { %6501 = vmatprep.mubr.bf16.mxu0 %v13980_v23 }
0x1127   : > { %7482 = vmatmul.mubr.msk.bf16.gmra.mrb[12].mxu0 %vm1203_vm5, %v6316_v47 }
0x1128   : > { %6511 = vmatprep.mubr.bf16.mxu0 %v13980_v23 }
0x112f   : > { %7483 = vmatmul.mubr.msk.bf16.gmra.mrb[16].mxu0 %vm1203_vm5, %v6318_v52 }
0x1130   : > { %6521 = vmatprep.mubr.bf16.mxu0 %v13980_v23 }
0x1137   : > { %7484 = vmatmul.mubr.msk.bf16.gmra.mrb[20].mxu0 %vm1203_vm5, %v6320_v36 }
0x1138   : > { %6531 = vmatprep.mubr.bf16.mxu0 %v13980_v23 }
0x113f   : > { %7485 = vmatmul.mubr.msk.bf16.gmra.mrb[24].mxu0 %vm1203_vm5, %v6322_v12 }
0x1140   : > { %6541 = vmatprep.mubr.bf16.mxu0 %v13980_v23 }
0x1147   : > { %7486 = vmatmul.mubr.msk.bf16.gmra.mrb[28].mxu0 %vm1203_vm5, %v6324_v63 }
0x1148   : > { %6551 = vmatprep.mubr.bf16.mxu0 %v13980_v23 }
0x114f   : > { %7487 = vmatmul.mubr.msk.bf16.gmra.mrb[32].mxu0 %vm1203_vm5, %v6326_v57 }
0x1150   : > { %6561 = vmatprep.mubr.bf16.mxu0 %v13980_v23 }
0x1157   : > { %7488 = vmatmul.mubr.msk.bf16.gmra.mrb[36].mxu0 %vm1203_vm5, %v6328_v54 }
0x1158   : > { %6571 = vmatprep.mubr.bf16.mxu0 %v13980_v23 }
0x115f   : > { %7489 = vmatmul.mubr.msk.bf16.gmra.mrb[40].mxu0 %vm1203_vm5, %v6330_v10 }
0x11b2   : > { %v6288_v34 = vpop.f32.mrb[232].mxu0 }
0x11b3   : > { %v12513_v58 = vmul.f32 %v8099_v55, %v6288_v34  ;;  %v6290_v6 = vpop.f32.mrb[233].mxu0 }
0x11b4   : > { %v12515_v27 = vmul.f32 %v8101_v20, %v6290_v6  ;;  %v6292_v13 = vpop.f32.mrb[234].mxu0 }
0x11b5   : > { %13981 = vst [vmem:[#allocation64_spill] sm:$0xff] %v12513_v58  ;;  %v6293_v42 = vpop.f32.mrb[235].mxu0 }
0x11b6   : > { %13982 = vst [vmem:[#allocation65_spill] sm:$0xff] %v12515_v27 }
0x11ba   : > { %v12517_v32 = vpop.f32.mrb[236].mxu0 }
0x11bb   : > { %v12519_v1 = vpop.f32.mrb[237].mxu0 }
0x11bc   : > { %v12521_v28 = vpop.f32.mrb[238].mxu0 }
0x11bd   : > { %13983 = vst [vmem:[#allocation66_spill] sm:$0xff] %v12521_v28  ;;  %v12523_v15 = vpop.f32.mrb[239].mxu0 }
0x11c2   : > { %v12525_v35 = vpop.f32.mrb[240].mxu0 }
0x11c3   : > { %13984 = vst [vmem:[#allocation67_spill] sm:$0xff] %v12525_v35  ;;  %v6582_v5 = vmax.f32 %v12517_v32, %v12525_v35  ;;  %v12529_v43 = vpop.f32.mrb[241].mxu0 }
0x11c4   : > { %v6619_v9 = vmax.f32 %v12519_v1, %v12529_v43  ;;  %v12533_v45 = vpop.f32.mrb[242].mxu0 }
0x11c5   : > { %13985 = vst [vmem:[#allocation68_spill] sm:$0xff] %v12533_v45  ;;  %v6583_v24 = vmax.f32 %v12521_v28, %v12533_v45  ;;  %v12537_v19 = vpop.f32.mrb[243].mxu0 }
0x11c6   : > { %v6620_v51 = vmax.f32 %v12523_v15, %v12537_v19 }
0x11ca   : > { %v12541_v7 = vpop.f32.mrb[244].mxu0 }
0x11cb   : > { %13986 = vst [vmem:[#allocation70_spill] sm:$0xff] %v12541_v7  ;;  %v6584_v56 = vmax.f32 %v6582_v5, %v12541_v7  ;;  %v12544_v29 = vpop.f32.mrb[245].mxu0 }
0x11cc   : > { %v6621_v40 = vmax.f32 %v6619_v9, %v12544_v29  ;;  %v12547_v61 = vpop.f32.mrb[246].mxu0 }
0x11cd   : > { %v6585_v53 = vmax.f32 %v6583_v24, %v12547_v61  ;;  %v12550_v16 = vpop.f32.mrb[247].mxu0 }
0x11ce   : > { %v6622_v48 = vmax.f32 %v6620_v51, %v12550_v16 }
0x11d2   : > { %v12553_v38 = vpop.f32.mrb[248].mxu0 }
0x11d3   : > { %v6586_v30 = vmax.f32 %v6584_v56, %v12553_v38  ;;  %v12556_v17 = vpop.f32.mrb[249].mxu0 }
0x11d4   : > { %v6623_v39 = vmax.f32 %v6621_v40, %v12556_v17  ;;  %v12559_v49 = vpop.f32.mrb[250].mxu0 }
0x11d5   : > { %v6587_v0 = vmax.f32 %v6585_v53, %v12559_v49  ;;  %v12562_v4 = vpop.f32.mrb[251].mxu0 }
0x11d6   : > { %v6624_v46 = vmax.f32 %v6622_v48, %v12562_v4 }
0x11da   : > { %v12565_v8 = vpop.f32.mrb[252].mxu0 }
0x11db   : > { %v6588_v37 = vmax.f32 %v6586_v30, %v12565_v8  ;;  %v12568_v47 = vpop.f32.mrb[253].mxu0 }
0x11dc   : > { %v6625_v52 = vmax.f32 %v6623_v39, %v12568_v47  ;;  %v12571_v36 = vpop.f32.mrb[254].mxu0 }
0x11dd   : > { %v6589_v12 = vmax.f32 %v6587_v0, %v12571_v36  ;;  %v12574_v63 = vpop.f32.mrb[255].mxu0 }
0x11de   : > { %v6626_v57 = vmax.f32 %v6624_v46, %v12574_v63 }
0x11e2   : > { %v12577_v54 = vpop.f32.mrb[0].mxu0 }
0x11e3   : > { %v6590_v10 = vmax.f32 %v6588_v37, %v12577_v54  ;;  %v12580_v31 = vpop.f32.mrb[1].mxu0 }
0x11e4   : > { %13987 = vst [vmem:[#allocation71_spill] sm:$0xff] %v12580_v31  ;;  %v6627_v3 = vmax.f32 %v6625_v52, %v12580_v31  ;;  %v12583_v59 = vpop.f32.mrb[2].mxu0 }
0x11e5   : > { %v6591_v44 = vmax.f32 %v6589_v12, %v12583_v59  ;;  %v12586_v60 = vpop.f32.mrb[3].mxu0 }
0x11e6   : > { %13988 = vst [vmem:[#allocation72_spill] sm:$0xff] %v12586_v60  ;;  %v6628_v22 = vmax.f32 %v6626_v57, %v12586_v60 }
0x11ea   : > { %v12589_v26 = vpop.f32.mrb[4].mxu0 }
0x11eb   : > { %v6592_v25 = vmax.f32 %v6590_v10, %v12589_v26  ;;  %v12592_v33 = vpop.f32.mrb[5].mxu0 }
0x11ec   : > { %13989 = vst [vmem:[#allocation30_spill] sm:$0xff] %v12592_v33  ;;  %v6629_v41 = vmax.f32 %v6627_v3, %v12592_v33  ;;  %v12595_v62 = vpop.f32.mrb[6].mxu0 }
0x11ed   : > { %v6593_v18 = vmax.f32 %v6591_v44, %v12595_v62  ;;  %v12598_v21 = vpop.f32.mrb[7].mxu0 }
0x11ee   : > { %13990 = vst [vmem:[#allocation79_spill] sm:$0xff] %v12598_v21  ;;  %v6630_v2 = vmax.f32 %v6628_v22, %v12598_v21 }
0x11f2   : > { %v12601_v11 = vpop.f32.mrb[8].mxu0 }
0x11f3   : > { %v6594_v50 = vmax.f32 %v6592_v25, %v12601_v11  ;;  %v12604_v55 = vpop.f32.mrb[9].mxu0 }
0x11f4   : > { %13991 = vst [vmem:[#allocation98_spill] sm:$0xff] %v12604_v55  ;;  %v6631_v34 = vmax.f32 %v6629_v41, %v12604_v55  ;;  %v12607_v20 = vpop.f32.mrb[10].mxu0 }
0x11f5   : > { %v6595_v6 = vmax.f32 %v6593_v18, %v12607_v20  ;;  %v12610_v13 = vpop.f32.mrb[11].mxu0 }
0x11f6   : > { %13992 = vst [vmem:[#allocation97_spill] sm:$0xff] %v12610_v13  ;;  %v6632_v42 = vmax.f32 %v6630_v2, %v12610_v13 }
0x11fa   : > { %v12613_v5 = vpop.f32.mrb[12].mxu0 }
0x11fb   : > { %v6596_v9 = vmax.f32 %v6594_v50, %v12613_v5  ;;  %v12616_v24 = vpop.f32.mrb[13].mxu0 }
0x11fc   : > { %13993 = vst [vmem:[#allocation75_spill] sm:$0xff] %v12616_v24  ;;  %v6633_v51 = vmax.f32 %v6631_v34, %v12616_v24  ;;  %v12619_v56 = vpop.f32.mrb[14].mxu0 }
0x11fd   : > { %v6597_v40 = vmax.f32 %v6595_v6, %v12619_v56  ;;  %v12622_v53 = vpop.f32.mrb[15].mxu0 }
0x11fe   : > { %13994 = vst [vmem:[#allocation74_spill] sm:$0xff] %v12622_v53  ;;  %v6634_v48 = vmax.f32 %v6632_v42, %v12622_v53 }
0x1202   : > { %v12625_v30 = vpop.f32.mrb[16].mxu0 }
0x1203   : > { %v6598_v39 = vmax.f32 %v6596_v9, %v12625_v30  ;;  %v12628_v0 = vpop.f32.mrb[17].mxu0 }
0x1204   : > { %13995 = vst [vmem:[#allocation73_spill] sm:$0xff] %v12628_v0  ;;  %v6635_v46 = vmax.f32 %v6633_v51, %v12628_v0  ;;  %v12631_v37 = vpop.f32.mrb[18].mxu0 }
0x1205   : > { %v6599_v52 = vmax.f32 %v6597_v40, %v12631_v37  ;;  %v12634_v12 = vpop.f32.mrb[19].mxu0 }
0x1206   : > { %13996 = vst [vmem:[#allocation77_spill] sm:$0xff] %v12634_v12  ;;  %v6636_v57 = vmax.f32 %v6634_v48, %v12634_v12 }
0x120a   : > { %v12637_v10 = vpop.f32.mrb[20].mxu0 }
0x120b   : > { %v6600_v3 = vmax.f32 %v6598_v39, %v12637_v10  ;;  %v12640_v44 = vpop.f32.mrb[21].mxu0 }
0x120c   : > { %13997 = vst [vmem:[#allocation76_spill] sm:$0xff] %v12640_v44  ;;  %v6637_v22 = vmax.f32 %v6635_v46, %v12640_v44  ;;  %v12643_v25 = vpop.f32.mrb[22].mxu0 }
0x120d   : > { %v6601_v41 = vmax.f32 %v6599_v52, %v12643_v25  ;;  %v12646_v18 = vpop.f32.mrb[23].mxu0 }
0x120e   : > { %13998 = vst [vmem:[#allocation47_spill] sm:$0xff] %v12646_v18  ;;  %v6638_v2 = vmax.f32 %v6636_v57, %v12646_v18 }
0x1212   : > { %v12649_v50 = vpop.f32.mrb[24].mxu0 }
0x1213   : > { %v6602_v34 = vmax.f32 %v6600_v3, %v12649_v50  ;;  %v12652_v6 = vpop.f32.mrb[25].mxu0 }
0x1214   : > { %13999 = vst [vmem:[#allocation48_spill] sm:$0xff] %v12652_v6  ;;  %v6639_v42 = vmax.f32 %v6637_v22, %v12652_v6  ;;  %v12655_v9 = vpop.f32.mrb[26].mxu0 }
0x1215   : > { %v6603_v51 = vmax.f32 %v6601_v41, %v12655_v9  ;;  %v12658_v40 = vpop.f32.mrb[27].mxu0 }
0x1216   : > { %14000 = vst [vmem:[#allocation54_spill] sm:$0xff] %v12658_v40  ;;  %v6640_v48 = vmax.f32 %v6638_v2, %v12658_v40 }
0x121a   : > { %v12661_v39 = vpop.f32.mrb[28].mxu0 }
0x121b   : > { %v6604_v46 = vmax.f32 %v6602_v34, %v12661_v39  ;;  %v12664_v52 = vpop.f32.mrb[29].mxu0 }
0x121c   : > { %14001 = vst [vmem:[#allocation49_spill] sm:$0xff] %v12664_v52  ;;  %v6641_v57 = vmax.f32 %v6639_v42, %v12664_v52  ;;  %v12667_v3 = vpop.f32.mrb[30].mxu0 }
0x121d   : > { %v6605_v22 = vmax.f32 %v6603_v51, %v12667_v3  ;;  %v12670_v27 = vpop.f32.mrb[31].mxu0 }
0x121e   : > { %14002 = vst [vmem:[#allocation17_spill] sm:$0xff] %v12670_v27  ;;  %v6642_v41 = vmax.f32 %v6640_v48, %v12670_v27 }
0x1222   : > { %v12673_v58 = vpop.f32.mrb[32].mxu0 }
0x1223   : > { %v6606_v2 = vmax.f32 %v6604_v46, %v12673_v58  ;;  %v12676_v23 = vpop.f32.mrb[33].mxu0 }
0x1224   : > { %14003 = vst [vmem:[#allocation19_spill] sm:$0xff] %v12676_v23  ;;  %v6643_v34 = vmax.f32 %v6641_v57, %v12676_v23  ;;  %v12679_v14 = vpop.f32.mrb[34].mxu0 }
0x1225   : > { %v6607_v42 = vmax.f32 %v6605_v22, %v12679_v14  ;;  %v12682_v52 = vpop.f32.mrb[35].mxu0 }
0x1226   : > { %14004 = vst [vmem:[#allocation20_spill] sm:$0xff] %v12682_v52  ;;  %v6644_v51 = vmax.f32 %v6642_v41, %v12682_v52 }
0x122a   : > { %v12685_v40 = vpop.f32.mrb[36].mxu0 }
0x122b   : > { %v6608_v48 = vmax.f32 %v6606_v2, %v12685_v40  ;;  %v12688_v27 = vpop.f32.mrb[37].mxu0 }
0x122c   : > { %14005 = vst [vmem:[#allocation21_spill] sm:$0xff] %v12688_v27  ;;  %v6645_v46 = vmax.f32 %v6643_v34, %v12688_v27  ;;  %v12691_v6 = vpop.f32.mrb[38].mxu0 }
0x122d   : > { %v6609_v57 = vmax.f32 %v6607_v42, %v12691_v6  ;;  %v12694_v23 = vpop.f32.mrb[39].mxu0 }
0x122e   : > { %14006 = vst [vmem:[#allocation22_spill] sm:$0xff] %v12694_v23  ;;  %v6646_v22 = vmax.f32 %v6644_v51, %v12694_v23 }
0x1232   : > { %v6573_v18 = vpop.f32.mrb[40].mxu0 }
0x1233   : > { %v6610_v44 = vmax.f32 %v6608_v48, %v6573_v18  ;;  %v12697_v12 = vpop.f32.mrb[41].mxu0 }
0x1234   : > { %v6647_v41 = vmax.f32 %v6645_v46, %v12697_v12  ;;  %v6577_v52 = vpop.f32.mrb[42].mxu0 }
0x1235   : > { %v6611_v2 = vmax.f32 %v6609_v57, %v6577_v52  ;;  %v6579_v0 = vpop.f32.mrb[43].mxu0 }
0x1236   : > { %v6648_v53 = vmax.f32 %v6646_v22, %v6579_v0 }
0x1237   : > { %v6612_v24 = vmax.f32 %v6610_v44, %v6611_v2  ;;  %v14011_v2 = vld [vmem:[#allocation72_spill] sm:$0xff] }
0x1238   : > { %v6649_v34 = vmax.f32 %v6647_v41, %v6648_v53 }
0x1239   : > { %v6613_v27 = vrot.slane %v6612_v24, 4 }
0x123a   : > { %v6650_v13 = vrot.slane %v6649_v34, 4 }
0x123b   : > { %v6614_v55 = vmax.f32 %v6612_v24, %v6613_v27 }
0x123c   : > { %v6651_v42 = vmax.f32 %v6649_v34, %v6650_v13  ;;  %v14012_v34 = vld [vmem:[#allocation30_spill] sm:$0xff] }
0x123d   : > { %v6615_v21 = vrot.slane %v6614_v55, 2 }
0x123e   : > { %v6652_v33 = vrot.slane %v6651_v42, 2 }
0x123f   : > { %v6616_v60 = vmax.f32 %v6614_v55, %v6615_v21 }
0x1240   : > { %v6653_v51 = vmax.f32 %v6651_v42, %v6652_v33  ;;  %v14013_v42 = vld [vmem:[#allocation79_spill] sm:$0xff] }
0x1241   : > { %v6617_v23 = vrot.slane %v6616_v60, 1 }
0x1242   : > { %v6654_v31 = vrot.slane %v6653_v51, 1 }
0x1243   : > { %v12700_v48 = vmax.f32 %v6616_v60, %v6617_v23 }
0x1244   : > { %v12738_v41 = vmax.f32 %v6653_v51, %v6654_v31 }
0x1245   : > { %14007 = vst [vmem:[#allocation23_spill] sm:$0xff] %v12700_v48  ;;  %v6716_v46 = vsub.f32 %v6573_v18, %v12700_v48  ;;  %v6718_v57 = vsub.f32 %v6577_v52, %v12700_v48  ;;  %v6666_v60 = vsub.f32 %v12547_v61, %v12700_v48  ;;  %v6668_v55 = vsub.f32 %v12553_v38, %v12700_v48 }
0x1246   : > { %v6670_v13 = vsub.f32 %v12559_v49, %v12700_v48  ;;  %v6672_v24 = vsub.f32 %v12565_v8, %v12700_v48  ;;  %v6674_v18 = vsub.f32 %v12571_v36, %v12700_v48  ;;  %v6676_v52 = vsub.f32 %v12577_v54, %v12700_v48 }
0x1247   : > { %v12716_v21 = vpack.c.bf16 %v6718_v57, %v6716_v46  ;;  %v6678_v61 = vsub.f32 %v12583_v59, %v12700_v48  ;;  %v6680_v22 = vsub.f32 %v12589_v26, %v12700_v48  ;;  %v6682_v38 = vsub.f32 %v12595_v62, %v12700_v48 }
0x1248   : > { %v6684_v49 = vsub.f32 %v12601_v11, %v12700_v48  ;;  %v6686_v8 = vsub.f32 %v12607_v20, %v12700_v48  ;;  %v6688_v36 = vsub.f32 %v12613_v5, %v12700_v48  ;;  %v6690_v54 = vsub.f32 %v12619_v56, %v12700_v48 }
0x1249   : > { %14008 = vst [vmem:[#allocation24_spill] sm:$0xff] %v12716_v21  ;;  %v6692_v59 = vsub.f32 %v12625_v30, %v12700_v48  ;;  %v6694_v26 = vsub.f32 %v12631_v37, %v12700_v48  ;;  %v6696_v62 = vsub.f32 %v12637_v10, %v12700_v48  ;;  %v6698_v11 = vsub.f32 %v12643_v25, %v12700_v48 }
0x124a   : > { %v6700_v31 = vsub.f32 %v12649_v50, %v12700_v48  ;;  %v6702_v20 = vsub.f32 %v12655_v9, %v12700_v48  ;;  %v6704_v5 = vsub.f32 %v12661_v39, %v12700_v48  ;;  %v6706_v56 = vsub.f32 %v12667_v3, %v12700_v48 }
0x124b   : > { %v6708_v30 = vsub.f32 %v12673_v58, %v12700_v48  ;;  %v6710_v37 = vsub.f32 %v12679_v14, %v12700_v48  ;;  %v6712_v10 = vsub.f32 %v12685_v40, %v12700_v48  ;;  %v6714_v25 = vsub.f32 %v12691_v6, %v12700_v48 }
0x124c   : > { %v6717_v50 = vsub.f32 %v12697_v12, %v12738_v41  ;;  %v6719_v9 = vsub.f32 %v6579_v0, %v12738_v41  ;;  %v6657_v39 = vsub.f32 %v12519_v1, %v12738_v41  ;;  %v6659_v58 = vsub.f32 %v12523_v15, %v12738_v41 }
0x124d   : > { %v6661_v14 = vsub.f32 %v12529_v43, %v12738_v41  ;;  %v6663_v40 = vsub.f32 %v12537_v19, %v12738_v41  ;;  %v6665_v6 = vsub.f32 %v12544_v29, %v12738_v41  ;;  %v6667_v12 = vsub.f32 %v12550_v16, %v12738_v41  ;;  %v14010_v19 = vld [vmem:[#allocation71_spill] sm:$0xff] }
0x124e   : > { %v6669_v0 = vsub.f32 %v12556_v17, %v12738_v41  ;;  %v12785_v3 = vpack.c.bf16 %v6719_v9, %v6717_v50  ;;  %v6671_v1 = vsub.f32 %v12562_v4, %v12738_v41  ;;  %v6673_v15 = vsub.f32 %v12568_v47, %v12738_v41  ;;  %v14014_v4 = vld [vmem:[#allocation98_spill] sm:$0xff]  ;;  %v14015_v47 = vld [vmem:[#allocation97_spill] sm:$0xff] }
0x124f   : > { %v6675_v43 = vsub.f32 %v12574_v63, %v12738_v41  ;;  %v6677_v29 = vsub.f32 %v14010_v19, %v12738_v41  ;;  %v6679_v16 = vsub.f32 %v14011_v2, %v12738_v41  ;;  %v6681_v17 = vsub.f32 %v14012_v34, %v12738_v41  ;;  %v14016_v63 = vld [vmem:[#allocation75_spill] sm:$0xff]  ;;  %v14017_v9 = vld [vmem:[#allocation74_spill] sm:$0xff]  ;;  %v14018_v2 = vld [vmem:[#allocation73_spill] sm:$0xff] }
0x1250   : > { %14009 = vst [vmem:[#allocation25_spill] sm:$0xff] %v12785_v3  ;;  %v6683_v51 = vsub.f32 %v14013_v42, %v12738_v41  ;;  %v6685_v46 = vsub.f32 %v14014_v4, %v12738_v41  ;;  %v6687_v57 = vsub.f32 %v14015_v47, %v12738_v41  ;;  %v6689_v50 = vsub.f32 %v14016_v63, %v12738_v41  ;;  %v14019_v34 = vld [vmem:[#allocation77_spill] sm:$0xff]  ;;  %v14020_v42 = vld [vmem:[#allocation76_spill] sm:$0xff]  ;;  %v14021_v4 = vld [vmem:[#allocation47_spill] sm:$0xff] }
0x1251   : > { %v6691_v19 = vsub.f32 %v14017_v9, %v12738_v41  ;;  %v6693_v23 = vsub.f32 %v14018_v2, %v12738_v41  ;;  %v6695_v33 = vsub.f32 %v14019_v34, %v12738_v41  ;;  %v6697_v27 = vsub.f32 %v14020_v42, %v12738_v41  ;;  %v14022_v47 = vld [vmem:[#allocation48_spill] sm:$0xff]  ;;  %v14023_v63 = vld [vmem:[#allocation54_spill] sm:$0xff]  ;;  %v14024_v9 = vld [vmem:[#allocation49_spill] sm:$0xff] }
0x1252   : > { %v6699_v53 = vsub.f32 %v14021_v4, %v12738_v41  ;;  %v6701_v44 = vsub.f32 %v14022_v47, %v12738_v41  ;;  %v6703_v21 = vsub.f32 %v14023_v63, %v12738_v41  ;;  %v6705_v3 = vsub.f32 %v14024_v9, %v12738_v41  ;;  %v14025_v2 = vld [vmem:[#allocation17_spill] sm:$0xff]  ;;  %v14026_v34 = vld [vmem:[#allocation19_spill] sm:$0xff]  ;;  %v14027_v42 = vld [vmem:[#allocation20_spill] sm:$0xff] }
0x1253   : > { %v6707_v7 = vsub.f32 %v14025_v2, %v12738_v41  ;;  %v6709_v45 = vsub.f32 %v14026_v34, %v12738_v41  ;;  %v6711_v35 = vsub.f32 %v14027_v42, %v12738_v41  ;;  %v14028_v4 = vld [vmem:[#allocation21_spill] sm:$0xff]  ;;  %v14029_v47 = vld [vmem:[#allocation22_spill] sm:$0xff]  ;;  %v14030_v63 = vld [vmem:[#allocation23_spill] sm:$0xff] }
0x1254   : > { %v6713_v28 = vsub.f32 %v14028_v4, %v12738_v41  ;;  %v6715_v48 = vsub.f32 %v14029_v47, %v12738_v41  ;;  %v14031_v9 = vsub.f32 %v12517_v32, %v14030_v63  ;;  %v14032_v2 = vld [vmem:[#allocation66_spill] sm:$0xff]  ;;  %v14034_v4 = vld [vmem:[#allocation67_spill] sm:$0xff]  ;;  %v14036_v47 = vld [vmem:[#allocation68_spill] sm:$0xff] }
0x1255   : > { %v14033_v34 = vsub.f32 %v14032_v2, %v14030_v63  ;;  %v14035_v41 = vsub.f32 %v14034_v4, %v14030_v63  ;;  %v14037_v32 = vsub.f32 %v14036_v47, %v14030_v63  ;;  %v6726_v47 = vpack.c.bf16 %v6670_v13, %v6668_v55 }
0x1256   : > { %v12858_v13 = vpack.c.bf16 %v6698_v11, %v6696_v62  ;;  %v12860_v55 = vpack.c.bf16 %v6702_v20, %v6700_v31  ;;  %v12876_v62 = vpack.c.bf16 %v6699_v53, %v6697_v27  ;;  %v12878_v11 = vpack.c.bf16 %v6703_v21, %v6701_v44 }
0x1257   : > { %v6720_v42 = vpack.c.bf16 %v14033_v34, %v14031_v9  ;;  %v6722_v2 = vpack.c.bf16 %v14037_v32, %v14035_v41  ;;  %v14038_v9 = vld [vmem:[#allocation70_spill] sm:$0xff]  ;;  %v6728_v32 = vpack.c.bf16 %v6674_v18, %v6672_v24  ;;  %v12848_v41 = vpack.c.bf16 %v6678_v61, %v6676_v52 }
0x1258   : > { %v14039_v34 = vsub.f32 %v14038_v9, %v14030_v63  ;;  %v12850_v9 = vpack.c.bf16 %v6682_v38, %v6680_v22  ;;  %v12852_v63 = vpack.c.bf16 %v6686_v8, %v6684_v49  ;;  %v12862_v18 = vpack.c.bf16 %v6706_v56, %v6704_v5 }
0x1259   : > { %14040 = vst [vmem:[#allocation26_spill] sm:$0xff] %v12848_v41  ;;  %v12864_v24 = vpack.c.bf16 %v6710_v37, %v6708_v30  ;;  %v12866_v52 = vpack.c.bf16 %v6714_v25, %v6712_v10  ;;  %v6721_v61 = vpack.c.bf16 %v6659_v58, %v6657_v39  ;;  %v6723_v41 = vpack.c.bf16 %v6663_v40, %v6661_v14 }
0x125a   : > { %v6724_v4 = vpack.c.bf16 %v6666_v60, %v14039_v34  ;;  %v12854_v34 = vpack.c.bf16 %v6690_v54, %v6688_v36  ;;  %v12856_v60 = vpack.c.bf16 %v6694_v26, %v6692_v59  ;;  %v6725_v22 = vpack.c.bf16 %v6667_v12, %v6665_v6 }
0x125b   : > { %v6727_v38 = vpack.c.bf16 %v6671_v1, %v6669_v0  ;;  %v6729_v49 = vpack.c.bf16 %v6675_v43, %v6673_v15  ;;  %v6731_v8 = vpack.c.bf16 %v6679_v16, %v6677_v29  ;;  %v12868_v36 = vpack.c.bf16 %v6683_v51, %v6681_v17 }
0x125c   : > { %v12870_v54 = vpack.c.bf16 %v6687_v57, %v6685_v46  ;;  %v12872_v59 = vpack.c.bf16 %v6691_v19, %v6689_v50  ;;  %v12874_v26 = vpack.c.bf16 %v6695_v33, %v6693_v23  ;;  %v12880_v31 = vpack.c.bf16 %v6707_v7, %v6705_v3 }
0x125d   : > { %v12882_v20 = vpack.c.bf16 %v6711_v35, %v6709_v45  ;;  %v12884_v5 = vpack.c.bf16 %v6715_v48, %v6713_v28  ;;  %v6753_v56 = vmul.bf16 1069105081, %v6720_v42  ;;  %v6756_v30 = vmul.bf16 1069105081, %v6721_v61 }
0x125e   : > { %v6759_v37 = vmul.bf16 1069105081, %v6722_v2  ;;  %v6762_v10 = vmul.bf16 1069105081, %v6723_v41  ;;  %v6765_v25 = vmul.bf16 1069105081, %v6724_v4 }
0x125f   : > { %8102 = vpow.bf16 %v6753_v56  ;;  %v6768_v39 = vmul.bf16 1069105081, %v6725_v22  ;;  %v6771_v53 = vmul.bf16 1069105081, %v6726_v47  ;;  %v6774_v44 = vmul.bf16 1069105081, %v6727_v38 }
0x1260   : > { %8104 = vpow.bf16 %v6756_v30  ;;  %v6777_v7 = vmul.bf16 1069105081, %v6728_v32  ;;  %v6780_v35 = vmul.bf16 1069105081, %v6729_v49  ;;  %v14041_v48 = vld [vmem:[#allocation26_spill] sm:$0xff] }
0x1261   : > { %8106 = vpow.bf16 %v6759_v37  ;;  %v6783_v27 = vmul.bf16 1069105081, %v14041_v48  ;;  %v6786_v58 = vmul.bf16 1069105081, %v6731_v8  ;;  %v6789_v29 = vmul.bf16 1069105081, %v12850_v9 }
0x1262   : > { %8108 = vpow.bf16 %v6762_v10  ;;  %v6792_v51 = vmul.bf16 1069105081, %v12868_v36  ;;  %v6795_v32 = vmul.bf16 1069105081, %v12852_v63  ;;  %v6798_v61 = vmul.bf16 1069105081, %v12870_v54 }
0x1263   : > { %8110 = vpow.bf16 %v6765_v25  ;;  %v6801_v10 = vmul.bf16 1069105081, %v12854_v34 }
0x1264   : > { %8112 = vpow.bf16 %v6768_v39  ;;  %v6804_v39 = vmul.bf16 1069105081, %v12872_v59 }
0x1265   : > { %8114 = vpow.bf16 %v6771_v53 }
0x1266   : > { %8116 = vpow.bf16 %v6774_v44 }
0x1267   : > { %8118 = vpow.bf16 %v6777_v7 }
0x1268   : > { %8120 = vpow.bf16 %v6780_v35 }
0x1269   : > { %8122 = vpow.bf16 %v6783_v27  ;;  %v6807_v27 = vmul.bf16 1069105081, %v12856_v60 }
0x126a   : > { %v8103_v28 = vpop.eup %8102  ;;  %8124 = vpow.bf16 %v6786_v58 }
0x126b   : > { %v8105_v45 = vpop.eup %8104  ;;  %v6848_v33 = vunpack.c.l.bf16 %v8103_v28  ;;  %v6850_v23 = vunpack.c.h.bf16 %v8103_v28  ;;  %8126 = vpow.bf16 %v6789_v29 }
0x126c   : > { %v8107_v21 = vpop.eup %8106  ;;  %v6849_v14 = vunpack.c.l.bf16 %v8105_v45  ;;  %v6851_v40 = vunpack.c.h.bf16 %v8105_v45  ;;  %6992 = vmatprep.subr.bf16.mxu1 %v8105_v45  ;;  %8128 = vpow.bf16 %v6792_v51 }
0x126d   : > { %v8109_v6 = vpop.eup %8108  ;;  %v6852_v12 = vunpack.c.l.bf16 %v8107_v21  ;;  %v6912_v0 = vadd.f32 %v6850_v23, %v6848_v33  ;;  %6993 = vmatpush1.bf16.msra.mxu1 %v8103_v28  ;;  %v6854_v16 = vunpack.c.h.bf16 %v8107_v21  ;;  %8130 = vpow.bf16 %v6795_v32 }
0x126e   : > { %v8111_v3 = vpop.eup %8110  ;;  %v6853_v1 = vunpack.c.l.bf16 %v8109_v6  ;;  %v6949_v15 = vadd.f32 %v6851_v40, %v6849_v14  ;;  %6994 = vmatprep.subr.bf16.mxu1 %v8109_v6  ;;  %v6855_v46 = vunpack.c.h.bf16 %v8109_v6  ;;  %8132 = vpow.bf16 %v6798_v61 }
0x126f   : > { %v8113_v43 = vpop.eup %8112  ;;  %v6913_v17 = vadd.f32 %v6912_v0, %v6852_v12  ;;  %v6856_v50 = vunpack.c.l.bf16 %v8111_v3  ;;  %v6858_v41 = vunpack.c.h.bf16 %v8111_v3  ;;  %8134 = vpow.bf16 %v6801_v10 }
0x1270   : > { %v6950_v57 = vadd.f32 %v6949_v15, %v6853_v1  ;;  %v8115_v42 = vpop.eup %8114  ;;  %v6857_v2 = vunpack.c.l.bf16 %v8113_v43  ;;  %v6859_v22 = vunpack.c.h.bf16 %v8113_v43  ;;  %8136 = vpow.bf16 %v6804_v39 }
0x1271   : > { %v6914_v19 = vadd.f32 %v6913_v17, %v6854_v16  ;;  %6995 = vmatpush1.bf16.msra.mxu1 %v8107_v21  ;;  %v8117_v47 = vpop.eup %8116  ;;  %v6860_v49 = vunpack.c.l.bf16 %v8115_v42  ;;  %v6862_v25 = vunpack.c.h.bf16 %v8115_v42  ;;  %v6810_v23 = vmul.bf16 1069105081, %v12874_v26 }
0x1272   : > { %v6951_v4 = vadd.f32 %v6950_v57, %v6855_v46  ;;  %6996 = vmatprep.subr.bf16.mxu1 %v8113_v43  ;;  %v8119_v36 = vpop.eup %8118  ;;  %v6861_v56 = vunpack.c.l.bf16 %v8117_v47  ;;  %v6863_v53 = vunpack.c.h.bf16 %v8117_v47  ;;  %8138 = vpow.bf16 %v6807_v27 }
0x1273   : > { %v6915_v9 = vadd.f32 %v6914_v19, %v6856_v50  ;;  %v8121_v37 = vpop.eup %8120  ;;  %v6864_v44 = vunpack.c.l.bf16 %v8119_v36  ;;  %v6866_v33 = vunpack.c.h.bf16 %v8119_v36  ;;  %8140 = vpow.bf16 %v6810_v23 }
0x1274   : > { %v6952_v38 = vadd.f32 %v6951_v4, %v6857_v2  ;;  %v8123_v35 = vpop.eup %8122  ;;  %v6865_v28 = vunpack.c.l.bf16 %v8121_v37  ;;  %v6867_v21 = vunpack.c.h.bf16 %v8121_v37  ;;  %v6816_v15 = vmul.bf16 1069105081, %v12876_v62 }
0x1275   : > { %v6916_v8 = vadd.f32 %v6915_v9, %v6858_v41  ;;  %6997 = vmatpush1.bf16.msra.mxu1 %v8111_v3  ;;  %v8125_v48 = vpop.eup %8124  ;;  %v6868_v58 = vunpack.c.l.bf16 %v8123_v35  ;;  %v6813_v3 = vmul.bf16 1069105081, %v12858_v13  ;;  %v6870_v1 = vunpack.c.h.bf16 %v8123_v35 }
0x1276   : > { %v6953_v30 = vadd.f32 %v6952_v38, %v6859_v22  ;;  %6998 = vmatprep.subr.bf16.mxu1 %v8117_v47  ;;  %v8127_v40 = vpop.eup %8126  ;;  %v6869_v6 = vunpack.c.l.bf16 %v8125_v48  ;;  %v6871_v43 = vunpack.c.h.bf16 %v8125_v48  ;;  %v6819_v50 = vmul.bf16 1069105081, %v12860_v55 }
0x1277   : > { %v6917_v63 = vadd.f32 %v6916_v8, %v6860_v49  ;;  %v8129_v0 = vpop.eup %8128  ;;  %v6872_v29 = vunpack.c.l.bf16 %v8127_v40  ;;  %8142 = vpow.bf16 %v6813_v3  ;;  %v6874_v19 = vunpack.c.h.bf16 %v8127_v40  ;;  %v14042_v3 = vld [vmem:[#allocation25_spill] sm:$0xff] }
0x1278   : > { %v6954_v54 = vadd.f32 %v6953_v30, %v6861_v56  ;;  %v8131_v17 = vpop.eup %8130  ;;  %v6873_v51 = vunpack.c.l.bf16 %v8129_v0  ;;  %8144 = vpow.bf16 %v6816_v15  ;;  %v6875_v2 = vunpack.c.h.bf16 %v8129_v0 }
0x1279   : > { %v6918_v7 = vadd.f32 %v6917_v63, %v6862_v25  ;;  %6999 = vmatpush1.bf16.msra.mxu1 %v8115_v42  ;;  %v8133_v57 = vpop.eup %8132  ;;  %v6822_v42 = vmul.bf16 1069105081, %v12878_v11  ;;  %v6876_v4 = vunpack.c.l.bf16 %v8131_v17  ;;  %8146 = vpow.bf16 %v6819_v50  ;;  %v14043_v50 = vld [vmem:[#allocation24_spill] sm:$0xff] }
0x127a   : > { %v6955_v45 = vadd.f32 %v6954_v54, %v6863_v53  ;;  %7000 = vmatprep.subr.bf16.mxu1 %v8121_v37  ;;  %v8135_v32 = vpop.eup %8134  ;;  %v6877_v41 = vunpack.c.l.bf16 %v8133_v57  ;;  %v6825_v22 = vmul.bf16 1069105081, %v12862_v18  ;;  %v6878_v38 = vunpack.c.h.bf16 %v8131_v17 }
0x127b   : > { %v6919_v34 = vadd.f32 %v6918_v7, %v6864_v44  ;;  %v8137_v61 = vpop.eup %8136  ;;  %8148 = vpow.bf16 %v6822_v42  ;;  %v6828_v49 = vmul.bf16 1069105081, %v12880_v31  ;;  %v6879_v8 = vunpack.c.h.bf16 %v8133_v57 }
0x127c   : > { %v6956_v59 = vadd.f32 %v6955_v45, %v6865_v28  ;;  %v6881_v37 = vunpack.c.l.bf16 %v8137_v61  ;;  %8150 = vpow.bf16 %v6825_v22  ;;  %v6831_v63 = vmul.bf16 1069105081, %v12864_v24 }
0x127d   : > { %v6920_v14 = vadd.f32 %v6919_v34, %v6866_v33  ;;  %7001 = vmatpush1.bf16.msra.mxu1 %v8119_v36  ;;  %v6880_v36 = vunpack.c.l.bf16 %v8135_v32  ;;  %v8139_v30 = vpop.eup %8138  ;;  %v6882_v39 = vunpack.c.h.bf16 %v8135_v32  ;;  %8152 = vpow.bf16 %v6828_v49 }
0x127e   : > { %v6957_v12 = vadd.f32 %v6956_v59, %v6867_v21  ;;  %7002 = vmatprep.subr.bf16.mxu1 %v8125_v48  ;;  %v8141_v25 = vpop.eup %8140  ;;  %v6834_v53 = vmul.bf16 1069105081, %v12882_v20  ;;  %v6883_v54 = vunpack.c.h.bf16 %v8137_v61  ;;  %v6884_v44 = vunpack.c.l.bf16 %v8139_v30 }
0x127f   : > { %v6921_v60 = vadd.f32 %v6920_v14, %v6868_v58  ;;  %v6885_v28 = vunpack.c.l.bf16 %v8141_v25  ;;  %8154 = vpow.bf16 %v6831_v63  ;;  %v6837_v27 = vmul.bf16 1069105081, %v12866_v52 }
0x1280   : > { %v6958_v26 = vadd.f32 %v6957_v12, %v6869_v6  ;;  %v6886_v33 = vunpack.c.h.bf16 %v8139_v30  ;;  %8156 = vpow.bf16 %v6834_v53  ;;  %v6840_v34 = vmul.bf16 1069105081, %v12884_v5 }
0x1281   : > { %v6922_v16 = vadd.f32 %v6921_v60, %v6870_v1  ;;  %7003 = vmatpush1.bf16.msra.mxu1 %v8123_v35  ;;  %v6887_v23 = vunpack.c.h.bf16 %v8141_v25  ;;  %8158 = vpow.bf16 %v6837_v27  ;;  %v6846_v52 = vmul.bf16 1069105081, %v14042_v3  ;;  %v7616_v3 = vld [vmem:[%s13040_s6] sm:$0xff]  }
0x1282   : > { %v6959_v46 = vadd.f32 %v6958_v26, %v6871_v43  ;;  %7004 = vmatprep.subr.bf16.mxu1 %v8129_v0  ;;  %v8143_v35 = vpop.eup %8142  ;;  %8160 = vpow.bf16 %v6840_v34  ;;  %v14045_v34 = vld [vmem:[#allocation81_spill] sm:$0xff] }
0x1283   : > { %v6923_v13 = vadd.f32 %v6922_v16, %v6872_v29  ;;  %v8145_v48 = vpop.eup %8144  ;;  %v6888_v21 = vunpack.c.l.bf16 %v8143_v35  ;;  %v6890_v12 = vunpack.c.h.bf16 %v8143_v35  ;;  %8162 = vpow.bf16 %v6846_v52  ;;  %v14055_v52 = vld [vmem:[#allocation10_spill] sm:$0xff] }
0x1284   : > { %v6960_v62 = vadd.f32 %v6959_v46, %v6873_v51  ;;  %v8147_v58 = vpop.eup %8146  ;;  %v6889_v14 = vunpack.c.l.bf16 %v8145_v48  ;;  %v6891_v1 = vunpack.c.h.bf16 %v8145_v48 }
0x1285   : > { %v6924_v47 = vadd.f32 %v6923_v13, %v6874_v19  ;;  %7005 = vmatpush1.bf16.msra.mxu1 %v8127_v40  ;;  %v6892_v15 = vunpack.c.l.bf16 %v8147_v58  ;;  %v6843_v19 = vmul.bf16 1069105081, %v14043_v50 }
0x1286   : > { %v6961_v9 = vadd.f32 %v6960_v62, %v6875_v2  ;;  %7006 = vmatprep.subr.bf16.mxu1 %v8133_v57  ;;  %v8149_v6 = vpop.eup %8148 }
0x1287   : > { %v6925_v55 = vadd.f32 %v6924_v47, %v6876_v4  ;;  %v8151_v43 = vpop.eup %8150  ;;  %v6893_v26 = vunpack.c.l.bf16 %v8149_v6  ;;  %v6895_v46 = vunpack.c.h.bf16 %v8149_v6  ;;  %8164 = vpow.bf16 %v6843_v19 }
0x1288   : > { %v6962_v11 = vadd.f32 %v6961_v9, %v6877_v41  ;;  %v8153_v16 = vpop.eup %8152  ;;  %v6896_v13 = vunpack.c.l.bf16 %v8151_v43 }
0x1289   : > { %v6926_v56 = vadd.f32 %v6925_v55, %v6878_v38  ;;  %7007 = vmatpush1.bf16.msra.mxu1 %v8131_v17  ;;  %v6894_v17 = vunpack.c.h.bf16 %v8147_v58  ;;  %v6897_v62 = vunpack.c.l.bf16 %v8153_v16  ;;  %v6899_v9 = vunpack.c.h.bf16 %v8153_v16 }
0x128a   : > { %v6963_v10 = vadd.f32 %v6962_v11, %v6879_v8  ;;  %7008 = vmatprep.subr.bf16.mxu1 %v8137_v61  ;;  %v8155_v2 = vpop.eup %8154 }
0x128b   : > { %v6927_v18 = vadd.f32 %v6926_v56, %v6880_v36  ;;  %v8157_v47 = vpop.eup %8156  ;;  %v6900_v22 = vunpack.c.l.bf16 %v8155_v2  ;;  %v6902_v36 = vunpack.c.h.bf16 %v8155_v2 }
0x128c   : > { %v6964_v31 = vadd.f32 %v6963_v10, %v6881_v37  ;;  %v8159_v55 = vpop.eup %8158  ;;  %v6901_v49 = vunpack.c.l.bf16 %v8157_v47 }
0x128d   : > { %v6928_v7 = vadd.f32 %v6927_v18, %v6882_v39  ;;  %7009 = vmatpush1.bf16.msra.mxu1 %v8135_v32  ;;  %v6898_v32 = vunpack.c.h.bf16 %v8151_v43  ;;  %v8161_v11 = vpop.eup %8160  ;;  %v6904_v10 = vunpack.c.l.bf16 %v8159_v55  ;;  %v6906_v53 = vunpack.c.h.bf16 %v8159_v55 }
0x128e   : > { %v6965_v45 = vadd.f32 %v6964_v31, %v6883_v54  ;;  %7010 = vmatprep.subr.bf16.mxu1 %v8141_v25  ;;  %v6905_v63 = vunpack.c.l.bf16 %v8161_v11  ;;  %v8163_v18 = vpop.eup %8162  ;;  %v6907_v31 = vunpack.c.h.bf16 %v8161_v11 }
0x128f   : > { %v6929_v24 = vadd.f32 %v6928_v7, %v6884_v44 }
0x1290   : > { %v6966_v20 = vadd.f32 %v6965_v45, %v6885_v28 }
0x1291   : > { %v6930_v59 = vadd.f32 %v6929_v24, %v6886_v33  ;;  %7011 = vmatpush1.bf16.msra.mxu1 %v8139_v30  ;;  %v6903_v30 = vunpack.c.h.bf16 %v8157_v47  ;;  %v14044_v33 = vld [vmem:[#allocation92_spill] sm:$0xff] }
0x1292   : > { %v6967_v40 = vadd.f32 %v6966_v20, %v6887_v23  ;;  %7012 = vmatprep.subr.bf16.mxu1 %v8145_v48  ;;  %v8165_v45 = vpop.eup %8164  ;;  %v6911_v48 = vunpack.c.h.bf16 %v8163_v18  ;;  %v6988_v24 = vrot.slane %v14044_v33, 4  ;;  %v14046_v23 = vld [vmem:[#allocation91_spill] sm:$0xff] }
0x1293   : > { %v6931_v0 = vadd.f32 %v6930_v59, %v6888_v21  ;;  %v14047_v20 = vpack.c.bf16 %v14045_v34, %v14046_v23  ;;  %v14048_v59 = vld [vmem:[#allocation32_spill] sm:$0xff]  ;;  %v8172_v34 = vld [vmem:[%s8460_s22 + $0x20] sm:$0xff] }
0x1294   : > { %v6968_v60 = vadd.f32 %v6967_v40, %v6889_v14  ;;  %v14051_v40 = vmov 0  }
0x1295   : > { %v6932_v5 = vadd.f32 %v6931_v0, %v6890_v12  ;;  %7013 = vmatpush1.bf16.msra.mxu1 %v8143_v35  ;;  %v6909_v35 = vunpack.c.l.bf16 %v8163_v18  ;;  %v14053_v12 = vld [vmem:[#allocation38_spill] sm:$0xff] }
0x1296   : > { %v6969_v29 = vadd.f32 %v6968_v60, %v6891_v1  ;;  %7014 = vmatprep.subr.bf16.mxu1 %v8149_v6  ;;  %v14052_v6 = vld [vmem:[#allocation9_spill] sm:$0xff] }
0x1297   : > { %v6933_v51 = vadd.f32 %v6932_v5, %v6892_v15  ;;  %v14054_v0 = vpack.c.bf16 %v14052_v6, %v14053_v12  ;;  %v14056_v1 = vld [vmem:[#allocation33_spill] sm:$0xff]  ;;  %v14058_v15 = vld [vmem:[#allocation84_spill] sm:$0xff] }
0x1298   : > { %v6970_v57 = vadd.f32 %v6969_v29, %v6893_v26  ;;  %v14057_v60 = vpack.c.bf16 %v14055_v52, %v14056_v1  ;;  %v14059_v5 = vld [vmem:[#allocation41_spill] sm:$0xff]  ;;  %v14061_v26 = vld [vmem:[#allocation80_spill] sm:$0xff]  ;;  %v14062_v29 = vld [vmem:[#allocation78_spill] sm:$0xff] }
0x1299   : > { %v6934_v42 = vadd.f32 %v6933_v51, %v6894_v17  ;;  %7015 = vmatpush1.bf16.msra.mxu1 %v8147_v58  ;;  %v14049_v58 = vld [vmem:[#allocation51_spill] sm:$0xff]  ;;  %v12935_v17 = vld [vmem:[%s13040_s6 + $0x8] sm:$0xff]   ;;  %v6908_v51 = vunpack.c.l.bf16 %v8165_v45 }
0x129a   : > { %v6971_v4 = vadd.f32 %v6970_v57, %v6895_v46  ;;  %7016 = vmatprep.subr.bf16.mxu1 %v8153_v16  ;;  %v14050_v14 = vpack.c.bf16 %v14048_v59, %v14049_v58  ;;  %v14063_v16 = vpack.c.bf16 %v14061_v26, %v14062_v29  ;;  %v6910_v57 = vunpack.c.h.bf16 %v8165_v45  ;;  %v8176_v26 = vld [vmem:[%s8460_s22 + $0x60] sm:$0xff] }
0x129b   : > { %v6935_v41 = vadd.f32 %v6934_v42, %v6896_v13 }
0x129c   : > { %v6972_v61 = vadd.f32 %v6971_v4, %v6897_v62 }
0x129d   : > { %7017 = vmatpush1.bf16.msra.mxu1 %v8151_v43  ;;  %v6936_v38 = vadd.f32 %v6935_v41, %v6898_v32  ;;  %v14060_v43 = vpack.c.bf16 %v14058_v15, %v14059_v5  ;;  %v8175_v15 = vld [vmem:[%s8460_s22 + $0x48] sm:$0xff] }
0x129e   : > { %7018 = vmatprep.subr.bf16.mxu1 %v8157_v47  ;;  %v6973_v8 = vadd.f32 %v6972_v61, %v6899_v9 }
0x129f   : > { %v6937_v56 = vadd.f32 %v6936_v38, %v6900_v22 }
0x12a0   : > { %v6974_v37 = vadd.f32 %v6973_v8, %v6901_v49 }
0x12a1   : > { %7019 = vmatpush1.bf16.msra.mxu1 %v8155_v2  ;;  %v6938_v25 = vadd.f32 %v6937_v56, %v6902_v36 }
0x12a2   : > { %7020 = vmatprep.subr.bf16.mxu1 %v8161_v11  ;;  %v6975_v39 = vadd.f32 %v6974_v37, %v6903_v30  ;;  %v14064_v30 = vld [vmem:[#allocation64_spill] sm:$0xff] }
0x12a3   : > { %v6939_v54 = vadd.f32 %v6938_v25, %v6904_v10  ;;  %v14065_v25 = vld [vmem:[#allocation65_spill] sm:$0xff] }
0x12a4   : > { %v6976_v44 = vadd.f32 %v6975_v39, %v6905_v63  ;;  %v7056_v39 = vpop.permute.xlu1 %7055 }
0x12a5   : > { %7021 = vmatpush1.bf16.msra.mxu1 %v8159_v55  ;;  %v6940_v7 = vadd.f32 %v6939_v54, %v6906_v53 }
0x12a6   : > { %7022 = vmatprep.subr.bf16.mxu1 %v8163_v18  ;;  %v6977_v28 = vadd.f32 %v6976_v44, %v6907_v31  ;;  %v7061_v31 = vpop.permute.xlu0 %7060 }
0x12a7   : > { %v6941_v46 = vadd.f32 %v6940_v7, %v6908_v51 }
0x12a8   : > { %v6978_v27 = vadd.f32 %v6977_v28, %v6909_v35  ;;  %v8170_v35 = vld [vmem:[%s8460_s22] sm:$0xff]  ;;  %v7066_v59 = vpop.permute.xlu1 %7065 }
0x12a9   : > { %7023 = vmatpush1.bf16.msra.mxu1 %v8165_v45  ;;  %v6942_v50 = vadd.f32 %v6941_v46, %v6910_v57 }
0x12aa   : > { %7089 = vmatprep.subr.bf16.mxu1 %v14047_v20  ;;  %v6979_v21 = vadd.f32 %v6978_v27, %v6911_v48  ;;  %v8171_v27 = vld [vmem:[%s8460_s22 + $0x8] sm:$0xff]  ;;  %v7071_v6 = vpop.permute.xlu0 %7070 }
0x12ab   : > { %v6943_v19 = vrot.slane %v6942_v50, 4  ;;  %v8173_v20 = vld [vmem:[%s8460_s22 + $0x28] sm:$0xff] }
0x12ac   : > { %7025 = vmatmul.mubr.bf16.vlgmr.msra.gmra.mrb[36].mxu1 %v6988_v24  ;;  %v6980_v13 = vrot.slane %v6979_v21, 4 }
0x12ad   : > { %7090 = vmatpush1.bf16.msra.mxu1 %v14050_v14  ;;  %7121 = vmatprep.mubr.bf16.mxu1 %v14051_v40  ;;  %v6944_v42 = vadd.f32 %v6943_v19, %v6942_v50 }
0x12ae   : > { %7091 = vmatprep.subr.bf16.mxu1 %v14054_v0  ;;  %v6981_v2 = vadd.f32 %v6980_v13, %v6979_v21  ;;  %v8178_v13 = vld [vmem:[%s8460_s22 + $0x10] sm:$0xff] }
0x12af   : > { %v6945_v62 = vrot.slane %v6944_v42, 2 }
0x12b0   : > { %v6982_v4 = vrot.slane %v6981_v2, 2 }
0x12b1   : > { %7092 = vmatpush1.bf16.msra.mxu1 %v14057_v60  ;;  %v6946_v47 = vadd.f32 %v6945_v62, %v6944_v42 }
0x12b2   : > { %7142 = vmatprep.subr.bf16.mxu1 %v14060_v43  ;;  %v6983_v32 = vadd.f32 %v6982_v4, %v6981_v2  ;;  %v8179_v4 = vld [vmem:[%s8460_s22 + $0x18] sm:$0xff] }
0x12b3   : > { %v6947_v41 = vrot.slane %v6946_v47, 1 }
0x12b4   : > { %7492 = vmatmul.mubr.msk.bf16.vlgmr.msra.gmra.mrb[40].mxu1 %vm471_vm0, %v7616_v3  ;;  %v6984_v9 = vrot.slane %v6983_v32, 1 }
0x12b5   : > { %7143 = vmatpush1.bf16.msra.mxu1 %v14063_v16  ;;  %7131 = vmatprep.mubr.bf16.mxu1 %v14051_v40  ;;  %v6948_v61 = vadd.f32 %v6947_v41, %v6946_v47  ;;  %v8177_v16 = vld [vmem:[%s8460_s22 + $0x68] sm:$0xff]  ;;  %v8180_v41 = vld [vmem:[%s8460_s22 + $0x30] sm:$0xff] }
0x12b6   : > { %v6985_v22 = vadd.f32 %v6984_v9, %v6983_v32 }
0x12b7   : > { %8166 = vrcp.f32 %v6948_v61  ;;  %v8181_v61 = vld [vmem:[%s8460_s22 + $0x38] sm:$0xff] }
0x12b8   : > { %8168 = vrcp.f32 %v6985_v22 }
0x12bc   : > { %7493 = vmatmul.mubr.msk.bf16.gmra.mrb[44].mxu1 %vm471_vm0, %v12935_v17 }
0x12bd   : > { %7174 = vmatprep.mubr.bf16.mxu1 %v14051_v40 }
0x12c1   : > { %v8167_v38 = vpop.eup %8166 }
0x12c2   : > { %v8169_v49 = vpop.eup %8168 }
0x137f   : > { %v7026_v55 = vpop.f32.mrb[36].mxu1 }
0x1380   : > { %v7035_v8 = vmul.f32 %v8167_v38, %v7026_v55  ;;  %v7028_v11 = vpop.f32.mrb[37].mxu1 }
0x1381   : > { %v7036_v36 = vmul.f32 %v8169_v49, %v7028_v11  ;;  %v7030_v56 = vpop.f32.mrb[38].mxu1 }
0x1382   : > { %v7043_v37 = vpack.c.bf16 %v7035_v8, %v14064_v30  ;;  %v7031_v10 = vpop.f32.mrb[39].mxu1 }
0x1383   : > { %v7044_v63 = vpack.c.bf16 %v7036_v36, %v14065_v25  ;;  %v8182_v36 = vld [vmem:[%s8460_s22 + $0x50] sm:$0xff]  ;;  %v8183_v10 = vld [vmem:[%s8460_s22 + $0x58] sm:$0xff] }
0x1385   : > { %7144 = vmatprep.subr.bf16.mxu1 %v7044_v63 }
0x1386   : > { %7145 = vmatpush1.bf16.msra.mxu1 %v7043_v37 }
0x1387   : > { %v7123_v18 = vpop.f32.mrb[40].mxu1 }
0x1388   : > { %v7124_v53 = vadd.f32 %v7123_v18, %v7056_v39  ;;  %v7125_v54 = vpop.f32.mrb[41].mxu1 }
0x1389   : > { %v7126_v44 = vadd.f32 %v7125_v54, %v7056_v39  ;;  %v7127_v7 = vpop.f32.mrb[42].mxu1  ;;  %7494 = vmatmul.mubr.msk.bf16.vlgmr.msra.gmra.mrb[48].mxu1 %vm471_vm0, %v7616_v3  ;;  %v8174_v3 = vld [vmem:[%s8460_s22 + $0x40] sm:$0xff] }
0x138a   : > { %v7195_v28 = vadd.f32 %v8170_v35, %v7124_v53  ;;  %v7128_v45 = vadd.f32 %v7127_v7, %v7061_v31  ;;  %v7129_v48 = vpop.f32.mrb[43].mxu1  ;;  %7184 = vmatprep.mubr.bf16.mxu1 %v14051_v40  ;;  %v8185_v53 = vld [vmem:[%s8460_s22 + $0x78] sm:$0xff] }
0x138b   : > { %v7196_v33 = vadd.f32 %v8171_v27, %v7126_v44  ;;  %v7130_v24 = vadd.f32 %v7129_v48, %v7061_v31 }
0x138c   : > { %7211 = vst [vmem:[%s12947_s21] sm:$0xff] %v7195_v28  ;;  %v7199_v23 = vadd.f32 %v8172_v34, %v7128_v45 }
0x138d   : > { %7212 = vst [vmem:[%s12947_s21 + $0x8] sm:$0xff] %v7196_v33  ;;  %v7200_v21 = vadd.f32 %v8173_v20, %v7130_v24 }
0x138e   : > { %7215 = vst [vmem:[%s12947_s21 + $0x20] sm:$0xff] %v7199_v23 }
0x138f   : > { %7216 = vst [vmem:[%s12947_s21 + $0x28] sm:$0xff] %v7200_v21  ;;  %v7133_v58 = vpop.f32.mrb[44].mxu1 }
0x1390   : > { %v7134_v14 = vadd.f32 %v7133_v58, %v7066_v59  ;;  %v7135_v40 = vpop.f32.mrb[45].mxu1 }
0x1391   : > { %v7136_v12 = vadd.f32 %v7135_v40, %v7066_v59  ;;  %v7137_v0 = vpop.f32.mrb[46].mxu1  ;;  %7495 = vmatmul.mubr.msk.bf16.gmra.mrb[52].mxu1 %vm471_vm0, %v12935_v17 }
0x1392   : > { %v7203_v52 = vadd.f32 %v8174_v3, %v7134_v14  ;;  %v7138_v1 = vadd.f32 %v7137_v0, %v7071_v6  ;;  %v7139_v60 = vpop.f32.mrb[47].mxu1 }
0x1393   : > { %v7204_v5 = vadd.f32 %v8175_v15, %v7136_v12  ;;  %v7140_v43 = vadd.f32 %v7139_v60, %v7071_v6 }
0x1394   : > { %7219 = vst [vmem:[%s12947_s21 + $0x40] sm:$0xff] %v7203_v52  ;;  %v7207_v29 = vadd.f32 %v8176_v26, %v7138_v1 }
0x1395   : > { %7220 = vst [vmem:[%s12947_s21 + $0x48] sm:$0xff] %v7204_v5  ;;  %v7208_v51 = vadd.f32 %v8177_v16, %v7140_v43 }
0x1396   : > { %7223 = vst [vmem:[%s12947_s21 + $0x60] sm:$0xff] %v7207_v29 }
0x1397   : > { %7224 = vst [vmem:[%s12947_s21 + $0x68] sm:$0xff] %v7208_v51 }
0x145c   : > { %v7176_v17 = vpop.f32.mrb[48].mxu1 }
0x145d   : > { %v7177_v46 = vadd.f32 %v7176_v17, %v7056_v39  ;;  %v7178_v57 = vpop.f32.mrb[49].mxu1 }
0x145e   : > { %v7179_v50 = vadd.f32 %v7178_v57, %v7056_v39  ;;  %v7180_v19 = vpop.f32.mrb[50].mxu1  ;;  %v8184_v39 = vld [vmem:[%s8460_s22 + $0x70] sm:$0xff] }
0x145f   : > { %v7197_v42 = vadd.f32 %v8178_v13, %v7177_v46  ;;  %v7181_v2 = vadd.f32 %v7180_v19, %v7061_v31  ;;  %v7182_v62 = vpop.f32.mrb[51].mxu1 }
0x1460   : > { %v7198_v47 = vadd.f32 %v8179_v4, %v7179_v50  ;;  %v7183_v32 = vadd.f32 %v7182_v62, %v7061_v31 }
0x1461   : > { %7213 = vst [vmem:[%s12947_s21 + $0x10] sm:$0xff] %v7197_v42  ;;  %v7201_v9 = vadd.f32 %v8180_v41, %v7181_v2 }
0x1462   : > { %7214 = vst [vmem:[%s12947_s21 + $0x18] sm:$0xff] %v7198_v47  ;;  %v7202_v22 = vadd.f32 %v8181_v61, %v7183_v32 }
0x1463   : > { %7217 = vst [vmem:[%s12947_s21 + $0x30] sm:$0xff] %v7201_v9 }
0x1464   : > { %7218 = vst [vmem:[%s12947_s21 + $0x38] sm:$0xff] %v7202_v22  ;;  %v7186_v38 = vpop.f32.mrb[52].mxu1 }
0x1465   : > { %v7187_v55 = vadd.f32 %v7186_v38, %v7066_v59  ;;  %v7188_v49 = vpop.f32.mrb[53].mxu1 }
0x1466   : > { %v7189_v8 = vadd.f32 %v7188_v49, %v7066_v59  ;;  %v7190_v11 = vpop.f32.mrb[54].mxu1 }
0x1467   : > { %v7205_v56 = vadd.f32 %v8182_v36, %v7187_v55  ;;  %v7191_v30 = vadd.f32 %v7190_v11, %v7071_v6  ;;  %v7192_v37 = vpop.f32.mrb[55].mxu1 }
0x1468   : > { %v7206_v25 = vadd.f32 %v8183_v10, %v7189_v8  ;;  %v7193_v63 = vadd.f32 %v7192_v37, %v7071_v6 }
0x1469   : > { %7221 = vst [vmem:[%s12947_s21 + $0x50] sm:$0xff] %v7205_v56  ;;  %v7209_v18 = vadd.f32 %v8184_v39, %v7191_v30 }
0x146a   : > { %7222 = vst [vmem:[%s12947_s21 + $0x58] sm:$0xff] %v7206_v25  ;;  %v7210_v54 = vadd.f32 %v8185_v53, %v7193_v63 }
0x146b   : > { %7225 = vst [vmem:[%s12947_s21 + $0x70] sm:$0xff] %v7209_v18 }
0x146c   : > { %7226 = vst [vmem:[%s12947_s21 + $0x78] sm:$0xff] %v7210_v54 }
0x146d   : > { %8227 = shalt.err (!%p8224_p9)
}
0x146e   : > { %s8228_s20 = scalar_lea.hbm %s12980_s9, 2048  ;;  %s8232_s21 = scalar_lea.hbm %s13042_s8, 4096 }
0x146f   : > { %p8229_p13 = scmp.ne.s32.totalorder %s12980_s9, %s8228_s20  ;;  %p8233_p6 = scmp.lt.u32.totalorder %s12980_s9, %s13042_s8 }
0x1470   : > { %p8234_p10 = scmp.lt.u32.totalorder %s8232_s21, %s8228_s20  ;;  %p8236_p0 = scmp.lt.u32.totalorder %s8228_s20, %s12980_s9 }
0x1471   : > { %p8230_p2 = pnand %p8229_p13, %p14066_p12 }
0x1472   : > { %p8235_p11 = por %p8234_p10, %p8233_p6 }
0x1473   : > { %p8231_p5 = pneg %p8230_p2 }
0x1474   : > { %p8237_p3 = por %p8236_p0, %p8235_p11 }
0x1476   : > { %p8238_p4 = pnand %p8237_p3, %p8231_p5 }
0x1478   : > { %8241 = shalt.err (!%p8238_p4)
}
0x1479   : > { %s8294_s23 = smov 512   ;;  %s8295_s24 = smov 1024  }
0x147a   : > { %s8296_s26 = smov 32  }
0x147b   : > { %7537 = dma.vmem_to_hbm [thread:$0]  (%p14066_p12), %s12984_s15, 2048, %s12980_s9, %s12992_s25, %s8294_s23, %s8295_s24, %s8296_s26  }
0x147c PF: > { %s7256_s12 = sand.u32 1, %s8268_s27   ;;  %p14067_p7 = scmp.ne.s32.totalorder %s13319_s17, 0 }
0x147d   : > { %s7257_s10 = scalar_lea.sflag [#allocation5], %s7256_s12 }
0x147e   : > { %p7544_p8 = pnand %p7324_p1, %p14067_p7 }
0x1480   : > { %8263 = dma.done.wait (!%p7544_p8), %s7257_s10, 2048  }
0x1481   : > { %8265 = vsyncadd (!%p7544_p8), %s7257_s10, 4294965248  ;;  %p19_p9 = scmp.ge.s32.totalorder %s8367_s11, 4   ;;  %s14068_s27 = smov %s8272_s28 }
0x1482   : > { %s14069_s28 = smov %s8276_s29  ;;  %s14070_s29 = smov %s8379_s14 }
0x1483   : > { %s14071_s30 = smov %s8367_s11  ;;  %21 = sbr.rel (!%p19_p9) target bundleno = 4 (0x4), region = 120 }
0x148a   :  { %7262 = vsyncpa [#allocation4], 1 }
0x148b   :  { %7264 = vsyncpa [#allocation4 + $0x1], 1 }
0x148c   :  { %7265 = vsyncpa [#allocation5], 1 }
0x148d   :  { %7267 = vsyncpa [#allocation5 + $0x1], 1 }

</bundles_post_ra>
